<compile_context>
chip_gen: v6e
topology: v6e:2x2x1
jax: 0.10.0
libtpu: 0.0.40
codegen_flags: <defaults>
</compile_context>

<pallas_src>
import math
import functools

import jax
import jax.numpy as jnp
from jax.experimental import pallas as pl
from jax.experimental.pallas import tpu as pltpu


# -----------------------------------------------------------------------------
# Single fused decoder kernel
# -----------------------------------------------------------------------------
def _decoder_kernel(x_ref, mask_ref, embw_ref, embb_ref,
                    qkvw_ref, qkvb_ref, wo_ref, bo_ref,
                    w1_ref, b1_ref, w2_ref, b2_ref, o_ref,
                    *, num_layers, num_heads, model_dim, seq_len, batch_block):
    H, D, L, Bb = num_heads, model_dim, seq_len, batch_block
    HD = H * D
    M = Bb * L
    Cin = x_ref.shape[2]

    # ---- Embedding + positional encoding (PE folded into the bias operand) ----
    x = x_ref[...].reshape(M, Cin)                                   # (M, Cin)
    h = jnp.dot(x, embw_ref[...], preferred_element_type=jnp.float32)
    h = (h.reshape(Bb, L, D) + embb_ref[...][None]).reshape(M, D)    # bias + PE

    # Additive block-diagonal causal mask (0 allowed / -1e30 masked), hoisted.
    mask = mask_ref[...]                                             # (M, M)

    for l in range(num_layers):                                      # small, static
        # ---------------- masked multi-head attention block ----------------
        qkv = jnp.dot(h, qkvw_ref[l], preferred_element_type=jnp.float32)
        qkv = qkv + qkvb_ref[l]                                      # (M, 3*H*D)

        # heads-leading (H, M, D) tensors -> ONE batched dot per einsum
        q = jnp.stack([qkv[:, i * D:(i + 1) * D] for i in range(H)], axis=0)
        k = jnp.stack([qkv[:, HD + i * D:HD + (i + 1) * D] for i in range(H)], axis=0)
        v = jnp.stack([qkv[:, 2 * HD + i * D:2 * HD + (i + 1) * D] for i in range(H)], axis=0)

        # 1/sqrt(D) already folded into the Q projection weights.
        s = jnp.einsum('hmd,hnd->hmn', q, k,
                       preferred_element_type=jnp.float32) + mask    # (H, M, M)
        mx = jnp.max(s, axis=-1, keepdims=True)
        p = jnp.exp(s - mx)
        p = p * pl.reciprocal(jnp.sum(p, axis=-1, keepdims=True), approx=True)

        ctx = jnp.einsum('hmn,hnd->hmd', p, v,
                         preferred_element_type=jnp.float32)          # (H, M, D)
        # TODO(synk): reference forward is unimplemented; conv_output expects a
        # model_dim-wide input, so heads are combined by averaging (not concat).
        ctx = ctx.sum(axis=0) * (1.0 / H)                             # (M, D)

        attn = jnp.dot(ctx, wo_ref[l], preferred_element_type=jnp.float32)
        h = attn + bo_ref[l] + h                                      # residual

        # ---------------- position-wise feed-forward block ----------------
        f = jnp.dot(h, w1_ref[l], preferred_element_type=jnp.float32) + b1_ref[l]
        f = jnp.maximum(f, 0.0)
        y = jnp.dot(f, w2_ref[l], preferred_element_type=jnp.float32) + b2_ref[l]
        h = y + h                                                     # residual

    o_ref[...] = h.reshape(Bb, L, D).astype(o_ref.dtype)


# -----------------------------------------------------------------------------
# Wrapper helpers
# -----------------------------------------------------------------------------
def positional_encoding(L, D):
    pos = jnp.arange(L, dtype=jnp.float32)[:, None]
    i = jnp.arange(D // 2, dtype=jnp.float32)[None, :]
    angle = pos / jnp.power(10000.0, (2.0 * i) / D)
    pe = jnp.zeros((L, D), dtype=jnp.float32)
    pe = pe.at[:, 0::2].set(jnp.sin(angle))
    pe = pe.at[:, 1::2].set(jnp.cos(angle))
    return pe


def _block_causal_bias(Bb, L):
    """Additive mask for Bb batch elements stacked along rows: causal within
    each length-L block, -1e30 across blocks."""
    M = Bb * L
    r = jnp.arange(M, dtype=jnp.int32)
    row, col = r[:, None], r[None, :]
    allowed = (col <= row) & (col >= (row // L) * L)
    return jnp.where(allowed, 0.0, -1e30).astype(jnp.float32)


def _pick_batch_block(B, L, max_rows=256):
    """Batch elements per grid step: make M = Bb*L as close to >=128 as possible
    while keeping >= 2 grid steps (so both v7x TensorCores get work)."""
    divs = [d for d in range(1, B + 1) if B % d == 0 and d * L <= max_rows]
    if not divs:
        divs = [1]
    pref = [d for d in divs if B // d >= 2] or divs
    return max(pref)


def decoder_forward(x_ncl, params, *, num_heads, model_dim):
    # x_ncl: (B, input_size, L) -- PyTorch NCL convention for Conv1d.
    B, Cin, L = x_ncl.shape
    D = model_dim
    x = jnp.transpose(x_ncl, (0, 2, 1))                    # (B, L, Cin), f32

    Bb = _pick_batch_block(B, L)
    M = Bb * L
    NL = params["qkv_w"].shape[0]
    HD3 = params["qkv_w"].shape[2]
    Hd = params["w1"].shape[2]

    emb_bpe = params["emb_b"] + positional_encoding(L, D)  # (L, D): bias + PE folded
    mask = _block_causal_bias(Bb, L)                        # (M, M) additive mask

    kern = functools.partial(_decoder_kernel,
                             num_layers=NL, num_heads=num_heads,
                             model_dim=D, seq_len=L, batch_block=Bb)

    def const(*shape):
        return pl.BlockSpec(shape, lambda i: (0,) * len(shape))

    y = pl.pallas_call(
        kern,
        out_shape=jax.ShapeDtypeStruct((B, L, D), jnp.float32),
        grid=(B // Bb,),
        in_specs=[
            pl.BlockSpec((Bb, L, Cin), lambda i: (i, 0, 0)),   # x (per batch block)
            const(M, M),                                       # additive causal mask
            const(Cin, D),                                     # embedding weight
            const(L, D),                                       # embedding bias + PE
            const(NL, D, HD3),                                 # fused QKV weights
            const(NL, 1, HD3),                                 # fused QKV biases
            const(NL, D, D),                                   # attention out proj
            const(NL, 1, D),
            const(NL, D, Hd),                                  # FFN w1
            const(NL, 1, Hd),
            const(NL, Hd, D),                                  # FFN w2
            const(NL, 1, D),
        ],
        out_specs=pl.BlockSpec((Bb, L, D), lambda i: (i, 0, 0)),
        compiler_params=pltpu.CompilerParams(dimension_semantics=("parallel",)),
    )(x, mask, params["emb_w"], emb_bpe,
      params["qkv_w"], params["qkv_b"], params["wo"], params["bo"],
      params["w1"], params["b1"], params["w2"], params["b2"])

    # Return in PyTorch NCL layout (B, model_dim, L), f32.
    return jnp.transpose(y, (0, 2, 1))


# -----------------------------------------------------------------------------
# Deterministic parameter initialization (weights stacked over layers)
# -----------------------------------------------------------------------------
def init_params(key, *, input_size, model_dim, num_heads, hidden_dim, num_layers):
    def dense(k, cin, cout):
        kw, kb = jax.random.split(k)
        s = 1.0 / math.sqrt(cin)
        w = jax.random.uniform(kw, (cin, cout), jnp.float32, -s, s)
        b = jax.random.uniform(kb, (1, cout), jnp.float32, -s, s)
        return w, b

    keys = jax.random.split(key, 1 + num_layers)
    ew, eb = dense(keys[0], input_size, model_dim)

    HD = num_heads * model_dim
    scale = 1.0 / math.sqrt(model_dim)        # per-head dim == model_dim here
    qkv_w, qkv_b, wo, bo, w1, b1, w2, b2 = ([] for _ in range(8))
    for li in range(num_layers):
        ks = jax.random.split(keys[1 + li], 6)
        wq, bq = dense(ks[0], model_dim, HD)
        wk, bk = dense(ks[1], model_dim, HD)
        wv, bv = dense(ks[2], model_dim, HD)
        wo_l, bo_l = dense(ks[3], model_dim, model_dim)
        w1_l, b1_l = dense(ks[4], model_dim, hidden_dim)
        w2_l, b2_l = dense(ks[5], hidden_dim, model_dim)
        # Fused QKV weight (one wide matmul) with the 1/sqrt(d) attention scale
        # folded into the Q projection (saves one (H, M, M) multiply per layer).
        qkv_w.append(jnp.concatenate([wq * scale, wk, wv], axis=1))
        qkv_b.append(jnp.concatenate([bq * scale, bk, bv], axis=1))
        wo.append(wo_l); bo.append(bo_l)
        w1.append(w1_l); b1.append(b1_l)
        w2.append(w2_l); b2.append(b2_l)

    stack = lambda xs: jnp.stack(xs, axis=0)
    return {
        "emb_w": ew, "emb_b": eb,
        "qkv_w": stack(qkv_w), "qkv_b": stack(qkv_b),
        "wo": stack(wo), "bo": stack(bo),
        "w1": stack(w1), "b1": stack(b1),
        "w2": stack(w2), "b2": stack(b2),
    }


# -----------------------------------------------------------------------------
if __name__ == "__main__":
    batch = 16          # -> 2 grid steps of 8 batch elements = 128-row matmuls
    input_size = 8      # Conv1d in_channels of the embedding
    seq = 16
    model_dim = 32
    num_heads = 4
    hidden_dim = 64
    num_layers = 2

    key = jax.random.PRNGKey(0)
    k_param, k_x = jax.random.split(key)

    params = init_params(
        k_param,
        input_size=input_size,
        model_dim=model_dim,
        num_heads=num_heads,
        hidden_dim=hidden_dim,
        num_layers=num_layers,
    )

    # PyTorch NCL input layout: (batch, channels, length)
    x = jax.random.normal(k_x, (batch, input_size, seq), dtype=jnp.float32)

    fwd = jax.jit(functools.partial(
        decoder_forward, num_heads=num_heads, model_dim=model_dim))
    out = fwd(x, params)
    jax.block_until_ready(out)

    assert out.shape == (batch, model_dim, seq), out.shape
    assert jnp.all(jnp.isfinite(out)), "non-finite output"
    print("KERNEL_OK")
</pallas_src>

<mosaic_0001>
module attributes {stable_mosaic.version = 11 : i64} {
  func.func @_decoder_kernel(%arg0: i32, %arg1: memref<8x16x8xf32, #tpu.memory_space<vmem>>, %arg2: memref<128x128xf32, #tpu.memory_space<vmem>>, %arg3: memref<8x32xf32, #tpu.memory_space<vmem>>, %arg4: memref<16x32xf32, #tpu.memory_space<vmem>>, %arg5: memref<2x32x384xf32, #tpu.memory_space<vmem>>, %arg6: memref<2x1x384xf32, #tpu.memory_space<vmem>>, %arg7: memref<2x32x32xf32, #tpu.memory_space<vmem>>, %arg8: memref<2x1x32xf32, #tpu.memory_space<vmem>>, %arg9: memref<2x32x64xf32, #tpu.memory_space<vmem>>, %arg10: memref<2x1x64xf32, #tpu.memory_space<vmem>>, %arg11: memref<2x64x32xf32, #tpu.memory_space<vmem>>, %arg12: memref<2x1x32xf32, #tpu.memory_space<vmem>>, %arg13: memref<8x16x32xf32, #tpu.memory_space<vmem>>) attributes {dimension_semantics = [#tpu.dimension_semantics<parallel>], iteration_bounds = array<i64: 2>, scalar_prefetch = 0 : i64, scratch_operands = 0 : i64, tpu.core_type = #tpu.core_type<tc>, window_params = [{transform_indices = @transform_0, window_bounds = array<i64: 8, 16, 8>}, {pipeline_mode = #tpu.pipeline_mode<synchronous>, transform_indices = @transform_1, window_bounds = array<i64: 128, 128>}, {pipeline_mode = #tpu.pipeline_mode<synchronous>, transform_indices = @transform_2, window_bounds = array<i64: 8, 32>}, {pipeline_mode = #tpu.pipeline_mode<synchronous>, transform_indices = @transform_3, window_bounds = array<i64: 16, 32>}, {pipeline_mode = #tpu.pipeline_mode<synchronous>, transform_indices = @transform_4, window_bounds = array<i64: 2, 32, 384>}, {pipeline_mode = #tpu.pipeline_mode<synchronous>, transform_indices = @transform_5, window_bounds = array<i64: 2, 1, 384>}, {pipeline_mode = #tpu.pipeline_mode<synchronous>, transform_indices = @transform_6, window_bounds = array<i64: 2, 32, 32>}, {pipeline_mode = #tpu.pipeline_mode<synchronous>, transform_indices = @transform_7, window_bounds = array<i64: 2, 1, 32>}, {pipeline_mode = #tpu.pipeline_mode<synchronous>, transform_indices = @transform_8, window_bounds = array<i64: 2, 32, 64>}, {pipeline_mode = #tpu.pipeline_mode<synchronous>, transform_indices = @transform_9, window_bounds = array<i64: 2, 1, 64>}, {pipeline_mode = #tpu.pipeline_mode<synchronous>, transform_indices = @transform_10, window_bounds = array<i64: 2, 64, 32>}, {pipeline_mode = #tpu.pipeline_mode<synchronous>, transform_indices = @transform_11, window_bounds = array<i64: 2, 1, 32>}, {transform_indices = @transform_12, window_bounds = array<i64: 8, 16, 32>}]} {
    %c0 = arith.constant 0 : index
    %c0_0 = arith.constant 0 : index
    %c0_1 = arith.constant 0 : index
    %0 = vector.load %arg1[%c0, %c0_0, %c0_1] : memref<8x16x8xf32, #tpu.memory_space<vmem>>, vector<8x16x8xf32>
    %1 = vector.shape_cast %0 : vector<8x16x8xf32> to vector<128x8xf32>
    %c0_2 = arith.constant 0 : index
    %c0_3 = arith.constant 0 : index
    %2 = vector.load %arg3[%c0_2, %c0_3] : memref<8x32xf32, #tpu.memory_space<vmem>>, vector<8x32xf32>
    %cst = arith.constant dense<0.000000e+00> : vector<128x32xf32>
    %3 = tpu.matmul %1, %2, %cst {dimension_numbers = #tpu.dot_dimension_numbers<[1], [0], [0], [1], [0, 0, 1, 1], [], []>} : vector<128x8xf32>, vector<8x32xf32>, vector<128x32xf32> -> vector<128x32xf32>
    %4 = vector.shape_cast %3 : vector<128x32xf32> to vector<8x16x32xf32>
    %c0_4 = arith.constant 0 : index
    %c0_5 = arith.constant 0 : index
    %5 = vector.load %arg4[%c0_4, %c0_5] : memref<16x32xf32, #tpu.memory_space<vmem>>, vector<16x32xf32>
    %6 = vector.shape_cast %5 : vector<16x32xf32> to vector<1x16x32xf32>
    %7 = vector.broadcast %6 : vector<1x16x32xf32> to vector<8x16x32xf32>
    %8 = arith.addf %4, %7 : vector<8x16x32xf32>
    %9 = vector.shape_cast %8 : vector<8x16x32xf32> to vector<128x32xf32>
    %c0_6 = arith.constant 0 : index
    %c0_7 = arith.constant 0 : index
    %10 = vector.load %arg2[%c0_6, %c0_7] : memref<128x128xf32, #tpu.memory_space<vmem>>, vector<128x128xf32>
    %c0_8 = arith.constant 0 : index
    %c0_9 = arith.constant 0 : index
    %c0_10 = arith.constant 0 : index
    %11 = vector.load %arg5[%c0_8, %c0_9, %c0_10] : memref<2x32x384xf32, #tpu.memory_space<vmem>>, vector<1x32x384xf32>
    %12 = vector.shape_cast %11 : vector<1x32x384xf32> to vector<32x384xf32>
    %cst_11 = arith.constant dense<0.000000e+00> : vector<128x384xf32>
    %13 = tpu.matmul %9, %12, %cst_11 {dimension_numbers = #tpu.dot_dimension_numbers<[1], [0], [0], [1], [0, 0, 1, 1], [], []>} : vector<128x32xf32>, vector<32x384xf32>, vector<128x384xf32> -> vector<128x384xf32>
    %c0_12 = arith.constant 0 : index
    %c0_13 = arith.constant 0 : index
    %c0_14 = arith.constant 0 : index
    %14 = vector.load %arg6[%c0_12, %c0_13, %c0_14] : memref<2x1x384xf32, #tpu.memory_space<vmem>>, vector<1x1x384xf32>
    %15 = vector.shape_cast %14 : vector<1x1x384xf32> to vector<1x384xf32>
    %16 = vector.broadcast %15 : vector<1x384xf32> to vector<128x384xf32>
    %17 = arith.addf %13, %16 : vector<128x384xf32>
    %18 = vector.extract_strided_slice %17 {offsets = [0, 0], sizes = [128, 32], strides = [1, 1]} : vector<128x384xf32> to vector<128x32xf32>
    %19 = vector.extract_strided_slice %17 {offsets = [0, 32], sizes = [128, 32], strides = [1, 1]} : vector<128x384xf32> to vector<128x32xf32>
    %20 = vector.extract_strided_slice %17 {offsets = [0, 64], sizes = [128, 32], strides = [1, 1]} : vector<128x384xf32> to vector<128x32xf32>
    %21 = vector.extract_strided_slice %17 {offsets = [0, 96], sizes = [128, 32], strides = [1, 1]} : vector<128x384xf32> to vector<128x32xf32>
    %22 = vector.shape_cast %18 : vector<128x32xf32> to vector<1x128x32xf32>
    %23 = vector.shape_cast %19 : vector<128x32xf32> to vector<1x128x32xf32>
    %24 = vector.shape_cast %20 : vector<128x32xf32> to vector<1x128x32xf32>
    %25 = vector.shape_cast %21 : vector<128x32xf32> to vector<1x128x32xf32>
    %26 = tpu.concatenate %22, %23, %24, %25 in 0 : vector<1x128x32xf32>, vector<1x128x32xf32>, vector<1x128x32xf32>, vector<1x128x32xf32> -> vector<4x128x32xf32>
    %27 = vector.extract_strided_slice %17 {offsets = [0, 128], sizes = [128, 32], strides = [1, 1]} : vector<128x384xf32> to vector<128x32xf32>
    %28 = vector.extract_strided_slice %17 {offsets = [0, 160], sizes = [128, 32], strides = [1, 1]} : vector<128x384xf32> to vector<128x32xf32>
    %29 = vector.extract_strided_slice %17 {offsets = [0, 192], sizes = [128, 32], strides = [1, 1]} : vector<128x384xf32> to vector<128x32xf32>
    %30 = vector.extract_strided_slice %17 {offsets = [0, 224], sizes = [128, 32], strides = [1, 1]} : vector<128x384xf32> to vector<128x32xf32>
    %31 = vector.shape_cast %27 : vector<128x32xf32> to vector<1x128x32xf32>
    %32 = vector.shape_cast %28 : vector<128x32xf32> to vector<1x128x32xf32>
    %33 = vector.shape_cast %29 : vector<128x32xf32> to vector<1x128x32xf32>
    %34 = vector.shape_cast %30 : vector<128x32xf32> to vector<1x128x32xf32>
    %35 = tpu.concatenate %31, %32, %33, %34 in 0 : vector<1x128x32xf32>, vector<1x128x32xf32>, vector<1x128x32xf32>, vector<1x128x32xf32> -> vector<4x128x32xf32>
    %36 = vector.extract_strided_slice %17 {offsets = [0, 256], sizes = [128, 32], strides = [1, 1]} : vector<128x384xf32> to vector<128x32xf32>
    %37 = vector.extract_strided_slice %17 {offsets = [0, 288], sizes = [128, 32], strides = [1, 1]} : vector<128x384xf32> to vector<128x32xf32>
    %38 = vector.extract_strided_slice %17 {offsets = [0, 320], sizes = [128, 32], strides = [1, 1]} : vector<128x384xf32> to vector<128x32xf32>
    %39 = vector.extract_strided_slice %17 {offsets = [0, 352], sizes = [128, 32], strides = [1, 1]} : vector<128x384xf32> to vector<128x32xf32>
    %40 = vector.shape_cast %36 : vector<128x32xf32> to vector<1x128x32xf32>
    %41 = vector.shape_cast %37 : vector<128x32xf32> to vector<1x128x32xf32>
    %42 = vector.shape_cast %38 : vector<128x32xf32> to vector<1x128x32xf32>
    %43 = vector.shape_cast %39 : vector<128x32xf32> to vector<1x128x32xf32>
    %44 = tpu.concatenate %40, %41, %42, %43 in 0 : vector<1x128x32xf32>, vector<1x128x32xf32>, vector<1x128x32xf32>, vector<1x128x32xf32> -> vector<4x128x32xf32>
    "tpu.trace_start"() <{level = 10 : i32, message = "hmd,hnd->hmn"}> : () -> ()
    %cst_15 = arith.constant dense<0.000000e+00> : vector<4x128x128xf32>
    %45 = tpu.matmul %26, %35, %cst_15 {dimension_numbers = #tpu.dot_dimension_numbers<[2], [2], [1], [1], [0, 0, 0, 1, 1, 1], [0], [0]>} : vector<4x128x32xf32>, vector<4x128x32xf32>, vector<4x128x128xf32> -> vector<4x128x128xf32>
    "tpu.trace_stop"() : () -> ()
    %46 = vector.shape_cast %10 : vector<128x128xf32> to vector<1x128x128xf32>
    %47 = vector.broadcast %46 : vector<1x128x128xf32> to vector<4x128x128xf32>
    %48 = arith.addf %45, %47 : vector<4x128x128xf32>
    %cst_16 = arith.constant dense<0xFF800000> : vector<4x128xf32>
    %49 = vector.multi_reduction <maximumf>, %48, %cst_16 [2] : vector<4x128x128xf32> to vector<4x128xf32>
    %50 = vector.shape_cast %49 : vector<4x128xf32> to vector<4x128x1xf32>
    %51 = vector.broadcast %50 : vector<4x128x1xf32> to vector<4x128x128xf32>
    %52 = arith.subf %48, %51 : vector<4x128x128xf32>
    %53 = math.exp %52 : vector<4x128x128xf32>
    %cst_17 = arith.constant dense<0.000000e+00> : vector<4x128xf32>
    %54 = vector.multi_reduction <add>, %53, %cst_17 [2] : vector<4x128x128xf32> to vector<4x128xf32>
    %55 = vector.shape_cast %54 : vector<4x128xf32> to vector<4x128x1xf32>
    %56 = tpu.reciprocal %55 {approx = true} : vector<4x128x1xf32> -> vector<4x128x1xf32>
    %57 = vector.broadcast %56 : vector<4x128x1xf32> to vector<4x128x128xf32>
    %58 = arith.mulf %53, %57 : vector<4x128x128xf32>
    "tpu.trace_start"() <{level = 10 : i32, message = "hmn,hnd->hmd"}> : () -> ()
    %cst_18 = arith.constant dense<0.000000e+00> : vector<4x128x32xf32>
    %59 = tpu.matmul %58, %44, %cst_18 {dimension_numbers = #tpu.dot_dimension_numbers<[2], [1], [1], [2], [0, 0, 0, 1, 1, 2], [0], [0]>} : vector<4x128x128xf32>, vector<4x128x32xf32>, vector<4x128x32xf32> -> vector<4x128x32xf32>
    "tpu.trace_stop"() : () -> ()
    %cst_19 = arith.constant dense<0.000000e+00> : vector<128x32xf32>
    %60 = vector.multi_reduction <add>, %59, %cst_19 [0] : vector<4x128x32xf32> to vector<128x32xf32>
    %cst_20 = arith.constant 2.500000e-01 : f32
    %61 = vector.broadcast %cst_20 : f32 to vector<128x32xf32>
    %62 = arith.mulf %60, %61 : vector<128x32xf32>
    %c0_21 = arith.constant 0 : index
    %c0_22 = arith.constant 0 : index
    %c0_23 = arith.constant 0 : index
    %63 = vector.load %arg7[%c0_21, %c0_22, %c0_23] : memref<2x32x32xf32, #tpu.memory_space<vmem>>, vector<1x32x32xf32>
    %64 = vector.shape_cast %63 : vector<1x32x32xf32> to vector<32x32xf32>
    %cst_24 = arith.constant dense<0.000000e+00> : vector<128x32xf32>
    %65 = tpu.matmul %62, %64, %cst_24 {dimension_numbers = #tpu.dot_dimension_numbers<[1], [0], [0], [1], [0, 0, 1, 1], [], []>} : vector<128x32xf32>, vector<32x32xf32>, vector<128x32xf32> -> vector<128x32xf32>
    %c0_25 = arith.constant 0 : index
    %c0_26 = arith.constant 0 : index
    %c0_27 = arith.constant 0 : index
    %66 = vector.load %arg8[%c0_25, %c0_26, %c0_27] : memref<2x1x32xf32, #tpu.memory_space<vmem>>, vector<1x1x32xf32>
    %67 = vector.shape_cast %66 : vector<1x1x32xf32> to vector<1x32xf32>
    %68 = vector.broadcast %67 : vector<1x32xf32> to vector<128x32xf32>
    %69 = arith.addf %65, %68 : vector<128x32xf32>
    %70 = arith.addf %69, %9 : vector<128x32xf32>
    %c0_28 = arith.constant 0 : index
    %c0_29 = arith.constant 0 : index
    %c0_30 = arith.constant 0 : index
    %71 = vector.load %arg9[%c0_28, %c0_29, %c0_30] : memref<2x32x64xf32, #tpu.memory_space<vmem>>, vector<1x32x64xf32>
    %72 = vector.shape_cast %71 : vector<1x32x64xf32> to vector<32x64xf32>
    %cst_31 = arith.constant dense<0.000000e+00> : vector<128x64xf32>
    %73 = tpu.matmul %70, %72, %cst_31 {dimension_numbers = #tpu.dot_dimension_numbers<[1], [0], [0], [1], [0, 0, 1, 1], [], []>} : vector<128x32xf32>, vector<32x64xf32>, vector<128x64xf32> -> vector<128x64xf32>
    %c0_32 = arith.constant 0 : index
    %c0_33 = arith.constant 0 : index
    %c0_34 = arith.constant 0 : index
    %74 = vector.load %arg10[%c0_32, %c0_33, %c0_34] : memref<2x1x64xf32, #tpu.memory_space<vmem>>, vector<1x1x64xf32>
    %75 = vector.shape_cast %74 : vector<1x1x64xf32> to vector<1x64xf32>
    %76 = vector.broadcast %75 : vector<1x64xf32> to vector<128x64xf32>
    %77 = arith.addf %73, %76 : vector<128x64xf32>
    %cst_35 = arith.constant 0.000000e+00 : f32
    %78 = vector.broadcast %cst_35 : f32 to vector<128x64xf32>
    %79 = arith.maximumf %77, %78 : vector<128x64xf32>
    %c0_36 = arith.constant 0 : index
    %c0_37 = arith.constant 0 : index
    %c0_38 = arith.constant 0 : index
    %80 = vector.load %arg11[%c0_36, %c0_37, %c0_38] : memref<2x64x32xf32, #tpu.memory_space<vmem>>, vector<1x64x32xf32>
    %81 = vector.shape_cast %80 : vector<1x64x32xf32> to vector<64x32xf32>
    %cst_39 = arith.constant dense<0.000000e+00> : vector<128x32xf32>
    %82 = tpu.matmul %79, %81, %cst_39 {dimension_numbers = #tpu.dot_dimension_numbers<[1], [0], [0], [1], [0, 0, 1, 1], [], []>} : vector<128x64xf32>, vector<64x32xf32>, vector<128x32xf32> -> vector<128x32xf32>
    %c0_40 = arith.constant 0 : index
    %c0_41 = arith.constant 0 : index
    %c0_42 = arith.constant 0 : index
    %83 = vector.load %arg12[%c0_40, %c0_41, %c0_42] : memref<2x1x32xf32, #tpu.memory_space<vmem>>, vector<1x1x32xf32>
    %84 = vector.shape_cast %83 : vector<1x1x32xf32> to vector<1x32xf32>
    %85 = vector.broadcast %84 : vector<1x32xf32> to vector<128x32xf32>
    %86 = arith.addf %82, %85 : vector<128x32xf32>
    %87 = arith.addf %86, %70 : vector<128x32xf32>
    %c1 = arith.constant 1 : index
    %c0_43 = arith.constant 0 : index
    %c0_44 = arith.constant 0 : index
    %88 = vector.load %arg5[%c1, %c0_43, %c0_44] : memref<2x32x384xf32, #tpu.memory_space<vmem>>, vector<1x32x384xf32>
    %89 = vector.shape_cast %88 : vector<1x32x384xf32> to vector<32x384xf32>
    %cst_45 = arith.constant dense<0.000000e+00> : vector<128x384xf32>
    %90 = tpu.matmul %87, %89, %cst_45 {dimension_numbers = #tpu.dot_dimension_numbers<[1], [0], [0], [1], [0, 0, 1, 1], [], []>} : vector<128x32xf32>, vector<32x384xf32>, vector<128x384xf32> -> vector<128x384xf32>
    %c1_46 = arith.constant 1 : index
    %c0_47 = arith.constant 0 : index
    %c0_48 = arith.constant 0 : index
    %91 = vector.load %arg6[%c1_46, %c0_47, %c0_48] : memref<2x1x384xf32, #tpu.memory_space<vmem>>, vector<1x1x384xf32>
    %92 = vector.shape_cast %91 : vector<1x1x384xf32> to vector<1x384xf32>
    %93 = vector.broadcast %92 : vector<1x384xf32> to vector<128x384xf32>
    %94 = arith.addf %90, %93 : vector<128x384xf32>
    %95 = vector.extract_strided_slice %94 {offsets = [0, 0], sizes = [128, 32], strides = [1, 1]} : vector<128x384xf32> to vector<128x32xf32>
    %96 = vector.extract_strided_slice %94 {offsets = [0, 32], sizes = [128, 32], strides = [1, 1]} : vector<128x384xf32> to vector<128x32xf32>
    %97 = vector.extract_strided_slice %94 {offsets = [0, 64], sizes = [128, 32], strides = [1, 1]} : vector<128x384xf32> to vector<128x32xf32>
    %98 = vector.extract_strided_slice %94 {offsets = [0, 96], sizes = [128, 32], strides = [1, 1]} : vector<128x384xf32> to vector<128x32xf32>
    %99 = vector.shape_cast %95 : vector<128x32xf32> to vector<1x128x32xf32>
    %100 = vector.shape_cast %96 : vector<128x32xf32> to vector<1x128x32xf32>
    %101 = vector.shape_cast %97 : vector<128x32xf32> to vector<1x128x32xf32>
    %102 = vector.shape_cast %98 : vector<128x32xf32> to vector<1x128x32xf32>
    %103 = tpu.concatenate %99, %100, %101, %102 in 0 : vector<1x128x32xf32>, vector<1x128x32xf32>, vector<1x128x32xf32>, vector<1x128x32xf32> -> vector<4x128x32xf32>
    %104 = vector.extract_strided_slice %94 {offsets = [0, 128], sizes = [128, 32], strides = [1, 1]} : vector<128x384xf32> to vector<128x32xf32>
    %105 = vector.extract_strided_slice %94 {offsets = [0, 160], sizes = [128, 32], strides = [1, 1]} : vector<128x384xf32> to vector<128x32xf32>
    %106 = vector.extract_strided_slice %94 {offsets = [0, 192], sizes = [128, 32], strides = [1, 1]} : vector<128x384xf32> to vector<128x32xf32>
    %107 = vector.extract_strided_slice %94 {offsets = [0, 224], sizes = [128, 32], strides = [1, 1]} : vector<128x384xf32> to vector<128x32xf32>
    %108 = vector.shape_cast %104 : vector<128x32xf32> to vector<1x128x32xf32>
    %109 = vector.shape_cast %105 : vector<128x32xf32> to vector<1x128x32xf32>
    %110 = vector.shape_cast %106 : vector<128x32xf32> to vector<1x128x32xf32>
    %111 = vector.shape_cast %107 : vector<128x32xf32> to vector<1x128x32xf32>
    %112 = tpu.concatenate %108, %109, %110, %111 in 0 : vector<1x128x32xf32>, vector<1x128x32xf32>, vector<1x128x32xf32>, vector<1x128x32xf32> -> vector<4x128x32xf32>
    %113 = vector.extract_strided_slice %94 {offsets = [0, 256], sizes = [128, 32], strides = [1, 1]} : vector<128x384xf32> to vector<128x32xf32>
    %114 = vector.extract_strided_slice %94 {offsets = [0, 288], sizes = [128, 32], strides = [1, 1]} : vector<128x384xf32> to vector<128x32xf32>
    %115 = vector.extract_strided_slice %94 {offsets = [0, 320], sizes = [128, 32], strides = [1, 1]} : vector<128x384xf32> to vector<128x32xf32>
    %116 = vector.extract_strided_slice %94 {offsets = [0, 352], sizes = [128, 32], strides = [1, 1]} : vector<128x384xf32> to vector<128x32xf32>
    %117 = vector.shape_cast %113 : vector<128x32xf32> to vector<1x128x32xf32>
    %118 = vector.shape_cast %114 : vector<128x32xf32> to vector<1x128x32xf32>
    %119 = vector.shape_cast %115 : vector<128x32xf32> to vector<1x128x32xf32>
    %120 = vector.shape_cast %116 : vector<128x32xf32> to vector<1x128x32xf32>
    %121 = tpu.concatenate %117, %118, %119, %120 in 0 : vector<1x128x32xf32>, vector<1x128x32xf32>, vector<1x128x32xf32>, vector<1x128x32xf32> -> vector<4x128x32xf32>
    "tpu.trace_start"() <{level = 10 : i32, message = "hmd,hnd->hmn"}> : () -> ()
    %cst_49 = arith.constant dense<0.000000e+00> : vector<4x128x128xf32>
    %122 = tpu.matmul %103, %112, %cst_49 {dimension_numbers = #tpu.dot_dimension_numbers<[2], [2], [1], [1], [0, 0, 0, 1, 1, 1], [0], [0]>} : vector<4x128x32xf32>, vector<4x128x32xf32>, vector<4x128x128xf32> -> vector<4x128x128xf32>
    "tpu.trace_stop"() : () -> ()
    %123 = vector.shape_cast %10 : vector<128x128xf32> to vector<1x128x128xf32>
    %124 = vector.broadcast %123 : vector<1x128x128xf32> to vector<4x128x128xf32>
    %125 = arith.addf %122, %124 : vector<4x128x128xf32>
    %cst_50 = arith.constant dense<0xFF800000> : vector<4x128xf32>
    %126 = vector.multi_reduction <maximumf>, %125, %cst_50 [2] : vector<4x128x128xf32> to vector<4x128xf32>
    %127 = vector.shape_cast %126 : vector<4x128xf32> to vector<4x128x1xf32>
    %128 = vector.broadcast %127 : vector<4x128x1xf32> to vector<4x128x128xf32>
    %129 = arith.subf %125, %128 : vector<4x128x128xf32>
    %130 = math.exp %129 : vector<4x128x128xf32>
    %cst_51 = arith.constant dense<0.000000e+00> : vector<4x128xf32>
    %131 = vector.multi_reduction <add>, %130, %cst_51 [2] : vector<4x128x128xf32> to vector<4x128xf32>
    %132 = vector.shape_cast %131 : vector<4x128xf32> to vector<4x128x1xf32>
    %133 = tpu.reciprocal %132 {approx = true} : vector<4x128x1xf32> -> vector<4x128x1xf32>
    %134 = vector.broadcast %133 : vector<4x128x1xf32> to vector<4x128x128xf32>
    %135 = arith.mulf %130, %134 : vector<4x128x128xf32>
    "tpu.trace_start"() <{level = 10 : i32, message = "hmn,hnd->hmd"}> : () -> ()
    %cst_52 = arith.constant dense<0.000000e+00> : vector<4x128x32xf32>
    %136 = tpu.matmul %135, %121, %cst_52 {dimension_numbers = #tpu.dot_dimension_numbers<[2], [1], [1], [2], [0, 0, 0, 1, 1, 2], [0], [0]>} : vector<4x128x128xf32>, vector<4x128x32xf32>, vector<4x128x32xf32> -> vector<4x128x32xf32>
    "tpu.trace_stop"() : () -> ()
    %cst_53 = arith.constant dense<0.000000e+00> : vector<128x32xf32>
    %137 = vector.multi_reduction <add>, %136, %cst_53 [0] : vector<4x128x32xf32> to vector<128x32xf32>
    %cst_54 = arith.constant 2.500000e-01 : f32
    %138 = vector.broadcast %cst_54 : f32 to vector<128x32xf32>
    %139 = arith.mulf %137, %138 : vector<128x32xf32>
    %c1_55 = arith.constant 1 : index
    %c0_56 = arith.constant 0 : index
    %c0_57 = arith.constant 0 : index
    %140 = vector.load %arg7[%c1_55, %c0_56, %c0_57] : memref<2x32x32xf32, #tpu.memory_space<vmem>>, vector<1x32x32xf32>
    %141 = vector.shape_cast %140 : vector<1x32x32xf32> to vector<32x32xf32>
    %cst_58 = arith.constant dense<0.000000e+00> : vector<128x32xf32>
    %142 = tpu.matmul %139, %141, %cst_58 {dimension_numbers = #tpu.dot_dimension_numbers<[1], [0], [0], [1], [0, 0, 1, 1], [], []>} : vector<128x32xf32>, vector<32x32xf32>, vector<128x32xf32> -> vector<128x32xf32>
    %c1_59 = arith.constant 1 : index
    %c0_60 = arith.constant 0 : index
    %c0_61 = arith.constant 0 : index
    %143 = vector.load %arg8[%c1_59, %c0_60, %c0_61] : memref<2x1x32xf32, #tpu.memory_space<vmem>>, vector<1x1x32xf32>
    %144 = vector.shape_cast %143 : vector<1x1x32xf32> to vector<1x32xf32>
    %145 = vector.broadcast %144 : vector<1x32xf32> to vector<128x32xf32>
    %146 = arith.addf %142, %145 : vector<128x32xf32>
    %147 = arith.addf %146, %87 : vector<128x32xf32>
    %c1_62 = arith.constant 1 : index
    %c0_63 = arith.constant 0 : index
    %c0_64 = arith.constant 0 : index
    %148 = vector.load %arg9[%c1_62, %c0_63, %c0_64] : memref<2x32x64xf32, #tpu.memory_space<vmem>>, vector<1x32x64xf32>
    %149 = vector.shape_cast %148 : vector<1x32x64xf32> to vector<32x64xf32>
    %cst_65 = arith.constant dense<0.000000e+00> : vector<128x64xf32>
    %150 = tpu.matmul %147, %149, %cst_65 {dimension_numbers = #tpu.dot_dimension_numbers<[1], [0], [0], [1], [0, 0, 1, 1], [], []>} : vector<128x32xf32>, vector<32x64xf32>, vector<128x64xf32> -> vector<128x64xf32>
    %c1_66 = arith.constant 1 : index
    %c0_67 = arith.constant 0 : index
    %c0_68 = arith.constant 0 : index
    %151 = vector.load %arg10[%c1_66, %c0_67, %c0_68] : memref<2x1x64xf32, #tpu.memory_space<vmem>>, vector<1x1x64xf32>
    %152 = vector.shape_cast %151 : vector<1x1x64xf32> to vector<1x64xf32>
    %153 = vector.broadcast %152 : vector<1x64xf32> to vector<128x64xf32>
    %154 = arith.addf %150, %153 : vector<128x64xf32>
    %cst_69 = arith.constant 0.000000e+00 : f32
    %155 = vector.broadcast %cst_69 : f32 to vector<128x64xf32>
    %156 = arith.maximumf %154, %155 : vector<128x64xf32>
    %c1_70 = arith.constant 1 : index
    %c0_71 = arith.constant 0 : index
    %c0_72 = arith.constant 0 : index
    %157 = vector.load %arg11[%c1_70, %c0_71, %c0_72] : memref<2x64x32xf32, #tpu.memory_space<vmem>>, vector<1x64x32xf32>
    %158 = vector.shape_cast %157 : vector<1x64x32xf32> to vector<64x32xf32>
    %cst_73 = arith.constant dense<0.000000e+00> : vector<128x32xf32>
    %159 = tpu.matmul %156, %158, %cst_73 {dimension_numbers = #tpu.dot_dimension_numbers<[1], [0], [0], [1], [0, 0, 1, 1], [], []>} : vector<128x64xf32>, vector<64x32xf32>, vector<128x32xf32> -> vector<128x32xf32>
    %c1_74 = arith.constant 1 : index
    %c0_75 = arith.constant 0 : index
    %c0_76 = arith.constant 0 : index
    %160 = vector.load %arg12[%c1_74, %c0_75, %c0_76] : memref<2x1x32xf32, #tpu.memory_space<vmem>>, vector<1x1x32xf32>
    %161 = vector.shape_cast %160 : vector<1x1x32xf32> to vector<1x32xf32>
    %162 = vector.broadcast %161 : vector<1x32xf32> to vector<128x32xf32>
    %163 = arith.addf %159, %162 : vector<128x32xf32>
    %164 = arith.addf %163, %147 : vector<128x32xf32>
    %165 = vector.shape_cast %164 : vector<128x32xf32> to vector<8x16x32xf32>
    %c0_77 = arith.constant 0 : index
    %c0_78 = arith.constant 0 : index
    %c0_79 = arith.constant 0 : index
    %166 = vector.load %arg13[%c0_77, %c0_78, %c0_79] : memref<8x16x32xf32, #tpu.memory_space<vmem>>, vector<8x16x32xf32>
    tpu.vector_store %arg13[%c0_77, %c0_78, %c0_79], %165 {strides = array<i32>} : memref<8x16x32xf32, #tpu.memory_space<vmem>>, vector<8x16x32xf32>,
    return
  }
  func.func @transform_0(%arg0: i32) -> (i32, i32, i32) {
    %c0_i32 = arith.constant 0 : i32
    %c0_i32_0 = arith.constant 0 : i32
    %c0_i32_1 = arith.constant 0 : i32
    return %arg0, %c0_i32, %c0_i32_0 : i32, i32, i32
  }
  func.func @transform_1(%arg0: i32) -> (i32, i32) {
    %c0_i32 = arith.constant 0 : i32
    %c0_i32_0 = arith.constant 0 : i32
    %c0_i32_1 = arith.constant 0 : i32
    return %c0_i32, %c0_i32_0 : i32, i32
  }
  func.func @transform_2(%arg0: i32) -> (i32, i32) {
    %c0_i32 = arith.constant 0 : i32
    %c0_i32_0 = arith.constant 0 : i32
    %c0_i32_1 = arith.constant 0 : i32
    return %c0_i32, %c0_i32_0 : i32, i32
  }
  func.func @transform_3(%arg0: i32) -> (i32, i32) {
    %c0_i32 = arith.constant 0 : i32
    %c0_i32_0 = arith.constant 0 : i32
    %c0_i32_1 = arith.constant 0 : i32
    return %c0_i32, %c0_i32_0 : i32, i32
  }
  func.func @transform_4(%arg0: i32) -> (i32, i32, i32) {
    %c0_i32 = arith.constant 0 : i32
    %c0_i32_0 = arith.constant 0 : i32
    %c0_i32_1 = arith.constant 0 : i32
    %c0_i32_2 = arith.constant 0 : i32
    return %c0_i32, %c0_i32_0, %c0_i32_1 : i32, i32, i32
  }
  func.func @transform_5(%arg0: i32) -> (i32, i32, i32) {
    %c0_i32 = arith.constant 0 : i32
    %c0_i32_0 = arith.constant 0 : i32
    %c0_i32_1 = arith.constant 0 : i32
    %c0_i32_2 = arith.constant 0 : i32
    return %c0_i32, %c0_i32_0, %c0_i32_1 : i32, i32, i32
  }
  func.func @transform_6(%arg0: i32) -> (i32, i32, i32) {
    %c0_i32 = arith.constant 0 : i32
    %c0_i32_0 = arith.constant 0 : i32
    %c0_i32_1 = arith.constant 0 : i32
    %c0_i32_2 = arith.constant 0 : i32
    return %c0_i32, %c0_i32_0, %c0_i32_1 : i32, i32, i32
  }
  func.func @transform_7(%arg0: i32) -> (i32, i32, i32) {
    %c0_i32 = arith.constant 0 : i32
    %c0_i32_0 = arith.constant 0 : i32
    %c0_i32_1 = arith.constant 0 : i32
    %c0_i32_2 = arith.constant 0 : i32
    return %c0_i32, %c0_i32_0, %c0_i32_1 : i32, i32, i32
  }
  func.func @transform_8(%arg0: i32) -> (i32, i32, i32) {
    %c0_i32 = arith.constant 0 : i32
    %c0_i32_0 = arith.constant 0 : i32
    %c0_i32_1 = arith.constant 0 : i32
    %c0_i32_2 = arith.constant 0 : i32
    return %c0_i32, %c0_i32_0, %c0_i32_1 : i32, i32, i32
  }
  func.func @transform_9(%arg0: i32) -> (i32, i32, i32) {
    %c0_i32 = arith.constant 0 : i32
    %c0_i32_0 = arith.constant 0 : i32
    %c0_i32_1 = arith.constant 0 : i32
    %c0_i32_2 = arith.constant 0 : i32
    return %c0_i32, %c0_i32_0, %c0_i32_1 : i32, i32, i32
  }
  func.func @transform_10(%arg0: i32) -> (i32, i32, i32) {
    %c0_i32 = arith.constant 0 : i32
    %c0_i32_0 = arith.constant 0 : i32
    %c0_i32_1 = arith.constant 0 : i32
    %c0_i32_2 = arith.constant 0 : i32
    return %c0_i32, %c0_i32_0, %c0_i32_1 : i32, i32, i32
  }
  func.func @transform_11(%arg0: i32) -> (i32, i32, i32) {
    %c0_i32 = arith.constant 0 : i32
    %c0_i32_0 = arith.constant 0 : i32
    %c0_i32_1 = arith.constant 0 : i32
    %c0_i32_2 = arith.constant 0 : i32
    return %c0_i32, %c0_i32_0, %c0_i32_1 : i32, i32, i32
  }
  func.func @transform_12(%arg0: i32) -> (i32, i32, i32) {
    %c0_i32 = arith.constant 0 : i32
    %c0_i32_0 = arith.constant 0 : i32
    %c0_i32_1 = arith.constant 0 : i32
    return %arg0, %c0_i32, %c0_i32_0 : i32, i32, i32
  }
}

</mosaic_0001>

<bundles_post_ra>
// kernel: decoder_forward.1
= control target key start
LH: loop header
LB: loop body
LE: loop exit
PB: predicated region body
PF: predicated region fallthrough
CT: control target
= control target key end

     0   :  { %s15876_s0 = inlined_call_operand.vmem [shape: f32[16,16,8], index: 0, kind: input, shape index: {}]   ;;  %s15877_s1 = inlined_call_operand.vmem [shape: f32[128,128], index: 1, kind: input, shape index: {}]   ;;  %s15878_s2 = inlined_call_operand.vmem [shape: f32[8,32], index: 2, kind: input, shape index: {}]   ;;  %s15879_s3 = inlined_call_operand.vmem [shape: f32[16,32], index: 3, kind: input, shape index: {}]   ;;  %s15880_s4 = inlined_call_operand.vmem [shape: f32[2,32,384], index: 4, kind: input, shape index: {}]   ;;  %s15881_s5 = inlined_call_operand.vmem [shape: f32[2,1,384], index: 5, kind: input, shape index: {}]   ;;  %s15882_s6 = inlined_call_operand.vmem [shape: f32[2,32,32], index: 6, kind: input, shape index: {}]   ;;  %s15883_s7 = inlined_call_operand.vmem [shape: f32[2,1,32], index: 7, kind: input, shape index: {}]   ;;  %s15884_s8 = inlined_call_operand.vmem [shape: f32[2,32,64], index: 8, kind: input, shape index: {}]   ;;  %s15885_s9 = inlined_call_operand.vmem [shape: f32[2,1,64], index: 9, kind: input, shape index: {}]   ;;  %s15886_s10 = inlined_call_operand.vmem [shape: f32[2,64,32], index: 10, kind: input, shape index: {}]   ;;  %s15887_s11 = inlined_call_operand.vmem [shape: f32[2,1,32], index: 11, kind: input, shape index: {}]   ;;  %s15888_s12 = inlined_call_operand.hbm [shape: f32[16,16,32], index: 12, kind: output, shape index: {}]  }
   0x1   :  { %16085 = sst [smem:[#allocation76_spill]] %s15876_s0 }
   0x2   :  { %16086 = sst [smem:[#allocation77_spill]] %s15877_s1 }
   0x3   :  { %17 = vsyncpa [#allocation3], 0 }
   0x4   :  { %19 = vsyncpa [#allocation3 + $0x1], 0  ;;  %s10955_s21 = smov 0   ;;  %s10957_s22 = smov 0  }
   0x5   :  { %s10959_s23 = smov 0   ;;  %s10961_s24 = smov 0  }
   0x6 LB: > { %s10976_s25 = sadd.s32 4294967295, %s10881_s24   ;;  %s7868_s26 = sadd.s32 4294967294, %s10881_s24   ;;  %s10881_s24 = sphi %s10961_s24, %s16474_s24   ;;  %s10877_s23 = sphi %s10959_s23, %s16473_s23   ;;  %s10873_s22 = sphi %s10957_s22, %s16472_s22   ;;  %s10869_s21 = sphi %s10955_s21, %s16471_s21  }
   0x7   : > { %s10980_s27 = sadd.s32 1, %s10881_s24   ;;  %s289_s28 = sadd.s32 1, %s10877_s23 }
   0x8   : > { %s286_s29 = ssub.s32 %s10881_s24, %s10980_s27  ;;  %p299_p0 = scmp.ne.s32.totalorder %s10877_s23, %s10873_s22 }
   0x9   : > { %p287_p1 = scmp.eq.s32.totalorder %s286_s29, 0  ;;  %p300_p2 = scmp.eq.s32.totalorder %s10976_s25, 1 }
   0xa   : > { %p305_p3 = scmp.ne.s32.totalorder %s10873_s22, %s10869_s21  ;;  %p306_p4 = scmp.eq.s32.totalorder %s7868_s26, 1 }
   0xb   : > { %s10991_s30 = scalar_select %p287_p1, %s10877_s23, %s289_s28  }
   0xc   : > { %p10993_p5 = por %p300_p2, %p299_p0  ;;  %p10997_p6 = por %p306_p4, %p305_p3 }
   0xd   : > { %p7871_p7 = scmp.ge.s32.totalorder %s10881_s24, 1  ;;  %p367_p8 = scmp.lt.s32.totalorder %s10881_s24, 3 }
   0xf   : > { %p368_p9 = pnand %p7871_p7, %p367_p8 }
  0x11   : > { %371 = sbr.rel (%p368_p9) target bundleno = 4265 (0x10a9), region = 68 }
  0x16   : > { %v434_v0 = vld [vmem:[%s15878_s2] sm:$0xff]  ;;  %s7873_s17 = sshll.u32 %s10976_s25, 3  ;;  %v673_v1 = vld [vmem:[%s15880_s4 + $0x50] sm:$0xff]  ;;  %v674_v2 = vld [vmem:[%s15880_s4 + $0x58] sm:$0xff]  ;;  %vm435_vm0 = vcmask 64512   ;;  %s16089_s0 = sld [smem:[#allocation76_spill]] }
  0x17   : > { %9052 = vmatprep.subr.mxu0 %v434_v0  ;;  %p411_p10 = scmp.lt.s32.totalorder %s7873_s17, 15  ;;  %10246 = vmatprep.subr.mxu1 %v434_v0  ;;  %v672_v7 = vld [vmem:[%s15880_s4 + $0x48] sm:$0xff]  ;;  %v670_v8 = vld [vmem:[%s15880_s4 + $0x38] sm:$0xff]  ;;  %v669_v13 = vld [vmem:[%s15880_s4 + $0x30] sm:$0xff]  ;;  %v15891_v29 = vmov 0.0   ;;  %vm692_vm1 = vcmask 261120  }
  0x18   : > { %9053 = vmatpush3.msra.mxu0 %v434_v0  ;;  %10247 = vmatpush3.msra.mxu1 %v434_v0  ;;  %v667_v15 = vld [vmem:[%s15880_s4 + $0x20] sm:$0xff]  ;;  %v666_v17 = vld [vmem:[%s15880_s4 + $0x18] sm:$0xff]  ;;  %v664_v25 = vld [vmem:[%s15880_s4 + $0x8] sm:$0xff]  ;;  %v677_v0 = vlaneseq  ;;  %s10885_s18 = smov 96   ;;  %s16004_s19 = smov 32   ;;  %vm4006_vm2 = vcmask 523264  }
  0x19   : > { %s16476_s17 = smov (!%p411_p10, %s7873_s17), 15  ;;  %765 = vmatprep.subr.mxu1 %v673_v1  ;;  %9078 = vmatprep.subr.mxu0 %v674_v2  ;;  %v671_v24 = vld [vmem:[%s15880_s4 + $0x40] sm:$0xff]  ;;  %v668_v27 = vld [vmem:[%s15880_s4 + $0x28] sm:$0xff]  ;;  %v665_v28 = vld [vmem:[%s15880_s4 + $0x10] sm:$0xff]  ;;  %s16140_s1 = sld [smem:[#allocation77_spill]] }
  0x1a   : > { %s8352_s28 = sshll.u32 %s16476_s17, 4  ;;  %v663_v26 = vld [vmem:[%s15880_s4] sm:$0xff]  ;;  %v630_v32 = vld [vmem:[%s15879_s3 + $0x8] sm:$0xff]  ;;  %v11198_v1 = vshrl.u32 %v677_v0, 7  ;;  %s16330_s20 = smov 64  }
  0x1b   : > { %v629_v31 = vld [vmem:[%s15879_s3] sm:$0xff]  ;;  %s16331_s26 = smov 32   ;;  %s8354_s29 = sshll.u32 %s10976_s25, 11 }
  0x1c   : > { %s11016_s16 = scalar_lea.vmem %s16089_s0, %s8352_s28  ;;  %16106 = vst [vmem:[#allocation21_spill] sm:$0xff] %v11198_v1 }
  0x1d   : > { %v418_v3 = vld [vmem:[%s11016_s16] sm:$0xff]  ;;  %v419_v4 = vld [vmem:[%s11016_s16 + $0x8] sm:$0xff]  ;;  %v420_v5 = vld [vmem:[%s11016_s16 + $0x10] sm:$0xff] }
  0x1e   : > { %9054 = vmatprep.mubr.msk.f32.mxu0 %vm435_vm0, %v418_v3  ;;  %v426_v6 = vld [vmem:[%s11016_s16 + $0x40] sm:$0xff]  ;;  %v421_v9 = vld [vmem:[%s11016_s16 + $0x18] sm:$0xff]  ;;  %v427_v10 = vld [vmem:[%s11016_s16 + $0x48] sm:$0xff] }
  0x1f   : > { %9055 = vmatmul.mubr.msk.f32.vlgmr.msra.gmra.mxu0 %vm435_vm0, %v419_v4  ;;  %9066 = vmatprep.mubr.msk.f32.mxu1 %vm435_vm0, %v426_v6  ;;  %v428_v11 = vld [vmem:[%s11016_s16 + $0x50] sm:$0xff]  ;;  %v422_v12 = vld [vmem:[%s11016_s16 + $0x20] sm:$0xff]  ;;  %v429_v14 = vld [vmem:[%s11016_s16 + $0x58] sm:$0xff] }
  0x20   : > { %9057 = vmatprep.mubr.msk.f32.mxu0 %vm435_vm0, %v420_v5  ;;  %9067 = vmatmul.mubr.msk.f32.vlgmr.msra.gmra.mxu1 %vm435_vm0, %v427_v10  ;;  %v430_v16 = vld [vmem:[%s11016_s16 + $0x60] sm:$0xff]  ;;  %v423_v18 = vld [vmem:[%s11016_s16 + $0x28] sm:$0xff]  ;;  %v424_v19 = vld [vmem:[%s11016_s16 + $0x30] sm:$0xff]  ;;  %v15889_v5 = vsub.s32 1, %v11198_v1 }
  0x21   : > { %9079 = vmatpush3.msra.mxu0 %v674_v2  ;;  %9069 = vmatprep.mubr.msk.f32.mxu1 %vm435_vm0, %v428_v11  ;;  %v431_v20 = vld [vmem:[%s11016_s16 + $0x68] sm:$0xff]  ;;  %v432_v21 = vld [vmem:[%s11016_s16 + $0x70] sm:$0xff]  ;;  %v425_v22 = vld [vmem:[%s11016_s16 + $0x38] sm:$0xff]  ;;  %v15890_v2 = vsub.s32 0, %v11198_v1 }
  0x22   : > { %766 = vmatpush1.msra.mxu1 %v672_v7  ;;  %v433_v23 = vld [vmem:[%s11016_s16 + $0x78] sm:$0xff]  ;;  %9080 = vmatprep.subr.mxu0 %v671_v24  ;;  %v11204_v3 = vld [vmem:[%s15881_s5] sm:$0x7]  ;;  %s16006_s16 = smov 64  }
  0x23   : > { %9058 = vmatmul.mubr.msk.f32.gmra.mxu0 %vm435_vm0, %v421_v9  ;;  %767 = vmatprep.subr.mxu1 %v670_v8  ;;  %v11209_v4 = vrot.slane %v11204_v3, %v15890_v2  ;;  %v11216_v8 = vrot.slane %v11204_v3, %v15889_v5 }
  0x24   : > { %9060 = vmatprep.mubr.msk.f32.mxu0 %vm435_vm0, %v422_v12  ;;  %768 = vmatpush1.msra.mxu1 %v669_v13 }
  0x25   : > { %9070 = vmatmul.mubr.msk.f32.gmra.mxu1 %vm435_vm0, %v429_v14  ;;  %769 = vmatprep.subr.mxu1 %v667_v15 }
  0x26   : > { %9072 = vmatprep.mubr.msk.f32.mxu1 %vm435_vm0, %v430_v16  ;;  %770 = vmatpush1.msra.mxu1 %v666_v17 }
  0x27   : > { %9061 = vmatmul.mubr.msk.f32.gmra.mxu0 %vm435_vm0, %v423_v18  ;;  %771 = vmatprep.subr.mxu1 %v664_v25 }
  0x28   : > { %9063 = vmatprep.mubr.msk.f32.mxu0 %vm435_vm0, %v424_v19  ;;  %9081 = vmatpush3.msra.mxu0 %v671_v24 }
  0x29   : > { %9073 = vmatmul.mubr.msk.f32.gmra.mxu1 %vm435_vm0, %v431_v20  ;;  %9082 = vmatprep.subr.mxu0 %v668_v27 }
  0x2a   : > { %9075 = vmatprep.mubr.msk.f32.mxu1 %vm435_vm0, %v432_v21  ;;  %772 = vmatpush1.msra.mxu1 %v663_v26 }
  0x2b   : > { %9064 = vmatmul.mubr.msk.f32.gmra.mxu0 %vm435_vm0, %v425_v22 }
  0x2c   : > { %9083 = vmatpush3.msra.mxu0 %v668_v27 }
  0x2d   : > { %9076 = vmatmul.mubr.msk.f32.gmra.mxu1 %vm435_vm0, %v433_v23  ;;  %9084 = vmatprep.subr.mxu0 %v665_v28 }
  0x2e   : > { %805 = vmatprep.mubr.f32.mxu1 %v15891_v29  ;;  %9085 = vmatpush3.msra.mxu0 %v665_v28 }
  0xdf   : > { %v9056_v30 = vpop.f32.mrf.mxu0 }
  0xe0   : > { %v11089_v35 = vadd.f32 %v9056_v30, %v630_v32  ;;  %v9068_v37 = vpop.f32.mrf.mxu1 }
  0xe1   : > { %v550_v33 = vpop.f32.mrf.mxu0  ;;  %v11135_v54 = vadd.f32 %v9068_v37, %v630_v32 }
  0xe2   : > { %v11087_v34 = vadd.f32 %v629_v31, %v550_v33  ;;  %16091 = vst [vmem:[#allocation6_spill] sm:$0xff] %v11089_v35  ;;  %v590_v42 = vpop.f32.mrf.mxu1 }
  0xe3   : > { %v9059_v36 = vpop.f32.mrf.mxu0  ;;  %v11126_v53 = vadd.f32 %v629_v31, %v590_v42  ;;  %16099 = vst [vmem:[#allocation14_spill] sm:$0xff] %v11135_v54 }
  0xe4   : > { %16090 = vst [vmem:[#allocation5_spill] sm:$0xff] %v11087_v34  ;;  %7892 = vmatmul.mubr.msk.f32.vlgmr.msra.gmra.mxu1 %vm692_vm1, %v11087_v34  ;;  %9086 = vmatprep.mubr.msk.f32.mxu0 %vm692_vm1, %v11087_v34  ;;  %v11100_v40 = vadd.f32 %v9059_v36, %v630_v32 }
  0xe5   : > { %9087 = vmatmul.mubr.msk.f32.vlgmr.msra.gmra.mxu0 %vm692_vm1, %v11089_v35  ;;  %811 = vmatprep.mubr.f32.mxu1 %v15891_v29  ;;  %v560_v38 = vpop.f32.mrf.mxu0  ;;  %v9071_v44 = vpop.f32.mrf.mxu1  ;;  %16098 = vst [vmem:[#allocation13_spill] sm:$0xff] %v11126_v53 }
  0xe6   : > { %v11098_v39 = vadd.f32 %v629_v31, %v560_v38  ;;  %16093 = vst [vmem:[#allocation8_spill] sm:$0xff] %v11100_v40  ;;  %v11146_v58 = vadd.f32 %v9071_v44, %v630_v32 }
  0xe7   : > { %v9062_v41 = vpop.f32.mrf.mxu0  ;;  %v600_v49 = vpop.f32.mrf.mxu1 }
  0xe8   : > { %16092 = vst [vmem:[#allocation7_spill] sm:$0xff] %v11098_v39  ;;  %7893 = vmatmul.mubr.msk.f32.gmra.mxu1 %vm692_vm1, %v11089_v35  ;;  %9089 = vmatprep.mubr.msk.f32.mxu0 %vm692_vm1, %v11098_v39  ;;  %v11111_v46 = vadd.f32 %v9062_v41, %v630_v32  ;;  %v11139_v56 = vadd.f32 %v629_v31, %v600_v49  ;;  %16101 = vst [vmem:[#allocation16_spill] sm:$0xff] %v11146_v58 }
  0xe9   : > { %817 = vmatprep.mubr.f32.mxu1 %v15891_v29  ;;  %v570_v43 = vpop.f32.mrf.mxu0  ;;  %9090 = vmatmul.mubr.msk.f32.gmra.mxu0 %vm692_vm1, %v11100_v40  ;;  %v9074_v52 = vpop.f32.mrf.mxu1 }
  0xea   : > { %v11109_v45 = vadd.f32 %v629_v31, %v570_v43  ;;  %16095 = vst [vmem:[#allocation10_spill] sm:$0xff] %v11111_v46  ;;  %16100 = vst [vmem:[#allocation15_spill] sm:$0xff] %v11139_v56  ;;  %v11157_v61 = vadd.f32 %v9074_v52, %v630_v32 }
  0xeb   : > { %v9065_v47 = vpop.f32.mrf.mxu0  ;;  %v610_v55 = vpop.f32.mrf.mxu1 }
  0xec   : > { %16094 = vst [vmem:[#allocation9_spill] sm:$0xff] %v11109_v45  ;;  %7894 = vmatmul.mubr.msk.f32.gmra.mxu1 %vm692_vm1, %v11098_v39  ;;  %9092 = vmatprep.mubr.msk.f32.mxu0 %vm692_vm1, %v11109_v45  ;;  %v11122_v51 = vadd.f32 %v9065_v47, %v630_v32  ;;  %v11150_v59 = vadd.f32 %v629_v31, %v610_v55  ;;  %16103 = vst [vmem:[#allocation18_spill] sm:$0xff] %v11157_v61 }
  0xed   : > { %823 = vmatprep.mubr.f32.mxu1 %v15891_v29  ;;  %v580_v48 = vpop.f32.mrf.mxu0  ;;  %9093 = vmatmul.mubr.msk.f32.gmra.mxu0 %vm692_vm1, %v11111_v46  ;;  %v9077_v57 = vpop.f32.mrf.mxu1 }
  0xee   : > { %v11120_v50 = vadd.f32 %v629_v31, %v580_v48  ;;  %16097 = vst [vmem:[#allocation12_spill] sm:$0xff] %v11122_v51  ;;  %16102 = vst [vmem:[#allocation17_spill] sm:$0xff] %v11150_v59  ;;  %v11168_v63 = vadd.f32 %v9077_v57, %v630_v32 }
  0xef   : > { %v620_v60 = vpop.f32.mrf.mxu1 }
  0xf0   : > { %16096 = vst [vmem:[#allocation11_spill] sm:$0xff] %v11120_v50  ;;  %7895 = vmatmul.mubr.msk.f32.gmra.mxu1 %vm692_vm1, %v11100_v40  ;;  %9095 = vmatprep.mubr.msk.f32.mxu0 %vm692_vm1, %v11120_v50  ;;  %v11161_v62 = vadd.f32 %v629_v31, %v620_v60  ;;  %16105 = vst [vmem:[#allocation20_spill] sm:$0xff] %v11168_v63 }
  0xf1   : > { %829 = vmatprep.mubr.f32.mxu1 %v15891_v29  ;;  %9096 = vmatmul.mubr.msk.f32.gmra.mxu0 %vm692_vm1, %v11122_v51 }
  0xf2   : > { %9098 = vmatprep.mubr.msk.f32.mxu0 %vm692_vm1, %v11126_v53  ;;  %16104 = vst [vmem:[#allocation19_spill] sm:$0xff] %v11161_v62 }
  0xf4   : > { %7896 = vmatmul.mubr.msk.f32.gmra.mxu1 %vm692_vm1, %v11109_v45 }
  0xf5   : > { %835 = vmatprep.mubr.f32.mxu1 %v15891_v29  ;;  %9099 = vmatmul.mubr.msk.f32.gmra.mxu0 %vm692_vm1, %v11135_v54 }
  0xf6   : > { %9101 = vmatprep.mubr.msk.f32.mxu0 %vm692_vm1, %v11139_v56 }
  0xf8   : > { %7897 = vmatmul.mubr.msk.f32.gmra.mxu1 %vm692_vm1, %v11111_v46 }
  0xf9   : > { %841 = vmatprep.mubr.f32.mxu1 %v15891_v29  ;;  %9102 = vmatmul.mubr.msk.f32.gmra.mxu0 %vm692_vm1, %v11146_v58 }
  0xfa   : > { %9104 = vmatprep.mubr.msk.f32.mxu0 %vm692_vm1, %v11150_v59 }
  0xfc   : > { %7898 = vmatmul.mubr.msk.f32.gmra.mxu1 %vm692_vm1, %v11120_v50 }
  0xfd   : > { %847 = vmatprep.mubr.f32.mxu1 %v15891_v29  ;;  %9105 = vmatmul.mubr.msk.f32.gmra.mxu0 %vm692_vm1, %v11157_v61 }
  0xfe   : > { %9107 = vmatprep.mubr.msk.f32.mxu0 %vm692_vm1, %v11161_v62 }
 0x100   : > { %7899 = vmatmul.mubr.msk.f32.gmra.mxu1 %vm692_vm1, %v11122_v51 }
 0x101   : > { %853 = vmatprep.mubr.f32.mxu1 %v15891_v29  ;;  %9108 = vmatmul.mubr.msk.f32.gmra.mxu0 %vm692_vm1, %v11168_v63 }
 0x104   : > { %7900 = vmatmul.mubr.msk.f32.gmra.mxu1 %vm692_vm1, %v11126_v53 }
 0x105   : > { %859 = vmatprep.mubr.f32.mxu1 %v15891_v29 }
 0x108   : > { %7901 = vmatmul.mubr.msk.f32.gmra.mxu1 %vm692_vm1, %v11135_v54 }
 0x109   : > { %865 = vmatprep.mubr.f32.mxu1 %v15891_v29 }
 0x10c   : > { %7902 = vmatmul.mubr.msk.f32.gmra.mxu1 %vm692_vm1, %v11139_v56  ;;  %v15906_v56 = vsub.s32 2, %v11198_v1 }
 0x10d   : > { %871 = vmatprep.mubr.f32.mxu1 %v15891_v29 }
 0x110   : > { %7903 = vmatmul.mubr.msk.f32.gmra.mxu1 %vm692_vm1, %v11146_v58 }
 0x111   : > { %877 = vmatprep.mubr.f32.mxu1 %v15891_v29 }
 0x114   : > { %7904 = vmatmul.mubr.msk.f32.gmra.mxu1 %vm692_vm1, %v11150_v59 }
 0x115   : > { %883 = vmatprep.mubr.f32.mxu1 %v15891_v29 }
 0x118   : > { %7905 = vmatmul.mubr.msk.f32.gmra.mxu1 %vm692_vm1, %v11157_v61 }
 0x119   : > { %889 = vmatprep.mubr.f32.mxu1 %v15891_v29 }
 0x11c   : > { %7906 = vmatmul.mubr.msk.f32.gmra.mxu1 %vm692_vm1, %v11161_v62 }
 0x11d   : > { %895 = vmatprep.mubr.f32.mxu1 %v15891_v29 }
 0x120   : > { %7907 = vmatmul.mubr.msk.f32.gmra.mxu1 %vm692_vm1, %v11168_v63 }
 0x1a4   : > { %v807_v6 = vpop.f32.mrf.mxu1 }
 0x1a5   : > { %v808_v7 = vadd.f32 %v807_v6, %v11209_v4 }
 0x1a6   : > { %v809_v9 = vpop.f32.mrf.mxu1 }
 0x1a7   : > { %1095 = vrot.lane.b32.xlu0 %v808_v7, %s16006_s16  ;;  %1063 = vrot.lane.b32.xlu1 %v808_v7, %s10885_s18  ;;  %v11222_v11 = vadd.f32 %v809_v9, %v11216_v8 }
 0x1a8   : > { %9142 = vmatprep.mubr.msk.f32.mxu1 %vm692_vm1, %v808_v7  ;;  %v813_v10 = vpop.f32.mrf.mxu1 }
 0x1a9   : > { %v11232_v16 = vadd.f32 %v813_v10, %v11209_v4 }
 0x1aa   : > { %v815_v12 = vpop.f32.mrf.mxu1 }
 0x1ab   : > { %1127 = vrot.lane.b32.xlu0 %v808_v7, %s16004_s19  ;;  %1175 = vrot.lane.b32.xlu1 %v11222_v11, %s10885_s18  ;;  %v11235_v17 = vadd.f32 %v815_v12, %v11216_v8 }
 0x1ac   : > { %v819_v13 = vpop.f32.mrf.mxu1 }
 0x1ad   : > { %v11246_v22 = vadd.f32 %v819_v13, %v11209_v4 }
 0x1ae   : > { %v821_v14 = vpop.f32.mrf.mxu1 }
 0x1af   : > { %1207 = vrot.lane.b32.xlu0 %v11222_v11, %s16006_s16  ;;  %1239 = vrot.lane.b32.xlu1 %v11222_v11, %s16004_s19  ;;  %v11261_v27 = vadd.f32 %v821_v14, %v11216_v8 }
 0x1b0   : > { %v825_v15 = vpop.f32.mrf.mxu1 }
 0x1b1   : > { %v11270_v31 = vadd.f32 %v825_v15, %v11209_v4 }
 0x1b2   : > { %v827_v18 = vpop.f32.mrf.mxu1 }
 0x1b3   : > { %1177 = vrot.lane.b32.xlu0 %v11235_v17, %s10885_s18  ;;  %1065 = vrot.lane.b32.xlu1 %v11232_v16, %s10885_s18  ;;  %v11284_v37 = vadd.f32 %v827_v18, %v11216_v8 }
 0x1b4   : > { %v831_v19 = vpop.f32.mrf.mxu1 }
 0x1b5   : > { %v11300_v47 = vadd.f32 %v831_v19, %v11209_v4 }
 0x1b6   : > { %v833_v20 = vpop.f32.mrf.mxu1 }
 0x1b7   : > { %1209 = vrot.lane.b32.xlu0 %v11235_v17, %s16006_s16  ;;  %1097 = vrot.lane.b32.xlu1 %v11232_v16, %s16006_s16  ;;  %v11317_v0 = vadd.f32 %v833_v20, %v11216_v8 }
 0x1b8   : > { %v837_v21 = vpop.f32.mrf.mxu1 }
 0x1b9   : > { %v11327_v10 = vadd.f32 %v837_v21, %v11209_v4 }
 0x1ba   : > { %v839_v23 = vpop.f32.mrf.mxu1 }
 0x1bb   : > { %1129 = vrot.lane.b32.xlu1 %v11232_v16, %s16004_s19  ;;  %1099 = vrot.lane.b32.xlu0 %v11246_v22, %s16006_s16  ;;  %v840_v15 = vadd.f32 %v839_v23, %v11216_v8 }
 0x1bc   : > { %v843_v24 = vpop.f32.mrf.mxu1 }
 0x1be   : > { %v11252_v25 = vpop.f32.mrf.mxu1 }
 0x1bf   : > { %1241 = vrot.lane.b32.xlu1 %v11235_v17, %s16004_s19  ;;  %1131 = vrot.lane.b32.xlu0 %v11246_v22, %s16004_s19 }
 0x1c0   : > { %v11258_v26 = vpop.f32.mrf.mxu1 }
 0x1c2   : > { %v11263_v28 = vpop.f32.mrf.mxu1 }
 0x1c3   : > { %1211 = vrot.lane.b32.xlu0 %v11261_v27, %s16006_s16  ;;  %1067 = vrot.lane.b32.xlu1 %v11246_v22, %s10885_s18 }
 0x1c4   : > { %v855_v30 = vpop.f32.mrf.mxu1 }
 0x1c5   : > { %v11273_v32 = vadd.f32 %v855_v30, %v11209_v4  ;;  %v11362_v30 = vadd.f32 %v843_v24, %v11209_v4 }
 0x1c6   : > { %v11275_v33 = vpop.f32.mrf.mxu1 }
 0x1c7   : > { %1069 = vrot.lane.b32.xlu0 %v11270_v31, %s10885_s18  ;;  %1179 = vrot.lane.b32.xlu1 %v11261_v27, %s10885_s18 }
 0x1c8   : > { %v11281_v36 = vpop.f32.mrf.mxu1 }
 0x1ca   : > { %v11286_v38 = vpop.f32.mrf.mxu1 }
 0x1cb   : > { %1181 = vrot.lane.b32.xlu0 %v11284_v37, %s10885_s18  ;;  %1243 = vrot.lane.b32.xlu1 %v11261_v27, %s16004_s19 }
 0x1cc   : > { %v867_v41 = vpop.f32.mrf.mxu1 }
 0x1cd   : > { %v11293_v42 = vadd.f32 %v867_v41, %v11209_v4 }
 0x1ce   : > { %v869_v43 = vpop.f32.mrf.mxu1 }
 0x1cf   : > { %1213 = vrot.lane.b32.xlu0 %v11284_v37, %s16006_s16  ;;  %1101 = vrot.lane.b32.xlu1 %v11270_v31, %s16006_s16 }
 0x1d0   : > { %v873_v44 = vpop.f32.mrf.mxu1 }
 0x1d1   : > { %v11303_v48 = vadd.f32 %v873_v44, %v11209_v4  ;;  %v846_v44 = vadd.f32 %v11252_v25, %v11216_v8  ;;  %v870_v25 = vadd.f32 %v869_v43, %v11216_v8 }
 0x1d2   : > { %v875_v49 = vpop.f32.mrf.mxu1 }
 0x1d3   : > { %1133 = vrot.lane.b32.xlu1 %v11270_v31, %s16004_s19  ;;  %1103 = vrot.lane.b32.xlu0 %v11300_v47, %s16006_s16  ;;  %v11382_v24 = vadd.f32 %v875_v49, %v11216_v8  ;;  %v852_v49 = vadd.f32 %v11263_v28, %v11216_v8  ;;  %v858_v28 = vadd.f32 %v11275_v33, %v11216_v8 }
 0x1d4   : > { %v879_v52 = vpop.f32.mrf.mxu1 }
 0x1d5   : > { %v11310_v55 = vadd.f32 %v879_v52, %v11209_v4  ;;  %v11388_v52 = vadd.f32 %v11258_v26, %v11209_v4  ;;  %v864_v26 = vadd.f32 %v11286_v38, %v11216_v8  ;;  %v11421_v38 = vadd.f32 %v11281_v36, %v11209_v4 }
 0x1d6   : > { %v881_v57 = vpop.f32.mrf.mxu1 }
 0x1d7   : > { %1245 = vrot.lane.b32.xlu1 %v11284_v37, %s16004_s19  ;;  %1135 = vrot.lane.b32.xlu0 %v11300_v47, %s16004_s19  ;;  %v11371_v41 = vadd.f32 %v881_v57, %v11216_v8 }
 0x1d8   : > { %v885_v60 = vpop.f32.mrf.mxu1 }
 0x1d9   : > { %v11320_v6 = vadd.f32 %v885_v60, %v11209_v4 }
 0x1da   : > { %v887_v7 = vpop.f32.mrf.mxu1 }
 0x1db   : > { %1215 = vrot.lane.b32.xlu0 %v11317_v0, %s16006_s16  ;;  %1071 = vrot.lane.b32.xlu1 %v11300_v47, %s10885_s18  ;;  %v11357_v23 = vadd.f32 %v887_v7, %v11216_v8 }
 0x1dc   : > { %v891_v9 = vpop.f32.mrf.mxu1 }
 0x1dd   : > { %v11330_v12 = vadd.f32 %v891_v9, %v11209_v4 }
 0x1de   : > { %v893_v13 = vpop.f32.mrf.mxu1 }
 0x1df   : > { %1073 = vrot.lane.b32.xlu0 %v11327_v10, %s10885_s18  ;;  %1183 = vrot.lane.b32.xlu1 %v11317_v0, %s10885_s18  ;;  %v11347_v21 = vadd.f32 %v893_v13, %v11216_v8 }
 0x1e0   : > { %v897_v14 = vpop.f32.mrf.mxu1 }
 0x1e1   : > { %v11338_v18 = vadd.f32 %v897_v14, %v11209_v4 }
 0x1e2   : > { %v899_v19 = vpop.f32.mrf.mxu1 }
 0x1e3   : > { %v11341_v20 = vadd.f32 %v899_v19, %v11216_v8  ;;  %1185 = vrot.lane.b32.xlu0 %v840_v15, %s10885_s18  ;;  %1247 = vrot.lane.b32.xlu1 %v11317_v0, %s16004_s19 }
 0x1e5   : > { %9110 = vmatprep.subr.msk.mxu1 %vm692_vm1, %v11341_v20 }
 0x1e6   : > { %9111 = vmatpush3.xpose.msk.msra.mxu1 %vm692_vm1, %v11341_v20 }
 0x1e7   : > { %1217 = vrot.lane.b32.xlu0 %v840_v15, %s16006_s16  ;;  %1105 = vrot.lane.b32.xlu1 %v11327_v10, %s16006_s16 }
 0x1e8   : > { %9112 = vmatprep.subr.msk.mxu1 %vm692_vm1, %v11347_v21 }
 0x1ea   : > { %9113 = vmatpush3.xpose.msk.msra.mxu1 %vm692_vm1, %v11347_v21 }
 0x1eb   : > { %1137 = vrot.lane.b32.xlu1 %v11327_v10, %s16004_s19  ;;  %1107 = vrot.lane.b32.xlu0 %v11362_v30, %s16006_s16 }
 0x1ec   : > { %9114 = vmatprep.subr.msk.mxu1 %vm692_vm1, %v11357_v23 }
 0x1ee   : > { %9115 = vmatpush3.xpose.msk.msra.mxu1 %vm692_vm1, %v11357_v23 }
 0x1ef   : > { %1249 = vrot.lane.b32.xlu1 %v840_v15, %s16004_s19  ;;  %1219 = vrot.lane.b32.xlu0 %v846_v44, %s16006_s16 }
 0x1f0   : > { %9116 = vmatprep.subr.msk.mxu1 %vm692_vm1, %v11371_v41 }
 0x1f2   : > { %9117 = vmatpush3.xpose.msk.msra.mxu1 %vm692_vm1, %v11371_v41 }
 0x1f3   : > { %1077 = vrot.lane.b32.xlu0 %v11388_v52, %s10885_s18  ;;  %1075 = vrot.lane.b32.xlu1 %v11362_v30, %s10885_s18 }
 0x1f4   : > { %9118 = vmatprep.subr.msk.mxu1 %vm692_vm1, %v11382_v24 }
 0x1f6   : > { %9119 = vmatpush3.xpose.msk.msra.mxu1 %vm692_vm1, %v11382_v24 }
 0x1f7   : > { %1189 = vrot.lane.b32.xlu0 %v852_v49, %s10885_s18  ;;  %1187 = vrot.lane.b32.xlu1 %v846_v44, %s10885_s18 }
 0x1f8   : > { %9120 = vmatprep.subr.msk.mxu1 %vm692_vm1, %v870_v25 }
 0x1fa   : > { %9121 = vmatpush3.xpose.msk.msra.mxu1 %vm692_vm1, %v870_v25 }
 0x1fb   : > { %9122 = vmatprep.subr.msk.mxu1 %vm692_vm1, %v864_v26  ;;  %1221 = vrot.lane.b32.xlu0 %v852_v49, %s16006_s16 }
 0x1fc   : > { %1251 = vrot.lane.b32.xlu1 %v846_v44, %s16004_s19 }
 0x1fe   : > { %9123 = vmatpush3.xpose.msk.msra.mxu1 %vm692_vm1, %v864_v26 }
 0x1ff   : > { %9124 = vmatprep.subr.msk.mxu1 %vm692_vm1, %v858_v28  ;;  %1223 = vrot.lane.b32.xlu0 %v858_v28, %s16006_s16 }
 0x200   : > { %1109 = vrot.lane.b32.xlu1 %v11388_v52, %s16006_s16 }
 0x202   : > { %9125 = vmatpush3.xpose.msk.msra.mxu1 %vm692_vm1, %v858_v28 }
 0x203   : > { %9126 = vmatprep.subr.msk.mxu1 %vm692_vm1, %v852_v49  ;;  %1081 = vrot.lane.b32.xlu0 %v11421_v38, %s10885_s18 }
 0x204   : > { %1253 = vrot.lane.b32.xlu1 %v852_v49, %s16004_s19 }
 0x206   : > { %9127 = vmatpush3.xpose.msk.msra.mxu1 %vm692_vm1, %v852_v49 }
 0x207   : > { %9128 = vmatprep.subr.msk.mxu1 %vm692_vm1, %v846_v44  ;;  %1193 = vrot.lane.b32.xlu0 %v864_v26, %s10885_s18 }
 0x208   : > { %1079 = vrot.lane.b32.xlu1 %v11273_v32, %s10885_s18 }
 0x20a   : > { %9129 = vmatpush3.xpose.msk.msra.mxu1 %vm692_vm1, %v846_v44 }
 0x20b   : > { %9130 = vmatprep.subr.msk.mxu1 %vm692_vm1, %v840_v15  ;;  %1225 = vrot.lane.b32.xlu0 %v864_v26, %s16006_s16 }
 0x20c   : > { %1191 = vrot.lane.b32.xlu1 %v858_v28, %s10885_s18 }
 0x20e   : > { %9131 = vmatpush3.xpose.msk.msra.mxu1 %vm692_vm1, %v840_v15 }
 0x20f   : > { %9132 = vmatprep.subr.msk.mxu1 %vm692_vm1, %v11317_v0  ;;  %1227 = vrot.lane.b32.xlu0 %v870_v25, %s16006_s16 }
 0x210   : > { %1255 = vrot.lane.b32.xlu1 %v858_v28, %s16004_s19 }
 0x212   : > { %9133 = vmatpush3.xpose.msk.msra.mxu1 %vm692_vm1, %v11317_v0 }
 0x213   : > { %9134 = vmatprep.subr.msk.mxu1 %vm692_vm1, %v11284_v37  ;;  %1085 = vrot.lane.b32.xlu0 %v11303_v48, %s10885_s18 }
 0x214   : > { %1257 = vrot.lane.b32.xlu1 %v864_v26, %s16004_s19 }
 0x216   : > { %9135 = vmatpush3.xpose.msk.msra.mxu1 %vm692_vm1, %v11284_v37 }
 0x217   : > { %9136 = vmatprep.subr.msk.mxu1 %vm692_vm1, %v11261_v27  ;;  %1197 = vrot.lane.b32.xlu0 %v11382_v24, %s10885_s18 }
 0x218   : > { %1083 = vrot.lane.b32.xlu1 %v11293_v42, %s10885_s18 }
 0x219   : > { %v11457_v4 = vpop.permute.xlu0 %1095  ;;  %v1064_v8 = vpop.permute.xlu1 %1063 }
 0x21a   : > { %9137 = vmatpush3.xpose.msk.msra.mxu1 %vm692_vm1, %v11261_v27  ;;  %9198 = vmatprep.mubr.msk.f32.mxu0 %vm692_vm1, %v1064_v8 }
 0x21b   : > { %9138 = vmatprep.subr.msk.mxu1 %vm692_vm1, %v11235_v17  ;;  %1229 = vrot.lane.b32.xlu0 %v11382_v24, %s16006_s16 }
 0x21c   : > { %1195 = vrot.lane.b32.xlu1 %v870_v25, %s10885_s18 }
 0x21d   : > { %v11467_v33 = vpop.permute.xlu0 %1127  ;;  %v11469_v36 = vpop.permute.xlu1 %1175 }
 0x21e   : > { %9139 = vmatpush3.xpose.msk.msra.mxu1 %vm692_vm1, %v11235_v17 }
 0x21f   : > { %9140 = vmatprep.subr.msk.mxu1 %vm692_vm1, %v11222_v11  ;;  %1231 = vrot.lane.b32.xlu0 %v11371_v41, %s16006_s16 }
 0x220   : > { %1259 = vrot.lane.b32.xlu1 %v870_v25, %s16004_s19 }
 0x221   : > { %v11478_v27 = vpop.permute.xlu0 %1207  ;;  %v11480_v37 = vpop.permute.xlu1 %1239 }
 0x222   : > { %9141 = vmatpush3.xpose.msk.msra.mxu1 %vm692_vm1, %v11222_v11 }
 0x223   : > { %1089 = vrot.lane.b32.xlu0 %v11320_v6, %s10885_s18 }
 0x224   : > { %1261 = vrot.lane.b32.xlu1 %v11382_v24, %s16004_s19 }
 0x225   : > { %v11488_v17 = vpop.permute.xlu0 %1177  ;;  %v11490_v43 = vpop.permute.xlu1 %1065  ;;  %9143 = vmatmul.mubr.msk.f32.vlgmr.msra.gmra.mxu1 %vm692_vm1, %v11232_v16 }
 0x226   : > { %9145 = vmatprep.mubr.msk.f32.mxu1 %vm692_vm1, %v11246_v22  ;;  %v11510_v16 = vpop.f32.mrf.mxu0 }
 0x227   : > { %1233 = vrot.lane.b32.xlu0 %v11357_v23, %s16006_s16 }
 0x228   : > { %1087 = vrot.lane.b32.xlu1 %v11310_v55, %s10885_s18 }
 0x229   : > { %v11500_v11 = vpop.permute.xlu0 %1209  ;;  %v11502_v57 = vpop.permute.xlu1 %1097  ;;  %9146 = vmatmul.mubr.msk.f32.gmra.mxu1 %vm692_vm1, %v11270_v31 }
 0x22a   : > { %16107 = vst [vmem:[#allocation22_spill] sm:$0xff] %v11502_v57  ;;  %9148 = vmatprep.mubr.msk.f32.mxu1 %vm692_vm1, %v11300_v47  ;;  %v11524_v31 = vpop.f32.mrf.mxu0 }
 0x22b   : > { %1203 = vrot.lane.b32.xlu0 %v11347_v21, %s10885_s18 }
 0x22c   : > { %1199 = vrot.lane.b32.xlu1 %v11371_v41, %s10885_s18  ;;  %v11534_v7 = vpop.f32.mrf.mxu0 }
 0x22d   : > { %v11514_v22 = vpop.permute.xlu1 %1129  ;;  %v11516_v60 = vpop.permute.xlu0 %1099  ;;  %9149 = vmatmul.mubr.msk.f32.gmra.mxu1 %vm692_vm1, %v11327_v10 }
 0x22e   : > { %16108 = vst [vmem:[#allocation23_spill] sm:$0xff] %v11514_v22  ;;  %16109 = vst [vmem:[#allocation24_spill] sm:$0xff] %v11516_v60  ;;  %9151 = vmatprep.mubr.msk.f32.mxu1 %vm692_vm1, %v11362_v30  ;;  %v11548_v13 = vpop.f32.mrf.mxu0 }
 0x22f   : > { %1235 = vrot.lane.b32.xlu0 %v11347_v21, %s16006_s16 }
 0x230   : > { %1263 = vrot.lane.b32.xlu1 %v11371_v41, %s16004_s19  ;;  %v11554_v14 = vpop.f32.mrf.mxu0 }
 0x231   : > { %v11528_v47 = vpop.permute.xlu1 %1241  ;;  %v11530_v0 = vpop.permute.xlu0 %1131  ;;  %9152 = vmatmul.mubr.msk.f32.gmra.mxu1 %vm692_vm1, %v11388_v52 }
 0x232   : > { %16110 = vst [vmem:[#allocation25_spill] sm:$0xff] %v11530_v0  ;;  %9154 = vmatprep.mubr.msk.f32.mxu1 %vm692_vm1, %v11273_v32  ;;  %v11568_v41 = vpop.f32.mrf.mxu0 }
 0x233   : > { %1093 = vrot.lane.b32.xlu0 %v11338_v18, %s10885_s18 }
 0x234   : > { %1201 = vrot.lane.b32.xlu1 %v11357_v23, %s10885_s18  ;;  %v11578_v24 = vpop.f32.mrf.mxu0 }
 0x235   : > { %v11542_v9 = vpop.permute.xlu0 %1211  ;;  %v11544_v10 = vpop.permute.xlu1 %1067  ;;  %9155 = vmatmul.mubr.msk.f32.gmra.mxu1 %vm692_vm1, %v11421_v38 }
 0x236   : > { %9157 = vmatprep.mubr.msk.f32.mxu1 %vm692_vm1, %v11293_v42  ;;  %v998_v49 = vpop.f32.mrf.mxu0 }
 0x237   : > { %1205 = vrot.lane.b32.xlu0 %v11341_v20, %s10885_s18 }
 0x238   : > { %1265 = vrot.lane.b32.xlu1 %v11357_v23, %s16004_s19  ;;  %v11596_v26 = vpop.f32.mrf.mxu0 }
 0x239   : > { %v11558_v15 = vpop.permute.xlu0 %1069  ;;  %v11560_v19 = vpop.permute.xlu1 %1179  ;;  %9158 = vmatmul.mubr.msk.f32.gmra.mxu1 %vm692_vm1, %v11303_v48 }
 0x23a   : > { %9160 = vmatprep.mubr.msk.f32.mxu1 %vm692_vm1, %v11310_v55  ;;  %v1008_v8 = vpop.f32.mrf.mxu0 }
 0x23b   : > { %1139 = vrot.lane.b32.xlu0 %v11362_v30, %s16004_s19 }
 0x23c   : > { %1091 = vrot.lane.b32.xlu1 %v11330_v12, %s10885_s18 }
 0x23d   : > { %v11572_v44 = vpop.permute.xlu0 %1181  ;;  %v11574_v23 = vpop.permute.xlu1 %1243  ;;  %9161 = vmatmul.mubr.msk.f32.gmra.mxu1 %vm692_vm1, %v11320_v6 }
 0x23e   : > { %9163 = vmatprep.mubr.msk.f32.mxu1 %vm692_vm1, %v11330_v12 }
 0x23f   : > { %1111 = vrot.lane.b32.xlu0 %v11273_v32, %s16006_s16 }
 0x240   : > { %1267 = vrot.lane.b32.xlu1 %v11347_v21, %s16004_s19 }
 0x241   : > { %v11586_v30 = vpop.permute.xlu0 %1213  ;;  %v11588_v25 = vpop.permute.xlu1 %1101  ;;  %9164 = vmatmul.mubr.msk.f32.gmra.mxu1 %vm692_vm1, %v11338_v18 }
 0x242   : > { %16111 = vst [vmem:[#allocation26_spill] sm:$0xff] %v11588_v25  ;;  %9254 = vmatprep.mubr.msk.f32.mxu1 %vm692_vm1, %v11457_v4 }
 0x243   : > { %1143 = vrot.lane.b32.xlu0 %v11273_v32, %s16004_s19  ;;  %v9103_v32 = vpop.f32.mrf.mxu0 }
 0x244   : > { %1141 = vrot.lane.b32.xlu1 %v11388_v52, %s16004_s19 }
 0x245   : > { %v11600_v21 = vpop.permute.xlu1 %1133  ;;  %v11602_v28 = vpop.permute.xlu0 %1103 }
 0x246   : > { %16112 = vst [vmem:[#allocation27_spill] sm:$0xff] %v11600_v21  ;;  %16113 = vst [vmem:[#allocation28_spill] sm:$0xff] %v11602_v28  ;;  %v1018_v29 = vpop.f32.mrf.mxu0 }
 0x247   : > { %1115 = vrot.lane.b32.xlu0 %v11293_v42, %s16006_s16 }
 0x248   : > { %1113 = vrot.lane.b32.xlu1 %v11421_v38, %s16006_s16  ;;  %v9106_v63 = vpop.f32.mrf.mxu0 }
 0x249   : > { %v11608_v4 = vpop.permute.xlu1 %1245  ;;  %v11610_v5 = vpop.permute.xlu0 %1135 }
 0x24a   : > { %16114 = vst [vmem:[#allocation29_spill] sm:$0xff] %v11610_v5 }
 0x24b   : > { %1147 = vrot.lane.b32.xlu0 %v11293_v42, %s16004_s19  ;;  %v1028_v42 = vpop.f32.mrf.mxu0 }
 0x24c   : > { %1145 = vrot.lane.b32.xlu1 %v11421_v38, %s16004_s19 }
 0x24d   : > { %v11616_v52 = vpop.permute.xlu0 %1215  ;;  %v11618_v2 = vpop.permute.xlu1 %1071 }
 0x24e   : > { %v9109_v58 = vpop.f32.mrf.mxu0 }
 0x24f   : > { %1119 = vrot.lane.b32.xlu0 %v11310_v55, %s16006_s16 }
 0x250   : > { %1117 = vrot.lane.b32.xlu1 %v11303_v48, %s16006_s16  ;;  %v1038_v53 = vpop.f32.mrf.mxu0 }
 0x251   : > { %v11624_v62 = vpop.permute.xlu0 %1073  ;;  %v11626_v61 = vpop.permute.xlu1 %1183 }
 0x253   : > { %1151 = vrot.lane.b32.xlu0 %v11310_v55, %s16004_s19 }
 0x254   : > { %1149 = vrot.lane.b32.xlu1 %v11303_v48, %s16004_s19  ;;  %v688_v48 = vrot.slane %v11204_v3, %v15906_v56 }
 0x255   : > { %v11632_v38 = vpop.permute.xlu0 %1185  ;;  %v11634_v59 = vpop.permute.xlu1 %1247 }
 0x256   : > { %v11652_v51 = vadd.f32 %v1038_v53, %v688_v48  ;;  %v11662_v1 = vadd.f32 %v1028_v42, %v688_v48  ;;  %v11672_v53 = vadd.f32 %v1018_v29, %v688_v48  ;;  %v11678_v45 = vadd.f32 %v9109_v58, %v688_v48 }
 0x257   : > { %1123 = vrot.lane.b32.xlu0 %v11330_v12, %s16006_s16  ;;  %v11684_v42 = vadd.f32 %v1008_v8, %v688_v48  ;;  %v11690_v29 = vadd.f32 %v9106_v63, %v688_v48  ;;  %v11696_v58 = vadd.f32 %v998_v49, %v688_v48  ;;  %v11700_v35 = vadd.f32 %v9103_v32, %v688_v48 }
 0x258   : > { %1121 = vrot.lane.b32.xlu1 %v11320_v6, %s16006_s16  ;;  %16116 = vst [vmem:[#allocation31_spill] sm:$0xff] %v11652_v51  ;;  %16119 = vst [vmem:[#allocation34_spill] sm:$0xff] %v11662_v1  ;;  %v11711_v34 = vadd.f32 %v11596_v26, %v688_v48  ;;  %v11722_v32 = vadd.f32 %v11578_v24, %v688_v48  ;;  %v11731_v26 = vadd.f32 %v11568_v41, %v688_v48 }
 0x259   : > { %v11641_v54 = vpop.permute.xlu0 %1217  ;;  %v11643_v55 = vpop.permute.xlu1 %1105  ;;  %16120 = vst [vmem:[#allocation35_spill] sm:$0xff] %v11672_v53  ;;  %16121 = vst [vmem:[#allocation36_spill] sm:$0xff] %v11684_v42  ;;  %v11750_v41 = vadd.f32 %v11534_v7, %v688_v48 }
 0x25a   : > { %16115 = vst [vmem:[#allocation30_spill] sm:$0xff] %v11643_v55  ;;  %16122 = vst [vmem:[#allocation37_spill] sm:$0xff] %v11690_v29 }
 0x25b   : > { %1155 = vrot.lane.b32.xlu0 %v11330_v12, %s16004_s19  ;;  %16123 = vst [vmem:[#allocation38_spill] sm:$0xff] %v11696_v58  ;;  %16124 = vst [vmem:[#allocation39_spill] sm:$0xff] %v11700_v35 }
 0x25c   : > { %1153 = vrot.lane.b32.xlu1 %v11320_v6, %s16004_s19  ;;  %16125 = vst [vmem:[#allocation40_spill] sm:$0xff] %v11711_v34  ;;  %16127 = vst [vmem:[#allocation42_spill] sm:$0xff] %v11731_v26 }
 0x25d   : > { %v11654_v50 = vpop.permute.xlu1 %1137  ;;  %v11656_v46 = vpop.permute.xlu0 %1107  ;;  %16130 = vst [vmem:[#allocation45_spill] sm:$0xff] %v11750_v41 }
 0x25e   : > { %16117 = vst [vmem:[#allocation32_spill] sm:$0xff] %v11654_v50  ;;  %16118 = vst [vmem:[#allocation33_spill] sm:$0xff] %v11656_v46  ;;  %v11736_v46 = vadd.f32 %v11554_v14, %v688_v48  ;;  %v11759_v14 = vadd.f32 %v11524_v31, %v688_v48 }
 0x25f   : > { %1315 = vrot.lane.b32.xlu0 %v11652_v51, %s10885_s18 }
 0x260   : > { %1125 = vrot.lane.b32.xlu1 %v11338_v18, %s16006_s16  ;;  %16128 = vst [vmem:[#allocation43_spill] sm:$0xff] %v11736_v46  ;;  %16131 = vst [vmem:[#allocation46_spill] sm:$0xff] %v11759_v14 }
 0x261   : > { %v11664_v3 = vpop.permute.xlu1 %1249  ;;  %v11666_v12 = vpop.permute.xlu0 %1219 }
 0x263   : > { %1311 = vrot.lane.b32.xlu0 %v11662_v1, %s10885_s18 }
 0x264   : > { %1157 = vrot.lane.b32.xlu1 %v11338_v18, %s16004_s19 }
 0x265   : > { %v11674_v6 = vpop.permute.xlu0 %1077  ;;  %v11676_v56 = vpop.permute.xlu1 %1075 }
 0x267   : > { %1307 = vrot.lane.b32.xlu0 %v11672_v53, %s10885_s18 }
 0x268   : > { %1317 = vrot.lane.b32.xlu1 %v11678_v45, %s10885_s18 }
 0x269   : > { %v11686_v40 = vpop.permute.xlu0 %1189  ;;  %v11688_v39 = vpop.permute.xlu1 %1187 }
 0x26b   : > { %1303 = vrot.lane.b32.xlu0 %v11684_v42, %s10885_s18 }
 0x26c   : > { %1313 = vrot.lane.b32.xlu1 %v11690_v29, %s10885_s18 }
 0x26d   : > { %v11698_v18 = vpop.permute.xlu0 %1221 }
 0x26e   : > { %v11702_v8 = vpop.permute.xlu1 %1251 }
 0x26f   : > { %1299 = vrot.lane.b32.xlu0 %v11696_v58, %s10885_s18 }
 0x270   : > { %1309 = vrot.lane.b32.xlu1 %v11700_v35, %s10885_s18 }
 0x271   : > { %v11708_v63 = vpop.permute.xlu0 %1223 }
 0x272   : > { %v11713_v50 = vpop.permute.xlu1 %1109 }
 0x273   : > { %16126 = vst [vmem:[#allocation41_spill] sm:$0xff] %v11713_v50  ;;  %1237 = vrot.lane.b32.xlu0 %v11341_v20, %s16006_s16 }
 0x274   : > { %1305 = vrot.lane.b32.xlu1 %v11711_v34, %s10885_s18 }
 0x275   : > { %v11719_v49 = vpop.permute.xlu0 %1081 }
 0x276   : > { %v11724_v5 = vpop.permute.xlu1 %1253 }
 0x277   : > { %1269 = vrot.lane.b32.xlu0 %v11341_v20, %s16004_s19  ;;  %v11745_v20 = vadd.f32 %v11548_v13, %v688_v48  ;;  %v11764_v13 = vadd.f32 %v11510_v16, %v688_v48 }
 0x278   : > { %1301 = vrot.lane.b32.xlu1 %v11722_v32, %s10885_s18 }
 0x279   : > { %v11733_v50 = vpop.permute.xlu0 %1193  ;;  %16129 = vst [vmem:[#allocation44_spill] sm:$0xff] %v11745_v20  ;;  %16132 = vst [vmem:[#allocation47_spill] sm:$0xff] %v11764_v13 }
 0x27a   : > { %v11738_v21 = vpop.permute.xlu1 %1079 }
 0x27b   : > { %1295 = vrot.lane.b32.xlu0 %v11731_v26, %s10885_s18 }
 0x27c   : > { %1297 = vrot.lane.b32.xlu1 %v11736_v46, %s10885_s18 }
 0x27d   : > { %v11747_v24 = vpop.permute.xlu0 %1225 }
 0x27e   : > { %v11752_v55 = vpop.permute.xlu1 %1191 }
 0x27f   : > { %1291 = vrot.lane.b32.xlu0 %v11745_v20, %s10885_s18 }
 0x280   : > { %1293 = vrot.lane.b32.xlu1 %v11750_v41, %s10885_s18 }
 0x281   : > { %v11761_v26 = vpop.permute.xlu0 %1227 }
 0x282   : > { %v11766_v0 = vpop.permute.xlu1 %1255 }
 0x283   : > { %1287 = vrot.lane.b32.xlu0 %v11759_v14, %s10885_s18 }
 0x284   : > { %1289 = vrot.lane.b32.xlu1 %v11764_v13, %s10885_s18 }
 0x285   : > { %v11772_v7 = vpop.permute.xlu0 %1085 }
 0x286   : > { %v11774_v20 = vpop.permute.xlu1 %1257 }
 0x287   : > { %1365 = vrot.lane.b32.xlu0 %v11678_v45, %s16006_s16 }
 0x288   : > { %1363 = vrot.lane.b32.xlu1 %v11652_v51, %s16006_s16 }
 0x289   : > { %v1198_v16 = vpop.permute.xlu0 %1197 }
 0x28a   : > { %v11780_v31 = vpop.permute.xlu1 %1083 }
 0x28b   : > { %1361 = vrot.lane.b32.xlu0 %v11690_v29, %s16006_s16 }
 0x28c   : > { %1413 = vrot.lane.b32.xlu1 %v11678_v45, %s16004_s19 }
 0x28d   : > { %v11786_v48 = vpop.permute.xlu0 %1229 }
 0x28e   : > { %v1196_v14 = vpop.permute.xlu1 %1195 }
 0x28f   : > { %1411 = vrot.lane.b32.xlu0 %v11652_v51, %s16004_s19 }
 0x290   : > { %1359 = vrot.lane.b32.xlu1 %v11662_v1, %s16006_s16 }
 0x291   : > { %v11792_v13 = vpop.permute.xlu0 %1231 }
 0x292   : > { %v11794_v41 = vpop.permute.xlu1 %1259 }
 0x293   : > { %1407 = vrot.lane.b32.xlu0 %v11662_v1, %s16004_s19 }
 0x294   : > { %1409 = vrot.lane.b32.xlu1 %v11690_v29, %s16004_s19 }
 0x295   : > { %v11800_v28 = vpop.permute.xlu0 %1089 }
 0x296   : > { %v11802_v22 = vpop.permute.xlu1 %1261 }
 0x297   : > { %1353 = vrot.lane.b32.xlu0 %v11711_v34, %s16006_s16 }
 0x298   : > { %1357 = vrot.lane.b32.xlu1 %v11700_v35, %s16006_s16 }
 0x299   : > { %v11808_v25 = vpop.permute.xlu0 %1233 }
 0x29a   : > { %v11814_v1 = vpop.permute.xlu1 %1087 }
 0x29b   : > { %1403 = vrot.lane.b32.xlu0 %v11672_v53, %s16004_s19 }
 0x29c   : > { %1355 = vrot.lane.b32.xlu1 %v11672_v53, %s16006_s16 }
 0x29d   : > { %v1204_v29 = vpop.permute.xlu0 %1203 }
 0x29e   : > { %v1200_v60 = vpop.permute.xlu1 %1199 }
 0x29f   : > { %1401 = vrot.lane.b32.xlu0 %v11711_v34, %s16004_s19 }
 0x2a0   : > { %1405 = vrot.lane.b32.xlu1 %v11700_v35, %s16004_s19 }
 0x2a1   : > { %v11820_v51 = vpop.permute.xlu0 %1235 }
 0x2a2   : > { %v11832_v34 = vpop.permute.xlu1 %1263 }
 0x2a3   : > { %1349 = vrot.lane.b32.xlu0 %v11722_v32, %s16006_s16 }
 0x2a4   : > { %1351 = vrot.lane.b32.xlu1 %v11684_v42, %s16006_s16 }
 0x2a5   : > { %v11826_v57 = vpop.permute.xlu0 %1093 }
 0x2a7   : > { %1399 = vrot.lane.b32.xlu0 %v11684_v42, %s16004_s19  ;;  %v1202_v42 = vpop.permute.xlu1 %1201 }
 0x2a8   : > { %1345 = vrot.lane.b32.xlu1 %v11736_v46, %s16006_s16 }
 0x2a9   : > { %v1206_v53 = vpop.permute.xlu0 %1205 }
 0x2aa   : > { %9166 = vmatprep.subr.msk.mxu0 %vm692_vm1, %v1206_v53 }
 0x2ab   : > { %1347 = vrot.lane.b32.xlu0 %v11696_v58, %s16006_s16  ;;  %9167 = vmatpush3.xpose.msk.msra.mxu0 %vm692_vm1, %v1206_v53 }
 0x2ac   : > { %1395 = vrot.lane.b32.xlu1 %v11696_v58, %s16004_s19  ;;  %9168 = vmatprep.subr.msk.mxu0 %vm692_vm1, %v1204_v29 }
 0x2ad   : > { %v11841_v35 = vpop.permute.xlu0 %1139 }
 0x2af   : > { %1397 = vrot.lane.b32.xlu0 %v11722_v32, %s16004_s19  ;;  %9169 = vmatpush3.xpose.msk.msra.mxu0 %vm692_vm1, %v1204_v29 }
 0x2b0   : > { %9170 = vmatprep.subr.msk.mxu0 %vm692_vm1, %v1202_v42 }
 0x2b1   : > { %v11847_v46 = vpop.permute.xlu0 %1111 }
 0x2b3   : > { %9171 = vmatpush3.xpose.msk.msra.mxu0 %vm692_vm1, %v1202_v42 }
 0x2b4   : > { %9172 = vmatprep.subr.msk.mxu0 %vm692_vm1, %v1200_v60 }
 0x2b5   : > { %v11851_v53 = vpop.permute.xlu0 %1143 }
 0x2b7   : > { %9173 = vmatpush3.xpose.msk.msra.mxu0 %vm692_vm1, %v1200_v60 }
 0x2b8   : > { %9174 = vmatprep.subr.msk.mxu0 %vm692_vm1, %v1198_v16 }
 0x2b9   : > { %v11855_v58 = vpop.permute.xlu0 %1115 }
 0x2bb   : > { %9175 = vmatpush3.xpose.msk.msra.mxu0 %vm692_vm1, %v1198_v16  ;;  %v11898_v16 = vpop.permute.xlu1 %1265 }
 0x2bc   : > { %9176 = vmatprep.subr.msk.mxu0 %vm692_vm1, %v1196_v14 }
 0x2bd   : > { %v11859_v29 = vpop.permute.xlu0 %1147 }
 0x2be   : > { %16133 = vst [vmem:[#allocation48_spill] sm:$0xff] %v11859_v29 }
 0x2bf   : > { %9177 = vmatpush3.xpose.msk.msra.mxu0 %vm692_vm1, %v1196_v14 }
 0x2c0   : > { %9178 = vmatprep.subr.msk.mxu0 %vm692_vm1, %v11733_v50 }
 0x2c1   : > { %v11864_v42 = vpop.permute.xlu0 %1119 }
 0x2c2   : > { %16134 = vst [vmem:[#allocation49_spill] sm:$0xff] %v11864_v42 }
 0x2c3   : > { %9179 = vmatpush3.xpose.msk.msra.mxu0 %vm692_vm1, %v11733_v50 }
 0x2c4   : > { %9180 = vmatprep.subr.msk.mxu0 %vm692_vm1, %v11752_v55 }
 0x2c5   : > { %v11870_v60 = vpop.permute.xlu0 %1151 }
 0x2c6   : > { %16135 = vst [vmem:[#allocation50_spill] sm:$0xff] %v11870_v60 }
 0x2c7   : > { %9181 = vmatpush3.xpose.msk.msra.mxu0 %vm692_vm1, %v11752_v55 }
 0x2c8   : > { %9182 = vmatprep.subr.msk.mxu0 %vm692_vm1, %v11686_v40 }
 0x2c9   : > { %v11876_v14 = vpop.permute.xlu0 %1123 }
 0x2ca   : > { %16136 = vst [vmem:[#allocation51_spill] sm:$0xff] %v11876_v14 }
 0x2cb   : > { %9183 = vmatpush3.xpose.msk.msra.mxu0 %vm692_vm1, %v11686_v40 }
 0x2cc   : > { %9184 = vmatprep.subr.msk.mxu0 %vm692_vm1, %v11688_v39 }
 0x2cd   : > { %v11882_v50 = vpop.permute.xlu0 %1155 }
 0x2ce   : > { %16137 = vst [vmem:[#allocation52_spill] sm:$0xff] %v11882_v50  ;;  %v11910_v50 = vpop.permute.xlu1 %1091 }
 0x2cf   : > { %9185 = vmatpush3.xpose.msk.msra.mxu0 %vm692_vm1, %v11688_v39 }
 0x2d0   : > { %9186 = vmatprep.subr.msk.mxu0 %vm692_vm1, %v11632_v38 }
 0x2d1   : > { %v11888_v55 = vpop.permute.xlu0 %1315 }
 0x2d2   : > { %v1268_v60 = vpop.permute.xlu1 %1267 }
 0x2d3   : > { %9187 = vmatpush3.xpose.msk.msra.mxu0 %vm692_vm1, %v11632_v38 }
 0x2d4   : > { %9188 = vmatprep.subr.msk.mxu0 %vm692_vm1, %v11626_v61 }
 0x2d5   : > { %v11894_v40 = vpop.permute.xlu0 %1311 }
 0x2d7   : > { %9189 = vmatpush3.xpose.msk.msra.mxu0 %vm692_vm1, %v11626_v61 }
 0x2d8   : > { %9190 = vmatprep.subr.msk.mxu0 %vm692_vm1, %v11572_v44 }
 0x2d9   : > { %v11902_v39 = vpop.permute.xlu0 %1307 }
 0x2db   : > { %9191 = vmatpush3.xpose.msk.msra.mxu0 %vm692_vm1, %v11572_v44  ;;  %v11923_v44 = vld [vmem:[%s16140_s1 + $0x8] sm:$0xff] }
 0x2dc   : > { %9192 = vmatprep.subr.msk.mxu0 %vm692_vm1, %v11560_v19  ;;  %16141 = vst [vmem:[#allocation55_spill] sm:$0xff] %v11923_v44 }
 0x2dd   : > { %v11908_v38 = vpop.permute.xlu0 %1303 }
 0x2de   : > { %16138 = vst [vmem:[#allocation53_spill] sm:$0xff] %v11908_v38 }
 0x2df   : > { %9193 = vmatpush3.xpose.msk.msra.mxu0 %vm692_vm1, %v11560_v19  ;;  %v11930_v19 = vld [vmem:[%s16140_s1] sm:$0xff] }
 0x2e0   : > { %9194 = vmatprep.subr.msk.mxu0 %vm692_vm1, %v11488_v17  ;;  %16142 = vst [vmem:[#allocation56_spill] sm:$0xff] %v11930_v19 }
 0x2e1   : > { %v11916_v61 = vpop.permute.xlu0 %1299 }
 0x2e2   : > { %16139 = vst [vmem:[#allocation54_spill] sm:$0xff] %v11916_v61 }
 0x2e3   : > { %9195 = vmatpush3.xpose.msk.msra.mxu0 %vm692_vm1, %v11488_v17 }
 0x2e4   : > { %9196 = vmatprep.subr.msk.mxu0 %vm692_vm1, %v11469_v36 }
 0x2e5   : > { %v9144_v14 = vpop.f32.mrf.mxu1  ;;  %v1238_v29 = vpop.permute.xlu0 %1237 }
 0x2e6   : > { %v11933_v61 = vadd.f32 %v9144_v14, %v11923_v44  ;;  %9222 = vmatprep.subr.msk.mxu1 %vm692_vm1, %v1238_v29  ;;  %v11948_v14 = vld [vmem:[%s16140_s1 + $0x18] sm:$0xff] }
 0x2e7   : > { %v1561_v17 = vpop.f32.mrf.mxu1  ;;  %9197 = vmatpush3.xpose.msk.msra.mxu0 %vm692_vm1, %v11469_v36  ;;  %9223 = vmatpush3.xpose.msk.msra.mxu1 %vm692_vm1, %v1238_v29  ;;  %v11953_v36 = vld [vmem:[%s16140_s1 + $0x10] sm:$0xff]  ;;  %v11958_v29 = vpop.permute.xlu1 %1141 }
 0x2e8   : > { %16143 = vst [vmem:[#allocation57_spill] sm:$0xff] %v11933_v61  ;;  %v11940_v42 = vadd.f32 %v1561_v17, %v11930_v19  ;;  %9224 = vmatprep.subr.msk.mxu1 %vm692_vm1, %v11820_v51  ;;  %2269 = vmax.xlane.f32.xlu1 %v11933_v61 }
 0x2e9   : > { %v9147_v44 = vpop.f32.mrf.mxu1  ;;  %v1270_v38 = vpop.permute.xlu0 %1269 }
 0x2ea   : > { %16144 = vst [vmem:[#allocation58_spill] sm:$0xff] %v11940_v42  ;;  %2267 = vmax.xlane.f32.xlu0 %v11940_v42  ;;  %9199 = vmatmul.mubr.msk.f32.vlgmr.msra.gmra.mxu0 %vm692_vm1, %v11490_v43  ;;  %v11964_v61 = vadd.f32 %v9147_v44, %v11948_v14  ;;  %v11978_v43 = vld [vmem:[%s16140_s1 + $0x28] sm:$0xff]  ;;  %v11983_v44 = vld [vmem:[%s16140_s1 + $0x20] sm:$0xff] }
 0x2eb   : > { %9278 = vmatprep.subr.msk.mxu0 %vm692_vm1, %v1270_v38  ;;  %v1571_v17 = vpop.f32.mrf.mxu1  ;;  %9201 = vmatprep.mubr.msk.f32.mxu0 %vm692_vm1, %v11544_v10  ;;  %v11999_v42 = vpop.permute.xlu1 %1113 }
 0x2ec   : > { %v11967_v19 = vadd.f32 %v1571_v17, %v11953_v36  ;;  %9225 = vmatpush3.xpose.msk.msra.mxu1 %vm692_vm1, %v11820_v51  ;;  %9279 = vmatpush3.xpose.msk.msra.mxu0 %vm692_vm1, %v1270_v38 }
 0x2ed   : > { %9226 = vmatprep.subr.msk.mxu1 %vm692_vm1, %v11808_v25  ;;  %9280 = vmatprep.subr.msk.mxu0 %vm692_vm1, %v1268_v60  ;;  %v9150_v10 = vpop.f32.mrf.mxu1 }
 0x2ee   : > { %2273 = vmax.xlane.f32.xlu0 %v11964_v61  ;;  %2271 = vmax.xlane.f32.xlu1 %v11967_v19  ;;  %v11990_v38 = vadd.f32 %v9150_v10, %v11978_v43 }
 0x2ef   : > { %9202 = vmatmul.mubr.msk.f32.gmra.mxu0 %vm692_vm1, %v11558_v15  ;;  %v1581_v51 = vpop.f32.mrf.mxu1  ;;  %v12007_v15 = vld [vmem:[%s16140_s1 + $0x38] sm:$0xff] }
 0x2f0   : > { %16145 = vst [vmem:[#allocation59_spill] sm:$0xff] %v11990_v38  ;;  %v11993_v17 = vadd.f32 %v1581_v51, %v11983_v44  ;;  %9204 = vmatprep.mubr.msk.f32.mxu0 %vm692_vm1, %v11618_v2  ;;  %9227 = vmatpush3.xpose.msk.msra.mxu1 %vm692_vm1, %v11808_v25  ;;  %v12012_v2 = vld [vmem:[%s16140_s1 + $0x30] sm:$0xff] }
 0x2f1   : > { %9281 = vmatpush3.xpose.msk.msra.mxu0 %vm692_vm1, %v1268_v60  ;;  %9228 = vmatprep.subr.msk.mxu1 %vm692_vm1, %v11792_v13  ;;  %v9153_v10 = vpop.f32.mrf.mxu1 }
 0x2f2   : > { %9282 = vmatprep.subr.msk.mxu0 %vm692_vm1, %v11898_v16  ;;  %2277 = vmax.xlane.f32.xlu0 %v11990_v38  ;;  %v12021_v60 = vadd.f32 %v9153_v10, %v12007_v15 }
 0x2f3   : > { %2275 = vmax.xlane.f32.xlu1 %v11993_v17  ;;  %9205 = vmatmul.mubr.msk.f32.gmra.mxu0 %vm692_vm1, %v11624_v62  ;;  %v1591_v25 = vpop.f32.mrf.mxu1  ;;  %v12037_v62 = vld [vmem:[%s16140_s1 + $0x48] sm:$0xff] }
 0x2f4   : > { %16146 = vst [vmem:[#allocation60_spill] sm:$0xff] %v12021_v60  ;;  %v12024_v51 = vadd.f32 %v1591_v25, %v12012_v2  ;;  %9207 = vmatprep.mubr.msk.f32.mxu0 %vm692_vm1, %v11676_v56  ;;  %9229 = vmatpush3.xpose.msk.msra.mxu1 %vm692_vm1, %v11792_v13  ;;  %v12042_v25 = vld [vmem:[%s16140_s1 + $0x40] sm:$0xff]  ;;  %v12047_v56 = vpop.permute.xlu1 %1145 }
 0x2f5   : > { %9283 = vmatpush3.xpose.msk.msra.mxu0 %vm692_vm1, %v11898_v16  ;;  %9230 = vmatprep.subr.msk.mxu1 %vm692_vm1, %v11786_v48  ;;  %v9156_v10 = vpop.f32.mrf.mxu1 }
 0x2f6   : > { %9284 = vmatprep.subr.msk.mxu0 %vm692_vm1, %v11832_v34  ;;  %2281 = vmax.xlane.f32.xlu0 %v12021_v60  ;;  %v12053_v16 = vadd.f32 %v9156_v10, %v12037_v62 }
 0x2f7   : > { %9208 = vmatmul.mubr.msk.f32.gmra.mxu0 %vm692_vm1, %v11674_v6  ;;  %2279 = vmax.xlane.f32.xlu1 %v12024_v51  ;;  %v1601_v13 = vpop.f32.mrf.mxu1  ;;  %v12069_v6 = vld [vmem:[%s16140_s1 + $0x58] sm:$0xff] }
 0x2f8   : > { %v12056_v38 = vadd.f32 %v1601_v13, %v12042_v25  ;;  %9210 = vmatprep.mubr.msk.f32.mxu0 %vm692_vm1, %v11738_v21  ;;  %9231 = vmatpush3.xpose.msk.msra.mxu1 %vm692_vm1, %v11786_v48  ;;  %v12074_v13 = vld [vmem:[%s16140_s1 + $0x50] sm:$0xff]  ;;  %v12092_v60 = vpop.permute.xlu1 %1117 }
 0x2f9   : > { %9285 = vmatpush3.xpose.msk.msra.mxu0 %vm692_vm1, %v11832_v34  ;;  %9232 = vmatprep.subr.msk.mxu1 %vm692_vm1, %v11761_v26  ;;  %v9159_v10 = vpop.f32.mrf.mxu1 }
 0x2fa   : > { %9286 = vmatprep.subr.msk.mxu0 %vm692_vm1, %v11802_v22  ;;  %2285 = vmax.xlane.f32.xlu0 %v12053_v16  ;;  %v12083_v21 = vadd.f32 %v9159_v10, %v12069_v6 }
 0x2fb   : > { %9211 = vmatmul.mubr.msk.f32.gmra.mxu0 %vm692_vm1, %v11719_v49  ;;  %2283 = vmax.xlane.f32.xlu1 %v12056_v38  ;;  %v1611_v34 = vpop.f32.mrf.mxu1  ;;  %v12101_v49 = vld [vmem:[%s16140_s1 + $0x68] sm:$0xff] }
 0x2fc   : > { %16147 = vst [vmem:[#allocation61_spill] sm:$0xff] %v12083_v21  ;;  %v12086_v48 = vadd.f32 %v1611_v34, %v12074_v13  ;;  %9213 = vmatprep.mubr.msk.f32.mxu0 %vm692_vm1, %v11780_v31  ;;  %9233 = vmatpush3.xpose.msk.msra.mxu1 %vm692_vm1, %v11761_v26  ;;  %v12106_v31 = vld [vmem:[%s16140_s1 + $0x60] sm:$0xff] }
 0x2fd   : > { %9287 = vmatpush3.xpose.msk.msra.mxu0 %vm692_vm1, %v11802_v22  ;;  %9234 = vmatprep.subr.msk.mxu1 %vm692_vm1, %v11747_v24  ;;  %v9162_v10 = vpop.f32.mrf.mxu1 }
 0x2fe   : > { %9288 = vmatprep.subr.msk.mxu0 %vm692_vm1, %v11794_v41  ;;  %2289 = vmax.xlane.f32.xlu0 %v12083_v21  ;;  %v12115_v26 = vadd.f32 %v9162_v10, %v12101_v49 }
 0x2ff   : > { %9214 = vmatmul.mubr.msk.f32.gmra.mxu0 %vm692_vm1, %v11772_v7  ;;  %2287 = vmax.xlane.f32.xlu1 %v12086_v48  ;;  %v1621_v22 = vpop.f32.mrf.mxu1  ;;  %v12131_v7 = vld [vmem:[%s16140_s1 + $0x78] sm:$0xff] }
 0x300   : > { %v12118_v34 = vadd.f32 %v1621_v22, %v12106_v31  ;;  %9216 = vmatprep.mubr.msk.f32.mxu0 %vm692_vm1, %v11814_v1  ;;  %9235 = vmatpush3.xpose.msk.msra.mxu1 %vm692_vm1, %v11747_v24  ;;  %v12136_v22 = vld [vmem:[%s16140_s1 + $0x70] sm:$0xff]  ;;  %v12141_v1 = vpop.permute.xlu1 %1149 }
 0x301   : > { %9289 = vmatpush3.xpose.msk.msra.mxu0 %vm692_vm1, %v11794_v41  ;;  %9236 = vmatprep.subr.msk.mxu1 %vm692_vm1, %v11708_v63  ;;  %v9165_v10 = vpop.f32.mrf.mxu1 }
 0x302   : > { %9290 = vmatprep.subr.msk.mxu0 %vm692_vm1, %v11774_v20  ;;  %2293 = vmax.xlane.f32.xlu0 %v12115_v26  ;;  %v12147_v41 = vadd.f32 %v9165_v10, %v12131_v7  ;;  %v16165_v10 = vld [vmem:[#allocation40_spill] sm:$0xff] }
 0x303   : > { %9217 = vmatmul.mubr.msk.f32.gmra.mxu0 %vm692_vm1, %v11800_v28  ;;  %2291 = vmax.xlane.f32.xlu1 %v12118_v34  ;;  %v1631_v24 = vpop.f32.mrf.mxu1 }
 0x304   : > { %v12150_v21 = vadd.f32 %v1631_v24, %v12136_v22  ;;  %9219 = vmatprep.mubr.msk.f32.mxu0 %vm692_vm1, %v11910_v50  ;;  %9237 = vmatpush3.xpose.msk.msra.mxu1 %vm692_vm1, %v11708_v63  ;;  %v12170_v28 = vpop.permute.xlu1 %1121  ;;  %v16161_v63 = vld [vmem:[#allocation29_spill] sm:$0xff] }
 0x305   : > { %9291 = vmatpush3.xpose.msk.msra.mxu0 %vm692_vm1, %v11774_v20  ;;  %9238 = vmatprep.subr.msk.mxu1 %vm692_vm1, %v11698_v18  ;;  %v16162_v20 = vld [vmem:[#allocation35_spill] sm:$0xff]  ;;  %v16163_v50 = vld [vmem:[#allocation41_spill] sm:$0xff] }
 0x306   : > { %9292 = vmatprep.subr.msk.mxu0 %vm692_vm1, %v11766_v0  ;;  %2297 = vmax.xlane.f32.xlu0 %v12147_v41 }
 0x307   : > { %9220 = vmatmul.mubr.msk.f32.gmra.mxu0 %vm692_vm1, %v11826_v57  ;;  %2295 = vmax.xlane.f32.xlu1 %v12150_v21  ;;  %v16148_v57 = vld [vmem:[#allocation22_spill] sm:$0xff] }
 0x308   : > { %9239 = vmatpush3.xpose.msk.msra.mxu1 %vm692_vm1, %v11698_v18  ;;  %9310 = vmatprep.mubr.msk.f32.mxu0 %vm692_vm1, %v11467_v33  ;;  %v12186_v33 = vpop.permute.xlu1 %1153  ;;  %v16160_v18 = vld [vmem:[#allocation33_spill] sm:$0xff] }
 0x309   : > { %9293 = vmatpush3.xpose.msk.msra.mxu0 %vm692_vm1, %v11766_v0  ;;  %9240 = vmatprep.subr.msk.mxu1 %vm692_vm1, %v11666_v12  ;;  %v16149_v0 = vld [vmem:[#allocation24_spill] sm:$0xff] }
 0x30a   : > { %9294 = vmatprep.subr.msk.mxu0 %vm692_vm1, %v11724_v5 }
 0x30c   : > { %9241 = vmatpush3.xpose.msk.msra.mxu1 %vm692_vm1, %v11666_v12  ;;  %v16159_v12 = vld [vmem:[#allocation39_spill] sm:$0xff] }
 0x30d   : > { %9295 = vmatpush3.xpose.msk.msra.mxu0 %vm692_vm1, %v11724_v5  ;;  %9242 = vmatprep.subr.msk.mxu1 %vm692_vm1, %v11641_v54  ;;  %v12198_v5 = vpop.permute.xlu1 %1125 }
 0x30e   : > { %9296 = vmatprep.subr.msk.mxu0 %vm692_vm1, %v11702_v8 }
 0x310   : > { %9243 = vmatpush3.xpose.msk.msra.mxu1 %vm692_vm1, %v11641_v54 }
 0x311   : > { %9297 = vmatpush3.xpose.msk.msra.mxu0 %vm692_vm1, %v11702_v8  ;;  %9244 = vmatprep.subr.msk.mxu1 %vm692_vm1, %v11616_v52  ;;  %v12214_v54 = vpop.permute.xlu1 %1157 }
 0x312   : > { %9298 = vmatprep.subr.msk.mxu0 %vm692_vm1, %v11664_v3 }
 0x314   : > { %9245 = vmatpush3.xpose.msk.msra.mxu1 %vm692_vm1, %v11616_v52  ;;  %v16157_v52 = vld [vmem:[#allocation30_spill] sm:$0xff] }
 0x315   : > { %9299 = vmatpush3.xpose.msk.msra.mxu0 %vm692_vm1, %v11664_v3  ;;  %9246 = vmatprep.subr.msk.mxu1 %vm692_vm1, %v11586_v30  ;;  %v16158_v3 = vld [vmem:[#allocation27_spill] sm:$0xff] }
 0x316   : > { %9300 = vmatprep.subr.msk.mxu0 %vm692_vm1, %v11634_v59 }
 0x318   : > { %9247 = vmatpush3.xpose.msk.msra.mxu1 %vm692_vm1, %v11586_v30  ;;  %v16154_v30 = vld [vmem:[#allocation28_spill] sm:$0xff] }
 0x319   : > { %9301 = vmatpush3.xpose.msk.msra.mxu0 %vm692_vm1, %v11634_v59  ;;  %9248 = vmatprep.subr.msk.mxu1 %vm692_vm1, %v11542_v9  ;;  %v1318_v59 = vpop.permute.xlu1 %1317 }
 0x31a   : > { %9302 = vmatprep.subr.msk.mxu0 %vm692_vm1, %v11608_v4 }
 0x31c   : > { %9249 = vmatpush3.xpose.msk.msra.mxu1 %vm692_vm1, %v11542_v9  ;;  %v16152_v9 = vld [vmem:[#allocation37_spill] sm:$0xff] }
 0x31d   : > { %9303 = vmatpush3.xpose.msk.msra.mxu0 %vm692_vm1, %v11608_v4  ;;  %9250 = vmatprep.subr.msk.mxu1 %vm692_vm1, %v11500_v11  ;;  %v16155_v4 = vld [vmem:[#allocation25_spill] sm:$0xff] }
 0x31e   : > { %9304 = vmatprep.subr.msk.mxu0 %vm692_vm1, %v11574_v23 }
 0x320   : > { %9251 = vmatpush3.xpose.msk.msra.mxu1 %vm692_vm1, %v11500_v11  ;;  %v1314_v11 = vpop.permute.xlu1 %1313 }
 0x321   : > { %9305 = vmatpush3.xpose.msk.msra.mxu0 %vm692_vm1, %v11574_v23  ;;  %9252 = vmatprep.subr.msk.mxu1 %vm692_vm1, %v11478_v27  ;;  %v16153_v23 = vld [vmem:[#allocation23_spill] sm:$0xff] }
 0x322   : > { %9306 = vmatprep.subr.msk.mxu0 %vm692_vm1, %v11528_v47 }
 0x324   : > { %9253 = vmatpush3.xpose.msk.msra.mxu1 %vm692_vm1, %v11478_v27  ;;  %v16150_v27 = vld [vmem:[#allocation31_spill] sm:$0xff] }
 0x325   : > { %9307 = vmatpush3.xpose.msk.msra.mxu0 %vm692_vm1, %v11528_v47  ;;  %9334 = vmatprep.subr.mxu1 %v11678_v45  ;;  %v16151_v47 = vld [vmem:[#allocation26_spill] sm:$0xff] }
 0x326   : > { %9308 = vmatprep.subr.msk.mxu0 %vm692_vm1, %v11480_v37 }
 0x327   : > { %9255 = vmatmul.mubr.msk.f32.vlgmr.msra.gmra.mxu1 %vm692_vm1, %v16148_v57  ;;  %v16175_v57 = vld [vmem:[#allocation51_spill] sm:$0xff] }
 0x328   : > { %9257 = vmatprep.mubr.msk.f32.mxu1 %vm692_vm1, %v16149_v0  ;;  %9335 = vmatpush3.msra.mxu1 %v11678_v45  ;;  %v1310_v45 = vpop.permute.xlu1 %1309 }
 0x329   : > { %9309 = vmatpush3.xpose.msk.msra.mxu0 %vm692_vm1, %v11480_v37  ;;  %9336 = vmatprep.subr.mxu1 %v16150_v27  ;;  %v16156_v37 = vld [vmem:[#allocation34_spill] sm:$0xff] }
 0x32a   : > { %9390 = vmatprep.subr.mxu0 %v1318_v59  ;;  %9337 = vmatpush3.msra.mxu1 %v16150_v27  ;;  %v16176_v27 = vld [vmem:[#allocation50_spill] sm:$0xff] }
 0x32b   : > { %9258 = vmatmul.mubr.msk.f32.gmra.mxu1 %vm692_vm1, %v16151_v47  ;;  %9338 = vmatprep.subr.mxu1 %v16152_v9  ;;  %v16177_v47 = vld [vmem:[#allocation44_spill] sm:$0xff] }
 0x32c   : > { %9311 = vmatmul.mubr.msk.f32.vlgmr.msra.gmra.mxu0 %vm692_vm1, %v16153_v23  ;;  %9260 = vmatprep.mubr.msk.f32.mxu1 %vm692_vm1, %v16154_v30  ;;  %v1306_v8 = vpop.permute.xlu1 %1305  ;;  %v16181_v30 = vld [vmem:[#allocation46_spill] sm:$0xff] }
 0x32d   : > { %9313 = vmatprep.mubr.msk.f32.mxu0 %vm692_vm1, %v16155_v4  ;;  %9339 = vmatpush3.msra.mxu1 %v16152_v9  ;;  %v16179_v9 = vld [vmem:[#allocation52_spill] sm:$0xff]  ;;  %v16184_v4 = vld [vmem:[#allocation55_spill] sm:$0xff] }
 0x32e   : > { %9391 = vmatpush3.msra.mxu0 %v1318_v59  ;;  %9340 = vmatprep.subr.mxu1 %v16156_v37  ;;  %v16172_v59 = vld [vmem:[#allocation42_spill] sm:$0xff] }
 0x32f   : > { %9392 = vmatprep.subr.mxu0 %v11888_v55  ;;  %9341 = vmatpush3.msra.mxu1 %v16156_v37 }
 0x330   : > { %9393 = vmatpush3.msra.mxu0 %v11888_v55  ;;  %9261 = vmatmul.mubr.msk.f32.gmra.mxu1 %vm692_vm1, %v16157_v52  ;;  %v16164_v55 = vld [vmem:[#allocation32_spill] sm:$0xff]  ;;  %v1302_v24 = vpop.permute.xlu1 %1301 }
 0x331   : > { %9314 = vmatmul.mubr.msk.f32.gmra.mxu0 %vm692_vm1, %v16158_v3  ;;  %9342 = vmatprep.subr.mxu1 %v16159_v12 }
 0x332   : > { %9394 = vmatprep.subr.mxu0 %v1314_v11  ;;  %9263 = vmatprep.mubr.msk.f32.mxu1 %vm692_vm1, %v16160_v18 }
 0x333   : > { %9316 = vmatprep.mubr.msk.f32.mxu0 %vm692_vm1, %v16161_v63  ;;  %9343 = vmatpush3.msra.mxu1 %v16159_v12 }
 0x334   : > { %9395 = vmatpush3.msra.mxu0 %v1314_v11  ;;  %9344 = vmatprep.subr.mxu1 %v16162_v20  ;;  %v16173_v11 = vld [vmem:[#allocation54_spill] sm:$0xff] }
 0x335   : > { %9396 = vmatprep.subr.mxu0 %v11894_v40  ;;  %9345 = vmatpush3.msra.mxu1 %v16162_v20 }
 0x336   : > { %9397 = vmatpush3.msra.mxu0 %v11894_v40  ;;  %9264 = vmatmul.mubr.msk.f32.gmra.mxu1 %vm692_vm1, %v16163_v50  ;;  %v16166_v40 = vld [vmem:[#allocation36_spill] sm:$0xff] }
 0x337   : > { %9317 = vmatmul.mubr.msk.f32.gmra.mxu0 %vm692_vm1, %v16164_v55  ;;  %9346 = vmatprep.subr.mxu1 %v16165_v10 }
 0x338   : > { %9398 = vmatprep.subr.mxu0 %v1310_v45  ;;  %9266 = vmatprep.mubr.msk.f32.mxu1 %vm692_vm1, %v11847_v46  ;;  %v16167_v46 = vld [vmem:[#allocation38_spill] sm:$0xff] }
 0x339   : > { %9319 = vmatprep.mubr.msk.f32.mxu0 %vm692_vm1, %v11841_v35  ;;  %9347 = vmatpush3.msra.mxu1 %v16165_v10  ;;  %v1298_v35 = vpop.permute.xlu1 %1297 }
 0x33a   : > { %9399 = vmatpush3.msra.mxu0 %v1310_v45  ;;  %9348 = vmatprep.subr.mxu1 %v16166_v40 }
 0x33b   : > { %9400 = vmatprep.subr.mxu0 %v11902_v39  ;;  %9349 = vmatpush3.msra.mxu1 %v16166_v40 }
 0x33c   : > { %9401 = vmatpush3.msra.mxu0 %v11902_v39  ;;  %9267 = vmatmul.mubr.msk.f32.gmra.mxu1 %vm692_vm1, %v11999_v42  ;;  %v16168_v39 = vld [vmem:[#allocation53_spill] sm:$0xff]  ;;  %v1296_v42 = vpop.permute.xlu0 %1295 }
 0x33d   : > { %9320 = vmatmul.mubr.msk.f32.gmra.mxu0 %vm692_vm1, %v11958_v29  ;;  %9350 = vmatprep.subr.mxu1 %v11722_v32  ;;  %v16171_v29 = vld [vmem:[#allocation48_spill] sm:$0xff] }
 0x33e   : > { %9402 = vmatprep.subr.mxu0 %v1306_v8  ;;  %9269 = vmatprep.mubr.msk.f32.mxu1 %vm692_vm1, %v11855_v58  ;;  %v16169_v58 = vld [vmem:[#allocation43_spill] sm:$0xff] }
 0x33f   : > { %9322 = vmatprep.mubr.msk.f32.mxu0 %vm692_vm1, %v11851_v53  ;;  %9351 = vmatpush3.msra.mxu1 %v11722_v32  ;;  %v16170_v32 = vld [vmem:[#allocation49_spill] sm:$0xff]  ;;  %v1294_v53 = vpop.permute.xlu1 %1293 }
 0x340   : > { %9403 = vmatpush3.msra.mxu0 %v1306_v8  ;;  %9352 = vmatprep.subr.mxu1 %v16167_v46 }
 0x341   : > { %9404 = vmatprep.subr.mxu0 %v16168_v39  ;;  %9353 = vmatpush3.msra.mxu1 %v16167_v46  ;;  %v16194_v46 = vld [vmem:[#allocation56_spill] sm:$0xff] }
 0x342   : > { %9405 = vmatpush3.msra.mxu0 %v16168_v39  ;;  %9270 = vmatmul.mubr.msk.f32.gmra.mxu1 %vm692_vm1, %v12092_v60  ;;  %v1292_v60 = vpop.permute.xlu0 %1291 }
 0x343   : > { %9323 = vmatmul.mubr.msk.f32.gmra.mxu0 %vm692_vm1, %v12047_v56  ;;  %9354 = vmatprep.subr.mxu1 %v16169_v58  ;;  %v16174_v56 = vld [vmem:[#allocation45_spill] sm:$0xff]  ;;  %v1290_v0 = vpop.permute.xlu1 %1289 }
 0x344   : > { %9406 = vmatprep.subr.mxu0 %v1302_v24  ;;  %9272 = vmatprep.mubr.msk.f32.mxu1 %vm692_vm1, %v16170_v32 }
 0x345   : > { %9325 = vmatprep.mubr.msk.f32.mxu0 %vm692_vm1, %v16171_v29  ;;  %9355 = vmatpush3.msra.mxu1 %v16169_v58 }
 0x346   : > { %9407 = vmatpush3.msra.mxu0 %v1302_v24  ;;  %9356 = vmatprep.subr.mxu1 %v16172_v59 }
 0x347   : > { %9408 = vmatprep.subr.mxu0 %v16173_v11  ;;  %9357 = vmatpush3.msra.mxu1 %v16172_v59  ;;  %v12337_v23 = vpop.permute.xlu1 %1363 }
 0x348   : > { %9409 = vmatpush3.msra.mxu0 %v16173_v11  ;;  %9273 = vmatmul.mubr.msk.f32.gmra.mxu1 %vm692_vm1, %v12170_v28  ;;  %v1288_v28 = vpop.permute.xlu0 %1287  ;;  %16180 = vst [vmem:[#allocation22_spill] sm:$0xff] %v12337_v23  ;;  %v16211_v23 = vld [vmem:[#allocation57_spill] sm:$0xff] }
 0x349   : > { %9326 = vmatmul.mubr.msk.f32.gmra.mxu0 %vm692_vm1, %v12141_v1  ;;  %9358 = vmatprep.subr.mxu1 %v16174_v56  ;;  %v16178_v1 = vld [vmem:[#allocation47_spill] sm:$0xff] }
 0x34a   : > { %9410 = vmatprep.subr.mxu0 %v1298_v35  ;;  %9275 = vmatprep.mubr.msk.f32.mxu1 %vm692_vm1, %v16175_v57 }
 0x34b   : > { %9328 = vmatprep.mubr.msk.f32.mxu0 %vm692_vm1, %v16176_v27  ;;  %9359 = vmatpush3.msra.mxu1 %v16174_v56 }
 0x34c   : > { %9411 = vmatpush3.msra.mxu0 %v1298_v35  ;;  %9360 = vmatprep.subr.mxu1 %v16177_v47 }
 0x34d   : > { %9412 = vmatprep.subr.mxu0 %v1296_v42  ;;  %9361 = vmatpush3.msra.mxu1 %v16177_v47 }
 0x34e   : > { %9413 = vmatpush3.msra.mxu0 %v1296_v42  ;;  %9276 = vmatmul.mubr.msk.f32.gmra.mxu1 %vm692_vm1, %v12198_v5  ;;  %v12342_v5 = vpop.permute.xlu0 %1365 }
 0x34f   : > { %9329 = vmatmul.mubr.msk.f32.gmra.mxu0 %vm692_vm1, %v12186_v33  ;;  %9362 = vmatprep.subr.mxu1 %v16178_v1  ;;  %16182 = vst [vmem:[#allocation24_spill] sm:$0xff] %v12342_v5  ;;  %v12347_v33 = vpop.permute.xlu1 %1413 }
 0x350   : > { %9414 = vmatprep.subr.mxu0 %v1294_v53  ;;  %9331 = vmatprep.mubr.msk.f32.mxu0 %vm692_vm1, %v16179_v9  ;;  %16183 = vst [vmem:[#allocation31_spill] sm:$0xff] %v12347_v33 }
 0x351   : > { %9363 = vmatpush3.msra.mxu1 %v16178_v1  ;;  %9415 = vmatpush3.msra.mxu0 %v1294_v53 }
 0x352   : > { %9364 = vmatprep.subr.mxu1 %v16181_v30  ;;  %9416 = vmatprep.subr.mxu0 %v1292_v60  ;;  %v12354_v52 = vpop.permute.xlu0 %1361 }
 0x353   : > { %9365 = vmatpush3.msra.mxu1 %v16181_v30  ;;  %9417 = vmatpush3.msra.mxu0 %v1292_v60  ;;  %16185 = vst [vmem:[#allocation26_spill] sm:$0xff] %v12354_v52 }
 0x354   : > { %9332 = vmatmul.mubr.msk.f32.gmra.mxu0 %vm692_vm1, %v12214_v54  ;;  %9418 = vmatprep.subr.mxu0 %v1290_v0  ;;  %v12358_v54 = vpop.permute.xlu1 %1359 }
 0x355   : > { %9446 = vmatprep.subr.mxu1 %v12342_v5  ;;  %9419 = vmatpush3.msra.mxu0 %v1290_v0  ;;  %16187 = vst [vmem:[#allocation23_spill] sm:$0xff] %v12358_v54 }
 0x356   : > { %9420 = vmatprep.subr.mxu0 %v1288_v28  ;;  %v12356_v3 = vpop.permute.xlu0 %1411 }
 0x357   : > { %9421 = vmatpush3.msra.mxu0 %v1288_v28  ;;  %16186 = vst [vmem:[#allocation37_spill] sm:$0xff] %v12356_v3 }
 0x358   : > { %9502 = vmatprep.subr.mxu0 %v12347_v33  ;;  %v12362_v18 = vpop.permute.xlu1 %1409 }
 0x359   : > { %16189 = vst [vmem:[#allocation25_spill] sm:$0xff] %v12362_v18 }
 0x35a   : > { %v12360_v12 = vpop.permute.xlu0 %1407 }
 0x35b   : > { %16188 = vst [vmem:[#allocation28_spill] sm:$0xff] %v12360_v12 }
 0x35c   : > { %v12366_v63 = vpop.permute.xlu1 %1357 }
 0x35d   : > { %16191 = vst [vmem:[#allocation30_spill] sm:$0xff] %v12366_v63 }
 0x35e   : > { %v12364_v8 = vpop.permute.xlu0 %1353 }
 0x35f   : > { %16190 = vst [vmem:[#allocation34_spill] sm:$0xff] %v12364_v8 }
 0x360   : > { %v12370_v55 = vpop.permute.xlu1 %1355 }
 0x361   : > { %16193 = vst [vmem:[#allocation39_spill] sm:$0xff] %v12370_v55 }
 0x362   : > { %v12368_v50 = vpop.permute.xlu0 %1403 }
 0x363   : > { %16192 = vst [vmem:[#allocation27_spill] sm:$0xff] %v12368_v50 }
 0x364   : > { %v12381_v29 = vpop.permute.xlu1 %1405 }
 0x365   : > { %16196 = vst [vmem:[#allocation29_spill] sm:$0xff] %v12381_v29 }
 0x366   : > { %v12379_v53 = vpop.permute.xlu0 %1401 }
 0x367   : > { %16195 = vst [vmem:[#allocation33_spill] sm:$0xff] %v12379_v53 }
 0x368   : > { %v12397_v9 = vpop.permute.xlu1 %1351 }
 0x369   : > { %16198 = vst [vmem:[#allocation41_spill] sm:$0xff] %v12397_v9 }
 0x36a   : > { %v12395_v28 = vpop.permute.xlu0 %1349 }
 0x36b   : > { %16197 = vst [vmem:[#allocation35_spill] sm:$0xff] %v12395_v28 }
 0x36e   : > { %v12411_v53 = vpop.permute.xlu0 %1399 }
 0x36f   : > { %16199 = vst [vmem:[#allocation32_spill] sm:$0xff] %v12411_v53 }
 0x372   : > { %v12427_v53 = vpop.permute.xlu0 %1347 }
 0x373   : > { %16201 = vst [vmem:[#allocation36_spill] sm:$0xff] %v12427_v53 }
 0x376   : > { %v12443_v53 = vpop.permute.xlu0 %1397 }
 0x377   : > { %16204 = vst [vmem:[#allocation49_spill] sm:$0xff] %v12443_v53 }
 0x37a   : > { %v2268_v9 = vpop.xlane.xlu0 %2267 }
 0x3aa   : > { %v9200_v45 = vpop.f32.mrf.mxu0 }
 0x3ab   : > { %v12351_v37 = vadd.f32 %v9200_v45, %v16184_v4 }
 0x3ac   : > { %v1770_v20 = vpop.f32.mrf.mxu0 }
 0x3ad   : > { %2301 = vmax.xlane.f32.xlu0 %v12351_v37  ;;  %v12384_v11 = vadd.f32 %v1770_v20, %v16194_v46 }
 0x3af   : > { %v9203_v10 = vpop.f32.mrf.mxu0 }
 0x3b0   : > { %v12392_v27 = vadd.f32 %v9203_v10, %v11948_v14 }
 0x3b1   : > { %v1780_v42 = vpop.f32.mrf.mxu0 }
 0x3b2   : > { %v12388_v60 = vadd.f32 %v1780_v42, %v11953_v36 }
 0x3b3   : > { %v9206_v57 = vpop.f32.mrf.mxu0 }
 0x3b4   : > { %v12416_v50 = vadd.f32 %v9206_v57, %v11978_v43 }
 0x3b5   : > { %v1790_v20 = vpop.f32.mrf.mxu0 }
 0x3b6   : > { %v12408_v10 = vadd.f32 %v1790_v20, %v11983_v44 }
 0x3b7   : > { %v9209_v42 = vpop.f32.mrf.mxu0 }
 0x3b8   : > { %v12436_v33 = vadd.f32 %v9209_v42, %v12007_v15 }
 0x3b9   : > { %v1800_v20 = vpop.f32.mrf.mxu0 }
 0x3ba   : > { %v12432_v57 = vadd.f32 %v1800_v20, %v12012_v2 }
 0x3e7   : > { %v9256_v24 = vpop.f32.mrf.mxu1 }
 0x3e8   : > { %v12373_v40 = vadd.f32 %v9256_v24, %v16184_v4 }
 0x3e9   : > { %v1979_v35 = vpop.f32.mrf.mxu1 }
 0x3ea   : > { %v12376_v39 = vadd.f32 %v1979_v35, %v16194_v46  ;;  %2333 = vmax.xlane.f32.xlu0 %v12373_v40 }
 0x3eb   : > { %v9259_v32 = vpop.f32.mrf.mxu1 }
 0x3ec   : > { %2331 = vmax.xlane.f32.xlu1 %v12376_v39  ;;  %v12404_v35 = vadd.f32 %v9259_v32, %v11948_v14 }
 0x3ed   : > { %v1989_v0 = vpop.f32.mrf.mxu1 }
 0x3ee   : > { %2299 = vmax.xlane.f32.xlu0 %v12384_v11  ;;  %v12400_v45 = vadd.f32 %v1989_v0, %v11953_v36  ;;  %v12413_v0 = vpop.permute.xlu1 %1345 }
 0x3ef   : > { %16200 = vst [vmem:[#allocation40_spill] sm:$0xff] %v12413_v0 }
 0x3f0   : > { %2303 = vmax.xlane.f32.xlu1 %v12388_v60  ;;  %v9262_v24 = vpop.f32.mrf.mxu1 }
 0x3f1   : > { %v12424_v12 = vadd.f32 %v9262_v24, %v11978_v43 }
 0x3f2   : > { %2305 = vmax.xlane.f32.xlu0 %v12392_v27  ;;  %v1999_v30 = vpop.f32.mrf.mxu1  ;;  %v12429_v18 = vpop.permute.xlu1 %1395 }
 0x3f3   : > { %v12420_v32 = vadd.f32 %v1999_v30, %v11983_v44  ;;  %16202 = vst [vmem:[#allocation38_spill] sm:$0xff] %v12429_v18  ;;  %v9212_v30 = vpop.f32.mrf.mxu0 }
 0x3f4   : > { %2335 = vmax.xlane.f32.xlu1 %v12400_v45  ;;  %v12456_v8 = vadd.f32 %v9212_v30, %v12037_v62 }
 0x3f5   : > { %v1810_v0 = vpop.f32.mrf.mxu0 }
 0x3f6   : > { %2337 = vmax.xlane.f32.xlu0 %v12404_v35  ;;  %v9265_v29 = vpop.f32.mrf.mxu1  ;;  %v2270_v24 = vpop.xlane.xlu1 %2269  ;;  %v12452_v42 = vadd.f32 %v1810_v0, %v12042_v25 }
 0x3f7   : > { %v12446_v20 = vadd.f32 %v9265_v29, %v12007_v15  ;;  %v2396_v5 = vsub.f32 %v16211_v23, %v2270_v24 }
 0x3f8   : > { %2307 = vmax.xlane.f32.xlu1 %v12408_v10  ;;  %v2009_v3 = vpop.f32.mrf.mxu1 }
 0x3f9   : > { %v12440_v1 = vadd.f32 %v2009_v3, %v12012_v2  ;;  %16205 = vst [vmem:[#allocation48_spill] sm:$0xff] %v12446_v20  ;;  %v9215_v3 = vpop.f32.mrf.mxu0  ;;  %v2461_v56 = vmul.f32 1.442695, %v2396_v5 }
 0x3fa   : > { %2309 = vmax.xlane.f32.xlu0 %v12416_v50  ;;  %v12449_v58 = vpop.xlane.xlu1 %2271 }
 0x3fb   : > { %16203 = vst [vmem:[#allocation53_spill] sm:$0xff] %v12440_v1  ;;  %v1820_v53 = vpop.f32.mrf.mxu0 }
 0x3fc   : > { %2339 = vmax.xlane.f32.xlu1 %v12420_v32  ;;  %v9268_v18 = vpop.f32.mrf.mxu1  ;;  %v12468_v63 = vadd.f32 %v1820_v53, %v12074_v13 }
 0x3fd   : > { %v12464_v0 = vadd.f32 %v9268_v18, %v12037_v62  ;;  %v9218_v30 = vpop.f32.mrf.mxu0 }
 0x3fe   : > { %2341 = vmax.xlane.f32.xlu0 %v12424_v12  ;;  %v2019_v28 = vpop.f32.mrf.mxu1  ;;  %v2276_v55 = vpop.xlane.xlu1 %2275  ;;  %16208 = vst [vmem:[#allocation50_spill] sm:$0xff] %v12468_v63  ;;  %v12492_v23 = vadd.f32 %v9218_v30, %v12101_v49 }
 0x3ff   : > { %v12460_v29 = vadd.f32 %v2019_v28, %v12042_v25  ;;  %16207 = vst [vmem:[#allocation51_spill] sm:$0xff] %v12464_v0  ;;  %v12472_v28 = vadd.f32 %v9215_v3, %v12069_v6  ;;  %v2399_v59 = vsub.f32 %v11993_v17, %v2276_v55 }
 0x400   : > { %2311 = vmax.xlane.f32.xlu1 %v12432_v57 }
 0x401   : > { %16206 = vst [vmem:[#allocation54_spill] sm:$0xff] %v12460_v29  ;;  %16209 = vst [vmem:[#allocation52_spill] sm:$0xff] %v12472_v28 }
 0x402   : > { %2313 = vmax.xlane.f32.xlu0 %v12436_v33  ;;  %v2280_v52 = vpop.xlane.xlu1 %2279 }
 0x403   : > { %v2401_v17 = vsub.f32 %v12024_v51, %v2280_v52 }
 0x404   : > { %2343 = vmax.xlane.f32.xlu1 %v12440_v1  ;;  %v9271_v1 = vpop.f32.mrf.mxu1 }
 0x405   : > { %v2471_v51 = vmul.f32 1.442695, %v2401_v17 }
 0x406   : > { %2345 = vmax.xlane.f32.xlu0 %v12446_v20  ;;  %v2274_v20 = vpop.xlane.xlu0 %2273  ;;  %v2029_v54 = vpop.f32.mrf.mxu1 }
 0x407   : > { %v2398_v47 = vsub.f32 %v11964_v61, %v2274_v20  ;;  %v12477_v18 = vadd.f32 %v2029_v54, %v12074_v13 }
 0x408   : > { %2315 = vmax.xlane.f32.xlu1 %v12452_v42  ;;  %v9274_v53 = vpop.f32.mrf.mxu1 }
 0x409   : > { %16210 = vst [vmem:[#allocation55_spill] sm:$0xff] %v12477_v18  ;;  %v2465_v3 = vmul.f32 1.442695, %v2398_v47  ;;  %v2467_v47 = vmul.f32 1.442695, %v2399_v59  ;;  %v12503_v30 = vadd.f32 %v9274_v53, %v12101_v49 }
 0x40a   : > { %2317 = vmax.xlane.f32.xlu0 %v12456_v8  ;;  %v2278_v54 = vpop.xlane.xlu0 %2277  ;;  %v2039_v20 = vpop.f32.mrf.mxu1 }
 0x40b   : > { %10293 = vpow2.f32 %v2465_v3  ;;  %v12497_v55 = vadd.f32 %v2039_v20, %v12106_v31 }
 0x40c   : > { %2347 = vmax.xlane.f32.xlu1 %v12460_v29  ;;  %v1830_v29 = vpop.f32.mrf.mxu0  ;;  %10295 = vpow2.f32 %v2461_v56 }
 0x40d   : > { %v12487_v61 = vadd.f32 %v1830_v29, %v12106_v31  ;;  %16214 = vst [vmem:[#allocation57_spill] sm:$0xff] %v12497_v55  ;;  %10297 = vpow2.f32 %v2467_v47 }
 0x40e   : > { %2349 = vmax.xlane.f32.xlu0 %v12464_v0  ;;  %v12482_v0 = vadd.f32 %v9271_v1, %v12069_v6  ;;  %v2284_v1 = vpop.xlane.xlu1 %2283  ;;  %v9221_v24 = vpop.f32.mrf.mxu0 }
 0x40f   : > { %v9277_v29 = vpop.f32.mrf.mxu1  ;;  %v2403_v52 = vsub.f32 %v12056_v38, %v2284_v1  ;;  %v12515_v20 = vadd.f32 %v9221_v24, %v12131_v7 }
 0x410   : > { %2319 = vmax.xlane.f32.xlu1 %v12468_v63  ;;  %16212 = vst [vmem:[#allocation56_spill] sm:$0xff] %v12482_v0  ;;  %v1840_v59 = vpop.f32.mrf.mxu0  ;;  %v12508_v3 = vadd.f32 %v9277_v29, %v12131_v7 }
 0x411   : > { %v2049_v47 = vpop.f32.mrf.mxu1  ;;  %v2475_v38 = vmul.f32 1.442695, %v2403_v52  ;;  %v12520_v17 = vadd.f32 %v1840_v59, %v12136_v22 }
 0x412   : > { %2321 = vmax.xlane.f32.xlu0 %v12472_v28  ;;  %v16213_v28 = vld [vmem:[#allocation58_spill] sm:$0xff]  ;;  %16216 = vst [vmem:[#allocation62_spill] sm:$0xff] %v12508_v3  ;;  %v2288_v56 = vpop.xlane.xlu1 %2287  ;;  %v12525_v24 = vadd.f32 %v2049_v47, %v12136_v22 }
 0x413   : > { %v2395_v63 = vsub.f32 %v16213_v28, %v2268_v9  ;;  %v2397_v9 = vsub.f32 %v11967_v19, %v12449_v58  ;;  %16215 = vst [vmem:[#allocation58_spill] sm:$0xff] %v12503_v30  ;;  %v2282_v28 = vpop.xlane.xlu0 %2281  ;;  %v16217_v58 = vld [vmem:[#allocation59_spill] sm:$0xff]  ;;  %v2405_v1 = vsub.f32 %v12086_v48, %v2288_v56 }
 0x414   : > { %2351 = vmax.xlane.f32.xlu1 %v12477_v18  ;;  %v2400_v53 = vsub.f32 %v16217_v58, %v2278_v54  ;;  %v16218_v54 = vld [vmem:[#allocation60_spill] sm:$0xff]  ;;  %16219 = vst [vmem:[#allocation59_spill] sm:$0xff] %v12525_v24 }
 0x415   : > { %v2459_v5 = vmul.f32 1.442695, %v2395_v63  ;;  %v12511_v63 = vpop.f32.mrf.mxu0  ;;  %v2463_v19 = vmul.f32 1.442695, %v2397_v9  ;;  %v2402_v58 = vsub.f32 %v16218_v54, %v2282_v28 }
 0x416   : > { %2353 = vmax.xlane.f32.xlu0 %v12482_v0  ;;  %v2469_v9 = vmul.f32 1.442695, %v2400_v53  ;;  %v2292_v59 = vpop.xlane.xlu1 %2291 }
 0x417   : > { %10299 = vpow2.f32 %v2459_v5  ;;  %v2286_v29 = vpop.xlane.xlu0 %2285  ;;  %v2188_v5 = vpop.f32.mrf.mxu0  ;;  %v2473_v56 = vmul.f32 1.442695, %v2402_v58  ;;  %v2407_v47 = vsub.f32 %v12118_v34, %v2292_v59 }
 0x418   : > { %2323 = vmax.xlane.f32.xlu1 %v12487_v61  ;;  %10301 = vpow2.f32 %v2471_v51  ;;  %v2479_v51 = vmul.f32 1.442695, %v2405_v1  ;;  %v12529_v48 = vpop.eup %10293 }
 0x419   : > { %10303 = vpow2.f32 %v2463_v19  ;;  %v12531_v52 = vpop.f32.mrf.mxu0  ;;  %v2404_v19 = vsub.f32 %v12053_v16, %v2286_v29  ;;  %v12535_v28 = vpop.eup %10295  ;;  %v2483_v29 = vmul.f32 1.442695, %v2407_v47 }
 0x41a   : > { %2325 = vmax.xlane.f32.xlu0 %v12492_v23  ;;  %10305 = vpow2.f32 %v2475_v38  ;;  %v12539_v38 = vpop.eup %10297 }
 0x41b   : > { %10307 = vpow2.f32 %v2469_v9  ;;  %v2290_v53 = vpop.xlane.xlu0 %2289  ;;  %v2198_v1 = vpop.f32.mrf.mxu0  ;;  %v2477_v54 = vmul.f32 1.442695, %v2404_v19 }
 0x41c   : > { %2355 = vmax.xlane.f32.xlu1 %v12497_v55  ;;  %10309 = vpow2.f32 %v2479_v51  ;;  %v2296_v51 = vpop.xlane.xlu1 %2295 }
 0x41d   : > { %10311 = vpow2.f32 %v2473_v56  ;;  %v9318_v34 = vpop.f32.mrf.mxu0 }
 0x41e   : > { %2357 = vmax.xlane.f32.xlu0 %v12503_v30  ;;  %10313 = vpow2.f32 %v2477_v54 }
 0x41f   : > { %v2294_v56 = vpop.xlane.xlu0 %2293  ;;  %10315 = vpow2.f32 %v2483_v29 }
 0x420   : > { %2361 = vmax.xlane.f32.xlu1 %v12508_v3  ;;  %v16220_v3 = vld [vmem:[#allocation61_spill] sm:$0xff]  ;;  %v2408_v47 = vsub.f32 %v12115_v26, %v2294_v56 }
 0x421   : > { %v2406_v9 = vsub.f32 %v16220_v3, %v2290_v53  ;;  %v2409_v3 = vsub.f32 %v12150_v21, %v2296_v51  ;;  %v2208_v53 = vpop.f32.mrf.mxu0 }
 0x422   : > { %2329 = vmax.xlane.f32.xlu0 %v12515_v20  ;;  %v2485_v55 = vmul.f32 1.442695, %v2408_v47 }
 0x423   : > { %v2481_v59 = vmul.f32 1.442695, %v2406_v9  ;;  %v2487_v9 = vmul.f32 1.442695, %v2409_v3  ;;  %v9321_v29 = vpop.f32.mrf.mxu0  ;;  %v2298_v51 = vpop.xlane.xlu0 %2297 }
 0x424   : > { %2327 = vmax.xlane.f32.xlu1 %v12520_v17  ;;  %v12543_v16 = vpop.eup %10299  ;;  %v2410_v56 = vsub.f32 %v12147_v41, %v2298_v51 }
 0x425   : > { %v12546_v58 = vpop.eup %10301  ;;  %10317 = vpow2.f32 %v2481_v59  ;;  %v12566_v59 = vadd.f32 %v2188_v5, %v16194_v46  ;;  %v2218_v26 = vpop.f32.mrf.mxu0  ;;  %v12580_v5 = vadd.f32 %v2198_v1, %v11953_v36  ;;  %v12595_v36 = vadd.f32 %v2208_v53, %v11983_v44 }
 0x426   : > { %2359 = vmax.xlane.f32.xlu0 %v12525_v24  ;;  %v12549_v24 = vpop.eup %10303  ;;  %10319 = vpow2.f32 %v2487_v9  ;;  %v2489_v18 = vmul.f32 1.442695, %v2410_v56 }
 0x427   : > { %v12553_v19 = vpop.eup %10305  ;;  %10321 = vpow2.f32 %v2485_v55  ;;  %v9324_v0 = vpop.f32.mrf.mxu0  ;;  %16221 = vst [vmem:[#allocation60_spill] sm:$0xff] %v12580_v5  ;;  %v12585_v55 = vadd.f32 %v12511_v63, %v16184_v4  ;;  %v12600_v4 = vadd.f32 %v12531_v52, %v11948_v14  ;;  %v12604_v63 = vadd.f32 %v2218_v26, %v12012_v2 }
 0x428   : > { %2593 = vadd.xlane.f32.xlu1 %v12529_v48  ;;  %v12557_v54 = vpop.eup %10307  ;;  %10323 = vpow2.f32 %v2489_v18  ;;  %v12615_v14 = vadd.f32 %v9318_v34, %v11978_v43  ;;  %v12632_v34 = vadd.f32 %v9324_v0, %v12037_v62 }
 0x429   : > { %v12560_v30 = vpop.eup %10309  ;;  %v2228_v41 = vpop.f32.mrf.mxu0  ;;  %16222 = vst [vmem:[#allocation61_spill] sm:$0xff] %v12604_v63 }
 0x42a   : > { %2589 = vadd.xlane.f32.xlu0 %v12535_v28  ;;  %v12563_v21 = vpop.eup %10311  ;;  %v12611_v44 = vadd.f32 %v2228_v41, %v12042_v25 }
 0x42b   : > { %v12571_v3 = vpop.eup %10313  ;;  %v9327_v51 = vpop.f32.mrf.mxu0 }
 0x42c   : > { %2595 = vadd.xlane.f32.xlu1 %v12539_v38  ;;  %v12574_v47 = vpop.eup %10315 }
 0x42d   : > { %v2238_v18 = vpop.f32.mrf.mxu0 }
 0x42e   : > { %2587 = vadd.xlane.f32.xlu0 %v12543_v16  ;;  %v12619_v52 = vadd.f32 %v2238_v18, %v12074_v13 }
 0x42f   : > { %v9330_v1 = vpop.f32.mrf.mxu0 }
 0x430   : > { %2599 = vadd.xlane.f32.xlu1 %v12546_v58 }
 0x431   : > { %v2248_v53 = vpop.f32.mrf.mxu0 }
 0x432   : > { %2591 = vadd.xlane.f32.xlu0 %v12549_v24  ;;  %v12577_v46 = vpop.eup %10317  ;;  %v12628_v41 = vadd.f32 %v2248_v53, %v12106_v31  ;;  %v12645_v31 = vadd.f32 %v9330_v1, %v12101_v49 }
 0x433   : > { %v12589_v9 = vpop.eup %10319  ;;  %v9333_v26 = vpop.f32.mrf.mxu0 }
 0x434   : > { %2603 = vadd.xlane.f32.xlu1 %v12553_v19  ;;  %v12592_v56 = vpop.eup %10321  ;;  %16223 = vst [vmem:[#allocation63_spill] sm:$0xff] %v12628_v41  ;;  %16225 = vst [vmem:[#allocation65_spill] sm:$0xff] %v12645_v31  ;;  %v12649_v62 = vadd.f32 %v9333_v26, %v12131_v7 }
 0x435   : > { %v2258_v43 = vpop.f32.mrf.mxu0 }
 0x436   : > { %2597 = vadd.xlane.f32.xlu0 %v12557_v54  ;;  %v2302_v2 = vpop.xlane.xlu0 %2301  ;;  %v12636_v18 = vadd.f32 %v2258_v43, %v12136_v22  ;;  %16226 = vst [vmem:[#allocation66_spill] sm:$0xff] %v12649_v62 }
 0x437   : > { %v2412_v25 = vsub.f32 %v12351_v37, %v2302_v2 }
 0x438   : > { %2607 = vadd.xlane.f32.xlu1 %v12560_v30  ;;  %16224 = vst [vmem:[#allocation64_spill] sm:$0xff] %v12636_v18 }
 0x439   : > { %v2493_v13 = vmul.f32 1.442695, %v2412_v25 }
 0x43a   : > { %2601 = vadd.xlane.f32.xlu0 %v12563_v21 }
 0x43b   : > { %10325 = vpow2.f32 %v2493_v13 }
 0x43c   : > { %2363 = vmax.xlane.f32.xlu1 %v12566_v59 }
 0x43e   : > { %2605 = vadd.xlane.f32.xlu0 %v12571_v3 }
 0x440   : > { %2611 = vadd.xlane.f32.xlu1 %v12574_v47 }
 0x442   : > { %2609 = vadd.xlane.f32.xlu0 %v12577_v46 }
 0x444   : > { %2367 = vmax.xlane.f32.xlu1 %v12580_v5  ;;  %v12608_v5 = vpop.eup %10323 }
 0x446   : > { %2365 = vmax.xlane.f32.xlu0 %v12585_v55 }
 0x448   : > { %2615 = vadd.xlane.f32.xlu1 %v12589_v9  ;;  %v12652_v22 = vpop.eup %10325 }
 0x44a   : > { %2613 = vadd.xlane.f32.xlu0 %v12592_v56 }
 0x44c   : > { %2371 = vmax.xlane.f32.xlu1 %v12595_v36 }
 0x44e   : > { %2369 = vmax.xlane.f32.xlu0 %v12600_v4 }
 0x450   : > { %2375 = vmax.xlane.f32.xlu1 %v12604_v63  ;;  %v12623_v63 = vadd.f32 %v9321_v29, %v12007_v15  ;;  %v12640_v15 = vadd.f32 %v9327_v51, %v12069_v6 }
 0x452   : > { %2617 = vadd.xlane.f32.xlu0 %v12608_v5 }
 0x454   : > { %2379 = vmax.xlane.f32.xlu1 %v12611_v44 }
 0x456   : > { %2373 = vmax.xlane.f32.xlu0 %v12615_v14 }
 0x458   : > { %2383 = vmax.xlane.f32.xlu1 %v12619_v52 }
 0x45a   : > { %2377 = vmax.xlane.f32.xlu0 %v12623_v63 }
 0x45c   : > { %2387 = vmax.xlane.f32.xlu1 %v12628_v41  ;;  %v16242_v41 = vld [vmem:[#allocation24_spill] sm:$0xff] }
 0x45e   : > { %2381 = vmax.xlane.f32.xlu0 %v12632_v34 }
 0x460   : > { %2391 = vmax.xlane.f32.xlu1 %v12636_v18 }
 0x462   : > { %2385 = vmax.xlane.f32.xlu0 %v12640_v15 }
 0x466   : > { %2389 = vmax.xlane.f32.xlu0 %v12645_v31 }
 0x46a   : > { %2393 = vmax.xlane.f32.xlu0 %v12649_v62 }
 0x46e   : > { %2621 = vadd.xlane.f32.xlu0 %v12652_v22 }
 0x473   : > { %v2334_v6 = vpop.xlane.xlu0 %2333 }
 0x474   : > { %v2428_v37 = vsub.f32 %v12373_v40, %v2334_v6 }
 0x475   : > { %v2332_v0 = vpop.xlane.xlu1 %2331 }
 0x476   : > { %v2525_v29 = vmul.f32 1.442695, %v2428_v37  ;;  %v2427_v51 = vsub.f32 %v12376_v39, %v2332_v0 }
 0x477   : > { %v2300_v49 = vpop.xlane.xlu0 %2299 }
 0x478   : > { %10327 = vpow2.f32 %v2525_v29  ;;  %v2411_v1 = vsub.f32 %v12384_v11, %v2300_v49  ;;  %v2523_v2 = vmul.f32 1.442695, %v2427_v51 }
 0x479   : > { %v2304_v53 = vpop.xlane.xlu1 %2303 }
 0x47a   : > { %v2491_v7 = vmul.f32 1.442695, %v2411_v1  ;;  %v2413_v6 = vsub.f32 %v12388_v60, %v2304_v53 }
 0x47b   : > { %v2306_v26 = vpop.xlane.xlu0 %2305 }
 0x47c   : > { %10329 = vpow2.f32 %v2491_v7  ;;  %v2414_v25 = vsub.f32 %v12392_v27, %v2306_v26  ;;  %v2495_v51 = vmul.f32 1.442695, %v2413_v6 }
 0x47d   : > { %v2336_v43 = vpop.xlane.xlu1 %2335  ;;  %10331 = vpow2.f32 %v2523_v2 }
 0x47e   : > { %v2497_v13 = vmul.f32 1.442695, %v2414_v25  ;;  %v2429_v62 = vsub.f32 %v12400_v45, %v2336_v43 }
 0x47f   : > { %v2338_v40 = vpop.xlane.xlu0 %2337 }
 0x480   : > { %10333 = vpow2.f32 %v2497_v13  ;;  %v2527_v39 = vmul.f32 1.442695, %v2429_v62  ;;  %v2430_v37 = vsub.f32 %v12404_v35, %v2338_v40 }
 0x481   : > { %v2308_v11 = vpop.xlane.xlu1 %2307 }
 0x482   : > { %v2529_v0 = vmul.f32 1.442695, %v2430_v37  ;;  %10335 = vpow2.f32 %v2527_v39  ;;  %v2415_v45 = vsub.f32 %v12408_v10, %v2308_v11 }
 0x483   : > { %v2310_v29 = vpop.xlane.xlu0 %2309 }
 0x484   : > { %10337 = vpow2.f32 %v2529_v0  ;;  %v2416_v27 = vsub.f32 %v12416_v50, %v2310_v29  ;;  %v2499_v50 = vmul.f32 1.442695, %v2415_v45 }
 0x485   : > { %v12663_v49 = vpop.eup %10327  ;;  %v2340_v1 = vpop.xlane.xlu1 %2339  ;;  %10339 = vpow2.f32 %v2495_v51 }
 0x486   : > { %16227 = vst [vmem:[#allocation67_spill] sm:$0xff] %v12663_v49  ;;  %2653 = vadd.xlane.f32.xlu0 %v12663_v49  ;;  %v2501_v60 = vmul.f32 1.442695, %v2416_v27  ;;  %v2431_v35 = vsub.f32 %v12420_v32, %v2340_v1 }
 0x487   : > { %v2342_v53 = vpop.xlane.xlu0 %2341 }
 0x488   : > { %v2432_v62 = vsub.f32 %v12424_v12, %v2342_v53  ;;  %10341 = vpow2.f32 %v2501_v60  ;;  %v2531_v10 = vmul.f32 1.442695, %v2431_v35 }
 0x489   : > { %v12669_v7 = vpop.eup %10329  ;;  %v2312_v2 = vpop.xlane.xlu1 %2311 }
 0x48a   : > { %v2533_v26 = vmul.f32 1.442695, %v2432_v62  ;;  %2619 = vadd.xlane.f32.xlu1 %v12669_v7  ;;  %v2417_v25 = vsub.f32 %v12432_v57, %v2312_v2  ;;  %v12673_v13 = vpop.eup %10331  ;;  %v16232_v2 = vld [vmem:[#allocation50_spill] sm:$0xff] }
 0x48b   : > { %v2314_v43 = vpop.xlane.xlu0 %2313 }
 0x48c   : > { %10343 = vpow2.f32 %v2533_v26  ;;  %v2418_v40 = vsub.f32 %v12436_v33, %v2314_v43  ;;  %v2503_v6 = vmul.f32 1.442695, %v2417_v25  ;;  %v16233_v43 = vld [vmem:[#allocation52_spill] sm:$0xff] }
 0x48d   : > { %v12676_v32 = vpop.eup %10333  ;;  %v12678_v12 = vpop.xlane.xlu1 %2343  ;;  %10345 = vpow2.f32 %v2499_v50 }
 0x48e   : > { %2625 = vadd.xlane.f32.xlu0 %v12676_v32  ;;  %2651 = vadd.xlane.f32.xlu1 %v12673_v13  ;;  %10347 = vpow2.f32 %v2531_v10  ;;  %v2505_v37 = vmul.f32 1.442695, %v2418_v40 }
 0x48f   : > { %v12682_v39 = vpop.xlane.xlu0 %2345  ;;  %v12684_v57 = vpop.eup %10335  ;;  %10349 = vpow2.f32 %v2503_v6 }
 0x490   : > { %16228 = vst [vmem:[#allocation68_spill] sm:$0xff] %v12684_v57  ;;  %10351 = vpow2.f32 %v2505_v37 }
 0x491   : > { %v12686_v11 = vpop.eup %10337  ;;  %v2316_v0 = vpop.xlane.xlu1 %2315 }
 0x492   : > { %16229 = vst [vmem:[#allocation69_spill] sm:$0xff] %v12686_v11  ;;  %v2419_v33 = vsub.f32 %v12452_v42, %v2316_v0  ;;  %2657 = vadd.xlane.f32.xlu0 %v12686_v11  ;;  %2655 = vadd.xlane.f32.xlu1 %v12684_v57  ;;  %v12692_v1 = vpop.eup %10339 }
 0x493   : > { %v2318_v29 = vpop.xlane.xlu0 %2317 }
 0x494   : > { %v2507_v51 = vmul.f32 1.442695, %v2419_v33  ;;  %v2420_v27 = vsub.f32 %v12456_v8, %v2318_v29 }
 0x495   : > { %v12694_v45 = vpop.xlane.xlu1 %2347  ;;  %v12699_v42 = vpop.eup %10341 }
 0x496   : > { %v2509_v60 = vmul.f32 1.442695, %v2420_v27  ;;  %2623 = vadd.xlane.f32.xlu0 %v12692_v1  ;;  %10353 = vpow2.f32 %v2507_v51 }
 0x497   : > { %v12697_v53 = vpop.xlane.xlu0 %2349 }
 0x498   : > { %16230 = vst [vmem:[#allocation70_spill] sm:$0xff] %v12697_v53  ;;  %10355 = vpow2.f32 %v2509_v60 }
 0x499   : > { %v12701_v35 = vpop.eup %10343  ;;  %v2320_v62 = vpop.xlane.xlu1 %2319 }
 0x49a   : > { %16231 = vst [vmem:[#allocation71_spill] sm:$0xff] %v12701_v35  ;;  %v2421_v26 = vsub.f32 %v16232_v2, %v2320_v62  ;;  %2629 = vadd.xlane.f32.xlu0 %v12699_v42  ;;  %2661 = vadd.xlane.f32.xlu1 %v12701_v35  ;;  %v12706_v50 = vpop.eup %10345 }
 0x49b   : > { %v2322_v8 = vpop.xlane.xlu0 %2321  ;;  %v12709_v40 = vpop.eup %10347 }
 0x49c   : > { %v2511_v25 = vmul.f32 1.442695, %v2421_v26  ;;  %v2422_v10 = vsub.f32 %v16233_v43, %v2322_v8  ;;  %16234 = vst [vmem:[#allocation50_spill] sm:$0xff] %v12709_v40  ;;  %v12717_v33 = vpop.eup %10349 }
 0x49d   : > { %v12711_v6 = vpop.xlane.xlu1 %2351  ;;  %v12719_v29 = vpop.eup %10351 }
 0x49e   : > { %10357 = vpow2.f32 %v2511_v25  ;;  %v2513_v37 = vmul.f32 1.442695, %v2422_v10  ;;  %2627 = vadd.xlane.f32.xlu1 %v12706_v50  ;;  %2659 = vadd.xlane.f32.xlu0 %v12709_v40 }
 0x49f   : > { %v12715_v0 = vpop.xlane.xlu0 %2353 }
 0x4a0   : > { %10359 = vpow2.f32 %v2513_v37 }
 0x4a1   : > { %v2324_v51 = vpop.xlane.xlu1 %2323 }
 0x4a2   : > { %v2423_v27 = vsub.f32 %v12487_v61, %v2324_v51  ;;  %2633 = vadd.xlane.f32.xlu0 %v12719_v29  ;;  %2631 = vadd.xlane.f32.xlu1 %v12717_v33 }
 0x4a3   : > { %v2326_v60 = vpop.xlane.xlu0 %2325  ;;  %v12724_v62 = vpop.eup %10353 }
 0x4a4   : > { %v2515_v2 = vmul.f32 1.442695, %v2423_v27  ;;  %v2424_v26 = vsub.f32 %v12492_v23, %v2326_v60 }
 0x4a5   : > { %v12727_v8 = vpop.eup %10355  ;;  %v12729_v25 = vpop.xlane.xlu1 %2355 }
 0x4a6   : > { %10361 = vpow2.f32 %v2515_v2  ;;  %v2517_v43 = vmul.f32 1.442695, %v2424_v26  ;;  %2637 = vadd.xlane.f32.xlu0 %v12727_v8  ;;  %2635 = vadd.xlane.f32.xlu1 %v12724_v62 }
 0x4a7   : > { %v12733_v61 = vpop.xlane.xlu0 %2357 }
 0x4a8   : > { %10363 = vpow2.f32 %v2517_v43 }
 0x4a9   : > { %v12735_v10 = vpop.xlane.xlu1 %2361 }
 0x4aa   : > { %16235 = vst [vmem:[#allocation52_spill] sm:$0xff] %v12735_v10 }
 0x4ab   : > { %v12737_v37 = vpop.eup %10357  ;;  %v2330_v51 = vpop.xlane.xlu0 %2329 }
 0x4ac   : > { %v2426_v23 = vsub.f32 %v12515_v20, %v2330_v51  ;;  %2639 = vadd.xlane.f32.xlu1 %v12737_v37 }
 0x4ad   : > { %v12741_v27 = vpop.eup %10359  ;;  %v12743_v60 = vpop.xlane.xlu1 %2327 }
 0x4ae   : > { %v2521_v2 = vmul.f32 1.442695, %v2426_v23  ;;  %2641 = vadd.xlane.f32.xlu0 %v12741_v27 }
 0x4af   : > { %v12746_v26 = vpop.xlane.xlu0 %2359 }
 0x4b0   : > { %16236 = vst [vmem:[#allocation72_spill] sm:$0xff] %v12746_v26  ;;  %10365 = vpow2.f32 %v2521_v2 }
 0x4b1   : > { %v2594_v43 = vpop.xlane.xlu1 %2593 }
 0x4b3   : > { %v12748_v35 = vpop.eup %10361  ;;  %v2590_v40 = vpop.xlane.xlu0 %2589 }
 0x4b4   : > { %16237 = vst [vmem:[#allocation73_spill] sm:$0xff] %v12748_v35  ;;  %2643 = vadd.xlane.f32.xlu1 %v12748_v35  ;;  %10367 = vrcp.f32 %v2590_v40  ;;  %v16243_v35 = vld [vmem:[#allocation22_spill] sm:$0xff] }
 0x4b5   : > { %v12751_v11 = vpop.eup %10363  ;;  %v2596_v20 = vpop.xlane.xlu1 %2595 }
 0x4b6   : > { %16238 = vst [vmem:[#allocation74_spill] sm:$0xff] %v12751_v11  ;;  %2645 = vadd.xlane.f32.xlu0 %v12751_v11 }
 0x4b7   : > { %v2588_v51 = vpop.xlane.xlu0 %2587 }
 0x4b8   : > { %10369 = vrcp.f32 %v2588_v51  ;;  %v16240_v51 = vld [vmem:[#allocation45_spill] sm:$0xff] }
 0x4b9   : > { %v2600_v23 = vpop.xlane.xlu1 %2599 }
 0x4bb   : > { %v2592_v57 = vpop.xlane.xlu0 %2591 }
 0x4bc   : > { %10371 = vrcp.f32 %v2592_v57 }
 0x4bd   : > { %v12754_v49 = vpop.eup %10365  ;;  %10373 = vrcp.f32 %v2594_v43  ;;  %v2604_v2 = vpop.xlane.xlu1 %2603 }
 0x4be   : > { %16239 = vst [vmem:[#allocation75_spill] sm:$0xff] %v12754_v49  ;;  %10375 = vrcp.f32 %v2596_v20  ;;  %2649 = vadd.xlane.f32.xlu0 %v12754_v49 }
 0x4bf   : > { %v2598_v10 = vpop.xlane.xlu0 %2597 }
 0x4c0   : > { %10377 = vrcp.f32 %v2598_v10 }
 0x4c1   : > { %v2608_v31 = vpop.xlane.xlu1 %2607  ;;  %10379 = vrcp.f32 %v2600_v23  ;;  %v10368_v18 = vpop.eup %10367  ;;  %v16241_v23 = vld [vmem:[#allocation42_spill] sm:$0xff] }
 0x4c2   : > { %v2780_v20 = vmul.f32 %v10368_v18, %v12535_v28  ;;  %v16244_v18 = vld [vmem:[#allocation26_spill] sm:$0xff] }
 0x4c3   : > { %v2602_v53 = vpop.xlane.xlu0 %2601 }
 0x4c4   : > { %10381 = vrcp.f32 %v2602_v53 }
 0x4c5   : > { %v10370_v40 = vpop.eup %10369  ;;  %1341 = vrot.lane.b32.xlu1 %v16240_v51, %s16006_s16  ;;  %v12759_v26 = vpop.xlane.xlu1 %2363  ;;  %10383 = vrcp.f32 %v2604_v2 }
 0x4c6   : > { %v2779_v57 = vmul.f32 %v10370_v40, %v12543_v16  ;;  %v16245_v40 = vld [vmem:[#allocation44_spill] sm:$0xff] }
 0x4c7   : > { %v2606_v43 = vpop.xlane.xlu0 %2605 }
 0x4c8   : > { %10385 = vrcp.f32 %v2606_v43  ;;  %9366 = vmatprep.mubr.f32.mxu1 %v2779_v57 }
 0x4c9   : > { %v10372_v10 = vpop.eup %10371  ;;  %9367 = vmatmul.mubr.f32.vlgmr.msra.gmra.mxu1 %v2780_v20  ;;  %1391 = vrot.lane.b32.xlu1 %v16241_v23, %s16004_s19  ;;  %v2612_v53 = vpop.xlane.xlu1 %2611  ;;  %10387 = vrcp.f32 %v2608_v31 }
 0x4ca   : > { %v10374_v49 = vpop.eup %10373  ;;  %9447 = vmatpush3.msra.mxu1 %v16242_v41  ;;  %v2781_v11 = vmul.f32 %v10372_v10, %v12549_v24  ;;  %v16247_v10 = vld [vmem:[#allocation30_spill] sm:$0xff] }
 0x4cb   : > { %v10376_v2 = vpop.eup %10375  ;;  %9448 = vmatprep.subr.mxu1 %v16243_v35  ;;  %v2610_v16 = vpop.xlane.xlu0 %2609  ;;  %v2782_v31 = vmul.f32 %v10374_v49, %v12529_v48 }
 0x4cc   : > { %9449 = vmatpush3.msra.mxu1 %v16243_v35  ;;  %10389 = vrcp.f32 %v2610_v16  ;;  %9369 = vmatprep.mubr.f32.mxu1 %v2781_v11  ;;  %v2783_v24 = vmul.f32 %v10376_v2, %v12539_v38  ;;  %v16246_v35 = vld [vmem:[#allocation23_spill] sm:$0xff] }
 0x4cd   : > { %v10378_v28 = vpop.eup %10377  ;;  %9450 = vmatprep.subr.mxu1 %v16244_v18  ;;  %1339 = vrot.lane.b32.xlu1 %v16245_v40, %s16006_s16  ;;  %v12773_v57 = vpop.xlane.xlu1 %2367  ;;  %10391 = vrcp.f32 %v2612_v53  ;;  %v16248_v38 = vld [vmem:[#allocation39_spill] sm:$0xff] }
 0x4ce   : > { %9451 = vmatpush3.msra.mxu1 %v16244_v18  ;;  %v10380_v41 = vpop.eup %10379  ;;  %v2784_v43 = vmul.f32 %v10378_v28, %v12557_v54  ;;  %v16249_v28 = vld [vmem:[#allocation34_spill] sm:$0xff] }
 0x4cf   : > { %9370 = vmatmul.mubr.f32.gmra.mxu1 %v2782_v31  ;;  %9452 = vmatprep.subr.mxu1 %v16246_v35  ;;  %v2366_v11 = vpop.xlane.xlu0 %2365  ;;  %v2785_v49 = vmul.f32 %v10380_v41, %v12546_v58  ;;  %v16250_v31 = vld [vmem:[#allocation41_spill] sm:$0xff] }
 0x4d0   : > { %9372 = vmatprep.mubr.f32.mxu1 %v2783_v24  ;;  %9453 = vmatpush3.msra.mxu1 %v16246_v35  ;;  %v16251_v35 = vld [vmem:[#allocation35_spill] sm:$0xff] }
 0x4d1   : > { %v10382_v20 = vpop.eup %10381  ;;  %9454 = vmatprep.subr.mxu1 %v16247_v10  ;;  %v2616_v48 = vpop.xlane.xlu1 %2615 }
 0x4d2   : > { %9455 = vmatpush3.msra.mxu1 %v16247_v10  ;;  %v10384_v53 = vpop.eup %10383  ;;  %v2786_v16 = vmul.f32 %v10382_v20, %v12563_v21  ;;  %10393 = vrcp.f32 %v2616_v48  ;;  %v2425_v20 = vsub.f32 %v12520_v17, %v12743_v60  ;;  %v16253_v10 = vld [vmem:[#allocation36_spill] sm:$0xff]  ;;  %v2443_v17 = vsub.f32 %v12566_v59, %v12759_v26 }
 0x4d3   : > { %9373 = vmatmul.mubr.f32.gmra.mxu1 %v2784_v43  ;;  %9456 = vmatprep.subr.mxu1 %v16248_v38  ;;  %v2614_v2 = vpop.xlane.xlu0 %2613  ;;  %v2787_v58 = vmul.f32 %v10384_v53, %v12553_v19  ;;  %v16252_v43 = vld [vmem:[#allocation43_spill] sm:$0xff]  ;;  %v16255_v59 = vld [vmem:[#allocation60_spill] sm:$0xff] }
 0x4d4   : > { %9375 = vmatprep.mubr.f32.mxu1 %v2785_v49  ;;  %9457 = vmatpush3.msra.mxu1 %v16248_v38  ;;  %10395 = vrcp.f32 %v2614_v2  ;;  %v16254_v49 = vld [vmem:[#allocation40_spill] sm:$0xff]  ;;  %v2519_v53 = vmul.f32 1.442695, %v2425_v20  ;;  %v2555_v2 = vmul.f32 1.442695, %v2443_v17  ;;  %v2445_v26 = vsub.f32 %v16255_v59, %v12773_v57 }
 0x4d5   : > { %v10386_v54 = vpop.eup %10385  ;;  %9458 = vmatprep.subr.mxu1 %v16249_v28  ;;  %1343 = vrot.lane.b32.xlu0 %v16241_v23, %s16006_s16 }
 0x4d6   : > { %9459 = vmatpush3.msra.mxu1 %v16249_v28  ;;  %v10388_v18 = vpop.eup %10387  ;;  %v2788_v24 = vmul.f32 %v10386_v54, %v12571_v3 }
 0x4d7   : > { %9376 = vmatmul.mubr.f32.gmra.mxu1 %v2786_v16  ;;  %9460 = vmatprep.subr.mxu1 %v16250_v31  ;;  %v2370_v21 = vpop.xlane.xlu0 %2369  ;;  %v2789_v19 = vmul.f32 %v10388_v18, %v12560_v30 }
 0x4d8   : > { %9378 = vmatprep.mubr.f32.mxu1 %v2787_v58  ;;  %9461 = vmatpush3.msra.mxu1 %v16250_v31  ;;  %v2446_v16 = vsub.f32 %v12600_v4, %v2370_v21  ;;  %v2372_v31 = vpop.xlane.xlu1 %2371 }
 0x4d9   : > { %v10390_v41 = vpop.eup %10389  ;;  %9462 = vmatprep.subr.mxu1 %v16251_v35  ;;  %1393 = vrot.lane.b32.xlu0 %v16252_v43, %s16004_s19  ;;  %v2447_v4 = vsub.f32 %v12595_v36, %v2372_v31 }
 0x4da   : > { %9463 = vmatpush3.msra.mxu1 %v16251_v35  ;;  %v10392_v23 = vpop.eup %10391  ;;  %v2790_v48 = vmul.f32 %v10390_v41, %v12577_v46  ;;  %v2444_v46 = vsub.f32 %v12585_v55, %v2366_v11  ;;  %v2561_v55 = vmul.f32 1.442695, %v2446_v16 }
 0x4db   : > { %9379 = vmatmul.mubr.f32.gmra.mxu1 %v2788_v24  ;;  %9464 = vmatprep.subr.mxu1 %v16253_v10  ;;  %v2618_v3 = vpop.xlane.xlu0 %2617  ;;  %v2791_v30 = vmul.f32 %v10392_v23, %v12574_v47  ;;  %v2559_v24 = vmul.f32 1.442695, %v2445_v26 }
 0x4dc   : > { %9381 = vmatprep.mubr.f32.mxu1 %v2789_v19  ;;  %9465 = vmatpush3.msra.mxu1 %v16253_v10  ;;  %10397 = vrcp.f32 %v2618_v3  ;;  %v2557_v47 = vmul.f32 1.442695, %v2444_v46  ;;  %v2376_v35 = vpop.xlane.xlu1 %2375 }
 0x4dd   : > { %9466 = vmatprep.subr.mxu1 %v16254_v49  ;;  %10399 = vpow2.f32 %v2519_v53 }
 0x4de   : > { %9467 = vmatpush3.msra.mxu1 %v16254_v49  ;;  %10401 = vpow2.f32 %v2555_v2  ;;  %v16256_v2 = vld [vmem:[#allocation47_spill] sm:$0xff] }
 0x4df   : > { %9382 = vmatmul.mubr.f32.gmra.mxu1 %v2790_v48  ;;  %v10394_v60 = vpop.eup %10393  ;;  %v2374_v54 = vpop.xlane.xlu0 %2373  ;;  %10403 = vpow2.f32 %v2557_v47  ;;  %v16258_v47 = vld [vmem:[#allocation61_spill] sm:$0xff] }
 0x4e0   : > { %9384 = vmatprep.mubr.f32.mxu1 %v2791_v30  ;;  %v2793_v58 = vmul.f32 %v10394_v60, %v12589_v9  ;;  %v2448_v18 = vsub.f32 %v12615_v14, %v2374_v54  ;;  %10405 = vpow2.f32 %v2561_v55  ;;  %v12839_v20 = vpop.xlane.xlu1 %2379 }
 0x4e1   : > { %v10396_v38 = vpop.eup %10395 }
 0x4e2   : > { %v2792_v28 = vmul.f32 %v10396_v38, %v12592_v56  ;;  %v2565_v21 = vmul.f32 1.442695, %v2448_v18  ;;  %v2563_v56 = vmul.f32 1.442695, %v2447_v4  ;;  %v2449_v18 = vsub.f32 %v16258_v47, %v2376_v35  ;;  %v16264_v47 = vld [vmem:[#allocation28_spill] sm:$0xff] }
 0x4e3   : > { %v12820_v41 = vpop.xlane.xlu0 %2377 }
 0x4e4   : > { %9385 = vmatmul.mubr.f32.gmra.mxu1 %v2792_v28  ;;  %10407 = vpow2.f32 %v2565_v21  ;;  %v12847_v48 = vpop.xlane.xlu1 %2383  ;;  %v16259_v21 = vld [vmem:[#allocation48_spill] sm:$0xff] }
 0x4e5   : > { %9387 = vmatprep.mubr.f32.mxu1 %v2793_v58  ;;  %10409 = vpow2.f32 %v2559_v24  ;;  %v2567_v24 = vmul.f32 1.442695, %v2449_v18 }
 0x4e6   : > { %10411 = vpow2.f32 %v2563_v56 }
 0x4e7   : > { %v12828_v43 = vpop.xlane.xlu0 %2381 }
 0x4e8   : > { %v12851_v30 = vpop.xlane.xlu1 %2387 }
 0x4e9   : > { %v10398_v11 = vpop.eup %10397 }
 0x4ea   : > { %v2794_v9 = vmul.f32 %v10398_v11, %v12608_v5  ;;  %v12818_v14 = vpop.eup %10399 }
 0x4eb   : > { %v12823_v57 = vpop.eup %10401  ;;  %v12841_v10 = vpop.xlane.xlu0 %2385 }
 0x4ec   : > { %9388 = vmatmul.mubr.f32.gmra.mxu1 %v2794_v9  ;;  %v12826_v36 = vpop.eup %10403  ;;  %v12857_v17 = vpop.xlane.xlu1 %2391 }
 0x4ed   : > { %v12830_v5 = vpop.eup %10405 }
 0x4ef   : > { %v12849_v49 = vpop.xlane.xlu0 %2389 }
 0x4f1   : > { %2647 = vadd.xlane.f32.xlu1 %v12818_v14  ;;  %v12834_v19 = vpop.eup %10407 }
 0x4f2   : > { %v12836_v23 = vpop.eup %10409 }
 0x4f3   : > { %v12844_v3 = vpop.eup %10411  ;;  %v12853_v53 = vpop.xlane.xlu0 %2393 }
 0x4f5   : > { %2683 = vadd.xlane.f32.xlu1 %v12823_v57 }
 0x4f7   : > { %v2622_v60 = vpop.xlane.xlu0 %2621 }
 0x4f8   : > { %2685 = vadd.xlane.f32.xlu0 %v12826_v36  ;;  %10413 = vrcp.f32 %v2622_v60  ;;  %v16260_v60 = vld [vmem:[#allocation31_spill] sm:$0xff] }
 0x4f9   : > { %2689 = vadd.xlane.f32.xlu1 %v12830_v5 }
 0x4fc   : > { %2693 = vadd.xlane.f32.xlu0 %v12834_v19 }
 0x4fd   : > { %2687 = vadd.xlane.f32.xlu1 %v12836_v23 }
 0x500   : > { %2691 = vadd.xlane.f32.xlu0 %v12844_v3 }
 0x505   : > { %v10414_v31 = vpop.eup %10413 }
 0x50e   : > { %1389 = vrot.lane.b32.xlu1 %v16240_v51, %s16004_s19  ;;  %v16257_v51 = vld [vmem:[#allocation53_spill] sm:$0xff] }
 0x50f   : > { %v12859_v38 = vpop.xlane.xlu0 %2653  ;;  %v2433_v58 = vsub.f32 %v16257_v51, %v12678_v12  ;;  %v2796_v12 = vmul.f32 %v10414_v31, %v12652_v22  ;;  %v16262_v22 = vld [vmem:[#allocation25_spill] sm:$0xff] }
 0x511   : > { %v2535_v55 = vmul.f32 1.442695, %v2433_v58  ;;  %v16263_v58 = vld [vmem:[#allocation54_spill] sm:$0xff] }
 0x513   : > { %v2620_v46 = vpop.xlane.xlu1 %2619 }
 0x514   : > { %10415 = vrcp.f32 %v2620_v46 }
 0x516   : > { %1337 = vrot.lane.b32.xlu0 %v16256_v2, %s16006_s16 }
 0x517   : > { %v2626_v16 = vpop.xlane.xlu0 %2625  ;;  %v2652_v54 = vpop.xlane.xlu1 %2651 }
 0x518   : > { %10417 = vrcp.f32 %v2652_v54 }
 0x519   : > { %10419 = vrcp.f32 %v2626_v16  ;;  %v16261_v16 = vld [vmem:[#allocation37_spill] sm:$0xff] }
 0x51a   : > { %1387 = vrot.lane.b32.xlu0 %v16245_v40, %s16004_s19  ;;  %v2434_v40 = vsub.f32 %v16259_v21, %v12682_v39  ;;  %v16266_v21 = vld [vmem:[#allocation27_spill] sm:$0xff] }
 0x51b   : > { %v12865_v28 = vpop.xlane.xlu0 %2657  ;;  %v12870_v59 = vpop.xlane.xlu1 %2655 }
 0x51c   : > { %v2537_v46 = vmul.f32 1.442695, %v2434_v40 }
 0x51f   : > { %v2624_v26 = vpop.xlane.xlu0 %2623 }
 0x520   : > { %10421 = vrcp.f32 %v2624_v26 }
 0x521   : > { %v10416_v11 = vpop.eup %10415  ;;  %10423 = vpow2.f32 %v2535_v55  ;;  %v16265_v55 = vld [vmem:[#allocation29_spill] sm:$0xff] }
 0x522   : > { %v2795_v4 = vmul.f32 %v10416_v11, %v12669_v7  ;;  %10425 = vpow2.f32 %v2567_v24  ;;  %v2450_v7 = vsub.f32 %v12623_v63, %v12820_v41  ;;  %v2435_v63 = vsub.f32 %v16263_v58, %v12694_v45 }
 0x523   : > { %v2630_v9 = vpop.xlane.xlu0 %2629  ;;  %v12875_v56 = vpop.xlane.xlu1 %2661  ;;  %v2451_v45 = vsub.f32 %v12611_v44, %v12839_v20 }
 0x524   : > { %9422 = vmatprep.mubr.f32.mxu0 %v2795_v4  ;;  %10427 = vrcp.f32 %v2630_v9  ;;  %v2569_v41 = vmul.f32 1.442695, %v2450_v7  ;;  %v2539_v4 = vmul.f32 1.442695, %v2435_v63 }
 0x525   : > { %9423 = vmatmul.mubr.f32.vlgmr.msra.gmra.mxu0 %v2796_v12  ;;  %v10418_v35 = vpop.eup %10417  ;;  %v2571_v44 = vmul.f32 1.442695, %v2451_v45 }
 0x526   : > { %9503 = vmatpush3.msra.mxu0 %v16260_v60  ;;  %v2811_v51 = vmul.f32 %v10418_v35, %v12673_v13  ;;  %v10420_v31 = vpop.eup %10419  ;;  %v16267_v35 = vld [vmem:[#allocation33_spill] sm:$0xff] }
 0x527   : > { %9504 = vmatprep.subr.mxu0 %v16261_v16  ;;  %v12882_v39 = vpop.xlane.xlu0 %2659  ;;  %v2628_v54 = vpop.xlane.xlu1 %2627  ;;  %v2798_v9 = vmul.f32 %v10420_v31, %v12676_v32  ;;  %v16268_v32 = vld [vmem:[#allocation32_spill] sm:$0xff] }
 0x528   : > { %9505 = vmatpush3.msra.mxu0 %v16261_v16  ;;  %10429 = vrcp.f32 %v2628_v54  ;;  %9478 = vmatprep.mubr.f32.mxu1 %v2811_v51  ;;  %v16270_v54 = vld [vmem:[#allocation55_spill] sm:$0xff]  ;;  %v16272_v31 = vld [vmem:[#allocation56_spill] sm:$0xff] }
 0x529   : > { %9506 = vmatprep.subr.mxu0 %v16262_v22  ;;  %10431 = vpow2.f32 %v2537_v46  ;;  %v16269_v46 = vld [vmem:[#allocation49_spill] sm:$0xff]  ;;  %v2437_v51 = vsub.f32 %v16270_v54, %v12711_v6 }
 0x52a   : > { %9507 = vmatpush3.msra.mxu0 %v16262_v22 }
 0x52b   : > { %9508 = vmatprep.subr.mxu0 %v16264_v47  ;;  %v2634_v18 = vpop.xlane.xlu0 %2633  ;;  %v2632_v26 = vpop.xlane.xlu1 %2631 }
 0x52c   : > { %10433 = vrcp.f32 %v2634_v18  ;;  %9509 = vmatpush3.msra.mxu0 %v16264_v47 }
 0x52d   : > { %v10422_v13 = vpop.eup %10421  ;;  %10435 = vrcp.f32 %v2632_v26  ;;  %9510 = vmatprep.subr.mxu0 %v16265_v55  ;;  %v2543_v26 = vmul.f32 1.442695, %v2437_v51 }
 0x52e   : > { %9511 = vmatpush3.msra.mxu0 %v16265_v55  ;;  %v2797_v11 = vmul.f32 %v10422_v13, %v12692_v1  ;;  %10437 = vpow2.f32 %v2569_v41  ;;  %v12900_v12 = vpop.eup %10423  ;;  %v2452_v1 = vsub.f32 %v12632_v34, %v12828_v43  ;;  %v16271_v43 = vld [vmem:[#allocation38_spill] sm:$0xff]  ;;  %v2438_v13 = vsub.f32 %v16272_v31, %v12715_v0  ;;  %v16279_v31 = vld [vmem:[#allocation72_spill] sm:$0xff] }
 0x52f   : > { %9512 = vmatprep.subr.mxu0 %v16266_v21  ;;  %v2638_v40 = vpop.xlane.xlu0 %2637  ;;  %v2636_v24 = vpop.xlane.xlu1 %2635  ;;  %v2453_v0 = vsub.f32 %v12619_v52, %v12847_v48 }
 0x530   : > { %10439 = vrcp.f32 %v2638_v40  ;;  %9513 = vmatpush3.msra.mxu0 %v16266_v21  ;;  %9425 = vmatprep.mubr.f32.mxu0 %v2797_v11  ;;  %v12908_v20 = vpop.eup %10425  ;;  %v2573_v34 = vmul.f32 1.442695, %v2452_v1  ;;  %v16273_v1 = vld [vmem:[#allocation57_spill] sm:$0xff] }
 0x531   : > { %10441 = vrcp.f32 %v2636_v24  ;;  %9514 = vmatprep.subr.mxu0 %v16267_v35  ;;  %9426 = vmatmul.mubr.f32.gmra.mxu0 %v2798_v9  ;;  %v10428_v60 = vpop.eup %10427  ;;  %v2575_v9 = vmul.f32 1.442695, %v2453_v0 }
 0x532   : > { %9515 = vmatpush3.msra.mxu0 %v16267_v35  ;;  %2663 = vadd.xlane.f32.xlu1 %v12900_v12  ;;  %10443 = vpow2.f32 %v2539_v4  ;;  %v2800_v41 = vmul.f32 %v10428_v60, %v12699_v42 }
 0x533   : > { %9516 = vmatprep.subr.mxu0 %v16268_v32 }
 0x534   : > { %9517 = vmatpush3.msra.mxu0 %v16268_v32  ;;  %v2439_v32 = vsub.f32 %v16273_v1, %v12729_v25  ;;  %v16286_v1 = vld [vmem:[#allocation62_spill] sm:$0xff] }
 0x535   : > { %9518 = vmatprep.subr.mxu0 %v16269_v46  ;;  %v2640_v7 = vpop.xlane.xlu1 %2639  ;;  %v10430_v16 = vpop.eup %10429 }
 0x536   : > { %9519 = vmatpush3.msra.mxu0 %v16269_v46  ;;  %10445 = vrcp.f32 %v2640_v7  ;;  %2695 = vadd.xlane.f32.xlu1 %v12908_v20  ;;  %v2799_v58 = vmul.f32 %v10430_v16, %v12706_v50  ;;  %v12918_v63 = vpop.eup %10431  ;;  %v2547_v16 = vmul.f32 1.442695, %v2439_v32 }
 0x537   : > { %10447 = vpow2.f32 %v2571_v44  ;;  %9520 = vmatprep.subr.mxu0 %v16271_v43  ;;  %v2642_v22 = vpop.xlane.xlu0 %2641 }
 0x538   : > { %10449 = vrcp.f32 %v2642_v22  ;;  %9521 = vmatpush3.msra.mxu0 %v16271_v43  ;;  %9428 = vmatprep.mubr.f32.mxu0 %v2799_v58  ;;  %v16277_v58 = vld [vmem:[#allocation74_spill] sm:$0xff] }
 0x539   : > { %v10434_v47 = vpop.eup %10433  ;;  %2665 = vadd.xlane.f32.xlu0 %v12918_v63  ;;  %9429 = vmatmul.mubr.f32.gmra.mxu0 %v2800_v41  ;;  %10451 = vpow2.f32 %v2573_v34  ;;  %v16276_v34 = vld [vmem:[#allocation73_spill] sm:$0xff] }
 0x53a   : > { %v10436_v18 = vpop.eup %10435  ;;  %v2802_v6 = vmul.f32 %v10434_v47, %v12719_v29  ;;  %v2545_v29 = vmul.f32 1.442695, %v2438_v13  ;;  %v16278_v47 = vld [vmem:[#allocation63_spill] sm:$0xff] }
 0x53b   : > { %v2801_v50 = vmul.f32 %v10436_v18, %v12717_v33  ;;  %v12927_v55 = vpop.eup %10437  ;;  %v2455_v18 = vsub.f32 %v16278_v47, %v12851_v30  ;;  %v16280_v13 = vld [vmem:[#allocation59_spill] sm:$0xff] }
 0x53d   : > { %v10440_v11 = vpop.eup %10439  ;;  %2697 = vadd.xlane.f32.xlu0 %v12927_v55  ;;  %9431 = vmatprep.mubr.f32.mxu0 %v2801_v50  ;;  %v2644_v42 = vpop.xlane.xlu1 %2643  ;;  %v2441_v50 = vsub.f32 %v16280_v13, %v16279_v31  ;;  %v2579_v30 = vmul.f32 1.442695, %v2455_v18  ;;  %v16288_v13 = vld [vmem:[#allocation75_spill] sm:$0xff] }
 0x53e   : > { %v10442_v4 = vpop.eup %10441  ;;  %9432 = vmatmul.mubr.f32.gmra.mxu0 %v2802_v6  ;;  %10453 = vrcp.f32 %v2644_v42  ;;  %v2804_v45 = vmul.f32 %v10440_v11, %v12727_v8  ;;  %v2454_v8 = vsub.f32 %v12640_v15, %v12841_v10  ;;  %v16274_v15 = vld [vmem:[#allocation46_spill] sm:$0xff] }
 0x53f   : > { %10455 = vpow2.f32 %v2543_v26  ;;  %v2646_v21 = vpop.xlane.xlu0 %2645  ;;  %v2803_v33 = vmul.f32 %v10442_v4, %v12724_v62  ;;  %v12934_v40 = vpop.eup %10443  ;;  %v2551_v42 = vmul.f32 1.442695, %v2441_v50  ;;  %v16281_v4 = vld [vmem:[#allocation64_spill] sm:$0xff] }
 0x540   : > { %10457 = vrcp.f32 %v2646_v21  ;;  %v2577_v60 = vmul.f32 1.442695, %v2454_v8 }
 0x541   : > { %2667 = vadd.xlane.f32.xlu0 %v12934_v40  ;;  %9434 = vmatprep.mubr.f32.mxu0 %v2803_v33  ;;  %10459 = vpow2.f32 %v2545_v29  ;;  %v1342_v35 = vpop.permute.xlu1 %1341  ;;  %v16282_v33 = vld [vmem:[#allocation70_spill] sm:$0xff] }
 0x542   : > { %9435 = vmatmul.mubr.f32.gmra.mxu0 %v2804_v45  ;;  %10461 = vpow2.f32 %v2575_v9  ;;  %v2457_v45 = vsub.f32 %v16281_v4, %v12857_v17 }
 0x543   : > { %v10446_v24 = vpop.eup %10445  ;;  %10463 = vpow2.f32 %v2577_v60 }
 0x544   : > { %v12939_v44 = vpop.eup %10447  ;;  %v2805_v52 = vmul.f32 %v10446_v24, %v12737_v37  ;;  %10465 = vpow2.f32 %v2547_v16  ;;  %v2583_v0 = vmul.f32 1.442695, %v2457_v45  ;;  %v16283_v24 = vld [vmem:[#allocation51_spill] sm:$0xff] }
 0x545   : > { %v10450_v48 = vpop.eup %10449  ;;  %2699 = vadd.xlane.f32.xlu0 %v12939_v44  ;;  %v1392_v37 = vpop.permute.xlu1 %1391  ;;  %v2436_v9 = vsub.f32 %v16283_v24, %v16282_v33 }
 0x546   : > { %9437 = vmatprep.mubr.f32.mxu0 %v2805_v52  ;;  %v2806_v62 = vmul.f32 %v10450_v48, %v12741_v27  ;;  %v12950_v10 = vpop.eup %10451  ;;  %v16275_v27 = vld [vmem:[#allocation58_spill] sm:$0xff]  ;;  %v16284_v52 = vld [vmem:[#allocation65_spill] sm:$0xff] }
 0x547   : > { %v12946_v46 = vpop.xlane.xlu0 %2649  ;;  %1335 = vrot.lane.b32.xlu1 %v16274_v15, %s16006_s16  ;;  %v2440_v54 = vsub.f32 %v16275_v27, %v12733_v61  ;;  %v2456_v17 = vsub.f32 %v16284_v52, %v12849_v49 }
 0x548   : > { %9438 = vmatmul.mubr.f32.gmra.mxu0 %v2806_v62  ;;  %v16285_v62 = vld [vmem:[#allocation52_spill] sm:$0xff] }
 0x549   : > { %2701 = vadd.xlane.f32.xlu0 %v12950_v10  ;;  %v2549_v61 = vmul.f32 1.442695, %v2440_v54  ;;  %v1340_v6 = vpop.permute.xlu1 %1339  ;;  %v2442_v32 = vsub.f32 %v16286_v1, %v16285_v62  ;;  %v2581_v60 = vmul.f32 1.442695, %v2456_v17 }
 0x54b   : > { %v10454_v7 = vpop.eup %10453  ;;  %v1344_v25 = vpop.permute.xlu0 %1343  ;;  %1385 = vrot.lane.b32.xlu1 %v16256_v2, %s16004_s19  ;;  %10467 = vpow2.f32 %v2549_v61 }
 0x54c   : > { %v12957_v51 = vpop.eup %10455  ;;  %9468 = vmatprep.subr.mxu1 %v1344_v25  ;;  %v2807_v43 = vmul.f32 %v10454_v7, %v16276_v34  ;;  %10469 = vpow2.f32 %v2579_v30  ;;  %v16287_v7 = vld [vmem:[#allocation66_spill] sm:$0xff] }
 0x54d   : > { %v10458_v22 = vpop.eup %10457  ;;  %2671 = vadd.xlane.f32.xlu0 %v12957_v51  ;;  %9469 = vmatpush3.msra.mxu1 %v1344_v25  ;;  %10471 = vpow2.f32 %v2551_v42  ;;  %v2458_v16 = vsub.f32 %v16287_v7, %v12853_v53  ;;  %v16292_v7 = vld [vmem:[#allocation50_spill] sm:$0xff] }
 0x54e   : > { %9440 = vmatprep.mubr.f32.mxu0 %v2807_v43  ;;  %9470 = vmatprep.subr.mxu1 %v1342_v35  ;;  %v2808_v41 = vmul.f32 %v10458_v22, %v16277_v58  ;;  %v12966_v26 = vpop.eup %10459  ;;  %10473 = vpow2.f32 %v2583_v0 }
 0x54f   : > { %v1394_v2 = vpop.permute.xlu0 %1393  ;;  %1383 = vrot.lane.b32.xlu1 %v16274_v15, %s16004_s19  ;;  %9471 = vmatpush3.msra.mxu1 %v1342_v35  ;;  %v12971_v11 = vpop.eup %10461  ;;  %v2541_v35 = vmul.f32 1.442695, %v2436_v9  ;;  %v2585_v27 = vmul.f32 1.442695, %v2458_v16 }
 0x550   : > { %9441 = vmatmul.mubr.f32.gmra.mxu0 %v2808_v41  ;;  %9472 = vmatprep.subr.mxu1 %v1340_v6  ;;  %v12976_v29 = vpop.eup %10463 }
 0x551   : > { %2673 = vadd.xlane.f32.xlu0 %v12966_v26  ;;  %9522 = vmatprep.subr.mxu0 %v1394_v2  ;;  %v12979_v21 = vpop.eup %10465  ;;  %10475 = vpow2.f32 %v2541_v35 }
 0x552   : > { %9473 = vmatpush3.msra.mxu1 %v1340_v6  ;;  %9523 = vmatpush3.msra.mxu0 %v1394_v2  ;;  %10477 = vpow2.f32 %v2581_v60 }
 0x553   : > { %9524 = vmatprep.subr.mxu0 %v1392_v37 }
 0x554   : > { %9525 = vmatpush3.msra.mxu0 %v1392_v37  ;;  %v2553_v37 = vmul.f32 1.442695, %v2442_v32  ;;  %v16291_v32 = vld [vmem:[#allocation69_spill] sm:$0xff] }
 0x555   : > { %2703 = vadd.xlane.f32.xlu0 %v12971_v11 }
 0x556   : > { %10479 = vpow2.f32 %v2553_v37 }
 0x557   : > { %10481 = vpow2.f32 %v2585_v27 }
 0x558   : > { %v12984_v8 = vpop.eup %10467  ;;  %10483 = vrcp.f32 %v12946_v46 }
 0x559   : > { %2705 = vadd.xlane.f32.xlu0 %v12976_v29  ;;  %v12989_v48 = vpop.eup %10469 }
 0x55a   : > { %v12994_v15 = vpop.eup %10471 }
 0x55b   : > { %v12999_v49 = vpop.eup %10473 }
 0x55d   : > { %2675 = vadd.xlane.f32.xlu0 %v12979_v21 }
 0x55e   : > { %v13002_v54 = vpop.eup %10475 }
 0x55f   : > { %v13005_v25 = vpop.eup %10477 }
 0x561   : > { %2677 = vadd.xlane.f32.xlu0 %v12984_v8 }
 0x563   : > { %v13008_v34 = vpop.eup %10479 }
 0x564   : > { %v13012_v43 = vpop.eup %10481 }
 0x565   : > { %2707 = vadd.xlane.f32.xlu0 %v12989_v48  ;;  %v10484_v18 = vpop.eup %10483 }
 0x566   : > { %v2810_v50 = vmul.f32 %v10484_v18, %v16288_v13 }
 0x569   : > { %2679 = vadd.xlane.f32.xlu0 %v12994_v15 }
 0x56d   : > { %2711 = vadd.xlane.f32.xlu0 %v12999_v49 }
 0x573   : > { %2669 = vadd.xlane.f32.xlu1 %v13002_v54 }
 0x577   : > { %2709 = vadd.xlane.f32.xlu1 %v13005_v25 }
 0x57a   : > { %v2648_v53 = vpop.xlane.xlu1 %2647 }
 0x57b   : > { %10485 = vrcp.f32 %v2648_v53  ;;  %2681 = vadd.xlane.f32.xlu1 %v13008_v34 }
 0x57e   : > { %v2684_v22 = vpop.xlane.xlu1 %2683 }
 0x57f   : > { %10487 = vrcp.f32 %v2684_v22  ;;  %2713 = vadd.xlane.f32.xlu1 %v13012_v43 }
 0x580   : > { %10489 = vrcp.f32 %v12859_v38 }
 0x581   : > { %v2686_v58 = vpop.xlane.xlu0 %2685  ;;  %10491 = vrcp.f32 %v12870_v59  ;;  %v16289_v59 = vld [vmem:[#allocation67_spill] sm:$0xff] }
 0x582   : > { %v2690_v41 = vpop.xlane.xlu1 %2689  ;;  %10493 = vrcp.f32 %v12865_v28 }
 0x583   : > { %10495 = vrcp.f32 %v12882_v39 }
 0x584   : > { %10497 = vrcp.f32 %v12875_v56  ;;  %v16290_v56 = vld [vmem:[#allocation68_spill] sm:$0xff] }
 0x585   : > { %v2694_v61 = vpop.xlane.xlu0 %2693  ;;  %10499 = vrcp.f32 %v2686_v58  ;;  %v16293_v58 = vld [vmem:[#allocation71_spill] sm:$0xff] }
 0x586   : > { %v2688_v47 = vpop.xlane.xlu1 %2687 }
 0x587   : > { %10501 = vrcp.f32 %v2688_v47 }
 0x588   : > { %v10486_v6 = vpop.eup %10485 }
 0x589   : > { %v2692_v2 = vpop.xlane.xlu0 %2691  ;;  %v2809_v31 = vmul.f32 %v10486_v6, %v12818_v14 }
 0x58a   : > { %v1390_v46 = vpop.permute.xlu1 %1389 }
 0x58b   : > { %9443 = vmatprep.mubr.f32.mxu0 %v2809_v31  ;;  %9526 = vmatprep.subr.mxu0 %v1390_v46 }
 0x58c   : > { %v10488_v30 = vpop.eup %10487  ;;  %9444 = vmatmul.mubr.f32.gmra.mxu0 %v2810_v50 }
 0x58d   : > { %v1338_v42 = vpop.permute.xlu0 %1337  ;;  %9527 = vmatpush3.msra.mxu0 %v1390_v46  ;;  %v2827_v4 = vmul.f32 %v10488_v30, %v12823_v57  ;;  %v10490_v0 = vpop.eup %10489 }
 0x58e   : > { %9474 = vmatprep.subr.mxu1 %v1338_v42  ;;  %v10492_v33 = vpop.eup %10491  ;;  %v2812_v28 = vmul.f32 %v10490_v0, %v16289_v59 }
 0x58f   : > { %9475 = vmatpush3.msra.mxu1 %v1338_v42  ;;  %9534 = vmatprep.mubr.f32.mxu0 %v2827_v4  ;;  %v10494_v9 = vpop.eup %10493  ;;  %v2813_v39 = vmul.f32 %v10492_v33, %v16290_v56  ;;  %v13038_v33 = vpop.f32.mrf.mxu1 }
 0x590   : > { %v10496_v35 = vpop.eup %10495  ;;  %v2814_v60 = vmul.f32 %v10494_v9, %v16291_v32 }
 0x591   : > { %v1388_v45 = vpop.permute.xlu0 %1387  ;;  %v10498_v17 = vpop.eup %10497  ;;  %v2815_v16 = vmul.f32 %v10496_v35, %v16292_v7 }
 0x592   : > { %9528 = vmatprep.subr.mxu0 %v1388_v45  ;;  %v10500_v1 = vpop.eup %10499 }
 0x593   : > { %9529 = vmatpush3.msra.mxu0 %v1388_v45 }
 0x594   : > { %v10502_v37 = vpop.eup %10501 }
 0x595   : > { %v2829_v6 = vmul.f32 %v10502_v37, %v12836_v23 }
 0x5bb   : > { %v2664_v14 = vpop.xlane.xlu1 %2663 }
 0x5bc   : > { %10503 = vrcp.f32 %v2664_v14 }
 0x5bd   : > { %10505 = vrcp.f32 %v2690_v41  ;;  %v2816_v41 = vmul.f32 %v10498_v17, %v16293_v58 }
 0x5be   : > { %10507 = vrcp.f32 %v2692_v2 }
 0x5bf   : > { %v2696_v57 = vpop.xlane.xlu1 %2695 }
 0x5c2   : > { %v2666_v24 = vpop.xlane.xlu0 %2665 }
 0x5c3   : > { %10509 = vrcp.f32 %v2666_v24  ;;  %v1336_v38 = vpop.permute.xlu1 %1335 }
 0x5c4   : > { %10511 = vrcp.f32 %v2694_v61  ;;  %9476 = vmatprep.subr.mxu1 %v1336_v38  ;;  %v2828_v61 = vmul.f32 %v10500_v1, %v12826_v36 }
 0x5c5   : > { %10513 = vrcp.f32 %v2696_v57  ;;  %9477 = vmatpush3.msra.mxu1 %v1336_v38  ;;  %v13041_v38 = vpop.f32.mrf.mxu1 }
 0x5c6   : > { %v2698_v52 = vpop.xlane.xlu0 %2697  ;;  %9479 = vmatmul.mubr.f32.vlgmr.msra.gmra.mxu1 %v2812_v28 }
 0x5c7   : > { %9481 = vmatprep.mubr.f32.mxu1 %v2813_v39  ;;  %v1386_v62 = vpop.permute.xlu1 %1385  ;;  %10515 = vrcp.f32 %v2698_v52 }
 0x5c8   : > { %9530 = vmatprep.subr.mxu0 %v1386_v62 }
 0x5c9   : > { %9531 = vmatpush3.msra.mxu0 %v1386_v62  ;;  %v10504_v27 = vpop.eup %10503 }
 0x5ca   : > { %v2668_v53 = vpop.xlane.xlu0 %2667  ;;  %9482 = vmatmul.mubr.f32.gmra.mxu1 %v2814_v60  ;;  %v10506_v47 = vpop.eup %10505  ;;  %v2817_v18 = vmul.f32 %v10504_v27, %v12900_v12 }
 0x5cb   : > { %10517 = vrcp.f32 %v2668_v53  ;;  %9484 = vmatprep.mubr.f32.mxu1 %v2815_v16  ;;  %v1384_v22 = vpop.permute.xlu1 %1383  ;;  %v10508_v2 = vpop.eup %10507  ;;  %v2830_v13 = vmul.f32 %v10506_v47, %v12830_v5 }
 0x5cc   : > { %9532 = vmatprep.subr.mxu0 %v1384_v22  ;;  %v2831_v36 = vmul.f32 %v10508_v2, %v12844_v3 }
 0x5cd   : > { %9533 = vmatpush3.msra.mxu0 %v1384_v22 }
 0x5ce   : > { %v2700_v31 = vpop.xlane.xlu0 %2699  ;;  %9485 = vmatmul.mubr.f32.gmra.mxu1 %v2816_v41  ;;  %9535 = vmatmul.mubr.f32.vlgmr.msra.gmra.mxu0 %v2828_v61 }
 0x5cf   : > { %10519 = vrcp.f32 %v2700_v31  ;;  %9487 = vmatprep.mubr.f32.mxu1 %v2817_v18  ;;  %9537 = vmatprep.mubr.f32.mxu0 %v2829_v6 }
 0x5d0   : > { %v10510_v46 = vpop.eup %10509 }
 0x5d1   : > { %v10512_v50 = vpop.eup %10511  ;;  %v2818_v30 = vmul.f32 %v10510_v46, %v12918_v63 }
 0x5d2   : > { %v10514_v42 = vpop.eup %10513  ;;  %v2702_v4 = vpop.xlane.xlu0 %2701  ;;  %9538 = vmatmul.mubr.f32.gmra.mxu0 %v2830_v13  ;;  %v2832_v23 = vmul.f32 %v10512_v50, %v12834_v19 }
 0x5d3   : > { %10521 = vrcp.f32 %v2702_v4  ;;  %9488 = vmatmul.mubr.f32.gmra.mxu1 %v2818_v30  ;;  %9540 = vmatprep.mubr.f32.mxu0 %v2831_v36  ;;  %v2833_v45 = vmul.f32 %v10514_v42, %v12908_v20 }
 0x5d4   : > { %v10516_v12 = vpop.eup %10515 }
 0x5d5   : > { %v2834_v57 = vmul.f32 %v10516_v12, %v12927_v55  ;;  %v13044_v55 = vpop.f32.mrf.mxu1 }
 0x5d6   : > { %v2672_v14 = vpop.xlane.xlu0 %2671  ;;  %9541 = vmatmul.mubr.f32.gmra.mxu0 %v2832_v23 }
 0x5d7   : > { %9543 = vmatprep.mubr.f32.mxu0 %v2833_v45  ;;  %v13046_v9 = vpop.f32.mrf.mxu1 }
 0x5d8   : > { %v10518_v5 = vpop.eup %10517 }
 0x5d9   : > { %v2819_v63 = vmul.f32 %v10518_v5, %v12934_v40  ;;  %v13048_v35 = vpop.f32.mrf.mxu1 }
 0x5da   : > { %v2674_v3 = vpop.xlane.xlu0 %2673  ;;  %9544 = vmatmul.mubr.f32.gmra.mxu0 %v2834_v57 }
 0x5db   : > { %9490 = vmatprep.mubr.f32.mxu1 %v2819_v63  ;;  %v13054_v1 = vpop.f32.mrf.mxu1 }
 0x5dc   : > { %v10520_v0 = vpop.eup %10519 }
 0x5dd   : > { %v2835_v24 = vmul.f32 %v10520_v0, %v12939_v44  ;;  %v13060_v37 = vpop.f32.mrf.mxu1 }
 0x5de   : > { %v2704_v19 = vpop.xlane.xlu0 %2703 }
 0x5df   : > { %10523 = vrcp.f32 %v2704_v19  ;;  %9546 = vmatprep.mubr.f32.mxu0 %v2835_v24 }
 0x5e0   : > { %v10522_v20 = vpop.eup %10521 }
 0x5e1   : > { %v2836_v59 = vmul.f32 %v10522_v20, %v12950_v10 }
 0x5e2   : > { %v2706_v28 = vpop.xlane.xlu0 %2705 }
 0x5e3   : > { %10525 = vrcp.f32 %v2706_v28  ;;  %9547 = vmatmul.mubr.f32.gmra.mxu0 %v2836_v59 }
 0x5e5   : > { %v13051_v52 = vpop.f32.mrf.mxu0 }
 0x5e6   : > { %v2676_v40 = vpop.xlane.xlu0 %2675 }
 0x5e7   : > { %v13056_v32 = vpop.f32.mrf.mxu0 }
 0x5ea   : > { %v2678_v56 = vpop.xlane.xlu0 %2677 }
 0x5ec   : > { %v10524_v39 = vpop.eup %10523 }
 0x5ed   : > { %v2837_v44 = vmul.f32 %v10524_v39, %v12971_v11  ;;  %v13064_v11 = vpop.f32.mrf.mxu1 }
 0x5ee   : > { %v2708_v17 = vpop.xlane.xlu0 %2707 }
 0x5ef   : > { %10527 = vrcp.f32 %v2708_v17  ;;  %9549 = vmatprep.mubr.f32.mxu0 %v2837_v44  ;;  %v9380_v61 = vpop.f32.mrf.mxu1 }
 0x5f0   : > { %v10526_v10 = vpop.eup %10525  ;;  %10529 = vrcp.f32 %v2672_v14  ;;  %v3486_v46 = vsel %vm692_vm1, %v9380_v61, 0.0 }
 0x5f1   : > { %v2838_v62 = vmul.f32 %v10526_v10, %v12976_v29  ;;  %v13058_v60 = vpop.f32.mrf.mxu0  ;;  %v13075_v2 = vpop.f32.mrf.mxu1 }
 0x5f2   : > { %v2680_v7 = vpop.xlane.xlu0 %2679 }
 0x5f3   : > { %9550 = vmatmul.mubr.f32.gmra.mxu0 %v2838_v62  ;;  %v13062_v16 = vpop.f32.mrf.mxu0  ;;  %v9383_v30 = vpop.f32.mrf.mxu1 }
 0x5f4   : > { %v3500_v12 = vsel %vm692_vm1, %v9383_v30, 0.0 }
 0x5f5   : > { %v13088_v0 = vpop.f32.mrf.mxu1 }
 0x5f6   : > { %v2712_v58 = vpop.xlane.xlu0 %2711 }
 0x5f7   : > { %v9386_v59 = vpop.f32.mrf.mxu1 }
 0x5f9   : > { %v13066_v27 = vpop.f32.mrf.mxu0  ;;  %v13117_v61 = vpop.f32.mrf.mxu1 }
 0x5fb   : > { %v13068_v22 = vpop.f32.mrf.mxu0 }
 0x5fc   : > { %v10528_v53 = vpop.eup %10527  ;;  %v2670_v29 = vpop.xlane.xlu1 %2669 }
 0x5fd   : > { %10531 = vrcp.f32 %v2670_v29  ;;  %v2839_v41 = vmul.f32 %v10528_v53, %v12989_v48  ;;  %v10530_v23 = vpop.eup %10529  ;;  %v3553_v53 = vld [vmem:[%s15882_s6 + $0x10] sm:$0xff] }
 0x5fe   : > { %10533 = vrcp.f32 %v2674_v3  ;;  %v13071_v47 = vpop.f32.mrf.mxu0  ;;  %v2821_v24 = vmul.f32 %v10530_v23, %v12957_v51  ;;  %v3514_v51 = vsel %vm692_vm1, %v9386_v59, 0.0 }
 0x5ff   : > { %10535 = vrcp.f32 %v2676_v40  ;;  %9552 = vmatprep.mubr.f32.mxu0 %v2839_v41 }
 0x600   : > { %10537 = vrcp.f32 %v2712_v58  ;;  %v13073_v18 = vpop.f32.mrf.mxu0  ;;  %v2710_v6 = vpop.xlane.xlu1 %2709  ;;  %v3552_v58 = vld [vmem:[%s15882_s6 + $0x8] sm:$0xff] }
 0x601   : > { %10539 = vrcp.f32 %v2710_v6  ;;  %v9389_v6 = vpop.f32.mrf.mxu1 }
 0x602   : > { %v9436_v31 = vpop.f32.mrf.mxu0  ;;  %10541 = vrcp.f32 %v2678_v56 }
 0x603   : > { %v3487_v13 = vsel %vm692_vm1, %v9436_v31, 0.0  ;;  %10543 = vrcp.f32 %v2680_v7 }
 0x604   : > { %v13079_v48 = vadd.f32 %v3487_v13, %v3486_v46  ;;  %v2682_v50 = vpop.xlane.xlu1 %2681  ;;  %v13081_v36 = vpop.f32.mrf.mxu0 }
 0x605   : > { %10545 = vrcp.f32 %v2682_v50  ;;  %v13125_v50 = vpop.f32.mrf.mxu1 }
 0x608   : > { %v9439_v42 = vpop.f32.mrf.mxu0  ;;  %v2714_v4 = vpop.xlane.xlu1 %2713 }
 0x609   : > { %v3501_v45 = vsel %vm692_vm1, %v9439_v42, 0.0  ;;  %10547 = vrcp.f32 %v2714_v4  ;;  %v3431_v4 = vsel %vm692_vm1, %v13051_v52, 0.0  ;;  %v3445_v52 = vsel %vm692_vm1, %v13058_v60, 0.0 }
 0x60a   : > { %v10532_v14 = vpop.eup %10531  ;;  %v13085_v5 = vadd.f32 %v3501_v45, %v3500_v12  ;;  %v13091_v28 = vpop.f32.mrf.mxu0  ;;  %v3424_v12 = vsel %vm692_vm1, %v13056_v32, 0.0  ;;  %v3430_v45 = vsel %vm692_vm1, %v13038_v33, 0.0  ;;  %v3444_v33 = vsel %vm692_vm1, %v13044_v55, 0.0 }
 0x60b   : > { %v10534_v57 = vpop.eup %10533  ;;  %v2820_v63 = vmul.f32 %v10532_v14, %v13002_v54 }
 0x60c   : > { %v10536_v3 = vpop.eup %10535  ;;  %v2822_v40 = vmul.f32 %v10534_v57, %v12966_v26  ;;  %v3554_v26 = vld [vmem:[%s15882_s6 + $0x18] sm:$0xff] }
 0x60d   : > { %v10538_v19 = vpop.eup %10537  ;;  %9491 = vmatmul.mubr.f32.gmra.mxu1 %v2820_v63  ;;  %v2823_v54 = vmul.f32 %v10536_v3, %v12979_v21  ;;  %9558 = vmatprep.subr.mxu1 %v3554_v26  ;;  %v3423_v3 = vsel %vm692_vm1, %v13041_v38, 0.0  ;;  %v3437_v38 = vsel %vm692_vm1, %v13046_v9, 0.0  ;;  %v3451_v9 = vsel %vm692_vm1, %v13054_v1, 0.0 }
 0x60e   : > { %v10540_v20 = vpop.eup %10539  ;;  %9493 = vmatprep.mubr.f32.mxu1 %v2821_v24  ;;  %v2841_v17 = vmul.f32 %v10538_v19, %v12999_v49  ;;  %9559 = vmatpush3.msra.mxu1 %v3554_v26  ;;  %v3432_v24 = vadd.f32 %v3431_v4, %v3430_v45  ;;  %v3458_v26 = vsel %vm692_vm1, %v13048_v35, 0.0  ;;  %v3466_v45 = vsel %vm692_vm1, %v13073_v18, 0.0 }
 0x60f   : > { %v2840_v56 = vmul.f32 %v10540_v20, %v13005_v25  ;;  %v10542_v39 = vpop.eup %10541  ;;  %9560 = vmatprep.subr.mxu1 %v3553_v53  ;;  %v3425_v20 = vadd.f32 %v3424_v12, %v3423_v3 }
 0x610   : > { %v9442_v44 = vpop.f32.mrf.mxu0  ;;  %v10544_v10 = vpop.eup %10543  ;;  %v2824_v25 = vmul.f32 %v10542_v39, %v12984_v8  ;;  %9561 = vmatpush3.msra.mxu1 %v3553_v53  ;;  %v3452_v53 = vsel %vm692_vm1, %v13068_v22, 0.0  ;;  %v3472_v22 = vsel %vm692_vm1, %v13060_v37, 0.0 }
 0x611   : > { %v3515_v62 = vsel %vm692_vm1, %v9442_v44, 0.0  ;;  %9494 = vmatmul.mubr.f32.gmra.mxu1 %v2822_v40  ;;  %9553 = vmatmul.mubr.f32.gmra.mxu0 %v2840_v56  ;;  %v2825_v49 = vmul.f32 %v10544_v10, %v12994_v15  ;;  %v3551_v15 = vld [vmem:[%s15882_s6] sm:$0xff]  ;;  %v3438_v40 = vsel %vm692_vm1, %v13062_v16, 0.0  ;;  %v3459_v44 = vsel %vm692_vm1, %v13066_v27, 0.0 }
 0x612   : > { %v13099_v7 = vadd.f32 %v3515_v62, %v3514_v51  ;;  %9496 = vmatprep.mubr.f32.mxu1 %v2823_v54  ;;  %9555 = vmatprep.mubr.f32.mxu0 %v2841_v17  ;;  %v10546_v21 = vpop.eup %10545  ;;  %v13119_v31 = vpop.f32.mrf.mxu0  ;;  %v3446_v51 = vadd.f32 %v3445_v52, %v3444_v33 }
 0x613   : > { %v2826_v8 = vmul.f32 %v10546_v21, %v13008_v34  ;;  %9562 = vmatprep.subr.mxu1 %v3552_v58  ;;  %v3528_v34 = vsel %vm692_vm1, %v9389_v6, 0.0 }
 0x614   : > { %9563 = vmatpush3.msra.mxu1 %v3552_v58 }
 0x615   : > { %9497 = vmatmul.mubr.f32.gmra.mxu1 %v2824_v25  ;;  %9564 = vmatprep.subr.mxu1 %v3551_v15  ;;  %v3439_v25 = vadd.f32 %v3438_v40, %v3437_v38 }
 0x616   : > { %v10548_v29 = vpop.eup %10547  ;;  %9499 = vmatprep.mubr.f32.mxu1 %v2825_v49  ;;  %9565 = vmatpush3.msra.mxu1 %v3551_v15  ;;  %v3460_v49 = vadd.f32 %v3459_v44, %v3458_v26 }
 0x617   : > { %v2842_v41 = vmul.f32 %v10548_v29, %v13012_v43 }
 0x619   : > { %9500 = vmatmul.mubr.f32.gmra.mxu1 %v2826_v8  ;;  %9556 = vmatmul.mubr.f32.gmra.mxu0 %v2842_v41  ;;  %v3473_v41 = vsel %vm692_vm1, %v13071_v47, 0.0  ;;  %v3465_v47 = vsel %vm692_vm1, %v13064_v11, 0.0 }
 0x61a   : > { %v3474_v3 = vadd.f32 %v3473_v41, %v3472_v22  ;;  %v3467_v33 = vadd.f32 %v3466_v45, %v3465_v47 }
 0x64c   : > { %v9445_v46 = vpop.f32.mrf.mxu0 }
 0x64d   : > { %v3529_v43 = vsel %vm692_vm1, %v9445_v46, 0.0 }
 0x64e   : > { %v13123_v13 = vadd.f32 %v3529_v43, %v3528_v34  ;;  %v13133_v14 = vpop.f32.mrf.mxu0 }
 0x686   : > { %v9480_v30 = vpop.f32.mrf.mxu1 }
 0x687   : > { %v3433_v57 = vsel %vm692_vm1, %v9480_v30, 0.0 }
 0x688   : > { %v3199_v42 = vpop.f32.mrf.mxu1  ;;  %v3434_v56 = vadd.f32 %v3433_v57, %v3432_v24 }
 0x689   : > { %v3426_v19 = vsel %vm692_vm1, %v3199_v42, 0.0  ;;  %v3453_v42 = vadd.f32 %v3452_v53, %v3451_v9  ;;  %v3480_v9 = vsel %vm692_vm1, %v13081_v36, 0.0 }
 0x68a   : > { %v9483_v23 = vpop.f32.mrf.mxu1  ;;  %v3427_v54 = vadd.f32 %v3426_v19, %v3425_v20 }
 0x68b   : > { %v3447_v60 = vsel %vm692_vm1, %v9483_v23, 0.0 }
 0x68c   : > { %v3209_v63 = vpop.f32.mrf.mxu1  ;;  %v3448_v29 = vadd.f32 %v3447_v60, %v3446_v51 }
 0x68d   : > { %v3440_v55 = vsel %vm692_vm1, %v3209_v63, 0.0 }
 0x68e   : > { %v9486_v59 = vpop.f32.mrf.mxu1  ;;  %v9536_v32 = vpop.f32.mrf.mxu0  ;;  %v3441_v15 = vadd.f32 %v3440_v55, %v3439_v25 }
 0x68f   : > { %v3435_v39 = vsel %vm692_vm1, %v9536_v32, 0.0  ;;  %v3461_v35 = vsel %vm692_vm1, %v9486_v59, 0.0 }
 0x690   : > { %v3219_v17 = vpop.f32.mrf.mxu1  ;;  %v3344_v10 = vpop.f32.mrf.mxu0  ;;  %v3436_v62 = vadd.f32 %v3435_v39, %v3434_v56  ;;  %v3462_v57 = vadd.f32 %v3461_v35, %v3460_v49 }
 0x691   : > { %v3428_v16 = vsel %vm692_vm1, %v3344_v10, 0.0  ;;  %v3454_v34 = vsel %vm692_vm1, %v3219_v17, 0.0 }
 0x692   : > { %v3429_v21 = vadd.f32 %v3428_v16, %v3427_v54  ;;  %v9539_v27 = vpop.f32.mrf.mxu0  ;;  %v3536_v1 = vmul.f32 0.25, %v3436_v62  ;;  %v3455_v24 = vadd.f32 %v3454_v34, %v3453_v42  ;;  %v3508_v42 = vsel %vm692_vm1, %v13119_v31, 0.0 }
 0x693   : > { %v9489_v58 = vpop.f32.mrf.mxu1  ;;  %v3449_v8 = vsel %vm692_vm1, %v9539_v27, 0.0  ;;  %v3479_v27 = vsel %vm692_vm1, %v13075_v2, 0.0 }
 0x694   : > { %v3535_v6 = vmul.f32 0.25, %v3429_v21  ;;  %v3354_v46 = vpop.f32.mrf.mxu0  ;;  %v3450_v43 = vadd.f32 %v3449_v8, %v3448_v29  ;;  %v3475_v37 = vsel %vm692_vm1, %v9489_v58, 0.0  ;;  %v3481_v53 = vadd.f32 %v3480_v9, %v3479_v27  ;;  %v3771_v27 = vld [vmem:[%s15884_s8] sm:$0xff] }
 0x695   : > { %v3442_v30 = vsel %vm692_vm1, %v3354_v46, 0.0  ;;  %v3229_v4 = vpop.f32.mrf.mxu1  ;;  %v3476_v56 = vadd.f32 %v3475_v37, %v3474_v3  ;;  %v3494_v8 = vsel %vm692_vm1, %v13091_v28, 0.0  ;;  %v3493_v46 = vsel %vm692_vm1, %v13088_v0, 0.0 }
 0x696   : > { %v3443_v23 = vadd.f32 %v3442_v30, %v3441_v15  ;;  %v9542_v12 = vpop.f32.mrf.mxu0  ;;  %9566 = vmatprep.mubr.msk.f32.mxu1 %vm692_vm1, %v3535_v6  ;;  %v3538_v52 = vmul.f32 0.25, %v3450_v43  ;;  %v3468_v59 = vsel %vm692_vm1, %v3229_v4, 0.0 }
 0x697   : > { %v3463_v63 = vsel %vm692_vm1, %v9542_v12, 0.0  ;;  %9567 = vmatmul.mubr.msk.f32.vlgmr.msra.gmra.mxu1 %vm692_vm1, %v3536_v1  ;;  %v3469_v38 = vadd.f32 %v3468_v59, %v3467_v33  ;;  %v3521_v59 = vsel %vm692_vm1, %v13125_v50, 0.0 }
 0x698   : > { %v3537_v19 = vmul.f32 0.25, %v3443_v23  ;;  %v3364_v20 = vpop.f32.mrf.mxu0  ;;  %v3464_v32 = vadd.f32 %v3463_v63, %v3462_v57  ;;  %v3507_v23 = vsel %vm692_vm1, %v13117_v61, 0.0  ;;  %v3522_v61 = vsel %vm692_vm1, %v13133_v14, 0.0  ;;  %v3774_v14 = vld [vmem:[%s15884_s8 + $0x18] sm:$0xff] }
 0x699   : > { %v3456_v11 = vsel %vm692_vm1, %v3364_v20, 0.0  ;;  %9590 = vmatprep.subr.mxu0 %v3774_v14 }
 0x69a   : > { %v3457_v40 = vadd.f32 %v3456_v11, %v3455_v24  ;;  %v9545_v18 = vpop.f32.mrf.mxu0  ;;  %9569 = vmatprep.mubr.msk.f32.mxu1 %vm692_vm1, %v3537_v19  ;;  %v3540_v60 = vmul.f32 0.25, %v3464_v32  ;;  %v3509_v24 = vadd.f32 %v3508_v42, %v3507_v23  ;;  %9591 = vmatpush3.msra.mxu0 %v3774_v14 }
 0x69b   : > { %v3477_v39 = vsel %vm692_vm1, %v9545_v18, 0.0  ;;  %9570 = vmatmul.mubr.msk.f32.gmra.mxu1 %vm692_vm1, %v3538_v52 }
 0x69c   : > { %v3539_v44 = vmul.f32 0.25, %v3457_v40  ;;  %v3374_v54 = vpop.f32.mrf.mxu0  ;;  %v3478_v17 = vadd.f32 %v3477_v39, %v3476_v56 }
 0x69d   : > { %v3470_v10 = vsel %vm692_vm1, %v3374_v54, 0.0 }
 0x69e   : > { %v3471_v51 = vadd.f32 %v3470_v10, %v3469_v38  ;;  %9572 = vmatprep.mubr.msk.f32.mxu1 %vm692_vm1, %v3539_v44  ;;  %v3542_v62 = vmul.f32 0.25, %v3478_v17  ;;  %v3523_v44 = vadd.f32 %v3522_v61, %v3521_v59  ;;  %v16300_v61 = vld [vmem:[#allocation11_spill] sm:$0xff]  ;;  %v16301_v59 = vld [vmem:[#allocation12_spill] sm:$0xff] }
 0x69f   : > { %9573 = vmatmul.mubr.msk.f32.gmra.mxu1 %vm692_vm1, %v3540_v60 }
 0x6a0   : > { %v3541_v55 = vmul.f32 0.25, %v3471_v51  ;;  %v3773_v51 = vld [vmem:[%s15884_s8 + $0x10] sm:$0xff] }
 0x6a1   : > { %9592 = vmatprep.subr.mxu0 %v3773_v51 }
 0x6a2   : > { %9575 = vmatprep.mubr.msk.f32.mxu1 %vm692_vm1, %v3541_v55  ;;  %9593 = vmatpush3.msra.mxu0 %v3773_v51  ;;  %v16305_v51 = vld [vmem:[#allocation16_spill] sm:$0xff] }
 0x6a3   : > { %9576 = vmatmul.mubr.msk.f32.gmra.mxu1 %vm692_vm1, %v3542_v62  ;;  %v9548_v16 = vpop.f32.mrf.mxu0 }
 0x6a4   : > { %v3491_v15 = vsel %vm692_vm1, %v9548_v16, 0.0 }
 0x6a5   : > { %v3384_v26 = vpop.f32.mrf.mxu0 }
 0x6a6   : > { %v3484_v2 = vsel %vm692_vm1, %v3384_v26, 0.0 }
 0x6b3   : > { %v9551_v25 = vpop.f32.mrf.mxu0 }
 0x6b4   : > { %v3505_v0 = vsel %vm692_vm1, %v9551_v25, 0.0  ;;  %v3772_v25 = vld [vmem:[%s15884_s8 + $0x8] sm:$0xff] }
 0x6b5   : > { %v3394_v35 = vpop.f32.mrf.mxu0  ;;  %9594 = vmatprep.subr.mxu0 %v3772_v25 }
 0x6b6   : > { %v3498_v57 = vsel %vm692_vm1, %v3394_v35, 0.0  ;;  %9595 = vmatpush3.msra.mxu0 %v3772_v25  ;;  %v3993_v25 = vld [vmem:[%s15886_s10 + $0x10] sm:$0xff] }
 0x6b7   : > { %9596 = vmatprep.subr.mxu0 %v3771_v27 }
 0x6b8   : > { %9597 = vmatpush3.msra.mxu0 %v3771_v27 }
 0x6cd   : > { %v9492_v21 = vpop.f32.mrf.mxu1 }
 0x6ce   : > { %v3489_v49 = vsel %vm692_vm1, %v9492_v21, 0.0 }
 0x6cf   : > { %v3490_v29 = vadd.f32 %v3489_v49, %v13079_v48  ;;  %v3239_v58 = vpop.f32.mrf.mxu1  ;;  %v3495_v48 = vadd.f32 %v3494_v8, %v3493_v46  ;;  %v3996_v8 = vld [vmem:[%s15886_s10 + $0x28] sm:$0xff] }
 0x6d0   : > { %v3482_v41 = vsel %vm692_vm1, %v3239_v58, 0.0  ;;  %v3997_v58 = vld [vmem:[%s15886_s10 + $0x30] sm:$0xff] }
 0x6d1   : > { %v3483_v36 = vadd.f32 %v3482_v41, %v3481_v53  ;;  %v9495_v6 = vpop.f32.mrf.mxu1  ;;  %v3492_v1 = vadd.f32 %v3491_v15, %v3490_v29  ;;  %v9554_v28 = vpop.f32.mrf.mxu0  ;;  %v3998_v29 = vld [vmem:[%s15886_s10 + $0x38] sm:$0xff]  ;;  %v3995_v41 = vld [vmem:[%s15886_s10 + $0x20] sm:$0xff] }
 0x6d2   : > { %v3503_v34 = vsel %vm692_vm1, %v9495_v6, 0.0  ;;  %v3519_v32 = vsel %vm692_vm1, %v9554_v28, 0.0  ;;  %9622 = vmatprep.subr.mxu1 %v3998_v29  ;;  %v13256_v15 = vld [vmem:[%s15883_s7] ss:$0 sm:$0xff] }
 0x6d3   : > { %v3485_v43 = vadd.f32 %v3484_v2, %v3483_v36  ;;  %v3504_v30 = vadd.f32 %v3503_v34, %v13085_v5  ;;  %v3249_v22 = vpop.f32.mrf.mxu1  ;;  %v3544_v63 = vmul.f32 0.25, %v3492_v1  ;;  %v3404_v19 = vpop.f32.mrf.mxu0  ;;  %9623 = vmatpush3.msra.mxu1 %v3998_v29  ;;  %v16294_v1 = vld [vmem:[#allocation5_spill] sm:$0xff] }
 0x6d4   : > { %v3496_v4 = vsel %vm692_vm1, %v3249_v22, 0.0  ;;  %v3512_v56 = vsel %vm692_vm1, %v3404_v19, 0.0  ;;  %9624 = vmatprep.subr.mxu1 %v3997_v58 }
 0x6d5   : > { %v3543_v12 = vmul.f32 0.25, %v3485_v43  ;;  %v3497_v47 = vadd.f32 %v3496_v4, %v3495_v48  ;;  %v9498_v45 = vpop.f32.mrf.mxu1  ;;  %v3506_v3 = vadd.f32 %v3505_v0, %v3504_v30  ;;  %9625 = vmatpush3.msra.mxu1 %v3997_v58  ;;  %v16295_v48 = vld [vmem:[#allocation6_spill] sm:$0xff]  ;;  %v16296_v4 = vld [vmem:[#allocation7_spill] sm:$0xff]  ;;  %v16297_v0 = vld [vmem:[#allocation8_spill] sm:$0xff] }
 0x6d6   : > { %v3517_v5 = vsel %vm692_vm1, %v9498_v45, 0.0  ;;  %9626 = vmatprep.subr.mxu1 %v3996_v8 }
 0x6d7   : > { %v3499_v37 = vadd.f32 %v3498_v57, %v3497_v47  ;;  %v3518_v31 = vadd.f32 %v3517_v5, %v13099_v7  ;;  %v3259_v20 = vpop.f32.mrf.mxu1  ;;  %9578 = vmatprep.mubr.msk.f32.mxu1 %vm692_vm1, %v3543_v12  ;;  %v3546_v7 = vmul.f32 0.25, %v3506_v3  ;;  %9627 = vmatpush3.msra.mxu1 %v3996_v8  ;;  %v16298_v3 = vld [vmem:[#allocation9_spill] sm:$0xff]  ;;  %v3992_v8 = vld [vmem:[%s15886_s10 + $0x8] sm:$0xff] }
 0x6d8   : > { %v3510_v52 = vsel %vm692_vm1, %v3259_v20, 0.0  ;;  %9579 = vmatmul.mubr.msk.f32.gmra.mxu1 %vm692_vm1, %v3544_v63  ;;  %9628 = vmatprep.subr.mxu1 %v3995_v41 }
 0x6d9   : > { %v3545_v11 = vmul.f32 0.25, %v3499_v37  ;;  %v3511_v33 = vadd.f32 %v3510_v52, %v3509_v24  ;;  %v9501_v40 = vpop.f32.mrf.mxu1  ;;  %v9557_v18 = vpop.f32.mrf.mxu0  ;;  %v3520_v39 = vadd.f32 %v3519_v32, %v3518_v31  ;;  %9629 = vmatpush3.msra.mxu1 %v3995_v41  ;;  %v16299_v24 = vld [vmem:[#allocation10_spill] sm:$0xff] }
 0x6da   : > { %v3531_v38 = vsel %vm692_vm1, %v9501_v40, 0.0  ;;  %v3533_v62 = vsel %vm692_vm1, %v9557_v18, 0.0 }
 0x6db   : > { %v3513_v54 = vadd.f32 %v3512_v56, %v3511_v33  ;;  %v3532_v50 = vadd.f32 %v3531_v38, %v13123_v13  ;;  %v3269_v60 = vpop.f32.mrf.mxu1  ;;  %v3414_v17 = vpop.f32.mrf.mxu0  ;;  %9581 = vmatprep.mubr.msk.f32.mxu1 %vm692_vm1, %v3545_v11  ;;  %v3548_v13 = vmul.f32 0.25, %v3520_v39  ;;  %v16302_v56 = vld [vmem:[#allocation13_spill] sm:$0xff]  ;;  %v16303_v38 = vld [vmem:[#allocation14_spill] sm:$0xff] }
 0x6dc   : > { %v3524_v10 = vsel %vm692_vm1, %v3269_v60, 0.0  ;;  %9582 = vmatmul.mubr.msk.f32.gmra.mxu1 %vm692_vm1, %v3546_v7  ;;  %v3526_v9 = vsel %vm692_vm1, %v3414_v17, 0.0  ;;  %v16304_v17 = vld [vmem:[#allocation15_spill] sm:$0xff] }
 0x6dd   : > { %v3547_v55 = vmul.f32 0.25, %v3513_v54  ;;  %v3525_v16 = vadd.f32 %v3524_v10, %v3523_v44  ;;  %v3534_v26 = vadd.f32 %v3533_v62, %v3532_v50 }
 0x6df   : > { %v3527_v21 = vadd.f32 %v3526_v9, %v3525_v16  ;;  %9584 = vmatprep.mubr.msk.f32.mxu1 %vm692_vm1, %v3547_v55  ;;  %v3550_v53 = vmul.f32 0.25, %v3534_v26 }
 0x6e0   : > { %9585 = vmatmul.mubr.msk.f32.gmra.mxu1 %vm692_vm1, %v3548_v13  ;;  %v3994_v13 = vld [vmem:[%s15886_s10 + $0x18] sm:$0xff] }
 0x6e1   : > { %v3549_v49 = vmul.f32 0.25, %v3527_v21  ;;  %9630 = vmatprep.subr.mxu1 %v3994_v13  ;;  %v16306_v21 = vld [vmem:[#allocation17_spill] sm:$0xff] }
 0x6e2   : > { %9631 = vmatpush3.msra.mxu1 %v3994_v13 }
 0x6e3   : > { %9587 = vmatprep.mubr.msk.f32.mxu1 %vm692_vm1, %v3549_v49  ;;  %9632 = vmatprep.subr.mxu1 %v3993_v25  ;;  %v16307_v49 = vld [vmem:[#allocation18_spill] sm:$0xff] }
 0x6e4   : > { %9588 = vmatmul.mubr.msk.f32.gmra.mxu1 %vm692_vm1, %v3550_v53 }
 0x6e5   : > { %9633 = vmatpush3.msra.mxu1 %v3993_v25 }
 0x6e6   : > { %9634 = vmatprep.subr.mxu1 %v3992_v8 }
 0x6e7   : > { %9635 = vmatpush3.msra.mxu1 %v3992_v8  ;;  %v8114_v8 = vld [vmem:[%s15880_s4 + $0xb8] sm:$0xff] }
 0x757   : > { %v9568_v35 = vpop.f32.mrf.mxu1 }
 0x758   : > { %v3682_v36 = vadd.f32 %v9568_v35, %v13256_v15  ;;  %v3991_v35 = vld [vmem:[%s15886_s10] sm:$0xff] }
 0x759   : > { %v3676_v6 = vpop.f32.mrf.mxu1  ;;  %9636 = vmatprep.subr.mxu1 %v3991_v35 }
 0x75a   : > { %v3677_v46 = vadd.f32 %v13256_v15, %v3676_v6  ;;  %v13264_v43 = vadd.f32 %v3682_v36, %v16295_v48  ;;  %v16308_v36 = vld [vmem:[#allocation19_spill] sm:$0xff]  ;;  %9637 = vmatpush3.msra.mxu1 %v3991_v35  ;;  %v13373_v48 = vld [vmem:[%s15885_s9] ss:$0 sm:$0xff] }
 0x75b   : > { %v9571_v2 = vpop.f32.mrf.mxu1  ;;  %9662 = vmatprep.subr.mxu1 %v8114_v8 }
 0x75c   : > { %v13261_v34 = vadd.f32 %v3677_v46, %v16294_v1  ;;  %v3692_v30 = vadd.f32 %v9571_v2, %v13256_v15  ;;  %v16309_v46 = vld [vmem:[#allocation20_spill] sm:$0xff]  ;;  %v8113_v1 = vld [vmem:[%s15880_s4 + $0xb0] sm:$0xff] }
 0x75d   : > { %v3686_v28 = vpop.f32.mrf.mxu1  ;;  %4319 = vmatprep.subr.mxu0 %v8113_v1  ;;  %v8111_v1 = vld [vmem:[%s15880_s4 + $0xa0] sm:$0xff] }
 0x75e   : > { %v3687_v22 = vadd.f32 %v13256_v15, %v3686_v28  ;;  %9598 = vmatprep.mubr.msk.f32.mxu0 %vm692_vm1, %v13261_v34  ;;  %v13276_v12 = vadd.f32 %v3692_v30, %v16297_v0 }
 0x75f   : > { %v9574_v42 = vpop.f32.mrf.mxu1  ;;  %9599 = vmatmul.mubr.msk.f32.vlgmr.msra.gmra.mxu0 %vm692_vm1, %v13264_v43 }
 0x760   : > { %v13273_v23 = vadd.f32 %v3687_v22, %v16296_v4  ;;  %v3702_v47 = vadd.f32 %v9574_v42, %v13256_v15 }
 0x761   : > { %v3696_v45 = vpop.f32.mrf.mxu1 }
 0x762   : > { %v3697_v57 = vadd.f32 %v13256_v15, %v3696_v45  ;;  %9601 = vmatprep.mubr.msk.f32.mxu0 %vm692_vm1, %v13273_v23  ;;  %v13288_v37 = vadd.f32 %v3702_v47, %v16299_v24 }
 0x763   : > { %v9577_v63 = vpop.f32.mrf.mxu1  ;;  %9602 = vmatmul.mubr.msk.f32.gmra.mxu0 %vm692_vm1, %v13276_v12 }
 0x764   : > { %v13285_v5 = vadd.f32 %v3697_v57, %v16298_v3  ;;  %v3712_v19 = vadd.f32 %v9577_v63, %v13256_v15 }
 0x765   : > { %v3706_v31 = vpop.f32.mrf.mxu1 }
 0x766   : > { %v3707_v20 = vadd.f32 %v13256_v15, %v3706_v31  ;;  %9604 = vmatprep.mubr.msk.f32.mxu0 %vm692_vm1, %v13285_v5  ;;  %v13300_v32 = vadd.f32 %v3712_v19, %v16301_v59 }
 0x767   : > { %9605 = vmatmul.mubr.msk.f32.gmra.mxu0 %vm692_vm1, %v13288_v37 }
 0x768   : > { %v13297_v52 = vadd.f32 %v3707_v20, %v16300_v61 }
 0x76a   : > { %9607 = vmatprep.mubr.msk.f32.mxu0 %vm692_vm1, %v13297_v52 }
 0x76b   : > { %9608 = vmatmul.mubr.msk.f32.gmra.mxu0 %vm692_vm1, %v13300_v32 }
 0x798   : > { %v9580_v11 = vpop.f32.mrf.mxu1 }
 0x799   : > { %v3722_v33 = vadd.f32 %v9580_v11, %v13256_v15 }
 0x79a   : > { %v3716_v40 = vpop.f32.mrf.mxu1 }
 0x79b   : > { %v3717_v18 = vadd.f32 %v13256_v15, %v3716_v40  ;;  %v13312_v14 = vadd.f32 %v3722_v33, %v16303_v38 }
 0x79c   : > { %v9583_v7 = vpop.f32.mrf.mxu1 }
 0x79d   : > { %v13309_v39 = vadd.f32 %v3717_v18, %v16302_v56  ;;  %v3732_v44 = vadd.f32 %v9583_v7, %v13256_v15 }
 0x79e   : > { %v3726_v54 = vpop.f32.mrf.mxu1 }
 0x79f   : > { %v3727_v50 = vadd.f32 %v13256_v15, %v3726_v54  ;;  %9610 = vmatprep.mubr.msk.f32.mxu0 %vm692_vm1, %v13309_v39  ;;  %v13324_v55 = vadd.f32 %v3732_v44, %v16305_v51 }
 0x7a0   : > { %v9586_v60 = vpop.f32.mrf.mxu1  ;;  %9611 = vmatmul.mubr.msk.f32.gmra.mxu0 %vm692_vm1, %v13312_v14 }
 0x7a1   : > { %v13321_v10 = vadd.f32 %v3727_v50, %v16304_v17  ;;  %v3742_v62 = vadd.f32 %v9586_v60, %v13256_v15 }
 0x7a2   : > { %v3736_v16 = vpop.f32.mrf.mxu1 }
 0x7a3   : > { %v3737_v26 = vadd.f32 %v13256_v15, %v3736_v16  ;;  %9613 = vmatprep.mubr.msk.f32.mxu0 %vm692_vm1, %v13321_v10  ;;  %v13342_v53 = vadd.f32 %v3742_v62, %v16307_v49 }
 0x7a4   : > { %v9589_v9 = vpop.f32.mrf.mxu1  ;;  %9614 = vmatmul.mubr.msk.f32.gmra.mxu0 %vm692_vm1, %v13324_v55 }
 0x7a5   : > { %v13339_v27 = vadd.f32 %v3737_v26, %v16306_v21  ;;  %v3752_v29 = vadd.f32 %v9589_v9, %v13256_v15 }
 0x7a6   : > { %v3746_v58 = vpop.f32.mrf.mxu1 }
 0x7a7   : > { %v3747_v41 = vadd.f32 %v13256_v15, %v3746_v58  ;;  %9616 = vmatprep.mubr.msk.f32.mxu0 %vm692_vm1, %v13339_v27  ;;  %v13360_v2 = vadd.f32 %v3752_v29, %v16309_v46  ;;  %v16310_v15 = vmov 0.0   ;;  %v8112_v58 = vld [vmem:[%s15880_s4 + $0xa8] sm:$0xff]  ;;  %v8109_v46 = vld [vmem:[%s15880_s4 + $0x90] sm:$0xff] }
 0x7a8   : > { %9617 = vmatmul.mubr.msk.f32.gmra.mxu0 %vm692_vm1, %v13342_v53 }
 0x7a9   : > { %v13357_v6 = vadd.f32 %v3747_v41, %v16308_v36  ;;  %v8110_v41 = vld [vmem:[%s15880_s4 + $0x98] sm:$0xff]  ;;  %4320 = vmatpush1.msra.mxu0 %v8112_v58 }
 0x7aa   : > { %4321 = vmatprep.subr.mxu0 %v8110_v41 }
 0x7ab   : > { %9619 = vmatprep.mubr.msk.f32.mxu0 %vm692_vm1, %v13357_v6  ;;  %4322 = vmatpush1.msra.mxu0 %v8109_v46 }
 0x7ac   : > { %9620 = vmatmul.mubr.msk.f32.gmra.mxu0 %vm692_vm1, %v13360_v2 }
 0x7ad   : > { %4359 = vmatprep.mubr.f32.mxu0 %v16310_v15 }
 0x81f   : > { %v9600_v30 = vpop.f32.mrf.mxu0 }
 0x820   : > { %v3902_v28 = vadd.f32 %v9600_v30, %v13373_v48  ;;  %v8107_v30 = vld [vmem:[%s15880_s4 + $0x80] sm:$0xff] }
 0x821   : > { %v3896_v22 = vpop.f32.mrf.mxu0  ;;  %4323 = vmatprep.subr.mxu0 %v8107_v30 }
 0x822   : > { %v3897_v42 = vadd.f32 %v13373_v48, %v3896_v22  ;;  %v3976_v47 = vmax.f32 %v3902_v28, 0.0 }
 0x823   : > { %v9603_v4 = vpop.f32.mrf.mxu0 }
 0x824   : > { %v3975_v0 = vmax.f32 %v3897_v42, 0.0  ;;  %v3912_v45 = vadd.f32 %v9603_v4, %v13373_v48 }
 0x825   : > { %v3906_v57 = vpop.f32.mrf.mxu0 }
 0x826   : > { %v3907_v63 = vadd.f32 %v13373_v48, %v3906_v57  ;;  %9638 = vmatprep.mubr.msk.f32.mxu1 %vm4006_vm2, %v3975_v0  ;;  %v3978_v19 = vmax.f32 %v3912_v45, 0.0  ;;  %v8106_v0 = vld [vmem:[%s15880_s4 + $0x78] sm:$0xff]  ;;  %v8108_v57 = vld [vmem:[%s15880_s4 + $0x88] sm:$0xff] }
 0x827   : > { %v9606_v3 = vpop.f32.mrf.mxu0  ;;  %9639 = vmatmul.mubr.msk.f32.vlgmr.msra.gmra.mxu1 %vm4006_vm2, %v3976_v47  ;;  %v8104_v47 = vld [vmem:[%s15880_s4 + $0x68] sm:$0xff]  ;;  %4324 = vmatpush1.msra.mxu0 %v8106_v0 }
 0x828   : > { %v3977_v24 = vmax.f32 %v3907_v63, 0.0  ;;  %v3922_v31 = vadd.f32 %v9606_v3, %v13373_v48  ;;  %9663 = vmatpush3.msra.mxu1 %v8114_v8  ;;  %v8103_v63 = vld [vmem:[%s15880_s4 + $0x60] sm:$0xff]  ;;  %4325 = vmatprep.subr.mxu0 %v8104_v47 }
 0x829   : > { %v3916_v20 = vpop.f32.mrf.mxu0  ;;  %9664 = vmatprep.subr.mxu1 %v8111_v1  ;;  %4326 = vmatpush1.msra.mxu0 %v8103_v63 }
 0x82a   : > { %v3917_v61 = vadd.f32 %v13373_v48, %v3916_v20  ;;  %9641 = vmatprep.mubr.msk.f32.mxu1 %vm4006_vm2, %v3977_v24  ;;  %v3980_v33 = vmax.f32 %v3922_v31, 0.0  ;;  %9665 = vmatpush3.msra.mxu1 %v8111_v1 }
 0x82b   : > { %v9609_v59 = vpop.f32.mrf.mxu0  ;;  %9642 = vmatmul.mubr.msk.f32.gmra.mxu1 %vm4006_vm2, %v3978_v19  ;;  %9666 = vmatprep.subr.mxu1 %v8108_v57  ;;  %v13443_v19 = vld [vmem:[%s15887_s11] ss:$0 sm:$0xff] }
 0x82c   : > { %v3979_v11 = vmax.f32 %v3917_v61, 0.0  ;;  %v3932_v40 = vadd.f32 %v9609_v59, %v13373_v48  ;;  %9667 = vmatpush3.msra.mxu1 %v8108_v57 }
 0x82d   : > { %v3926_v18 = vpop.f32.mrf.mxu0 }
 0x82e   : > { %v3927_v7 = vadd.f32 %v13373_v48, %v3926_v18  ;;  %9644 = vmatprep.mubr.msk.f32.mxu1 %vm4006_vm2, %v3979_v11  ;;  %v3982_v38 = vmax.f32 %v3932_v40, 0.0 }
 0x82f   : > { %9645 = vmatmul.mubr.msk.f32.gmra.mxu1 %vm4006_vm2, %v3980_v33 }
 0x830   : > { %v3981_v56 = vmax.f32 %v3927_v7, 0.0 }
 0x832   : > { %9647 = vmatprep.mubr.msk.f32.mxu1 %vm4006_vm2, %v3981_v56 }
 0x833   : > { %9648 = vmatmul.mubr.msk.f32.gmra.mxu1 %vm4006_vm2, %v3982_v38 }
 0x860   : > { %v9612_v44 = vpop.f32.mrf.mxu0 }
 0x861   : > { %v3942_v54 = vadd.f32 %v9612_v44, %v13373_v48 }
 0x862   : > { %v3936_v50 = vpop.f32.mrf.mxu0 }
 0x863   : > { %v3937_v60 = vadd.f32 %v13373_v48, %v3936_v50  ;;  %v3984_v62 = vmax.f32 %v3942_v54, 0.0 }
 0x864   : > { %v9615_v17 = vpop.f32.mrf.mxu0 }
 0x865   : > { %v3983_v51 = vmax.f32 %v3937_v60, 0.0  ;;  %v3952_v16 = vadd.f32 %v9615_v17, %v13373_v48 }
 0x866   : > { %v3946_v13 = vpop.f32.mrf.mxu0 }
 0x867   : > { %v3947_v26 = vadd.f32 %v13373_v48, %v3946_v13  ;;  %9650 = vmatprep.mubr.msk.f32.mxu1 %vm4006_vm2, %v3983_v51  ;;  %v3986_v21 = vmax.f32 %v3952_v16, 0.0 }
 0x868   : > { %v9618_v9 = vpop.f32.mrf.mxu0  ;;  %9651 = vmatmul.mubr.msk.f32.gmra.mxu1 %vm4006_vm2, %v3984_v62 }
 0x869   : > { %v3985_v25 = vmax.f32 %v3947_v26, 0.0  ;;  %v3962_v49 = vadd.f32 %v9618_v9, %v13373_v48 }
 0x86a   : > { %v3956_v29 = vpop.f32.mrf.mxu0 }
 0x86b   : > { %v3957_v35 = vadd.f32 %v13373_v48, %v3956_v29  ;;  %9653 = vmatprep.mubr.msk.f32.mxu1 %vm4006_vm2, %v3985_v25  ;;  %v3988_v22 = vmax.f32 %v3962_v49, 0.0 }
 0x86c   : > { %v9621_v36 = vpop.f32.mrf.mxu0  ;;  %9654 = vmatmul.mubr.msk.f32.gmra.mxu1 %vm4006_vm2, %v3986_v21 }
 0x86d   : > { %v3987_v28 = vmax.f32 %v3957_v35, 0.0  ;;  %v3972_v42 = vadd.f32 %v9621_v36, %v13373_v48 }
 0x86e   : > { %v3966_v4 = vpop.f32.mrf.mxu0 }
 0x86f   : > { %v3967_v45 = vadd.f32 %v13373_v48, %v3966_v4  ;;  %9656 = vmatprep.mubr.msk.f32.mxu1 %vm4006_vm2, %v3987_v28  ;;  %v8105_v48 = vld [vmem:[%s15880_s4 + $0x70] sm:$0xff]  ;;  %v3990_v24 = vmax.f32 %v3972_v42, 0.0 }
 0x870   : > { %9657 = vmatmul.mubr.msk.f32.gmra.mxu1 %vm4006_vm2, %v3988_v22  ;;  %9668 = vmatprep.subr.mxu1 %v8105_v48 }
 0x871   : > { %v3989_v3 = vmax.f32 %v3967_v45, 0.0  ;;  %9669 = vmatpush3.msra.mxu1 %v8105_v48 }
 0x873   : > { %9659 = vmatprep.mubr.msk.f32.mxu1 %vm4006_vm2, %v3989_v3 }
 0x874   : > { %9660 = vmatmul.mubr.msk.f32.gmra.mxu1 %vm4006_vm2, %v3990_v24 }
 0x8e7   : > { %v9640_v31 = vpop.f32.mrf.mxu1 }
 0x8e8   : > { %v4127_v20 = vadd.f32 %v9640_v31, %v13443_v19 }
 0x8e9   : > { %v4121_v61 = vpop.f32.mrf.mxu1 }
 0x8ea   : > { %v4122_v59 = vadd.f32 %v13443_v19, %v4121_v61  ;;  %v13451_v40 = vadd.f32 %v4127_v20, %v13264_v43 }
 0x8eb   : > { %v9643_v11 = vpop.f32.mrf.mxu1 }
 0x8ec   : > { %v13448_v33 = vadd.f32 %v4122_v59, %v13261_v34  ;;  %16312 = vst [vmem:[#allocation42_spill] sm:$0xff] %v13451_v40  ;;  %v4137_v18 = vadd.f32 %v9643_v11, %v13443_v19 }
 0x8ed   : > { %v4131_v7 = vpop.f32.mrf.mxu1 }
 0x8ee   : > { %16311 = vst [vmem:[#allocation45_spill] sm:$0xff] %v13448_v33  ;;  %v4132_v56 = vadd.f32 %v13443_v19, %v4131_v7  ;;  %8116 = vmatmul.mubr.msk.f32.vlgmr.msra.gmra.mxu0 %vm692_vm1, %v13448_v33  ;;  %9670 = vmatprep.mubr.msk.f32.mxu1 %vm692_vm1, %v13448_v33  ;;  %v13466_v43 = vadd.f32 %v4137_v18, %v13276_v12 }
 0x8ef   : > { %v9646_v38 = vpop.f32.mrf.mxu1  ;;  %9671 = vmatmul.mubr.msk.f32.vlgmr.msra.gmra.mxu1 %vm692_vm1, %v13451_v40  ;;  %4365 = vmatprep.mubr.f32.mxu0 %v16310_v15 }
 0x8f0   : > { %v13463_v34 = vadd.f32 %v4132_v56, %v13273_v23  ;;  %16314 = vst [vmem:[#allocation22_spill] sm:$0xff] %v13466_v43  ;;  %v4147_v44 = vadd.f32 %v9646_v38, %v13443_v19 }
 0x8f1   : > { %v4141_v54 = vpop.f32.mrf.mxu1 }
 0x8f2   : > { %16313 = vst [vmem:[#allocation24_spill] sm:$0xff] %v13463_v34  ;;  %v4142_v50 = vadd.f32 %v13443_v19, %v4141_v54  ;;  %8117 = vmatmul.mubr.msk.f32.gmra.mxu0 %vm692_vm1, %v13451_v40  ;;  %9673 = vmatprep.mubr.msk.f32.mxu1 %vm692_vm1, %v13463_v34  ;;  %v13481_v12 = vadd.f32 %v4147_v44, %v13288_v37 }
 0x8f3   : > { %v9649_v60 = vpop.f32.mrf.mxu1  ;;  %9674 = vmatmul.mubr.msk.f32.gmra.mxu1 %vm692_vm1, %v13466_v43  ;;  %4371 = vmatprep.mubr.f32.mxu0 %v16310_v15 }
 0x8f4   : > { %v13478_v23 = vadd.f32 %v4142_v50, %v13285_v5  ;;  %16316 = vst [vmem:[#allocation44_spill] sm:$0xff] %v13481_v12  ;;  %v4157_v17 = vadd.f32 %v9649_v60, %v13443_v19 }
 0x8f5   : > { %v4151_v51 = vpop.f32.mrf.mxu1 }
 0x8f6   : > { %16315 = vst [vmem:[#allocation26_spill] sm:$0xff] %v13478_v23  ;;  %v4152_v62 = vadd.f32 %v13443_v19, %v4151_v51  ;;  %8118 = vmatmul.mubr.msk.f32.gmra.mxu0 %vm692_vm1, %v13463_v34  ;;  %9676 = vmatprep.mubr.msk.f32.mxu1 %vm692_vm1, %v13478_v23  ;;  %v13496_v37 = vadd.f32 %v4157_v17, %v13300_v32 }
 0x8f7   : > { %9677 = vmatmul.mubr.msk.f32.gmra.mxu1 %vm692_vm1, %v13481_v12  ;;  %4377 = vmatprep.mubr.f32.mxu0 %v16310_v15 }
 0x8f8   : > { %v13493_v5 = vadd.f32 %v4152_v62, %v13297_v52  ;;  %16318 = vst [vmem:[#allocation30_spill] sm:$0xff] %v13496_v37 }
 0x8fa   : > { %16317 = vst [vmem:[#allocation23_spill] sm:$0xff] %v13493_v5  ;;  %8119 = vmatmul.mubr.msk.f32.gmra.mxu0 %vm692_vm1, %v13466_v43  ;;  %9679 = vmatprep.mubr.msk.f32.mxu1 %vm692_vm1, %v13493_v5 }
 0x8fb   : > { %9680 = vmatmul.mubr.msk.f32.gmra.mxu1 %vm692_vm1, %v13496_v37  ;;  %4383 = vmatprep.mubr.f32.mxu0 %v16310_v15 }
 0x8fe   : > { %8120 = vmatmul.mubr.msk.f32.gmra.mxu0 %vm692_vm1, %v13478_v23 }
 0x8ff   : > { %4389 = vmatprep.mubr.f32.mxu0 %v16310_v15 }
 0x902   : > { %8121 = vmatmul.mubr.msk.f32.gmra.mxu0 %vm692_vm1, %v13481_v12 }
 0x903   : > { %4395 = vmatprep.mubr.f32.mxu0 %v16310_v15 }
 0x906   : > { %8122 = vmatmul.mubr.msk.f32.gmra.mxu0 %vm692_vm1, %v13493_v5 }
 0x907   : > { %4401 = vmatprep.mubr.f32.mxu0 %v16310_v15 }
 0x90a   : > { %8123 = vmatmul.mubr.msk.f32.gmra.mxu0 %vm692_vm1, %v13496_v37 }
 0x90b   : > { %4407 = vmatprep.mubr.f32.mxu0 %v16310_v15 }
 0x928   : > { %v9652_v52 = vpop.f32.mrf.mxu1 }
 0x929   : > { %v4167_v32 = vadd.f32 %v9652_v52, %v13443_v19 }
 0x92a   : > { %v4161_v16 = vpop.f32.mrf.mxu1 }
 0x92b   : > { %v4162_v13 = vadd.f32 %v13443_v19, %v4161_v16  ;;  %v13523_v25 = vadd.f32 %v4167_v32, %v13312_v14 }
 0x92c   : > { %v9655_v26 = vpop.f32.mrf.mxu1 }
 0x92d   : > { %v13520_v9 = vadd.f32 %v4162_v13, %v13309_v39  ;;  %16320 = vst [vmem:[#allocation34_spill] sm:$0xff] %v13523_v25  ;;  %v4177_v21 = vadd.f32 %v9655_v26, %v13443_v19 }
 0x92e   : > { %v4171_v49 = vpop.f32.mrf.mxu1 }
 0x92f   : > { %16319 = vst [vmem:[#allocation39_spill] sm:$0xff] %v13520_v9  ;;  %v4172_v29 = vadd.f32 %v13443_v19, %v4171_v49  ;;  %8124 = vmatmul.mubr.msk.f32.gmra.mxu0 %vm692_vm1, %v13520_v9  ;;  %9682 = vmatprep.mubr.msk.f32.mxu1 %vm692_vm1, %v13520_v9  ;;  %v13538_v14 = vadd.f32 %v4177_v21, %v13324_v55 }
 0x930   : > { %v9658_v58 = vpop.f32.mrf.mxu1  ;;  %9683 = vmatmul.mubr.msk.f32.gmra.mxu1 %vm692_vm1, %v13523_v25  ;;  %4413 = vmatprep.mubr.f32.mxu0 %v16310_v15 }
 0x931   : > { %v13535_v39 = vadd.f32 %v4172_v29, %v13321_v10  ;;  %16322 = vst [vmem:[#allocation35_spill] sm:$0xff] %v13538_v14  ;;  %v4187_v8 = vadd.f32 %v9658_v58, %v13443_v19 }
 0x932   : > { %v4181_v41 = vpop.f32.mrf.mxu1 }
 0x933   : > { %16321 = vst [vmem:[#allocation41_spill] sm:$0xff] %v13535_v39  ;;  %v4182_v35 = vadd.f32 %v13443_v19, %v4181_v41  ;;  %8125 = vmatmul.mubr.msk.f32.gmra.mxu0 %vm692_vm1, %v13523_v25  ;;  %9685 = vmatprep.mubr.msk.f32.mxu1 %vm692_vm1, %v13535_v39  ;;  %v13553_v55 = vadd.f32 %v4187_v8, %v13342_v53 }
 0x934   : > { %v9661_v36 = vpop.f32.mrf.mxu1  ;;  %9686 = vmatmul.mubr.msk.f32.gmra.mxu1 %vm692_vm1, %v13538_v14  ;;  %4419 = vmatprep.mubr.f32.mxu0 %v16310_v15 }
 0x935   : > { %v13550_v10 = vadd.f32 %v4182_v35, %v13339_v27  ;;  %16324 = vst [vmem:[#allocation36_spill] sm:$0xff] %v13553_v55  ;;  %v4197_v46 = vadd.f32 %v9661_v36, %v13443_v19 }
 0x936   : > { %v4191_v1 = vpop.f32.mrf.mxu1 }
 0x937   : > { %16323 = vst [vmem:[#allocation43_spill] sm:$0xff] %v13550_v10  ;;  %v4192_v30 = vadd.f32 %v13443_v19, %v4191_v1  ;;  %8126 = vmatmul.mubr.msk.f32.gmra.mxu0 %vm692_vm1, %v13535_v39  ;;  %9688 = vmatprep.mubr.msk.f32.mxu1 %vm692_vm1, %v13550_v10  ;;  %v13568_v53 = vadd.f32 %v4197_v46, %v13360_v2  ;;  %v16327_v2 = vld [vmem:[#allocation21_spill] sm:$0xff] }
 0x938   : > { %9689 = vmatmul.mubr.msk.f32.gmra.mxu1 %vm692_vm1, %v13553_v55  ;;  %4425 = vmatprep.mubr.f32.mxu0 %v16310_v15  ;;  %v16328_v28 = vsub.s32 0, %v16327_v2  ;;  %v16329_v0 = vsub.s32 1, %v16327_v2 }
 0x939   : > { %v13565_v27 = vadd.f32 %v4192_v30, %v13357_v6  ;;  %16326 = vst [vmem:[#allocation60_spill] sm:$0xff] %v13568_v53  ;;  %v13591_v6 = vld [vmem:[%s15881_s5 + $0x3] sm:$0x7] }
 0x93a   : > { %v13596_v22 = vrot.slane %v13591_v6, %v16328_v28 }
 0x93b   : > { %16325 = vst [vmem:[#allocation40_spill] sm:$0xff] %v13565_v27  ;;  %8127 = vmatmul.mubr.msk.f32.gmra.mxu0 %vm692_vm1, %v13538_v14  ;;  %9691 = vmatprep.mubr.msk.f32.mxu1 %vm692_vm1, %v13565_v27 }
 0x93c   : > { %9692 = vmatmul.mubr.msk.f32.gmra.mxu1 %vm692_vm1, %v13568_v53  ;;  %4431 = vmatprep.mubr.f32.mxu0 %v16310_v15 }
 0x93f   : > { %8128 = vmatmul.mubr.msk.f32.gmra.mxu0 %vm692_vm1, %v13550_v10 }
 0x940   : > { %4437 = vmatprep.mubr.f32.mxu0 %v16310_v15 }
 0x943   : > { %8129 = vmatmul.mubr.msk.f32.gmra.mxu0 %vm692_vm1, %v13553_v55 }
 0x944   : > { %4443 = vmatprep.mubr.f32.mxu0 %v16310_v15 }
 0x947   : > { %8130 = vmatmul.mubr.msk.f32.gmra.mxu0 %vm692_vm1, %v13565_v27 }
 0x948   : > { %4449 = vmatprep.mubr.f32.mxu0 %v16310_v15  ;;  %v13604_v15 = vrot.slane %v13591_v6, %v16329_v0 }
 0x94b   : > { %8131 = vmatmul.mubr.msk.f32.gmra.mxu0 %vm692_vm1, %v13568_v53 }
 0x9ae   : > { %v4361_v42 = vpop.f32.mrf.mxu0 }
 0x9af   : > { %v13599_v4 = vadd.f32 %v4361_v42, %v13596_v22 }
 0x9b0   : > { %v4363_v47 = vpop.f32.mrf.mxu0 }
 0x9b1   : > { %4617 = vrot.lane.b32.xlu0 %v13599_v4, %s10885_s18  ;;  %9726 = vmatprep.mubr.msk.f32.mxu0 %vm692_vm1, %v13599_v4  ;;  %v13611_v57 = vadd.f32 %v4363_v47, %v13604_v15 }
 0x9b2   : > { %v4367_v45 = vpop.f32.mrf.mxu0 }
 0x9b3   : > { %v13619_v24 = vadd.f32 %v4367_v45, %v13596_v22 }
 0x9b4   : > { %v4369_v63 = vpop.f32.mrf.mxu0 }
 0x9b5   : > { %v13614_v3 = vadd.f32 %v4369_v63, %v13604_v15  ;;  %4729 = vrot.lane.b32.xlu0 %v13611_v57, %s10885_s18 }
 0x9b6   : > { %v4373_v48 = vpop.f32.mrf.mxu0 }
 0x9b7   : > { %4731 = vrot.lane.b32.xlu1 %v13614_v3, %s10885_s18  ;;  %v13626_v20 = vadd.f32 %v4373_v48, %v13596_v22 }
 0x9b8   : > { %v4375_v19 = vpop.f32.mrf.mxu0 }
 0x9b9   : > { %4619 = vrot.lane.b32.xlu0 %v13619_v24, %s10885_s18  ;;  %v13638_v18 = vadd.f32 %v4375_v19, %v13604_v15 }
 0x9ba   : > { %v4379_v31 = vpop.f32.mrf.mxu0 }
 0x9bb   : > { %v13629_v61 = vadd.f32 %v4379_v31, %v13596_v22 }
 0x9bc   : > { %v4381_v59 = vpop.f32.mrf.mxu0 }
 0x9bd   : > { %4623 = vrot.lane.b32.xlu1 %v13629_v61, %s10885_s18  ;;  %4621 = vrot.lane.b32.xlu0 %v13626_v20, %s10885_s18  ;;  %v13641_v7 = vadd.f32 %v4381_v59, %v13604_v15 }
 0x9be   : > { %v13635_v11 = vpop.f32.mrf.mxu0 }
 0x9c0   : > { %v4387_v56 = vpop.f32.mrf.mxu0 }
 0x9c1   : > { %4735 = vrot.lane.b32.xlu1 %v13641_v7, %s10885_s18  ;;  %4733 = vrot.lane.b32.xlu0 %v13638_v18, %s10885_s18  ;;  %v13650_v44 = vadd.f32 %v4387_v56, %v13604_v15  ;;  %v13742_v56 = vadd.f32 %v13635_v11, %v13596_v22 }
 0x9c2   : > { %v13647_v38 = vpop.f32.mrf.mxu0 }
 0x9c4   : > { %v4393_v54 = vpop.f32.mrf.mxu0 }
 0x9c5   : > { %v13653_v50 = vadd.f32 %v4393_v54, %v13604_v15  ;;  %4737 = vrot.lane.b32.xlu0 %v13650_v44, %s10885_s18 }
 0x9c6   : > { %v13657_v60 = vpop.f32.mrf.mxu0 }
 0x9c7   : > { %4739 = vrot.lane.b32.xlu1 %v13653_v50, %s10885_s18  ;;  %v13761_v11 = vadd.f32 %v13657_v60, %v13596_v22 }
 0x9c8   : > { %v4399_v17 = vpop.f32.mrf.mxu0 }
 0x9c9   : > { %v13662_v51 = vadd.f32 %v4399_v17, %v13604_v15 }
 0x9ca   : > { %v13664_v62 = vpop.f32.mrf.mxu0 }
 0x9cb   : > { %4773 = vrot.lane.b32.xlu1 %v13662_v51, %s16330_s20  ;;  %4741 = vrot.lane.b32.xlu0 %v13662_v51, %s10885_s18  ;;  %v13783_v60 = vadd.f32 %v13664_v62, %v13596_v22 }
 0x9cc   : > { %v4405_v52 = vpop.f32.mrf.mxu0 }
 0x9cd   : > { %v13671_v32 = vadd.f32 %v4405_v52, %v13604_v15 }
 0x9cf   : > { %4743 = vrot.lane.b32.xlu1 %v13671_v32, %s10885_s18  ;;  %4805 = vrot.lane.b32.xlu0 %v13662_v51, %s16331_s26 }
 0x9d3   : > { %4775 = vrot.lane.b32.xlu1 %v13671_v32, %s16330_s20  ;;  %4807 = vrot.lane.b32.xlu0 %v13671_v32, %s16331_s26 }
 0x9ef   : > { %v13681_v16 = vpop.f32.mrf.mxu0 }
 0x9f0   : > { %v13778_v54 = vadd.f32 %v13681_v16, %v13596_v22 }
 0x9f1   : > { %v4411_v13 = vpop.f32.mrf.mxu0 }
 0x9f2   : > { %v13684_v26 = vadd.f32 %v4411_v13, %v13604_v15 }
 0x9f3   : > { %v13686_v21 = vpop.f32.mrf.mxu0 }
 0x9f4   : > { %4777 = vrot.lane.b32.xlu1 %v13684_v26, %s16330_s20  ;;  %4745 = vrot.lane.b32.xlu0 %v13684_v26, %s10885_s18  ;;  %v13802_v17 = vadd.f32 %v13686_v21, %v13596_v22 }
 0x9f5   : > { %v4417_v49 = vpop.f32.mrf.mxu0 }
 0x9f6   : > { %v13693_v29 = vadd.f32 %v4417_v49, %v13604_v15 }
 0x9f7   : > { %v13695_v58 = vpop.f32.mrf.mxu0 }
 0x9f8   : > { %4747 = vrot.lane.b32.xlu1 %v13693_v29, %s10885_s18  ;;  %4809 = vrot.lane.b32.xlu0 %v13684_v26, %s16331_s26  ;;  %v13819_v62 = vadd.f32 %v13695_v58, %v13596_v22 }
 0x9f9   : > { %v4423_v8 = vpop.f32.mrf.mxu0 }
 0x9fa   : > { %v4424_v36 = vadd.f32 %v4423_v8, %v13604_v15 }
 0x9fb   : > { %v13701_v41 = vpop.f32.mrf.mxu0 }
 0x9fc   : > { %4779 = vrot.lane.b32.xlu1 %v13693_v29, %s16330_s20  ;;  %4811 = vrot.lane.b32.xlu0 %v13693_v29, %s16331_s26 }
 0x9fd   : > { %v4429_v35 = vpop.f32.mrf.mxu0 }
 0x9fe   : > { %v4430_v30 = vadd.f32 %v4429_v35, %v13604_v15 }
 0x9ff   : > { %v13708_v46 = vpop.f32.mrf.mxu0 }
 0xa00   : > { %4781 = vrot.lane.b32.xlu1 %v4424_v36, %s16330_s20  ;;  %4749 = vrot.lane.b32.xlu0 %v4424_v36, %s10885_s18 }
 0xa01   : > { %v4435_v1 = vpop.f32.mrf.mxu0 }
 0xa02   : > { %v4436_v45 = vadd.f32 %v4435_v1, %v13604_v15 }
 0xa03   : > { %v13713_v28 = vpop.f32.mrf.mxu0 }
 0xa04   : > { %4751 = vrot.lane.b32.xlu1 %v4430_v30, %s10885_s18  ;;  %4813 = vrot.lane.b32.xlu0 %v4424_v36, %s16331_s26  ;;  %v13863_v13 = vadd.f32 %v13713_v28, %v13596_v22 }
 0xa05   : > { %v4441_v42 = vpop.f32.mrf.mxu0 }
 0xa06   : > { %v4442_v19 = vadd.f32 %v4441_v42, %v13604_v15 }
 0xa07   : > { %v13717_v0 = vpop.f32.mrf.mxu0 }
 0xa08   : > { %4783 = vrot.lane.b32.xlu1 %v4430_v30, %s16330_s20  ;;  %4815 = vrot.lane.b32.xlu0 %v4430_v30, %s16331_s26 }
 0xa09   : > { %v4447_v47 = vpop.f32.mrf.mxu0 }
 0xa0a   : > { %v4448_v59 = vadd.f32 %v4447_v47, %v13604_v15 }
 0xa0b   : > { %v13722_v63 = vpop.f32.mrf.mxu0 }
 0xa0c   : > { %4785 = vrot.lane.b32.xlu1 %v4436_v45, %s16330_s20  ;;  %4753 = vrot.lane.b32.xlu0 %v4436_v45, %s10885_s18  ;;  %v13891_v21 = vadd.f32 %v13722_v63, %v13596_v22 }
 0xa0d   : > { %v4453_v48 = vpop.f32.mrf.mxu0 }
 0xa0e   : > { %v13728_v31 = vadd.f32 %v4453_v48, %v13604_v15  ;;  %v13757_v15 = vadd.f32 %v13647_v38, %v13596_v22 }
 0xa10   : > { %4755 = vrot.lane.b32.xlu1 %v4442_v19, %s10885_s18  ;;  %4817 = vrot.lane.b32.xlu0 %v4436_v45, %s16331_s26 }
 0xa11   : > { %9694 = vmatprep.subr.msk.mxu0 %vm692_vm1, %v13728_v31 }
 0xa12   : > { %9695 = vmatpush3.xpose.msk.msra.mxu0 %vm692_vm1, %v13728_v31 }
 0xa13   : > { %9696 = vmatprep.subr.msk.mxu0 %vm692_vm1, %v4448_v59 }
 0xa14   : > { %4787 = vrot.lane.b32.xlu1 %v4442_v19, %s16330_s20  ;;  %4819 = vrot.lane.b32.xlu0 %v4442_v19, %s16331_s26 }
 0xa16   : > { %9697 = vmatpush3.xpose.msk.msra.mxu0 %vm692_vm1, %v4448_v59 }
 0xa17   : > { %9698 = vmatprep.subr.msk.mxu0 %vm692_vm1, %v4442_v19 }
 0xa18   : > { %4625 = vrot.lane.b32.xlu0 %v13742_v56, %s10885_s18  ;;  %4757 = vrot.lane.b32.xlu1 %v4448_v59, %s10885_s18 }
 0xa1a   : > { %9699 = vmatpush3.xpose.msk.msra.mxu0 %vm692_vm1, %v4442_v19 }
 0xa1b   : > { %9700 = vmatprep.subr.msk.mxu0 %vm692_vm1, %v4436_v45 }
 0xa1c   : > { %4803 = vrot.lane.b32.xlu0 %v13653_v50, %s16331_s26  ;;  %4771 = vrot.lane.b32.xlu1 %v13653_v50, %s16330_s20 }
 0xa1e   : > { %9701 = vmatpush3.xpose.msk.msra.mxu0 %vm692_vm1, %v4436_v45 }
 0xa1f   : > { %9702 = vmatprep.subr.msk.mxu0 %vm692_vm1, %v4430_v30 }
 0xa20   : > { %4629 = vrot.lane.b32.xlu0 %v13761_v11, %s10885_s18  ;;  %4627 = vrot.lane.b32.xlu1 %v13757_v15, %s10885_s18 }
 0xa22   : > { %9703 = vmatpush3.xpose.msk.msra.mxu0 %vm692_vm1, %v4430_v30 }
 0xa23   : > { %9704 = vmatprep.subr.msk.mxu0 %vm692_vm1, %v4424_v36  ;;  %v4618_v38 = vpop.permute.xlu0 %4617 }
 0xa24   : > { %4801 = vrot.lane.b32.xlu0 %v13650_v44, %s16331_s26  ;;  %9782 = vmatprep.mubr.msk.f32.mxu1 %vm692_vm1, %v4618_v38 }
 0xa25   : > { %4769 = vrot.lane.b32.xlu1 %v13650_v44, %s16330_s20 }
 0xa26   : > { %9705 = vmatpush3.xpose.msk.msra.mxu0 %vm692_vm1, %v4424_v36 }
 0xa27   : > { %9706 = vmatprep.subr.msk.mxu0 %vm692_vm1, %v13693_v29  ;;  %v13829_v52 = vpop.permute.xlu0 %4729 }
 0xa28   : > { %4633 = vrot.lane.b32.xlu0 %v13778_v54, %s10885_s18 }
 0xa29   : > { %4631 = vrot.lane.b32.xlu1 %v13783_v60, %s10885_s18  ;;  %v13857_v16 = vpop.permute.xlu1 %4731 }
 0xa2a   : > { %9707 = vmatpush3.xpose.msk.msra.mxu0 %vm692_vm1, %v13693_v29 }
 0xa2b   : > { %9708 = vmatprep.subr.msk.mxu0 %vm692_vm1, %v13684_v26 }
 0xa2c   : > { %4821 = vrot.lane.b32.xlu0 %v4448_v59, %s16331_s26 }
 0xa2d   : > { %4767 = vrot.lane.b32.xlu1 %v13641_v7, %s16330_s20 }
 0xa2e   : > { %9709 = vmatpush3.xpose.msk.msra.mxu0 %vm692_vm1, %v13684_v26 }
 0xa2f   : > { %9710 = vmatprep.subr.msk.mxu0 %vm692_vm1, %v13671_v32  ;;  %v13875_v26 = vpop.permute.xlu1 %4623 }
 0xa30   : > { %4759 = vrot.lane.b32.xlu0 %v13728_v31, %s10885_s18 }
 0xa31   : > { %4635 = vrot.lane.b32.xlu1 %v13802_v17, %s10885_s18 }
 0xa32   : > { %9711 = vmatpush3.xpose.msk.msra.mxu0 %vm692_vm1, %v13671_v32  ;;  %v13835_v32 = vadd.f32 %v13701_v41, %v13596_v22 }
 0xa33   : > { %9712 = vmatprep.subr.msk.mxu0 %vm692_vm1, %v13662_v51 }
 0xa34   : > { %4799 = vrot.lane.b32.xlu0 %v13641_v7, %s16331_s26 }
 0xa35   : > { %4789 = vrot.lane.b32.xlu1 %v4448_v59, %s16330_s20 }
 0xa36   : > { %9713 = vmatpush3.xpose.msk.msra.mxu0 %vm692_vm1, %v13662_v51  ;;  %v13845_v51 = vadd.f32 %v13708_v46, %v13596_v22 }
 0xa37   : > { %9714 = vmatprep.subr.msk.mxu0 %vm692_vm1, %v13653_v50 }
 0xa38   : > { %4637 = vrot.lane.b32.xlu0 %v13819_v62, %s10885_s18 }
 0xa39   : > { %4765 = vrot.lane.b32.xlu1 %v13638_v18, %s16330_s20 }
 0xa3a   : > { %9715 = vmatpush3.xpose.msk.msra.mxu0 %vm692_vm1, %v13653_v50  ;;  %v13851_v50 = vpop.permute.xlu0 %4619 }
 0xa3b   : > { %9716 = vmatprep.subr.msk.mxu0 %vm692_vm1, %v13650_v44 }
 0xa3c   : > { %4797 = vrot.lane.b32.xlu0 %v13638_v18, %s16331_s26 }
 0xa3d   : > { %4639 = vrot.lane.b32.xlu1 %v13835_v32, %s10885_s18 }
 0xa3e   : > { %9717 = vmatpush3.xpose.msk.msra.mxu0 %vm692_vm1, %v13650_v44  ;;  %v13873_v44 = vadd.f32 %v13717_v0, %v13596_v22 }
 0xa3f   : > { %9718 = vmatprep.subr.msk.mxu0 %vm692_vm1, %v13641_v7 }
 0xa40   : > { %4641 = vrot.lane.b32.xlu0 %v13845_v51, %s10885_s18 }
 0xa41   : > { %4763 = vrot.lane.b32.xlu1 %v13614_v3, %s16330_s20 }
 0xa42   : > { %9719 = vmatpush3.xpose.msk.msra.mxu0 %vm692_vm1, %v13641_v7  ;;  %v13877_v7 = vpop.permute.xlu0 %4621 }
 0xa43   : > { %9720 = vmatprep.subr.msk.mxu0 %vm692_vm1, %v13638_v18 }
 0xa44   : > { %4795 = vrot.lane.b32.xlu0 %v13614_v3, %s16331_s26 }
 0xa45   : > { %4643 = vrot.lane.b32.xlu1 %v13863_v13, %s10885_s18 }
 0xa46   : > { %9721 = vmatpush3.xpose.msk.msra.mxu0 %vm692_vm1, %v13638_v18  ;;  %v13895_v18 = vpop.permute.xlu1 %4735  ;;  %v13897_v49 = vpop.permute.xlu0 %4733 }
 0xa47   : > { %9722 = vmatprep.subr.msk.mxu0 %vm692_vm1, %v13614_v3 }
 0xa48   : > { %4645 = vrot.lane.b32.xlu0 %v13873_v44, %s10885_s18 }
 0xa49   : > { %4761 = vrot.lane.b32.xlu1 %v13611_v57, %s16330_s20 }
 0xa4a   : > { %9723 = vmatpush3.xpose.msk.msra.mxu0 %vm692_vm1, %v13614_v3  ;;  %v13905_v3 = vpop.permute.xlu1 %4739  ;;  %v13913_v22 = vpop.permute.xlu0 %4737 }
 0xa4b   : > { %9724 = vmatprep.subr.msk.mxu0 %vm692_vm1, %v13611_v57 }
 0xa4c   : > { %4793 = vrot.lane.b32.xlu0 %v13611_v57, %s16331_s26 }
 0xa4d   : > { %4647 = vrot.lane.b32.xlu1 %v13891_v21, %s10885_s18 }
 0xa4e   : > { %9725 = vmatpush3.xpose.msk.msra.mxu0 %vm692_vm1, %v13611_v57  ;;  %v13919_v57 = vpop.f32.mrf.mxu1  ;;  %v13925_v29 = vpop.permute.xlu1 %4773 }
 0xa4f   : > { %v13927_v58 = vpop.permute.xlu0 %4741 }
 0xa50   : > { %4651 = vrot.lane.b32.xlu0 %v13619_v24, %s16330_s20  ;;  %v13933_v8 = vpop.f32.mrf.mxu1 }
 0xa51   : > { %4791 = vrot.lane.b32.xlu1 %v13728_v31, %s16330_s20  ;;  %9727 = vmatmul.mubr.msk.f32.vlgmr.msra.gmra.mxu0 %vm692_vm1, %v13619_v24 }
 0xa52   : > { %9729 = vmatprep.mubr.msk.f32.mxu0 %vm692_vm1, %v13626_v20  ;;  %v13947_v35 = vpop.f32.mrf.mxu1 }
 0xa53   : > { %v13943_v41 = vpop.permute.xlu0 %4805 }
 0xa54   : > { %4683 = vrot.lane.b32.xlu0 %v13619_v24, %s16331_s26  ;;  %v13941_v24 = vpop.permute.xlu1 %4743  ;;  %16332 = vst [vmem:[#allocation47_spill] sm:$0xff] %v13943_v41  ;;  %v13957_v36 = vpop.f32.mrf.mxu1 }
 0xa55   : > { %4823 = vrot.lane.b32.xlu1 %v13728_v31, %s16331_s26  ;;  %9730 = vmatmul.mubr.msk.f32.gmra.mxu0 %vm692_vm1, %v13629_v61 }
 0xa56   : > { %9732 = vmatprep.mubr.msk.f32.mxu0 %vm692_vm1, %v13742_v56  ;;  %v13971_v46 = vpop.f32.mrf.mxu1 }
 0xa58   : > { %4655 = vrot.lane.b32.xlu0 %v13629_v61, %s16330_s20  ;;  %v13985_v28 = vpop.f32.mrf.mxu1 }
 0xa59   : > { %4649 = vrot.lane.b32.xlu1 %v13599_v4, %s16330_s20  ;;  %9733 = vmatmul.mubr.msk.f32.gmra.mxu0 %vm692_vm1, %v13757_v15 }
 0xa5a   : > { %9735 = vmatprep.mubr.msk.f32.mxu0 %vm692_vm1, %v13761_v11  ;;  %v13999_v0 = vpop.f32.mrf.mxu1 }
 0xa5c   : > { %4687 = vrot.lane.b32.xlu0 %v13629_v61, %s16331_s26  ;;  %v13963_v61 = vpop.permute.xlu1 %4775  ;;  %v14011_v63 = vpop.f32.mrf.mxu1 }
 0xa5d   : > { %4681 = vrot.lane.b32.xlu1 %v13599_v4, %s16331_s26  ;;  %9736 = vmatmul.mubr.msk.f32.gmra.mxu0 %vm692_vm1, %v13783_v60  ;;  %v13965_v4 = vpop.permute.xlu0 %4807 }
 0xa5e   : > { %9738 = vmatprep.mubr.msk.f32.mxu0 %vm692_vm1, %v13778_v54  ;;  %16333 = vst [vmem:[#allocation53_spill] sm:$0xff] %v13965_v4  ;;  %v9684_v31 = vpop.f32.mrf.mxu1 }
 0xa60   : > { %4659 = vrot.lane.b32.xlu0 %v13757_v15, %s16330_s20 }
 0xa61   : > { %4653 = vrot.lane.b32.xlu1 %v13626_v20, %s16330_s20  ;;  %9739 = vmatmul.mubr.msk.f32.gmra.mxu0 %vm692_vm1, %v13802_v17 }
 0xa62   : > { %9741 = vmatprep.mubr.msk.f32.mxu0 %vm692_vm1, %v13819_v62 }
 0xa64   : > { %4691 = vrot.lane.b32.xlu0 %v13757_v15, %s16331_s26  ;;  %v4562_v15 = vpop.f32.mrf.mxu1 }
 0xa65   : > { %4685 = vrot.lane.b32.xlu1 %v13626_v20, %s16331_s26  ;;  %9742 = vmatmul.mubr.msk.f32.gmra.mxu0 %vm692_vm1, %v13835_v32 }
 0xa66   : > { %9744 = vmatprep.mubr.msk.f32.mxu0 %vm692_vm1, %v13845_v51  ;;  %v13979_v1 = vpop.permute.xlu1 %4777  ;;  %v13981_v30 = vpop.permute.xlu0 %4745 }
 0xa67   : > { %v9687_v53 = vpop.f32.mrf.mxu1 }
 0xa68   : > { %4663 = vrot.lane.b32.xlu0 %v13783_v60, %s16330_s20 }
 0xa69   : > { %4657 = vrot.lane.b32.xlu1 %v13742_v56, %s16330_s20  ;;  %9745 = vmatmul.mubr.msk.f32.gmra.mxu0 %vm692_vm1, %v13863_v13  ;;  %v4572_v27 = vpop.f32.mrf.mxu1 }
 0xa6a   : > { %9747 = vmatprep.mubr.msk.f32.mxu0 %vm692_vm1, %v13873_v44  ;;  %v13993_v20 = vpop.permute.xlu1 %4747  ;;  %v13995_v42 = vpop.permute.xlu0 %4809 }
 0xa6b   : > { %16334 = vst [vmem:[#allocation61_spill] sm:$0xff] %v13995_v42  ;;  %v9690_v14 = vpop.f32.mrf.mxu1 }
 0xa6c   : > { %4695 = vrot.lane.b32.xlu0 %v13783_v60, %s16331_s26 }
 0xa6d   : > { %4689 = vrot.lane.b32.xlu1 %v13742_v56, %s16331_s26  ;;  %9748 = vmatmul.mubr.msk.f32.gmra.mxu0 %vm692_vm1, %v13891_v21  ;;  %v4582_v39 = vpop.f32.mrf.mxu1 }
 0xa6e   : > { %v14005_v47 = vpop.permute.xlu1 %4779  ;;  %v14007_v45 = vpop.permute.xlu0 %4811 }
 0xa6f   : > { %v9693_v37 = vpop.f32.mrf.mxu1 }
 0xa70   : > { %4667 = vrot.lane.b32.xlu0 %v13802_v17, %s16330_s20 }
 0xa71   : > { %4661 = vrot.lane.b32.xlu1 %v13761_v11, %s16330_s20 }
 0xa72   : > { %v14015_v48 = vpop.permute.xlu1 %4781  ;;  %v14017_v19 = vpop.permute.xlu0 %4749 }
 0xa74   : > { %4699 = vrot.lane.b32.xlu0 %v13802_v17, %s16331_s26 }
 0xa75   : > { %4693 = vrot.lane.b32.xlu1 %v13761_v11, %s16331_s26 }
 0xa76   : > { %v14023_v59 = vpop.permute.xlu1 %4751  ;;  %v14025_v56 = vpop.permute.xlu0 %4813 }
 0xa78   : > { %4671 = vrot.lane.b32.xlu0 %v13835_v32, %s16330_s20 }
 0xa79   : > { %4665 = vrot.lane.b32.xlu1 %v13778_v54, %s16330_s20 }
 0xa7a   : > { %v14031_v38 = vpop.permute.xlu1 %4783  ;;  %v14033_v60 = vpop.permute.xlu0 %4815 }
 0xa7c   : > { %4703 = vrot.lane.b32.xlu0 %v13835_v32, %s16331_s26 }
 0xa7d   : > { %4697 = vrot.lane.b32.xlu1 %v13778_v54, %s16331_s26 }
 0xa7e   : > { %v14039_v11 = vpop.permute.xlu1 %4785  ;;  %v14041_v17 = vpop.permute.xlu0 %4753 }
 0xa80   : > { %4675 = vrot.lane.b32.xlu0 %v13863_v13, %s16330_s20 }
 0xa81   : > { %4669 = vrot.lane.b32.xlu1 %v13819_v62, %s16330_s20 }
 0xa82   : > { %v14047_v55 = vpop.permute.xlu1 %4755  ;;  %v14049_v10 = vpop.permute.xlu0 %4817 }
 0xa84   : > { %4707 = vrot.lane.b32.xlu0 %v13863_v13, %s16331_s26  ;;  %v16335_v13 = vsub.s32 2, %v16327_v2 }
 0xa85   : > { %4701 = vrot.lane.b32.xlu1 %v13819_v62, %s16331_s26 }
 0xa86   : > { %v14055_v54 = vpop.permute.xlu1 %4787  ;;  %v14057_v32 = vpop.permute.xlu0 %4819  ;;  %v4243_v5 = vrot.slane %v13591_v6, %v16335_v13 }
 0xa87   : > { %v4592_v13 = vpop.f32.mrf.mxu1 }
 0xa88   : > { %4679 = vrot.lane.b32.xlu0 %v13891_v21, %s16330_s20  ;;  %v14072_v62 = vadd.f32 %v9693_v37, %v4243_v5  ;;  %v14082_v2 = vadd.f32 %v9690_v14, %v4243_v5  ;;  %v14092_v37 = vadd.f32 %v9687_v53, %v4243_v5  ;;  %v14096_v43 = vadd.f32 %v4592_v13, %v4243_v5 }
 0xa89   : > { %4673 = vrot.lane.b32.xlu1 %v13845_v51, %s16330_s20  ;;  %v14104_v14 = vadd.f32 %v4572_v27, %v4243_v5  ;;  %v14108_v33 = vadd.f32 %v4582_v39, %v4243_v5  ;;  %v14129_v39 = vadd.f32 %v14011_v63, %v4243_v5  ;;  %v14132_v41 = vadd.f32 %v13999_v0, %v4243_v5 }
 0xa8a   : > { %v14063_v25 = vpop.permute.xlu0 %4625  ;;  %v4758_v9 = vpop.permute.xlu1 %4757  ;;  %v14144_v63 = vadd.f32 %v13985_v28, %v4243_v5  ;;  %v14149_v0 = vadd.f32 %v13971_v46, %v4243_v5  ;;  %v14164_v46 = vadd.f32 %v13947_v35, %v4243_v5  ;;  %v14182_v35 = vadd.f32 %v13919_v57, %v4243_v5 }
 0xa8c   : > { %4711 = vrot.lane.b32.xlu0 %v13891_v21, %s16331_s26 }
 0xa8d   : > { %4705 = vrot.lane.b32.xlu1 %v13845_v51, %s16331_s26 }
 0xa8e   : > { %v14074_v12 = vpop.permute.xlu0 %4803  ;;  %v14076_v23 = vpop.permute.xlu1 %4771 }
 0xa8f   : > { %16336 = vst [vmem:[#allocation48_spill] sm:$0xff] %v14074_v12 }
 0xa90   : > { %4871 = vrot.lane.b32.xlu0 %v14072_v62, %s10885_s18 }
 0xa91   : > { %4677 = vrot.lane.b32.xlu1 %v13873_v44, %s16330_s20 }
 0xa92   : > { %v14084_v6 = vpop.permute.xlu0 %4629  ;;  %v14086_v21 = vpop.permute.xlu1 %4627 }
 0xa94   : > { %4867 = vrot.lane.b32.xlu0 %v14082_v2, %s10885_s18 }
 0xa95   : > { %4709 = vrot.lane.b32.xlu1 %v13873_v44, %s16331_s26  ;;  %v14116_v44 = vadd.f32 %v4562_v15, %v4243_v5 }
 0xa96   : > { %v14094_v51 = vpop.permute.xlu0 %4801 }
 0xa97   : > { %16337 = vst [vmem:[#allocation31_spill] sm:$0xff] %v14094_v51  ;;  %v14098_v34 = vpop.permute.xlu1 %4769  ;;  %v14120_v51 = vadd.f32 %v9684_v31, %v4243_v5 }
 0xa98   : > { %4863 = vrot.lane.b32.xlu0 %v14092_v37, %s10885_s18 }
 0xa99   : > { %4869 = vrot.lane.b32.xlu1 %v14096_v43, %s10885_s18 }
 0xa9a   : > { %v14106_v40 = vpop.permute.xlu0 %4633 }
 0xa9b   : > { %v14110_v53 = vpop.permute.xlu1 %4631 }
 0xa9c   : > { %4861 = vrot.lane.b32.xlu0 %v14104_v14, %s10885_s18 }
 0xa9d   : > { %4865 = vrot.lane.b32.xlu1 %v14108_v33, %s10885_s18 }
 0xa9e   : > { %v14118_v13 = vpop.permute.xlu0 %4821 }
 0xa9f   : > { %v14122_v27 = vpop.permute.xlu1 %4767 }
 0xaa0   : > { %4857 = vrot.lane.b32.xlu0 %v14116_v44, %s10885_s18 }
 0xaa1   : > { %4859 = vrot.lane.b32.xlu1 %v14120_v51, %s10885_s18 }
 0xaa2   : > { %v4760_v12 = vpop.permute.xlu0 %4759 }
 0xaa3   : > { %v14134_v15 = vpop.permute.xlu1 %4635  ;;  %9750 = vmatprep.subr.msk.mxu1 %vm692_vm1, %v4760_v12 }
 0xaa4   : > { %9751 = vmatpush3.xpose.msk.msra.mxu1 %vm692_vm1, %v4760_v12  ;;  %4853 = vrot.lane.b32.xlu0 %v14129_v39, %s10885_s18  ;;  %v14159_v12 = vadd.f32 %v13957_v36, %v4243_v5 }
 0xaa5   : > { %4855 = vrot.lane.b32.xlu1 %v14132_v41, %s10885_s18  ;;  %9752 = vmatprep.subr.msk.mxu1 %vm692_vm1, %v4758_v9 }
 0xaa6   : > { %v14146_v31 = vpop.permute.xlu0 %4799 }
 0xaa7   : > { %16338 = vst [vmem:[#allocation37_spill] sm:$0xff] %v14146_v31  ;;  %v4790_v4 = vpop.permute.xlu1 %4789 }
 0xaa8   : > { %9753 = vmatpush3.xpose.msk.msra.mxu1 %vm692_vm1, %v4758_v9  ;;  %4849 = vrot.lane.b32.xlu0 %v14144_v63, %s10885_s18  ;;  %v14177_v9 = vadd.f32 %v13933_v8, %v4243_v5 }
 0xaa9   : > { %4851 = vrot.lane.b32.xlu1 %v14149_v0, %s10885_s18  ;;  %9754 = vmatprep.subr.msk.mxu1 %vm692_vm1, %v14047_v55 }
 0xaaa   : > { %v14161_v28 = vpop.permute.xlu0 %4637 }
 0xaab   : > { %v14166_v31 = vpop.permute.xlu1 %4765 }
 0xaac   : > { %9755 = vmatpush3.xpose.msk.msra.mxu1 %vm692_vm1, %v14047_v55  ;;  %4845 = vrot.lane.b32.xlu0 %v14159_v12, %s10885_s18 }
 0xaad   : > { %4847 = vrot.lane.b32.xlu1 %v14164_v46, %s10885_s18  ;;  %9756 = vmatprep.subr.msk.mxu1 %vm692_vm1, %v14041_v17 }
 0xaae   : > { %v14179_v36 = vpop.permute.xlu0 %4797 }
 0xaaf   : > { %16339 = vst [vmem:[#allocation25_spill] sm:$0xff] %v14179_v36  ;;  %v14184_v42 = vpop.permute.xlu1 %4639 }
 0xab0   : > { %9757 = vmatpush3.xpose.msk.msra.mxu1 %vm692_vm1, %v14041_v17  ;;  %4841 = vrot.lane.b32.xlu0 %v14177_v9, %s10885_s18 }
 0xab1   : > { %4843 = vrot.lane.b32.xlu1 %v14182_v35, %s10885_s18  ;;  %9758 = vmatprep.subr.msk.mxu1 %vm692_vm1, %v14023_v59  ;;  %s15825_s18 = scalar_lea.hbm %s15888_s12, %s8354_s29 }
 0xab2   : > { %v14194_v55 = vpop.permute.xlu0 %4641 }
 0xab3   : > { %v14196_v8 = vpop.permute.xlu1 %4763 }
 0xab4   : > { %9759 = vmatpush3.xpose.msk.msra.mxu1 %vm692_vm1, %v14023_v59  ;;  %4917 = vrot.lane.b32.xlu0 %v14096_v43, %s16330_s20 }
 0xab5   : > { %4919 = vrot.lane.b32.xlu1 %v14072_v62, %s16330_s20  ;;  %9760 = vmatprep.subr.msk.mxu1 %vm692_vm1, %v14017_v19 }
 0xab6   : > { %v14206_v5 = vpop.permute.xlu0 %4795 }
 0xab7   : > { %16340 = vst [vmem:[#allocation54_spill] sm:$0xff] %v14206_v5  ;;  %v14208_v57 = vpop.permute.xlu1 %4643 }
 0xab8   : > { %9761 = vmatpush3.xpose.msk.msra.mxu1 %vm692_vm1, %v14017_v19  ;;  %4915 = vrot.lane.b32.xlu0 %v14082_v2, %s16330_s20 }
 0xab9   : > { %4967 = vrot.lane.b32.xlu1 %v14072_v62, %s16331_s26  ;;  %9762 = vmatprep.subr.msk.mxu1 %vm692_vm1, %v13993_v20 }
 0xaba   : > { %v14218_v59 = vpop.permute.xlu0 %4645 }
 0xabb   : > { %v14220_v17 = vpop.permute.xlu1 %4761 }
 0xabc   : > { %9763 = vmatpush3.xpose.msk.msra.mxu1 %vm692_vm1, %v13993_v20  ;;  %4913 = vrot.lane.b32.xlu0 %v14108_v33, %s16330_s20 }
 0xabd   : > { %4965 = vrot.lane.b32.xlu1 %v14096_v43, %s16331_s26  ;;  %9764 = vmatprep.subr.msk.mxu1 %vm692_vm1, %v13981_v30 }
 0xabe   : > { %v14230_v19 = vpop.permute.xlu0 %4793 }
 0xabf   : > { %16341 = vst [vmem:[#allocation28_spill] sm:$0xff] %v14230_v19  ;;  %v14232_v5 = vpop.permute.xlu1 %4647 }
 0xac0   : > { %9765 = vmatpush3.xpose.msk.msra.mxu1 %vm692_vm1, %v13981_v30  ;;  %4911 = vrot.lane.b32.xlu0 %v14092_v37, %s16330_s20 }
 0xac1   : > { %4963 = vrot.lane.b32.xlu1 %v14082_v2, %s16331_s26  ;;  %9766 = vmatprep.subr.msk.mxu1 %vm692_vm1, %v13941_v24 }
 0xac2   : > { %v14242_v20 = vpop.permute.xlu0 %4651 }
 0xac3   : > { %v4792_v36 = vpop.permute.xlu1 %4791 }
 0xac4   : > { %9806 = vmatprep.subr.msk.mxu0 %vm692_vm1, %v4792_v36  ;;  %9767 = vmatpush3.xpose.msk.msra.mxu1 %vm692_vm1, %v13941_v24 }
 0xac5   : > { %9807 = vmatpush3.xpose.msk.msra.mxu0 %vm692_vm1, %v4792_v36  ;;  %4961 = vrot.lane.b32.xlu1 %v14108_v33, %s16331_s26 }
 0xac6   : > { %4909 = vrot.lane.b32.xlu0 %v14104_v14, %s16330_s20  ;;  %9768 = vmatprep.subr.msk.mxu1 %vm692_vm1, %v13927_v58  ;;  %v14254_v30 = vpop.permute.xlu0 %4683 }
 0xac7   : > { %9808 = vmatprep.subr.msk.mxu0 %vm692_vm1, %v4790_v4  ;;  %v4824_v19 = vpop.permute.xlu1 %4823 }
 0xac8   : > { %9769 = vmatpush3.xpose.msk.msra.mxu1 %vm692_vm1, %v13927_v58 }
 0xac9   : > { %9809 = vmatpush3.xpose.msk.msra.mxu0 %vm692_vm1, %v4790_v4  ;;  %4959 = vrot.lane.b32.xlu1 %v14092_v37, %s16331_s26 }
 0xaca   : > { %4907 = vrot.lane.b32.xlu0 %v14120_v51, %s16330_s20  ;;  %9770 = vmatprep.subr.msk.mxu1 %vm692_vm1, %v13905_v3  ;;  %v14266_v24 = vpop.permute.xlu0 %4655 }
 0xacb   : > { %9810 = vmatprep.subr.msk.mxu0 %vm692_vm1, %v14055_v54  ;;  %v4650_v36 = vpop.permute.xlu1 %4649 }
 0xacc   : > { %9838 = vmatprep.mubr.msk.f32.mxu0 %vm692_vm1, %v4650_v36  ;;  %9771 = vmatpush3.xpose.msk.msra.mxu1 %vm692_vm1, %v13905_v3 }
 0xacd   : > { %9811 = vmatpush3.xpose.msk.msra.mxu0 %vm692_vm1, %v14055_v54  ;;  %4957 = vrot.lane.b32.xlu1 %v14104_v14, %s16331_s26 }
 0xace   : > { %4905 = vrot.lane.b32.xlu0 %v14116_v44, %s16330_s20  ;;  %9772 = vmatprep.subr.msk.mxu1 %vm692_vm1, %v13913_v22  ;;  %v14281_v58 = vpop.permute.xlu0 %4687 }
 0xacf   : > { %9812 = vmatprep.subr.msk.mxu0 %vm692_vm1, %v14039_v11  ;;  %v14285_v4 = vpop.permute.xlu1 %4681 }
 0xad0   : > { %9773 = vmatpush3.xpose.msk.msra.mxu1 %vm692_vm1, %v13913_v22 }
 0xad1   : > { %9813 = vmatpush3.xpose.msk.msra.mxu0 %vm692_vm1, %v14039_v11  ;;  %4955 = vrot.lane.b32.xlu1 %v14120_v51, %s16331_s26 }
 0xad2   : > { %4903 = vrot.lane.b32.xlu0 %v14132_v41, %s16330_s20  ;;  %9774 = vmatprep.subr.msk.mxu1 %vm692_vm1, %v13895_v18  ;;  %v14297_v3 = vpop.permute.xlu0 %4659 }
 0xad3   : > { %9814 = vmatprep.subr.msk.mxu0 %vm692_vm1, %v14031_v38  ;;  %v14301_v54 = vpop.permute.xlu1 %4653 }
 0xad4   : > { %9775 = vmatpush3.xpose.msk.msra.mxu1 %vm692_vm1, %v13895_v18 }
 0xad5   : > { %9815 = vmatpush3.xpose.msk.msra.mxu0 %vm692_vm1, %v14031_v38  ;;  %4953 = vrot.lane.b32.xlu1 %v14116_v44, %s16331_s26 }
 0xad6   : > { %4901 = vrot.lane.b32.xlu0 %v14129_v39, %s16330_s20  ;;  %9776 = vmatprep.subr.msk.mxu1 %vm692_vm1, %v13897_v49  ;;  %v14313_v22 = vpop.permute.xlu0 %4691 }
 0xad7   : > { %9816 = vmatprep.subr.msk.mxu0 %vm692_vm1, %v14015_v48  ;;  %v14317_v11 = vpop.permute.xlu1 %4685 }
 0xad8   : > { %9777 = vmatpush3.xpose.msk.msra.mxu1 %vm692_vm1, %v13897_v49 }
 0xad9   : > { %9817 = vmatpush3.xpose.msk.msra.mxu0 %vm692_vm1, %v14015_v48  ;;  %4951 = vrot.lane.b32.xlu1 %v14132_v41, %s16331_s26 }
 0xada   : > { %4899 = vrot.lane.b32.xlu0 %v14149_v0, %s16330_s20  ;;  %9778 = vmatprep.subr.msk.mxu1 %vm692_vm1, %v13857_v16  ;;  %v14329_v18 = vpop.permute.xlu0 %4663 }
 0xadb   : > { %9818 = vmatprep.subr.msk.mxu0 %vm692_vm1, %v14005_v47  ;;  %v14333_v38 = vpop.permute.xlu1 %4657 }
 0xadc   : > { %9779 = vmatpush3.xpose.msk.msra.mxu1 %vm692_vm1, %v13857_v16 }
 0xadd   : > { %9819 = vmatpush3.xpose.msk.msra.mxu0 %vm692_vm1, %v14005_v47  ;;  %4949 = vrot.lane.b32.xlu1 %v14129_v39, %s16331_s26  ;;  %v16343_v47 = vld [vmem:[#allocation53_spill] sm:$0xff] }
 0xade   : > { %4897 = vrot.lane.b32.xlu0 %v14144_v63, %s16330_s20  ;;  %9780 = vmatprep.subr.msk.mxu1 %vm692_vm1, %v13829_v52  ;;  %v14349_v48 = vpop.permute.xlu0 %4695 }
 0xadf   : > { %9820 = vmatprep.subr.msk.mxu0 %vm692_vm1, %v13979_v1  ;;  %v14347_v49 = vpop.permute.xlu1 %4689 }
 0xae0   : > { %9781 = vmatpush3.xpose.msk.msra.mxu1 %vm692_vm1, %v13829_v52 }
 0xae1   : > { %9821 = vmatpush3.xpose.msk.msra.mxu0 %vm692_vm1, %v13979_v1  ;;  %4947 = vrot.lane.b32.xlu1 %v14149_v0, %s16331_s26 }
 0xae2   : > { %4895 = vrot.lane.b32.xlu0 %v14164_v46, %s16330_s20  ;;  %9822 = vmatprep.subr.msk.mxu0 %vm692_vm1, %v13963_v61  ;;  %v14373_v52 = vpop.permute.xlu0 %4667 }
 0xae3   : > { %9862 = vmatprep.subr.msk.mxu1 %vm692_vm1, %v4824_v19  ;;  %v14362_v16 = vpop.permute.xlu1 %4661  ;;  %9783 = vmatmul.mubr.msk.f32.vlgmr.msra.gmra.mxu1 %vm692_vm1, %v13851_v50 }
 0xae4   : > { %9785 = vmatprep.mubr.msk.f32.mxu1 %vm692_vm1, %v13877_v7  ;;  %9863 = vmatpush3.xpose.msk.msra.mxu1 %vm692_vm1, %v4824_v19  ;;  %v16348_v19 = vld [vmem:[#allocation25_spill] sm:$0xff] }
 0xae5   : > { %9823 = vmatpush3.xpose.msk.msra.mxu0 %vm692_vm1, %v13963_v61  ;;  %4945 = vrot.lane.b32.xlu1 %v14144_v63, %s16331_s26  ;;  %v16342_v61 = vld [vmem:[#allocation61_spill] sm:$0xff] }
 0xae6   : > { %4893 = vrot.lane.b32.xlu0 %v14159_v12, %s16330_s20  ;;  %9824 = vmatprep.subr.msk.mxu0 %vm692_vm1, %v13925_v29 }
 0xae7   : > { %9864 = vmatprep.subr.msk.mxu1 %vm692_vm1, %v14118_v13  ;;  %v14381_v50 = vpop.permute.xlu1 %4693  ;;  %9786 = vmatmul.mubr.msk.f32.gmra.mxu1 %vm692_vm1, %v13875_v26 }
 0xae8   : > { %9788 = vmatprep.mubr.msk.f32.mxu1 %vm692_vm1, %v14063_v25  ;;  %9865 = vmatpush3.xpose.msk.msra.mxu1 %vm692_vm1, %v14118_v13  ;;  %v14403_v25 = vpop.permute.xlu0 %4699 }
 0xae9   : > { %9825 = vmatpush3.xpose.msk.msra.mxu0 %vm692_vm1, %v13925_v29  ;;  %4943 = vrot.lane.b32.xlu1 %v14164_v46, %s16331_s26 }
 0xaea   : > { %4891 = vrot.lane.b32.xlu0 %v14182_v35, %s16330_s20  ;;  %9826 = vmatprep.subr.msk.mxu0 %vm692_vm1, %v14076_v23 }
 0xaeb   : > { %9866 = vmatprep.subr.msk.mxu1 %vm692_vm1, %v14057_v32  ;;  %v14399_v26 = vpop.permute.xlu1 %4665  ;;  %9789 = vmatmul.mubr.msk.f32.gmra.mxu1 %vm692_vm1, %v14086_v21 }
 0xaec   : > { %9791 = vmatprep.mubr.msk.f32.mxu1 %vm692_vm1, %v14084_v6  ;;  %9867 = vmatpush3.xpose.msk.msra.mxu1 %vm692_vm1, %v14057_v32  ;;  %v16345_v6 = vld [vmem:[#allocation48_spill] sm:$0xff] }
 0xaed   : > { %9827 = vmatpush3.xpose.msk.msra.mxu0 %vm692_vm1, %v14076_v23  ;;  %4941 = vrot.lane.b32.xlu1 %v14159_v12, %s16331_s26  ;;  %v14431_v23 = vpop.permute.xlu0 %4671 }
 0xaee   : > { %4889 = vrot.lane.b32.xlu0 %v14177_v9, %s16330_s20  ;;  %9828 = vmatprep.subr.msk.mxu0 %vm692_vm1, %v14098_v34 }
 0xaef   : > { %9868 = vmatprep.subr.msk.mxu1 %vm692_vm1, %v14049_v10  ;;  %v14419_v7 = vpop.permute.xlu1 %4697  ;;  %9792 = vmatmul.mubr.msk.f32.gmra.mxu1 %vm692_vm1, %v14110_v53 }
 0xaf0   : > { %9794 = vmatprep.mubr.msk.f32.mxu1 %vm692_vm1, %v14106_v40  ;;  %9869 = vmatpush3.xpose.msk.msra.mxu1 %vm692_vm1, %v14049_v10 }
 0xaf1   : > { %9829 = vmatpush3.xpose.msk.msra.mxu0 %vm692_vm1, %v14098_v34  ;;  %4939 = vrot.lane.b32.xlu1 %v14182_v35, %s16331_s26  ;;  %v14455_v34 = vpop.permute.xlu0 %4703 }
 0xaf2   : > { %9830 = vmatprep.subr.msk.mxu0 %vm692_vm1, %v14122_v27  ;;  %9870 = vmatprep.subr.msk.mxu1 %vm692_vm1, %v14033_v60 }
 0xaf3   : > { %v14437_v29 = vpop.permute.xlu1 %4669  ;;  %9795 = vmatmul.mubr.msk.f32.gmra.mxu1 %vm692_vm1, %v14134_v15  ;;  %v16347_v15 = vld [vmem:[#allocation37_spill] sm:$0xff] }
 0xaf4   : > { %9797 = vmatprep.mubr.msk.f32.mxu1 %vm692_vm1, %v14161_v28  ;;  %9871 = vmatpush3.xpose.msk.msra.mxu1 %vm692_vm1, %v14033_v60  ;;  %v16344_v60 = vld [vmem:[#allocation47_spill] sm:$0xff] }
 0xaf5   : > { %9831 = vmatpush3.xpose.msk.msra.mxu0 %vm692_vm1, %v14122_v27  ;;  %9872 = vmatprep.subr.msk.mxu1 %vm692_vm1, %v14025_v56  ;;  %v14479_v1 = vpop.permute.xlu0 %4675 }
 0xaf6   : > { %9832 = vmatprep.subr.msk.mxu0 %vm692_vm1, %v14166_v31 }
 0xaf7   : > { %v14451_v40 = vpop.permute.xlu1 %4701  ;;  %9798 = vmatmul.mubr.msk.f32.gmra.mxu1 %vm692_vm1, %v14184_v42 }
 0xaf8   : > { %9800 = vmatprep.mubr.msk.f32.mxu1 %vm692_vm1, %v14194_v55  ;;  %9873 = vmatpush3.xpose.msk.msra.mxu1 %vm692_vm1, %v14025_v56 }
 0xaf9   : > { %9833 = vmatpush3.xpose.msk.msra.mxu0 %vm692_vm1, %v14166_v31  ;;  %9874 = vmatprep.subr.msk.mxu1 %vm692_vm1, %v14007_v45  ;;  %v14498_v56 = vpop.permute.xlu0 %4707  ;;  %v14568_v31 = vld [vmem:[%s16140_s1] sm:$0xff] }
 0xafa   : > { %9834 = vmatprep.subr.msk.mxu0 %vm692_vm1, %v14196_v8 }
 0xafb   : > { %v14467_v10 = vpop.permute.xlu1 %4673  ;;  %9801 = vmatmul.mubr.msk.f32.gmra.mxu1 %vm692_vm1, %v14208_v57  ;;  %v14587_v57 = vld [vmem:[%s16140_s1 + $0x18] sm:$0xff] }
 0xafc   : > { %9803 = vmatprep.mubr.msk.f32.mxu1 %vm692_vm1, %v14218_v59  ;;  %9875 = vmatpush3.xpose.msk.msra.mxu1 %vm692_vm1, %v14007_v45 }
 0xafd   : > { %9835 = vmatpush3.xpose.msk.msra.mxu0 %vm692_vm1, %v14196_v8  ;;  %9876 = vmatprep.subr.msk.mxu1 %vm692_vm1, %v16342_v61 }
 0xafe   : > { %9836 = vmatprep.subr.msk.mxu0 %vm692_vm1, %v14220_v17 }
 0xaff   : > { %v14483_v42 = vpop.permute.xlu1 %4705  ;;  %9804 = vmatmul.mubr.msk.f32.gmra.mxu1 %vm692_vm1, %v14232_v5 }
 0xb00   : > { %9877 = vmatpush3.xpose.msk.msra.mxu1 %vm692_vm1, %v16342_v61  ;;  %9894 = vmatprep.mubr.msk.f32.mxu1 %vm692_vm1, %v14285_v4  ;;  %v16350_v61 = vld [vmem:[#allocation28_spill] sm:$0xff] }
 0xb01   : > { %9837 = vmatpush3.xpose.msk.msra.mxu0 %vm692_vm1, %v14220_v17  ;;  %9878 = vmatprep.subr.msk.mxu1 %vm692_vm1, %v16343_v47 }
 0xb02   : > { %9918 = vmatprep.subr.mxu0 %v14072_v62 }
 0xb03   : > { %v14496_v45 = vpop.permute.xlu1 %4677 }
 0xb04   : > { %9839 = vmatmul.mubr.msk.f32.vlgmr.msra.gmra.mxu0 %vm692_vm1, %v14242_v20  ;;  %9879 = vmatpush3.xpose.msk.msra.mxu1 %vm692_vm1, %v16343_v47 }
 0xb05   : > { %9841 = vmatprep.mubr.msk.f32.mxu0 %vm692_vm1, %v14301_v54  ;;  %9919 = vmatpush3.msra.mxu0 %v14072_v62  ;;  %v14520_v62 = vpop.permute.xlu0 %4679 }
 0xb06   : > { %9880 = vmatprep.subr.msk.mxu1 %vm692_vm1, %v16344_v60  ;;  %9920 = vmatprep.subr.mxu0 %v14096_v43 }
 0xb07   : > { %v14510_v32 = vpop.permute.xlu1 %4709  ;;  %9921 = vmatpush3.msra.mxu0 %v14096_v43 }
 0xb08   : > { %9842 = vmatmul.mubr.msk.f32.gmra.mxu0 %vm692_vm1, %v14266_v24  ;;  %9922 = vmatprep.subr.mxu0 %v14082_v2 }
 0xb09   : > { %9844 = vmatprep.mubr.msk.f32.mxu0 %vm692_vm1, %v14333_v38  ;;  %9881 = vmatpush3.xpose.msk.msra.mxu1 %vm692_vm1, %v16344_v60  ;;  %v14541_v53 = vpop.permute.xlu0 %4711  ;;  %v16349_v38 = vld [vmem:[#allocation54_spill] sm:$0xff] }
 0xb0a   : > { %9923 = vmatpush3.msra.mxu0 %v14082_v2  ;;  %9882 = vmatprep.subr.msk.mxu1 %vm692_vm1, %v16345_v6  ;;  %v16346_v2 = vld [vmem:[#allocation31_spill] sm:$0xff] }
 0xb0b   : > { %9924 = vmatprep.subr.mxu0 %v14108_v33  ;;  %v14526_v43 = vpop.permute.xlu1 %4869 }
 0xb0c   : > { %9925 = vmatpush3.msra.mxu0 %v14108_v33 }
 0xb0d   : > { %9845 = vmatmul.mubr.msk.f32.gmra.mxu0 %vm692_vm1, %v14297_v3  ;;  %9926 = vmatprep.subr.mxu0 %v14092_v37  ;;  %v14575_v8 = vpop.permute.xlu0 %4871 }
 0xb0e   : > { %9847 = vmatprep.mubr.msk.f32.mxu0 %vm692_vm1, %v14362_v16  ;;  %9883 = vmatpush3.xpose.msk.msra.mxu1 %vm692_vm1, %v16345_v6 }
 0xb0f   : > { %9927 = vmatpush3.msra.mxu0 %v14092_v37  ;;  %9884 = vmatprep.subr.msk.mxu1 %vm692_vm1, %v16346_v2  ;;  %v14539_v21 = vpop.permute.xlu1 %4865  ;;  %v14551_v37 = vld [vmem:[%s16140_s1 + $0x8] sm:$0xff] }
 0xb10   : > { %9928 = vmatprep.subr.mxu0 %v14104_v14 }
 0xb11   : > { %9929 = vmatpush3.msra.mxu0 %v14104_v14  ;;  %v9728_v33 = vpop.f32.mrf.mxu0  ;;  %v14613_v4 = vpop.permute.xlu0 %4867 }
 0xb12   : > { %9848 = vmatmul.mubr.msk.f32.gmra.mxu0 %vm692_vm1, %v14329_v18  ;;  %9930 = vmatprep.subr.mxu0 %v14120_v51  ;;  %v14554_v13 = vadd.f32 %v14551_v37, %v9728_v33 }
 0xb13   : > { %9850 = vmatprep.mubr.msk.f32.mxu0 %vm692_vm1, %v14399_v26  ;;  %9885 = vmatpush3.xpose.msk.msra.mxu1 %vm692_vm1, %v16346_v2  ;;  %v5115_v14 = vpop.f32.mrf.mxu0  ;;  %v14560_v27 = vpop.permute.xlu1 %4859 }
 0xb14   : > { %9931 = vmatpush3.msra.mxu0 %v14120_v51  ;;  %9886 = vmatprep.subr.msk.mxu1 %vm692_vm1, %v16347_v15  ;;  %v14571_v28 = vadd.f32 %v14568_v31, %v5115_v14 }
 0xb15   : > { %9932 = vmatprep.subr.mxu0 %v14116_v44  ;;  %5823 = vmax.xlane.f32.xlu0 %v14554_v13  ;;  %v9731_v55 = vpop.f32.mrf.mxu0 }
 0xb16   : > { %9933 = vmatpush3.msra.mxu0 %v14116_v44  ;;  %5821 = vmax.xlane.f32.xlu1 %v14571_v28  ;;  %v14590_v59 = vadd.f32 %v14587_v57, %v9731_v55  ;;  %v14599_v44 = vld [vmem:[%s16140_s1 + $0x10] sm:$0xff] }
 0xb17   : > { %9851 = vmatmul.mubr.msk.f32.gmra.mxu0 %vm692_vm1, %v14373_v52  ;;  %9934 = vmatprep.subr.mxu0 %v14132_v41  ;;  %v5125_v51 = vpop.f32.mrf.mxu0  ;;  %v14582_v5 = vpop.permute.xlu1 %4855 }
 0xb18   : > { %9853 = vmatprep.mubr.msk.f32.mxu0 %vm692_vm1, %v14437_v29  ;;  %9887 = vmatpush3.xpose.msk.msra.mxu1 %vm692_vm1, %v16347_v15  ;;  %v14602_v17 = vadd.f32 %v14599_v44, %v5125_v51  ;;  %v14658_v29 = vpop.permute.xlu0 %4863 }
 0xb19   : > { %9935 = vmatpush3.msra.mxu0 %v14132_v41  ;;  %9888 = vmatprep.subr.msk.mxu1 %vm692_vm1, %v16348_v19  ;;  %v9734_v20 = vpop.f32.mrf.mxu0  ;;  %v14621_v41 = vld [vmem:[%s16140_s1 + $0x20] sm:$0xff] }
 0xb1a   : > { %9936 = vmatprep.subr.mxu0 %v14129_v39  ;;  %5827 = vmax.xlane.f32.xlu1 %v14590_v59 }
 0xb1b   : > { %9937 = vmatpush3.msra.mxu0 %v14129_v39  ;;  %5825 = vmax.xlane.f32.xlu0 %v14602_v17  ;;  %v5135_v24 = vpop.f32.mrf.mxu0  ;;  %v14611_v36 = vpop.permute.xlu1 %4851  ;;  %v14629_v39 = vld [vmem:[%s16140_s1 + $0x28] sm:$0xff] }
 0xb1c   : > { %9854 = vmatmul.mubr.msk.f32.gmra.mxu0 %vm692_vm1, %v14431_v23  ;;  %9938 = vmatprep.subr.mxu0 %v14149_v0  ;;  %v14624_v3 = vadd.f32 %v14621_v41, %v5135_v24  ;;  %v14632_v54 = vadd.f32 %v14629_v39, %v9734_v20  ;;  %v4862_v2 = vpop.permute.xlu0 %4861 }
 0xb1d   : > { %9856 = vmatprep.mubr.msk.f32.mxu0 %vm692_vm1, %v14467_v10  ;;  %9889 = vmatpush3.xpose.msk.msra.mxu1 %vm692_vm1, %v16348_v19  ;;  %v9737_v18 = vpop.f32.mrf.mxu0  ;;  %v14741_v19 = vld [vmem:[%s16140_s1 + $0x68] sm:$0xff] }
 0xb1e   : > { %9939 = vmatpush3.msra.mxu0 %v14149_v0  ;;  %9890 = vmatprep.subr.msk.mxu1 %vm692_vm1, %v16349_v38  ;;  %v14653_v0 = vld [vmem:[%s16140_s1 + $0x30] sm:$0xff] }
 0xb1f   : > { %9940 = vmatprep.subr.mxu0 %v14144_v63  ;;  %5831 = vmax.xlane.f32.xlu1 %v14632_v54  ;;  %v5145_v16 = vpop.f32.mrf.mxu0  ;;  %v14643_v52 = vpop.permute.xlu1 %4847 }
 0xb20   : > { %9941 = vmatpush3.msra.mxu0 %v14144_v63  ;;  %5829 = vmax.xlane.f32.xlu0 %v14624_v3  ;;  %v14656_v26 = vadd.f32 %v14653_v0, %v5145_v16  ;;  %v14663_v63 = vld [vmem:[%s16140_s1 + $0x38] sm:$0xff] }
 0xb21   : > { %9857 = vmatmul.mubr.msk.f32.gmra.mxu0 %vm692_vm1, %v14479_v1  ;;  %9942 = vmatprep.subr.mxu0 %v14164_v46  ;;  %v9740_v23 = vpop.f32.mrf.mxu0  ;;  %v14666_v10 = vadd.f32 %v14663_v63, %v9737_v18 }
 0xb22   : > { %9859 = vmatprep.mubr.msk.f32.mxu0 %vm692_vm1, %v14496_v45  ;;  %9891 = vmatpush3.xpose.msk.msra.mxu1 %vm692_vm1, %v16349_v38 }
 0xb23   : > { %9943 = vmatpush3.msra.mxu0 %v14164_v46  ;;  %9892 = vmatprep.subr.msk.mxu1 %vm692_vm1, %v16350_v61  ;;  %v5155_v1 = vpop.f32.mrf.mxu0  ;;  %v14675_v47 = vpop.permute.xlu1 %4843  ;;  %v14687_v46 = vld [vmem:[%s16140_s1 + $0x40] sm:$0xff] }
 0xb24   : > { %9944 = vmatprep.subr.mxu0 %v14159_v12  ;;  %5835 = vmax.xlane.f32.xlu1 %v14666_v10  ;;  %v14690_v60 = vadd.f32 %v14687_v46, %v5155_v1 }
 0xb25   : > { %9945 = vmatpush3.msra.mxu0 %v14159_v12  ;;  %5833 = vmax.xlane.f32.xlu0 %v14656_v26  ;;  %v9743_v45 = vpop.f32.mrf.mxu0  ;;  %v14695_v12 = vld [vmem:[%s16140_s1 + $0x48] sm:$0xff] }
 0xb26   : > { %9860 = vmatmul.mubr.msk.f32.gmra.mxu0 %vm692_vm1, %v14520_v62  ;;  %9946 = vmatprep.subr.mxu0 %v14182_v35  ;;  %v14698_v6 = vadd.f32 %v14695_v12, %v9740_v23 }
 0xb27   : > { %9893 = vmatpush3.xpose.msk.msra.mxu1 %vm692_vm1, %v16350_v61  ;;  %9947 = vmatpush3.msra.mxu0 %v14182_v35  ;;  %v5165_v62 = vpop.f32.mrf.mxu0  ;;  %v14707_v33 = vpop.permute.xlu1 %4919  ;;  %v14715_v35 = vld [vmem:[%s16140_s1 + $0x58] sm:$0xff] }
 0xb28   : > { %9948 = vmatprep.subr.mxu0 %v14177_v9  ;;  %9974 = vmatprep.subr.mxu1 %v14575_v8  ;;  %16351 = vst [vmem:[#allocation29_spill] sm:$0xff] %v14707_v33  ;;  %v14718_v15 = vadd.f32 %v14715_v35, %v9743_v45 }
 0xb29   : > { %9949 = vmatpush3.msra.mxu0 %v14177_v9  ;;  %5839 = vmax.xlane.f32.xlu1 %v14698_v6  ;;  %v9746_v14 = vpop.f32.mrf.mxu0 }
 0xb2a   : > { %9895 = vmatmul.mubr.msk.f32.vlgmr.msra.gmra.mxu1 %vm692_vm1, %v14254_v30  ;;  %5837 = vmax.xlane.f32.xlu0 %v14690_v60  ;;  %v14727_v30 = vld [vmem:[%s16140_s1 + $0x50] sm:$0xff]  ;;  %v14744_v20 = vadd.f32 %v14741_v19, %v9746_v14 }
 0xb2b   : > { %9897 = vmatprep.mubr.msk.f32.mxu1 %vm692_vm1, %v14317_v11  ;;  %9975 = vmatpush3.msra.mxu1 %v14575_v8  ;;  %v5175_v55 = vpop.f32.mrf.mxu0  ;;  %v14730_v51 = vadd.f32 %v14727_v30, %v5165_v62  ;;  %v4858_v8 = vpop.permute.xlu0 %4857 }
 0xb2c   : > { %9976 = vmatprep.subr.mxu1 %v14526_v43  ;;  %10030 = vmatprep.subr.mxu0 %v14707_v33 }
 0xb2d   : > { %9977 = vmatpush3.msra.mxu1 %v14526_v43  ;;  %5843 = vmax.xlane.f32.xlu1 %v14718_v15  ;;  %v9749_v11 = vpop.f32.mrf.mxu0 }
 0xb2e   : > { %9898 = vmatmul.mubr.msk.f32.gmra.mxu1 %vm692_vm1, %v14281_v58  ;;  %9978 = vmatprep.subr.mxu1 %v14613_v4  ;;  %v14754_v58 = vld [vmem:[%s16140_s1 + $0x60] sm:$0xff] }
 0xb2f   : > { %9900 = vmatprep.mubr.msk.f32.mxu1 %vm692_vm1, %v14347_v49  ;;  %9979 = vmatpush3.msra.mxu1 %v14613_v4  ;;  %v14757_v43 = vadd.f32 %v14754_v58, %v5175_v55  ;;  %v5185_v24 = vpop.f32.mrf.mxu0  ;;  %v14767_v49 = vld [vmem:[%s16140_s1 + $0x78] sm:$0xff]  ;;  %v4854_v18 = vpop.permute.xlu0 %4853 }
 0xb30   : > { %5841 = vmax.xlane.f32.xlu0 %v14730_v51  ;;  %9980 = vmatprep.subr.mxu1 %v14539_v21  ;;  %v14770_v4 = vadd.f32 %v14767_v49, %v9749_v11 }
 0xb31   : > { %9981 = vmatpush3.msra.mxu1 %v14539_v21  ;;  %5847 = vmax.xlane.f32.xlu1 %v14744_v20 }
 0xb32   : > { %9901 = vmatmul.mubr.msk.f32.gmra.mxu1 %vm692_vm1, %v14313_v22  ;;  %9982 = vmatprep.subr.mxu1 %v14658_v29  ;;  %v14779_v22 = vld [vmem:[%s16140_s1 + $0x70] sm:$0xff] }
 0xb33   : > { %9903 = vmatprep.mubr.msk.f32.mxu1 %vm692_vm1, %v14381_v50  ;;  %9983 = vmatpush3.msra.mxu1 %v14658_v29  ;;  %v14782_v21 = vadd.f32 %v14779_v22, %v5185_v24  ;;  %v4850_v50 = vpop.permute.xlu0 %4849 }
 0xb34   : > { %5845 = vmax.xlane.f32.xlu0 %v14757_v43  ;;  %9984 = vmatprep.subr.mxu1 %v4862_v2 }
 0xb35   : > { %9985 = vmatpush3.msra.mxu1 %v4862_v2  ;;  %5851 = vmax.xlane.f32.xlu1 %v14770_v4 }
 0xb36   : > { %9904 = vmatmul.mubr.msk.f32.gmra.mxu1 %vm692_vm1, %v14349_v48  ;;  %9986 = vmatprep.subr.mxu1 %v14560_v27 }
 0xb37   : > { %9906 = vmatprep.mubr.msk.f32.mxu1 %vm692_vm1, %v14419_v7  ;;  %9987 = vmatpush3.msra.mxu1 %v14560_v27  ;;  %v4846_v48 = vpop.permute.xlu0 %4845  ;;  %v14814_v7 = vpop.permute.xlu1 %4967 }
 0xb38   : > { %9988 = vmatprep.subr.mxu1 %v4858_v8  ;;  %5849 = vmax.xlane.f32.xlu0 %v14782_v21  ;;  %16352 = vst [vmem:[#allocation27_spill] sm:$0xff] %v14814_v7 }
 0xb39   : > { %9989 = vmatpush3.msra.mxu1 %v4858_v8 }
 0xb3a   : > { %9907 = vmatmul.mubr.msk.f32.gmra.mxu1 %vm692_vm1, %v14403_v25  ;;  %9990 = vmatprep.subr.mxu1 %v14582_v5 }
 0xb3b   : > { %9909 = vmatprep.mubr.msk.f32.mxu1 %vm692_vm1, %v14451_v40  ;;  %9991 = vmatpush3.msra.mxu1 %v14582_v5  ;;  %v4842_v25 = vpop.permute.xlu0 %4841 }
 0xb3c   : > { %9992 = vmatprep.subr.mxu1 %v4854_v18 }
 0xb3d   : > { %9993 = vmatpush3.msra.mxu1 %v4854_v18 }
 0xb3e   : > { %9910 = vmatmul.mubr.msk.f32.gmra.mxu1 %vm692_vm1, %v14455_v34  ;;  %9994 = vmatprep.subr.mxu1 %v14611_v36  ;;  %v14819_v34 = vpop.permute.xlu1 %4965 }
 0xb3f   : > { %9912 = vmatprep.mubr.msk.f32.mxu1 %vm692_vm1, %v14483_v42  ;;  %9995 = vmatpush3.msra.mxu1 %v14611_v36  ;;  %v14817_v40 = vpop.permute.xlu0 %4917  ;;  %16354 = vst [vmem:[#allocation32_spill] sm:$0xff] %v14819_v34 }
 0xb40   : > { %9996 = vmatprep.subr.mxu1 %v4850_v50  ;;  %16353 = vst [vmem:[#allocation33_spill] sm:$0xff] %v14817_v40 }
 0xb41   : > { %9997 = vmatpush3.msra.mxu1 %v4850_v50 }
 0xb42   : > { %9913 = vmatmul.mubr.msk.f32.gmra.mxu1 %vm692_vm1, %v14498_v56  ;;  %9998 = vmatprep.subr.mxu1 %v14643_v52  ;;  %v14823_v56 = vpop.permute.xlu1 %4963 }
 0xb43   : > { %9915 = vmatprep.mubr.msk.f32.mxu1 %vm692_vm1, %v14510_v32  ;;  %9999 = vmatpush3.msra.mxu1 %v14643_v52  ;;  %v14821_v42 = vpop.permute.xlu0 %4915  ;;  %16356 = vst [vmem:[#allocation55_spill] sm:$0xff] %v14823_v56 }
 0xb44   : > { %10000 = vmatprep.subr.mxu1 %v4846_v48  ;;  %16355 = vst [vmem:[#allocation49_spill] sm:$0xff] %v14821_v42 }
 0xb45   : > { %10001 = vmatpush3.msra.mxu1 %v4846_v48 }
 0xb46   : > { %9916 = vmatmul.mubr.msk.f32.gmra.mxu1 %vm692_vm1, %v14541_v53  ;;  %10002 = vmatprep.subr.mxu1 %v14675_v47  ;;  %v14827_v53 = vpop.permute.xlu1 %4961 }
 0xb47   : > { %10003 = vmatpush3.msra.mxu1 %v14675_v47  ;;  %v14825_v32 = vpop.permute.xlu0 %4913  ;;  %16358 = vst [vmem:[#allocation56_spill] sm:$0xff] %v14827_v53 }
 0xb48   : > { %10004 = vmatprep.subr.mxu1 %v4842_v25  ;;  %16357 = vst [vmem:[#allocation38_spill] sm:$0xff] %v14825_v32 }
 0xb49   : > { %10005 = vmatpush3.msra.mxu1 %v4842_v25 }
 0xb4a   : > { %10086 = vmatprep.subr.mxu1 %v14814_v7  ;;  %v14831_v5 = vpop.permute.xlu1 %4959 }
 0xb4b   : > { %v14829_v27 = vpop.permute.xlu0 %4911  ;;  %16360 = vst [vmem:[#allocation46_spill] sm:$0xff] %v14831_v5 }
 0xb4c   : > { %16359 = vst [vmem:[#allocation57_spill] sm:$0xff] %v14829_v27 }
 0xb4e   : > { %v14835_v38 = vpop.permute.xlu1 %4957 }
 0xb4f   : > { %v14833_v36 = vpop.permute.xlu0 %4909  ;;  %16362 = vst [vmem:[#allocation73_spill] sm:$0xff] %v14835_v38 }
 0xb50   : > { %16361 = vst [vmem:[#allocation58_spill] sm:$0xff] %v14833_v36 }
 0xb52   : > { %v14847_v1 = vpop.permute.xlu1 %4955 }
 0xb53   : > { %v14840_v23 = vpop.permute.xlu0 %4907  ;;  %16364 = vst [vmem:[#allocation63_spill] sm:$0xff] %v14847_v1 }
 0xb54   : > { %16363 = vst [vmem:[#allocation74_spill] sm:$0xff] %v14840_v23 }
 0xb56   : > { %v14851_v45 = vpop.permute.xlu1 %4953 }
 0xb57   : > { %v14849_v47 = vpop.permute.xlu0 %4905  ;;  %16366 = vst [vmem:[#allocation59_spill] sm:$0xff] %v14851_v45 }
 0xb58   : > { %16365 = vst [vmem:[#allocation72_spill] sm:$0xff] %v14849_v47 }
 0xb5a   : > { %v14855_v2 = vpop.permute.xlu1 %4951 }
 0xb5b   : > { %v14853_v62 = vpop.permute.xlu0 %4903  ;;  %16368 = vst [vmem:[#allocation70_spill] sm:$0xff] %v14855_v2 }
 0xb5c   : > { %16367 = vst [vmem:[#allocation64_spill] sm:$0xff] %v14853_v62 }
 0xb5e   : > { %v14859_v55 = vpop.permute.xlu1 %4949 }
 0xb5f   : > { %v14857_v14 = vpop.permute.xlu0 %4901  ;;  %16370 = vst [vmem:[#allocation65_spill] sm:$0xff] %v14859_v55 }
 0xb60   : > { %16369 = vst [vmem:[#allocation51_spill] sm:$0xff] %v14857_v14 }
 0xb62   : > { %v14863_v8 = vpop.permute.xlu1 %4947 }
 0xb63   : > { %v14861_v11 = vpop.permute.xlu0 %4899  ;;  %16372 = vst [vmem:[#allocation62_spill] sm:$0xff] %v14863_v8 }
 0xb64   : > { %16371 = vst [vmem:[#allocation52_spill] sm:$0xff] %v14861_v11 }
 0xb67   : > { %v14865_v24 = vpop.permute.xlu0 %4897 }
 0xb68   : > { %16373 = vst [vmem:[#allocation66_spill] sm:$0xff] %v14865_v24 }
 0xb6b   : > { %v14876_v45 = vpop.permute.xlu0 %4895 }
 0xb6c   : > { %16375 = vst [vmem:[#allocation67_spill] sm:$0xff] %v14876_v45 }
 0xb6f   : > { %v14892_v5 = vpop.permute.xlu0 %4893 }
 0xb70   : > { %16377 = vst [vmem:[#allocation69_spill] sm:$0xff] %v14892_v5 }
 0xba3   : > { %v9784_v16 = vpop.f32.mrf.mxu1 }
 0xba4   : > { %v14838_v52 = vadd.f32 %v14551_v37, %v9784_v16  ;;  %v14870_v16 = vpop.permute.xlu1 %4945 }
 0xba5   : > { %v5324_v29 = vpop.f32.mrf.mxu1  ;;  %16374 = vst [vmem:[#allocation75_spill] sm:$0xff] %v14870_v16 }
 0xba6   : > { %v14843_v61 = vadd.f32 %v14568_v31, %v5324_v29  ;;  %5855 = vmax.xlane.f32.xlu1 %v14838_v52 }
 0xba7   : > { %v9787_v18 = vpop.f32.mrf.mxu1 }
 0xba8   : > { %5853 = vmax.xlane.f32.xlu0 %v14843_v61  ;;  %v14879_v8 = vadd.f32 %v14587_v57, %v9787_v18 }
 0xba9   : > { %v5334_v55 = vpop.f32.mrf.mxu1 }
 0xbab   : > { %v9790_v16 = vpop.f32.mrf.mxu1 }
 0xbac   : > { %v14899_v56 = vadd.f32 %v14629_v39, %v9790_v16 }
 0xbc4   : > { %v9840_v50 = vpop.f32.mrf.mxu0 }
 0xbc5   : > { %v14868_v48 = vadd.f32 %v14551_v37, %v9840_v50  ;;  %v14883_v50 = vadd.f32 %v14599_v44, %v5334_v55  ;;  %v5344_v55 = vpop.f32.mrf.mxu1 }
 0xbc6   : > { %v5533_v25 = vpop.f32.mrf.mxu0 }
 0xbc7   : > { %v14873_v29 = vadd.f32 %v14568_v31, %v5533_v25  ;;  %5887 = vmax.xlane.f32.xlu1 %v14868_v48  ;;  %v14886_v25 = vpop.permute.xlu1 %4943  ;;  %v9793_v34 = vpop.f32.mrf.mxu1 }
 0xbc8   : > { %v9843_v2 = vpop.f32.mrf.mxu0  ;;  %16376 = vst [vmem:[#allocation68_spill] sm:$0xff] %v14886_v25  ;;  %v14921_v24 = vadd.f32 %v14663_v63, %v9793_v34 }
 0xbc9   : > { %5885 = vmax.xlane.f32.xlu0 %v14873_v29  ;;  %v14889_v38 = vadd.f32 %v14587_v57, %v9843_v2  ;;  %v14905_v2 = vadd.f32 %v14621_v41, %v5344_v55 }
 0xbca   : > { %v5543_v1 = vpop.f32.mrf.mxu0 }
 0xbcb   : > { %5859 = vmax.xlane.f32.xlu1 %v14879_v8  ;;  %v14895_v18 = vadd.f32 %v14599_v44, %v5543_v1  ;;  %v14902_v25 = vpop.permute.xlu1 %4941  ;;  %16379 = vst [vmem:[#allocation71_spill] sm:$0xff] %v14905_v2  ;;  %v14908_v1 = vpop.permute.xlu0 %4891 }
 0xbcc   : > { %16378 = vst [vmem:[#allocation50_spill] sm:$0xff] %v14902_v25  ;;  %16380 = vst [vmem:[#allocation5_spill] sm:$0xff] %v14908_v1  ;;  %v5354_v25 = vpop.f32.mrf.mxu1 }
 0xbcd   : > { %5857 = vmax.xlane.f32.xlu0 %v14883_v50  ;;  %v9846_v53 = vpop.f32.mrf.mxu0 }
 0xbce   : > { %v14911_v5 = vadd.f32 %v14629_v39, %v9846_v53  ;;  %v14927_v53 = vadd.f32 %v14653_v0, %v5354_v25 }
 0xbcf   : > { %5891 = vmax.xlane.f32.xlu1 %v14889_v38  ;;  %v5553_v7 = vpop.f32.mrf.mxu0  ;;  %v14918_v55 = vpop.permute.xlu1 %4939 }
 0xbd0   : > { %16381 = vst [vmem:[#allocation6_spill] sm:$0xff] %v14911_v5  ;;  %v14915_v16 = vadd.f32 %v14621_v41, %v5553_v7  ;;  %16382 = vst [vmem:[#allocation7_spill] sm:$0xff] %v14918_v55  ;;  %v14924_v1 = vpop.permute.xlu0 %4889  ;;  %v9796_v7 = vpop.f32.mrf.mxu1 }
 0xbd1   : > { %5889 = vmax.xlane.f32.xlu0 %v14895_v18  ;;  %16383 = vst [vmem:[#allocation8_spill] sm:$0xff] %v14924_v1  ;;  %16384 = vst [vmem:[#allocation9_spill] sm:$0xff] %v14927_v53  ;;  %v14939_v25 = vadd.f32 %v14695_v12, %v9796_v7 }
 0xbd2   : > { %v9849_v45 = vpop.f32.mrf.mxu0  ;;  %v5364_v1 = vpop.f32.mrf.mxu1 }
 0xbd3   : > { %5863 = vmax.xlane.f32.xlu1 %v14899_v56  ;;  %v5822_v14 = vpop.xlane.xlu1 %5821  ;;  %v14931_v62 = vadd.f32 %v14663_v63, %v9849_v45  ;;  %16387 = vst [vmem:[#allocation12_spill] sm:$0xff] %v14939_v25  ;;  %v14943_v45 = vadd.f32 %v14687_v46, %v5364_v1 }
 0xbd4   : > { %v5563_v11 = vpop.f32.mrf.mxu0  ;;  %v5824_v55 = vpop.xlane.xlu0 %5823 }
 0xbd5   : > { %5861 = vmax.xlane.f32.xlu0 %v14905_v2  ;;  %16385 = vst [vmem:[#allocation10_spill] sm:$0xff] %v14931_v62  ;;  %v14935_v34 = vadd.f32 %v14653_v0, %v5563_v11  ;;  %16388 = vst [vmem:[#allocation13_spill] sm:$0xff] %v14943_v45  ;;  %v9799_v27 = vpop.f32.mrf.mxu1 }
 0xbd6   : > { %v14955_v1 = vadd.f32 %v14715_v35, %v9799_v27 }
 0xbd7   : > { %5895 = vmax.xlane.f32.xlu1 %v14911_v5  ;;  %16386 = vst [vmem:[#allocation11_spill] sm:$0xff] %v14935_v34  ;;  %v9852_v47 = vpop.f32.mrf.mxu0  ;;  %v5828_v23 = vpop.xlane.xlu1 %5827 }
 0xbd8   : > { %v5826_v36 = vpop.xlane.xlu0 %5825  ;;  %v14947_v11 = vadd.f32 %v14695_v12, %v9852_v47  ;;  %v5374_v7 = vpop.f32.mrf.mxu1  ;;  %16391 = vst [vmem:[#allocation16_spill] sm:$0xff] %v14955_v1 }
 0xbd9   : > { %5893 = vmax.xlane.f32.xlu0 %v14915_v16  ;;  %v5573_v32 = vpop.f32.mrf.mxu0  ;;  %v5951_v5 = vsub.f32 %v14602_v17, %v5826_v36 }
 0xbda   : > { %16389 = vst [vmem:[#allocation14_spill] sm:$0xff] %v14947_v11  ;;  %v14951_v42 = vadd.f32 %v14687_v46, %v5573_v32  ;;  %v9802_v47 = vpop.f32.mrf.mxu1  ;;  %v5949_v32 = vsub.f32 %v14571_v28, %v5822_v14 }
 0xbdb   : > { %5867 = vmax.xlane.f32.xlu1 %v14921_v24  ;;  %v5832_v33 = vpop.xlane.xlu1 %5831  ;;  %v14974_v28 = vadd.f32 %v14741_v19, %v9802_v47 }
 0xbdc   : > { %16390 = vst [vmem:[#allocation15_spill] sm:$0xff] %v14951_v42  ;;  %v9855_v40 = vpop.f32.mrf.mxu0 }
 0xbdd   : > { %5865 = vmax.xlane.f32.xlu0 %v14927_v53  ;;  %v5830_v53 = vpop.xlane.xlu0 %5829 }
 0xbdf   : > { %5899 = vmax.xlane.f32.xlu1 %v14931_v62  ;;  %v14959_v62 = vadd.f32 %v14727_v30, %v5374_v7  ;;  %v5836_v27 = vpop.xlane.xlu1 %5835  ;;  %v5384_v7 = vpop.f32.mrf.mxu1 }
 0xbe0   : > { %v14979_v14 = vadd.f32 %v14754_v58, %v5384_v7 }
 0xbe1   : > { %5897 = vmax.xlane.f32.xlu0 %v14935_v34  ;;  %16392 = vst [vmem:[#allocation17_spill] sm:$0xff] %v14959_v62  ;;  %v5834_v2 = vpop.xlane.xlu0 %5833  ;;  %v6013_v34 = vmul.f32 1.442695, %v5949_v32  ;;  %v5954_v32 = vsub.f32 %v14632_v54, %v5832_v33  ;;  %v5953_v33 = vsub.f32 %v14624_v3, %v5830_v53  ;;  %v5956_v3 = vsub.f32 %v14666_v10, %v5836_v27 }
 0xbe3   : > { %5871 = vmax.xlane.f32.xlu1 %v14939_v25  ;;  %v5950_v25 = vsub.f32 %v14554_v13, %v5824_v55  ;;  %v5952_v13 = vsub.f32 %v14590_v59, %v5828_v23  ;;  %v9805_v55 = vpop.f32.mrf.mxu1  ;;  %10549 = vpow2.f32 %v6013_v34  ;;  %v5840_v17 = vpop.xlane.xlu1 %5839  ;;  %v5955_v23 = vsub.f32 %v14656_v26, %v5834_v2 }
 0xbe4   : > { %v6023_v54 = vmul.f32 1.442695, %v5954_v32  ;;  %v5958_v10 = vsub.f32 %v14698_v6, %v5840_v17 }
 0xbe5   : > { %5869 = vmax.xlane.f32.xlu0 %v14943_v45  ;;  %v5583_v45 = vpop.f32.mrf.mxu0  ;;  %v6019_v59 = vmul.f32 1.442695, %v5952_v13  ;;  %v5394_v34 = vpop.f32.mrf.mxu1  ;;  %v6025_v7 = vmul.f32 1.442695, %v5955_v23 }
 0xbe7   : > { %5903 = vmax.xlane.f32.xlu1 %v14947_v11  ;;  %v14964_v11 = vadd.f32 %v14715_v35, %v9855_v40  ;;  %v6015_v40 = vmul.f32 1.442695, %v5950_v25  ;;  %v5838_v25 = vpop.xlane.xlu0 %5837  ;;  %v5844_v2 = vpop.xlane.xlu1 %5843 }
 0xbe8   : > { %v5957_v26 = vsub.f32 %v14690_v60, %v5838_v25 }
 0xbe9   : > { %5901 = vmax.xlane.f32.xlu0 %v14951_v42  ;;  %v14969_v42 = vadd.f32 %v14727_v30, %v5583_v45  ;;  %10551 = vpow2.f32 %v6015_v40  ;;  %v14999_v40 = vadd.f32 %v14779_v22, %v5394_v34 }
 0xbea   : > { %v15012_v25 = vpop.f32.mrf.mxu1 }
 0xbeb   : > { %5875 = vmax.xlane.f32.xlu1 %v14955_v1  ;;  %v9858_v1 = vpop.f32.mrf.mxu0  ;;  %v5842_v13 = vpop.xlane.xlu0 %5841 }
 0xbec   : > { %v14984_v36 = vadd.f32 %v14741_v19, %v9858_v1  ;;  %v14994_v1 = vadd.f32 %v14767_v49, %v9805_v55  ;;  %v6029_v55 = vmul.f32 1.442695, %v5957_v26  ;;  %v5959_v60 = vsub.f32 %v14730_v51, %v5842_v13  ;;  %v5848_v23 = vpop.xlane.xlu1 %5847 }
 0xbed   : > { %5873 = vmax.xlane.f32.xlu0 %v14959_v62  ;;  %v5593_v45 = vpop.f32.mrf.mxu0  ;;  %v6017_v62 = vmul.f32 1.442695, %v5951_v5 }
 0xbee   : > { %v14989_v47 = vadd.f32 %v14754_v58, %v5593_v45  ;;  %v6021_v45 = vmul.f32 1.442695, %v5953_v33  ;;  %v6033_v34 = vmul.f32 1.442695, %v5959_v60  ;;  %v6031_v33 = vmul.f32 1.442695, %v5958_v10 }
 0xbef   : > { %5907 = vmax.xlane.f32.xlu1 %v14964_v11  ;;  %v9861_v5 = vpop.f32.mrf.mxu0  ;;  %10553 = vpow2.f32 %v6017_v62  ;;  %v5962_v60 = vsub.f32 %v14744_v20, %v5848_v23 }
 0xbf0   : > { %10555 = vpow2.f32 %v6019_v59  ;;  %v15004_v53 = vadd.f32 %v14767_v49, %v9861_v5  ;;  %v6027_v59 = vmul.f32 1.442695, %v5956_v3  ;;  %v15016_v27 = vpop.eup %10549  ;;  %v5846_v5 = vpop.xlane.xlu0 %5845 }
 0xbf1   : > { %5905 = vmax.xlane.f32.xlu0 %v14969_v42  ;;  %v5603_v62 = vpop.f32.mrf.mxu0  ;;  %10557 = vpow2.f32 %v6023_v54  ;;  %v5742_v54 = vpop.f32.mrf.mxu1  ;;  %v5961_v17 = vsub.f32 %v14757_v43, %v5846_v5 }
 0xbf2   : > { %16393 = vst [vmem:[#allocation18_spill] sm:$0xff] %v15004_v53  ;;  %10559 = vpow2.f32 %v6025_v7  ;;  %v15009_v32 = vadd.f32 %v14779_v22, %v5603_v62  ;;  %v5960_v7 = vsub.f32 %v14718_v15, %v5844_v2  ;;  %v5852_v13 = vpop.xlane.xlu1 %5851 }
 0xbf3   : > { %5879 = vmax.xlane.f32.xlu1 %v14974_v28  ;;  %10561 = vpow2.f32 %v6021_v45  ;;  %v9899_v62 = vpop.f32.mrf.mxu1  ;;  %v6037_v15 = vmul.f32 1.442695, %v5961_v17  ;;  %v5964_v2 = vsub.f32 %v14770_v4, %v5852_v13 }
 0xbf4   : > { %10563 = vpow2.f32 %v6029_v55  ;;  %v6035_v45 = vmul.f32 1.442695, %v5960_v7  ;;  %v5850_v5 = vpop.xlane.xlu0 %5849 }
 0xbf5   : > { %5877 = vmax.xlane.f32.xlu0 %v14979_v14  ;;  %10565 = vpow2.f32 %v6027_v59  ;;  %v5752_v43 = vpop.f32.mrf.mxu1  ;;  %v6043_v10 = vmul.f32 1.442695, %v5964_v2  ;;  %v5963_v20 = vsub.f32 %v14782_v21, %v5850_v5  ;;  %v15065_v5 = vadd.f32 %v14551_v37, %v15012_v25 }
 0xbf6   : > { %v15019_v51 = vpop.eup %10551  ;;  %10567 = vpow2.f32 %v6033_v34  ;;  %v15079_v37 = vadd.f32 %v14587_v57, %v9899_v62 }
 0xbf7   : > { %5911 = vmax.xlane.f32.xlu1 %v14984_v36  ;;  %10569 = vpow2.f32 %v6031_v33  ;;  %v9902_v4 = vpop.f32.mrf.mxu1  ;;  %v6039_v33 = vmul.f32 1.442695, %v5962_v60 }
 0xbf8   : > { %10571 = vpow2.f32 %v6035_v45  ;;  %v6041_v45 = vmul.f32 1.442695, %v5963_v20  ;;  %v15075_v20 = vadd.f32 %v14599_v44, %v5752_v43 }
 0xbf9   : > { %5909 = vmax.xlane.f32.xlu0 %v14989_v47  ;;  %10573 = vpow2.f32 %v6037_v15  ;;  %v5762_v17 = vpop.f32.mrf.mxu1  ;;  %v15054_v15 = vadd.f32 %v14568_v31, %v5742_v54 }
 0xbfa   : > { %10575 = vpow2.f32 %v6043_v10  ;;  %v15090_v44 = vadd.f32 %v14621_v41, %v5762_v17 }
 0xbfb   : > { %5883 = vmax.xlane.f32.xlu1 %v14994_v1  ;;  %10577 = vpow2.f32 %v6039_v33  ;;  %v9905_v2 = vpop.f32.mrf.mxu1 }
 0xbfc   : > { %v15023_v6 = vpop.eup %10553  ;;  %10579 = vpow2.f32 %v6041_v45  ;;  %v15094_v57 = vadd.f32 %v14663_v63, %v9905_v2 }
 0xbfd   : > { %5881 = vmax.xlane.f32.xlu0 %v14999_v40  ;;  %v15027_v26 = vpop.eup %10555  ;;  %v5772_v10 = vpop.f32.mrf.mxu1 }
 0xbfe   : > { %v15030_v3 = vpop.eup %10557  ;;  %v15098_v62 = vadd.f32 %v14653_v0, %v5772_v10 }
 0xbff   : > { %5915 = vmax.xlane.f32.xlu1 %v15004_v53  ;;  %v15034_v55 = vpop.eup %10559  ;;  %v9908_v54 = vpop.f32.mrf.mxu1 }
 0xc00   : > { %v15038_v59 = vpop.eup %10561  ;;  %v15103_v41 = vadd.f32 %v14695_v12, %v9908_v54 }
 0xc01   : > { %5913 = vmax.xlane.f32.xlu0 %v15009_v32  ;;  %v15041_v34 = vpop.eup %10563  ;;  %v5782_v45 = vpop.f32.mrf.mxu1 }
 0xc02   : > { %v15044_v7 = vpop.eup %10565  ;;  %v15108_v2 = vadd.f32 %v14687_v46, %v5782_v45 }
 0xc03   : > { %6141 = vadd.xlane.f32.xlu1 %v15016_v27  ;;  %v15048_v23 = vpop.eup %10567  ;;  %v9911_v53 = vpop.f32.mrf.mxu1 }
 0xc04   : > { %v15051_v13 = vpop.eup %10569  ;;  %v15112_v10 = vadd.f32 %v14715_v35, %v9911_v53 }
 0xc05   : > { %6143 = vadd.xlane.f32.xlu0 %v15019_v51  ;;  %v15058_v21 = vpop.eup %10571  ;;  %v5792_v43 = vpop.f32.mrf.mxu1 }
 0xc06   : > { %v15061_v60 = vpop.eup %10573  ;;  %v15116_v12 = vadd.f32 %v14727_v30, %v5792_v43 }
 0xc07   : > { %6145 = vadd.xlane.f32.xlu1 %v15023_v6  ;;  %v15069_v31 = vpop.eup %10575 }
 0xc08   : > { %16394 = vst [vmem:[#allocation19_spill] sm:$0xff] %v15069_v31  ;;  %v15072_v33 = vpop.eup %10577 }
 0xc09   : > { %6147 = vadd.xlane.f32.xlu0 %v15027_v26  ;;  %16395 = vst [vmem:[#allocation20_spill] sm:$0xff] %v15072_v33  ;;  %v15083_v25 = vpop.eup %10579 }
 0xc0a   : > { %16396 = vst [vmem:[#allocation21_spill] sm:$0xff] %v15083_v25 }
 0xc0b   : > { %6151 = vadd.xlane.f32.xlu1 %v15030_v3 }
 0xc0d   : > { %6153 = vadd.xlane.f32.xlu0 %v15034_v55 }
 0xc0f   : > { %6149 = vadd.xlane.f32.xlu1 %v15038_v59 }
 0xc11   : > { %6157 = vadd.xlane.f32.xlu0 %v15041_v34 }
 0xc13   : > { %6155 = vadd.xlane.f32.xlu1 %v15044_v7 }
 0xc15   : > { %6161 = vadd.xlane.f32.xlu0 %v15048_v23 }
 0xc17   : > { %6159 = vadd.xlane.f32.xlu1 %v15051_v13 }
 0xc19   : > { %5917 = vmax.xlane.f32.xlu0 %v15054_v15 }
 0xc1b   : > { %6163 = vadd.xlane.f32.xlu1 %v15058_v21 }
 0xc1d   : > { %6165 = vadd.xlane.f32.xlu0 %v15061_v60 }
 0xc1f   : > { %5919 = vmax.xlane.f32.xlu1 %v15065_v5 }
 0xc21   : > { %6171 = vadd.xlane.f32.xlu0 %v15069_v31  ;;  %v15086_v31 = vadd.f32 %v14629_v39, %v9902_v4  ;;  %v9914_v4 = vpop.f32.mrf.mxu1 }
 0xc23   : > { %6167 = vadd.xlane.f32.xlu1 %v15072_v33  ;;  %v5802_v0 = vpop.f32.mrf.mxu1 }
 0xc24   : > { %v15124_v46 = vadd.f32 %v14754_v58, %v5802_v0 }
 0xc25   : > { %5921 = vmax.xlane.f32.xlu0 %v15075_v20  ;;  %v9917_v54 = vpop.f32.mrf.mxu1 }
 0xc26   : > { %v15128_v53 = vadd.f32 %v14767_v49, %v9917_v54 }
 0xc27   : > { %5923 = vmax.xlane.f32.xlu1 %v15079_v37  ;;  %v5812_v35 = vpop.f32.mrf.mxu1 }
 0xc28   : > { %v15132_v30 = vadd.f32 %v14779_v22, %v5812_v35 }
 0xc29   : > { %6169 = vadd.xlane.f32.xlu0 %v15083_v25 }
 0xc2b   : > { %5927 = vmax.xlane.f32.xlu1 %v15086_v31 }
 0xc2d   : > { %5925 = vmax.xlane.f32.xlu0 %v15090_v44 }
 0xc2f   : > { %5931 = vmax.xlane.f32.xlu1 %v15094_v57  ;;  %v5856_v39 = vpop.xlane.xlu1 %5855 }
 0xc30   : > { %v5966_v25 = vsub.f32 %v14838_v52, %v5856_v39 }
 0xc31   : > { %5929 = vmax.xlane.f32.xlu0 %v15098_v62  ;;  %v5854_v17 = vpop.xlane.xlu0 %5853 }
 0xc32   : > { %v6047_v33 = vmul.f32 1.442695, %v5966_v25  ;;  %v5965_v63 = vsub.f32 %v14843_v61, %v5854_v17  ;;  %v15120_v61 = vadd.f32 %v14741_v19, %v9914_v4 }
 0xc33   : > { %5935 = vmax.xlane.f32.xlu1 %v15103_v41 }
 0xc34   : > { %10581 = vpow2.f32 %v6047_v33  ;;  %v6045_v52 = vmul.f32 1.442695, %v5965_v63 }
 0xc35   : > { %5933 = vmax.xlane.f32.xlu0 %v15108_v2 }
 0xc36   : > { %10583 = vpow2.f32 %v6045_v52 }
 0xc37   : > { %5939 = vmax.xlane.f32.xlu1 %v15112_v10 }
 0xc39   : > { %5937 = vmax.xlane.f32.xlu0 %v15116_v12 }
 0xc3b   : > { %5943 = vmax.xlane.f32.xlu1 %v15120_v61 }
 0xc3d   : > { %5941 = vmax.xlane.f32.xlu0 %v15124_v46 }
 0xc3f   : > { %5947 = vmax.xlane.f32.xlu1 %v15128_v53 }
 0xc41   : > { %v15135_v19 = vpop.eup %10581  ;;  %5945 = vmax.xlane.f32.xlu0 %v15132_v30 }
 0xc43   : > { %6175 = vadd.xlane.f32.xlu1 %v15135_v19  ;;  %v15139_v58 = vpop.eup %10583 }
 0xc47   : > { %6173 = vadd.xlane.f32.xlu1 %v15139_v58 }
 0xc50   : > { %v5888_v33 = vpop.xlane.xlu1 %5887 }
 0xc52   : > { %v5886_v49 = vpop.xlane.xlu0 %5885 }
 0xc53   : > { %v5981_v45 = vsub.f32 %v14873_v29, %v5886_v49 }
 0xc54   : > { %v5860_v25 = vpop.xlane.xlu1 %5859 }
 0xc55   : > { %v6077_v43 = vmul.f32 1.442695, %v5981_v45  ;;  %v5968_v22 = vsub.f32 %v14879_v8, %v5860_v25  ;;  %v5982_v45 = vsub.f32 %v14868_v48, %v5888_v33 }
 0xc56   : > { %v5858_v39 = vpop.xlane.xlu0 %5857 }
 0xc57   : > { %10585 = vpow2.f32 %v6077_v43  ;;  %v6051_v4 = vmul.f32 1.442695, %v5968_v22  ;;  %v5967_v17 = vsub.f32 %v14883_v50, %v5858_v39  ;;  %4937 = vrot.lane.b32.xlu0 %v14177_v9, %s16331_s26  ;;  %v6079_v39 = vmul.f32 1.442695, %v5982_v45  ;;  %v16400_v45 = vld [vmem:[#allocation71_spill] sm:$0xff]  ;;  %s407_s26 = sand.u32 1, %s10873_s22  }
 0xc58   : > { %v5892_v63 = vpop.xlane.xlu1 %5891  ;;  %s7872_s19 = sshll.u32 %s407_s26, 7  ;;  %s15836_s25 = scalar_lea.sflag [#allocation3], %s407_s26 }
 0xc59   : > { %10587 = vpow2.f32 %v6051_v4  ;;  %v6049_v52 = vmul.f32 1.442695, %v5967_v17  ;;  %v5984_v4 = vsub.f32 %v14889_v38, %v5892_v63  ;;  %v16399_v63 = vld [vmem:[#allocation11_spill] sm:$0xff]  ;;  %s15762_s28 = scalar_lea.vmem [#allocation2], %s7872_s19  ;;  %s10887_s19 = smov [#allocation2]  }
 0xc5a   : > { %v5890_v0 = vpop.xlane.xlu0 %5889  ;;  %s7806_s15 = sshll.u32 %s15762_s28, 4  ;;  %s10825_s29 = sshll.u32 %s10887_s19, 4  ;;  %s15827_s15 = int_to_ptr.vmem [resolvable:$true] %s7806_s15  ;;  %s10826_s29 = int_to_ptr.vmem [resolvable:$false] %s10825_s29 }
 0xc5b   : > { %v5983_v54 = vsub.f32 %v14895_v18, %v5890_v0  ;;  %10589 = vpow2.f32 %v6049_v52  ;;  %v6083_v33 = vmul.f32 1.442695, %v5984_v4  ;;  %v16398_v52 = vld [vmem:[#allocation6_spill] sm:$0xff]  ;;  %s10821_s16 = scalar_lea.vmem %s15827_s15, 2048  ;;  %s10827_s17 = scalar_lea.vmem %s10826_s29, 4096 }
 0xc5c   : > { %v5864_v35 = vpop.xlane.xlu1 %5863  ;;  %p10822_p11 = scmp.ne.s32.totalorder %s15827_s15, %s10821_s16  ;;  %p10828_p0 = scmp.lt.s32.totalorder %s15827_s15, %s10826_s29 }
 0xc5d   : > { %v6081_v49 = vmul.f32 1.442695, %v5983_v54  ;;  %v5970_v8 = vsub.f32 %v14899_v56, %v5864_v35  ;;  %p10829_p1 = scmp.lt.s32.totalorder %s10827_s17, %s10821_s16 }
 0xc5e   : > { %v5862_v29 = vpop.xlane.xlu0 %5861  ;;  %p10823_p12 = pnand %p10822_p11, %p10993_p5 }
 0xc5f   : > { %10591 = vpow2.f32 %v6081_v49  ;;  %v6055_v50 = vmul.f32 1.442695, %v5970_v8  ;;  %p10830_p2 = por %p10829_p1, %p10828_p0 }
 0xc60   : > { %v5896_v25 = vpop.xlane.xlu1 %5895  ;;  %p10824_p13 = pneg %p10823_p12 }
 0xc61   : > { %10593 = vpow2.f32 %v6055_v50  ;;  %v5986_v54 = vsub.f32 %v16398_v52, %v5896_v25 }
 0xc62   : > { %v5894_v43 = vpop.xlane.xlu0 %5893  ;;  %10595 = vpow2.f32 %v6079_v39  ;;  %v16401_v39 = vld [vmem:[#allocation12_spill] sm:$0xff]  ;;  %p10831_p3 = pnand %p10830_p2, %p10824_p13 }
 0xc63   : > { %v5985_v9 = vsub.f32 %v14915_v16, %v5894_v43  ;;  %v5969_v43 = vsub.f32 %v16400_v45, %v5862_v29 }
 0xc64   : > { %v15151_v22 = vpop.eup %10585  ;;  %v5868_v18 = vpop.xlane.xlu1 %5867 }
 0xc65   : > { %6205 = vadd.xlane.f32.xlu1 %v15151_v22  ;;  %v6085_v0 = vmul.f32 1.442695, %v5985_v9  ;;  %v5972_v56 = vsub.f32 %v14921_v24, %v5868_v18  ;;  %v6087_v24 = vmul.f32 1.442695, %v5986_v54  ;;  %v16403_v54 = vld [vmem:[#allocation15_spill] sm:$0xff] }
 0xc66   : > { %v5866_v17 = vpop.xlane.xlu0 %5865  ;;  %v15156_v48 = vpop.eup %10587 }
 0xc67   : > { %16397 = vst [vmem:[#allocation61_spill] sm:$0xff] %v15156_v48  ;;  %10597 = vpow2.f32 %v6085_v0  ;;  %v6059_v38 = vmul.f32 1.442695, %v5972_v56  ;;  %v6053_v0 = vmul.f32 1.442695, %v5969_v43  ;;  %v16402_v56 = vld [vmem:[#allocation10_spill] sm:$0xff] }
 0xc68   : > { %v5900_v16 = vpop.xlane.xlu1 %5899  ;;  %v15161_v8 = vpop.eup %10589  ;;  %10599 = vpow2.f32 %v6083_v33 }
 0xc69   : > { %6179 = vadd.xlane.f32.xlu1 %v15156_v48  ;;  %10601 = vpow2.f32 %v6059_v38  ;;  %v5988_v52 = vsub.f32 %v16402_v56, %v5900_v16  ;;  %v16405_v38 = vld [vmem:[#allocation9_spill] sm:$0xff] }
 0xc6a   : > { %v5898_v35 = vpop.xlane.xlu0 %5897  ;;  %10603 = vpow2.f32 %v6087_v24  ;;  %v16406_v24 = vld [vmem:[#allocation16_spill] sm:$0xff] }
 0xc6b   : > { %v5987_v49 = vsub.f32 %v16399_v63, %v5898_v35 }
 0xc6c   : > { %v5872_v50 = vpop.xlane.xlu1 %5871  ;;  %v15166_v18 = vpop.eup %10591 }
 0xc6d   : > { %6177 = vadd.xlane.f32.xlu1 %v15161_v8  ;;  %v6089_v25 = vmul.f32 1.442695, %v5987_v49  ;;  %v5974_v4 = vsub.f32 %v16401_v39, %v5872_v50  ;;  %v5971_v49 = vsub.f32 %v16405_v38, %v5866_v17  ;;  %v6091_v50 = vmul.f32 1.442695, %v5988_v52 }
 0xc6e   : > { %v5870_v9 = vpop.xlane.xlu0 %5869  ;;  %v15171_v45 = vpop.eup %10593 }
 0xc6f   : > { %10605 = vpow2.f32 %v6089_v25  ;;  %v6063_v29 = vmul.f32 1.442695, %v5974_v4  ;;  %16404 = vst [vmem:[#allocation53_spill] sm:$0xff] %v15171_v45  ;;  %v15174_v48 = vpop.eup %10595  ;;  %v6057_v56 = vmul.f32 1.442695, %v5971_v49 }
 0xc70   : > { %v5904_v35 = vpop.xlane.xlu1 %5903  ;;  %10607 = vpow2.f32 %v6053_v0  ;;  %v16407_v0 = vld [vmem:[#allocation14_spill] sm:$0xff] }
 0xc71   : > { %6209 = vadd.xlane.f32.xlu1 %v15166_v18  ;;  %10609 = vpow2.f32 %v6063_v29 }
 0xc72   : > { %v5902_v33 = vpop.xlane.xlu0 %5901  ;;  %10611 = vpow2.f32 %v6091_v50 }
 0xc73   : > { %v5989_v63 = vsub.f32 %v16403_v54, %v5902_v33  ;;  %v5990_v33 = vsub.f32 %v16407_v0, %v5904_v35 }
 0xc74   : > { %v5876_v39 = vpop.xlane.xlu1 %5875  ;;  %v15179_v4 = vpop.eup %10597 }
 0xc75   : > { %6183 = vadd.xlane.f32.xlu1 %v15171_v45  ;;  %v6093_v43 = vmul.f32 1.442695, %v5989_v63  ;;  %v5976_v25 = vsub.f32 %v16406_v24, %v5876_v39  ;;  %v15182_v52 = vpop.eup %10599  ;;  %v16409_v39 = vld [vmem:[#allocation13_spill] sm:$0xff]  ;;  %v6095_v50 = vmul.f32 1.442695, %v5990_v33 }
 0xc76   : > { %6207 = vadd.xlane.f32.xlu0 %v15174_v48  ;;  %v5874_v16 = vpop.xlane.xlu0 %5873  ;;  %v15187_v63 = vpop.eup %10601  ;;  %v5973_v49 = vsub.f32 %v16409_v39, %v5870_v9 }
 0xc77   : > { %10613 = vpow2.f32 %v6093_v43  ;;  %v6067_v38 = vmul.f32 1.442695, %v5976_v25  ;;  %16408 = vst [vmem:[#allocation47_spill] sm:$0xff] %v15187_v63  ;;  %v15190_v35 = vpop.eup %10603 }
 0xc78   : > { %v5908_v17 = vpop.xlane.xlu1 %5907  ;;  %10615 = vpow2.f32 %v6057_v56 }
 0xc79   : > { %6213 = vadd.xlane.f32.xlu1 %v15179_v4  ;;  %10617 = vpow2.f32 %v6067_v38  ;;  %v5992_v56 = vsub.f32 %v14964_v11, %v5908_v17 }
 0xc7a   : > { %6211 = vadd.xlane.f32.xlu0 %v15182_v52  ;;  %v5906_v54 = vpop.xlane.xlu0 %5905  ;;  %10619 = vpow2.f32 %v6095_v50 }
 0xc7b   : > { %v5991_v29 = vsub.f32 %v14969_v42, %v5906_v54  ;;  %v6061_v42 = vmul.f32 1.442695, %v5973_v49  ;;  %v6099_v50 = vmul.f32 1.442695, %v5992_v56 }
 0xc7c   : > { %v5880_v24 = vpop.xlane.xlu1 %5879  ;;  %v15195_v25 = vpop.eup %10605 }
 0xc7d   : > { %6187 = vadd.xlane.f32.xlu1 %v15187_v63  ;;  %v6097_v45 = vmul.f32 1.442695, %v5991_v29  ;;  %v5978_v43 = vsub.f32 %v14974_v28, %v5880_v24  ;;  %v15198_v33 = vpop.eup %10607  ;;  %v16410_v28 = vld [vmem:[#allocation17_spill] sm:$0xff] }
 0xc7e   : > { %6215 = vadd.xlane.f32.xlu0 %v15190_v35  ;;  %v5878_v0 = vpop.xlane.xlu0 %5877  ;;  %v15203_v29 = vpop.eup %10609  ;;  %v5975_v49 = vsub.f32 %v16410_v28, %v5874_v16 }
 0xc7f   : > { %10621 = vpow2.f32 %v6097_v45  ;;  %v6071_v39 = vmul.f32 1.442695, %v5978_v43  ;;  %v15206_v11 = vpop.eup %10611  ;;  %v5977_v28 = vsub.f32 %v14979_v14, %v5878_v0 }
 0xc80   : > { %v5912_v9 = vpop.xlane.xlu1 %5911  ;;  %10623 = vpow2.f32 %v6061_v42  ;;  %v6065_v42 = vmul.f32 1.442695, %v5975_v49 }
 0xc81   : > { %6217 = vadd.xlane.f32.xlu1 %v15195_v25  ;;  %v5994_v17 = vsub.f32 %v14984_v36, %v5912_v9  ;;  %10625 = vpow2.f32 %v6071_v39 }
 0xc82   : > { %6181 = vadd.xlane.f32.xlu0 %v15198_v33  ;;  %v5910_v54 = vpop.xlane.xlu0 %5909  ;;  %10627 = vpow2.f32 %v6099_v50 }
 0xc83   : > { %v5993_v38 = vsub.f32 %v14989_v47, %v5910_v54  ;;  %v6103_v54 = vmul.f32 1.442695, %v5994_v17 }
 0xc84   : > { %v5884_v24 = vpop.xlane.xlu1 %5883  ;;  %v15212_v43 = vpop.eup %10613 }
 0xc85   : > { %6191 = vadd.xlane.f32.xlu1 %v15203_v29  ;;  %v6101_v45 = vmul.f32 1.442695, %v5993_v38  ;;  %v15216_v56 = vpop.eup %10615  ;;  %v5980_v49 = vsub.f32 %v14994_v1, %v5884_v24 }
 0xc86   : > { %6219 = vadd.xlane.f32.xlu0 %v15206_v11  ;;  %v5882_v63 = vpop.xlane.xlu0 %5881  ;;  %v15221_v38 = vpop.eup %10617 }
 0xc87   : > { %v5979_v47 = vsub.f32 %v14999_v40, %v5882_v63  ;;  %10629 = vpow2.f32 %v6101_v45  ;;  %16411 = vst [vmem:[#allocation48_spill] sm:$0xff] %v15221_v38  ;;  %v15223_v63 = vpop.eup %10619  ;;  %v6075_v14 = vmul.f32 1.442695, %v5980_v49 }
 0xc88   : > { %v15214_v16 = vpop.xlane.xlu1 %5915  ;;  %10631 = vpow2.f32 %v6065_v42  ;;  %v6069_v42 = vmul.f32 1.442695, %v5977_v28 }
 0xc89   : > { %6221 = vadd.xlane.f32.xlu1 %v15212_v43  ;;  %v6073_v9 = vmul.f32 1.442695, %v5979_v47  ;;  %10633 = vpow2.f32 %v6103_v54 }
 0xc8a   : > { %6185 = vadd.xlane.f32.xlu0 %v15216_v56  ;;  %v5914_v36 = vpop.xlane.xlu0 %5913 }
 0xc8b   : > { %v5995_v39 = vsub.f32 %v15009_v32, %v5914_v36 }
 0xc8c   : > { %v6142_v40 = vpop.xlane.xlu1 %6141  ;;  %v15229_v32 = vpop.eup %10621 }
 0xc8d   : > { %6195 = vadd.xlane.f32.xlu1 %v15221_v38  ;;  %v6105_v50 = vmul.f32 1.442695, %v5995_v39  ;;  %10635 = vrcp.f32 %v6142_v40  ;;  %v15231_v47 = vpop.eup %10623 }
 0xc8e   : > { %6223 = vadd.xlane.f32.xlu0 %v15223_v63  ;;  %v6144_v17 = vpop.xlane.xlu0 %6143  ;;  %10637 = vpow2.f32 %v6073_v9  ;;  %v15235_v0 = vpop.eup %10625 }
 0xc8f   : > { %10639 = vrcp.f32 %v6144_v17  ;;  %16412 = vst [vmem:[#allocation31_spill] sm:$0xff] %v15235_v0  ;;  %v15237_v54 = vpop.eup %10627 }
 0xc90   : > { %v6146_v45 = vpop.xlane.xlu1 %6145 }
 0xc91   : > { %10641 = vrcp.f32 %v6146_v45  ;;  %6225 = vadd.xlane.f32.xlu1 %v15229_v32 }
 0xc92   : > { %10643 = vpow2.f32 %v6105_v50  ;;  %6189 = vadd.xlane.f32.xlu0 %v15231_v47  ;;  %v6148_v1 = vpop.xlane.xlu0 %6147 }
 0xc93   : > { %10645 = vrcp.f32 %v6148_v1 }
 0xc94   : > { %v6152_v24 = vpop.xlane.xlu1 %6151  ;;  %10647 = vpow2.f32 %v6069_v42  ;;  %v15241_v9 = vpop.eup %10629 }
 0xc95   : > { %6199 = vadd.xlane.f32.xlu1 %v15235_v0  ;;  %10649 = vpow2.f32 %v6075_v14  ;;  %v15243_v40 = vpop.eup %10631 }
 0xc96   : > { %6227 = vadd.xlane.f32.xlu0 %v15237_v54  ;;  %v6154_v36 = vpop.xlane.xlu0 %6153  ;;  %10651 = vrcp.f32 %v6152_v24  ;;  %v15246_v28 = vpop.eup %10633 }
 0xc97   : > { %10653 = vrcp.f32 %v6154_v36 }
 0xc98   : > { %v6150_v39 = vpop.xlane.xlu1 %6149 }
 0xc99   : > { %10655 = vrcp.f32 %v6150_v39  ;;  %6229 = vadd.xlane.f32.xlu1 %v15241_v9 }
 0xc9a   : > { %6193 = vadd.xlane.f32.xlu0 %v15243_v40  ;;  %v6158_v49 = vpop.xlane.xlu0 %6157  ;;  %v10636_v50 = vpop.eup %10635 }
 0xc9b   : > { %v15249_v17 = vpop.eup %10637  ;;  %10657 = vrcp.f32 %v6158_v49  ;;  %v6333_v42 = vmul.f32 %v10636_v50, %v15016_v27  ;;  %v16413_v27 = vld [vmem:[#allocation29_spill] sm:$0xff] }
 0xc9c   : > { %v6156_v45 = vpop.xlane.xlu1 %6155  ;;  %v10640_v14 = vpop.eup %10639 }
 0xc9d   : > { %10659 = vrcp.f32 %v6156_v45  ;;  %6201 = vadd.xlane.f32.xlu1 %v15249_v17  ;;  %v6334_v24 = vmul.f32 %v10640_v14, %v15019_v51  ;;  %9950 = vmatprep.mubr.f32.mxu0 %v6333_v42  ;;  %v16414_v45 = vld [vmem:[#allocation33_spill] sm:$0xff] }
 0xc9e   : > { %v10642_v1 = vpop.eup %10641  ;;  %6231 = vadd.xlane.f32.xlu0 %v15246_v28  ;;  %v6162_v36 = vpop.xlane.xlu0 %6161 }
 0xc9f   : > { %v15255_v39 = vpop.eup %10643  ;;  %v6335_v0 = vmul.f32 %v10642_v1, %v15023_v6  ;;  %10661 = vrcp.f32 %v6162_v36  ;;  %9951 = vmatmul.mubr.f32.vlgmr.msra.gmra.mxu0 %v6334_v24  ;;  %v16416_v24 = vld [vmem:[#allocation49_spill] sm:$0xff] }
 0xca0   : > { %v10646_v38 = vpop.eup %10645  ;;  %v6160_v49 = vpop.xlane.xlu1 %6159  ;;  %10031 = vmatpush3.msra.mxu0 %v16413_v27 }
 0xca1   : > { %10663 = vrcp.f32 %v6160_v49  ;;  %6233 = vadd.xlane.f32.xlu1 %v15255_v39  ;;  %v6336_v50 = vmul.f32 %v10646_v38, %v15027_v26  ;;  %v15261_v51 = vpop.eup %10647  ;;  %10032 = vmatprep.subr.mxu0 %v16414_v45  ;;  %v16417_v49 = vld [vmem:[#allocation38_spill] sm:$0xff] }
 0xca2   : > { %9953 = vmatprep.mubr.f32.mxu0 %v6335_v0  ;;  %v5918_v42 = vpop.xlane.xlu0 %5917  ;;  %v15264_v14 = vpop.eup %10649  ;;  %10033 = vmatpush3.msra.mxu0 %v16414_v45  ;;  %v16418_v45 = vld [vmem:[#allocation57_spill] sm:$0xff] }
 0xca3   : > { %16415 = vst [vmem:[#allocation37_spill] sm:$0xff] %v15264_v14  ;;  %6197 = vadd.xlane.f32.xlu0 %v15261_v51  ;;  %v5997_v6 = vsub.f32 %v15054_v15, %v5918_v42  ;;  %v10652_v1 = vpop.eup %10651  ;;  %10034 = vmatprep.subr.mxu0 %v16416_v24 }
 0xca4   : > { %9954 = vmatmul.mubr.f32.gmra.mxu0 %v6336_v50  ;;  %v6164_v36 = vpop.xlane.xlu1 %6163  ;;  %v10654_v26 = vpop.eup %10653  ;;  %v6338_v42 = vmul.f32 %v10652_v1, %v15030_v3  ;;  %v16420_v3 = vld [vmem:[#allocation74_spill] sm:$0xff] }
 0xca5   : > { %v6109_v38 = vmul.f32 1.442695, %v5997_v6  ;;  %10035 = vmatpush3.msra.mxu0 %v16416_v24  ;;  %10665 = vrcp.f32 %v6164_v36  ;;  %v6339_v36 = vmul.f32 %v10654_v26, %v15034_v55  ;;  %v16421_v26 = vld [vmem:[#allocation72_spill] sm:$0xff] }
 0xca6   : > { %v10656_v0 = vpop.eup %10655  ;;  %10036 = vmatprep.subr.mxu0 %v16417_v49  ;;  %v6166_v27 = vpop.xlane.xlu0 %6165 }
 0xca7   : > { %10667 = vpow2.f32 %v6109_v38  ;;  %10037 = vmatpush3.msra.mxu0 %v16417_v49  ;;  %6203 = vadd.xlane.f32.xlu0 %v15264_v14  ;;  %v6337_v15 = vmul.f32 %v10656_v0, %v15038_v59  ;;  %v16419_v49 = vld [vmem:[#allocation58_spill] sm:$0xff] }
 0xca8   : > { %10038 = vmatprep.subr.mxu0 %v16418_v45  ;;  %10669 = vrcp.f32 %v6166_v27  ;;  %v5920_v50 = vpop.xlane.xlu1 %5919  ;;  %v10658_v6 = vpop.eup %10657 }
 0xca9   : > { %10039 = vmatpush3.msra.mxu0 %v16418_v45  ;;  %v5998_v24 = vsub.f32 %v15065_v5, %v5920_v50  ;;  %9956 = vmatprep.mubr.f32.mxu0 %v6337_v15  ;;  %v6341_v55 = vmul.f32 %v10658_v6, %v15041_v34  ;;  %v16422_v50 = vld [vmem:[#allocation64_spill] sm:$0xff] }
 0xcaa   : > { %v10660_v38 = vpop.eup %10659  ;;  %10040 = vmatprep.subr.mxu0 %v16419_v49  ;;  %9957 = vmatmul.mubr.f32.gmra.mxu0 %v6338_v42  ;;  %v6172_v14 = vpop.xlane.xlu0 %6171 }
 0xcab   : > { %v6111_v59 = vmul.f32 1.442695, %v5998_v24  ;;  %10041 = vmatpush3.msra.mxu0 %v16419_v49  ;;  %9959 = vmatprep.mubr.f32.mxu0 %v6339_v36  ;;  %v6340_v0 = vmul.f32 %v10660_v38, %v15044_v7  ;;  %v16423_v38 = vld [vmem:[#allocation51_spill] sm:$0xff] }
 0xcac   : > { %10042 = vmatprep.subr.mxu0 %v16420_v3  ;;  %v6168_v1 = vpop.xlane.xlu1 %6167  ;;  %v10662_v27 = vpop.eup %10661 }
 0xcad   : > { %10671 = vpow2.f32 %v6111_v59  ;;  %10043 = vmatpush3.msra.mxu0 %v16420_v3  ;;  %v6343_v6 = vmul.f32 %v10662_v27, %v15048_v23  ;;  %v16425_v3 = vld [vmem:[#allocation66_spill] sm:$0xff] }
 0xcae   : > { %v10664_v5 = vpop.eup %10663  ;;  %10673 = vrcp.f32 %v6168_v1  ;;  %10044 = vmatprep.subr.mxu0 %v16421_v26  ;;  %9960 = vmatmul.mubr.f32.gmra.mxu0 %v6340_v0  ;;  %v5922_v15 = vpop.xlane.xlu0 %5921  ;;  %v16424_v0 = vld [vmem:[#allocation52_spill] sm:$0xff] }
 0xcaf   : > { %10045 = vmatpush3.msra.mxu0 %v16421_v26  ;;  %v5999_v45 = vsub.f32 %v15075_v20, %v5922_v15  ;;  %9962 = vmatprep.mubr.f32.mxu0 %v6341_v55  ;;  %v6342_v7 = vmul.f32 %v10664_v5, %v15051_v13  ;;  %10675 = vrcp.f32 %v6172_v14  ;;  %v16426_v5 = vld [vmem:[#allocation67_spill] sm:$0xff] }
 0xcb0   : > { %10046 = vmatprep.subr.mxu0 %v16422_v50  ;;  %v5924_v42 = vpop.xlane.xlu1 %5923 }
 0xcb1   : > { %v6113_v24 = vmul.f32 1.442695, %v5999_v45  ;;  %10047 = vmatpush3.msra.mxu0 %v16422_v50  ;;  %v6000_v34 = vsub.f32 %v15079_v37, %v5924_v42 }
 0xcb2   : > { %v10666_v36 = vpop.eup %10665  ;;  %10048 = vmatprep.subr.mxu0 %v16423_v38  ;;  %9963 = vmatmul.mubr.f32.gmra.mxu0 %v6342_v7  ;;  %v6170_v49 = vpop.xlane.xlu0 %6169  ;;  %v16427_v7 = vld [vmem:[#allocation69_spill] sm:$0xff] }
 0xcb3   : > { %10677 = vpow2.f32 %v6113_v24  ;;  %v6115_v20 = vmul.f32 1.442695, %v6000_v34  ;;  %10049 = vmatpush3.msra.mxu0 %v16423_v38  ;;  %9965 = vmatprep.mubr.f32.mxu0 %v6343_v6  ;;  %v6344_v13 = vmul.f32 %v10666_v36, %v15058_v21  ;;  %v16428_v24 = vld [vmem:[#allocation5_spill] sm:$0xff]  ;;  %v16429_v6 = vld [vmem:[#allocation20_spill] sm:$0xff] }
 0xcb4   : > { %v15297_v59 = vpop.eup %10667  ;;  %10050 = vmatprep.subr.mxu0 %v16424_v0  ;;  %10679 = vrcp.f32 %v6170_v49  ;;  %v5928_v37 = vpop.xlane.xlu1 %5927  ;;  %v16430_v49 = vld [vmem:[#allocation8_spill] sm:$0xff] }
 0xcb5   : > { %v10670_v23 = vpop.eup %10669  ;;  %10681 = vpow2.f32 %v6115_v20  ;;  %10051 = vmatpush3.msra.mxu0 %v16424_v0  ;;  %v6002_v14 = vsub.f32 %v15086_v31, %v5928_v37  ;;  %6237 = vadd.xlane.f32.xlu1 %v15297_v59 }
 0xcb6   : > { %10052 = vmatprep.subr.mxu0 %v16425_v3  ;;  %9966 = vmatmul.mubr.f32.gmra.mxu0 %v6344_v13  ;;  %v5926_v1 = vpop.xlane.xlu0 %5925  ;;  %v6345_v21 = vmul.f32 %v10670_v23, %v15061_v60 }
 0xcb7   : > { %v6119_v27 = vmul.f32 1.442695, %v6002_v14  ;;  %10053 = vmatpush3.msra.mxu0 %v16425_v3  ;;  %v6001_v55 = vsub.f32 %v15090_v44, %v5926_v1 }
 0xcb8   : > { %10054 = vmatprep.subr.mxu0 %v16426_v5  ;;  %9968 = vmatprep.mubr.f32.mxu0 %v6345_v21  ;;  %v5932_v26 = vpop.xlane.xlu1 %5931 }
 0xcb9   : > { %10683 = vpow2.f32 %v6119_v27  ;;  %v6117_v15 = vmul.f32 1.442695, %v6001_v55  ;;  %10055 = vmatpush3.msra.mxu0 %v16426_v5  ;;  %v6004_v31 = vsub.f32 %v15094_v57, %v5932_v26  ;;  %v16431_v27 = vld [vmem:[#allocation21_spill] sm:$0xff] }
 0xcba   : > { %v15310_v45 = vpop.eup %10671  ;;  %10056 = vmatprep.subr.mxu0 %v16427_v7  ;;  %v5930_v60 = vpop.xlane.xlu0 %5929 }
 0xcbb   : > { %v10674_v50 = vpop.eup %10673  ;;  %10685 = vpow2.f32 %v6117_v15  ;;  %v6123_v42 = vmul.f32 1.442695, %v6004_v31  ;;  %10057 = vmatpush3.msra.mxu0 %v16427_v7  ;;  %v6003_v44 = vsub.f32 %v15098_v62, %v5930_v60  ;;  %6239 = vadd.xlane.f32.xlu0 %v15310_v45 }
 0xcbc   : > { %10058 = vmatprep.subr.mxu0 %v16428_v24  ;;  %v5936_v34 = vpop.xlane.xlu1 %5935  ;;  %v6346_v36 = vmul.f32 %v10674_v50, %v16429_v6  ;;  %v10676_v13 = vpop.eup %10675  ;;  %v16433_v50 = vld [vmem:[#allocation18_spill] sm:$0xff] }
 0xcbd   : > { %10687 = vpow2.f32 %v6123_v42  ;;  %v6121_v57 = vmul.f32 1.442695, %v6003_v44  ;;  %10059 = vmatpush3.msra.mxu0 %v16428_v24  ;;  %v6006_v38 = vsub.f32 %v15103_v41, %v5936_v34  ;;  %v5996_v42 = vsub.f32 %v16433_v50, %v15214_v16  ;;  %v16437_v50 = vld [vmem:[#allocation56_spill] sm:$0xff] }
 0xcbe   : > { %10060 = vmatprep.subr.mxu0 %v16430_v49  ;;  %9969 = vmatmul.mubr.f32.gmra.mxu0 %v6346_v36  ;;  %v5934_v20 = vpop.xlane.xlu0 %5933 }
 0xcbf   : > { %10689 = vpow2.f32 %v6121_v57  ;;  %v6127_v62 = vmul.f32 1.442695, %v6006_v38  ;;  %10061 = vmatpush3.msra.mxu0 %v16430_v49  ;;  %v6005_v0 = vsub.f32 %v15108_v2, %v5934_v20  ;;  %v16432_v2 = vld [vmem:[#allocation19_spill] sm:$0xff]  ;;  %v6107_v57 = vmul.f32 1.442695, %v5996_v42 }
 0xcc0   : > { %v15323_v37 = vpop.eup %10677  ;;  %v5940_v23 = vpop.xlane.xlu1 %5939  ;;  %v6348_v15 = vmul.f32 %v10676_v13, %v16432_v2  ;;  %v16440_v42 = vld [vmem:[#allocation63_spill] sm:$0xff] }
 0xcc1   : > { %v10680_v14 = vpop.eup %10679  ;;  %10691 = vpow2.f32 %v6127_v62  ;;  %v6125_v3 = vmul.f32 1.442695, %v6005_v0  ;;  %v6008_v1 = vsub.f32 %v15112_v10, %v5940_v23  ;;  %6241 = vadd.xlane.f32.xlu1 %v15323_v37 }
 0xcc2   : > { %v15327_v41 = vpop.eup %10681  ;;  %v5938_v21 = vpop.xlane.xlu0 %5937  ;;  %v6347_v55 = vmul.f32 %v10680_v14, %v16431_v27 }
 0xcc3   : > { %10693 = vpow2.f32 %v6125_v3  ;;  %v6131_v5 = vmul.f32 1.442695, %v6008_v1  ;;  %v6007_v26 = vsub.f32 %v15116_v12, %v5938_v21  ;;  %6243 = vadd.xlane.f32.xlu0 %v15327_v41 }
 0xcc4   : > { %9971 = vmatprep.mubr.f32.mxu0 %v6347_v55  ;;  %v5944_v31 = vpop.xlane.xlu1 %5943 }
 0xcc5   : > { %10695 = vpow2.f32 %v6131_v5  ;;  %v6129_v7 = vmul.f32 1.442695, %v6007_v26  ;;  %v6010_v10 = vsub.f32 %v15120_v61, %v5944_v31  ;;  %9972 = vmatmul.mubr.f32.gmra.mxu0 %v6348_v15  ;;  %v16434_v31 = vld [vmem:[#allocation27_spill] sm:$0xff] }
 0xcc6   : > { %v15334_v60 = vpop.eup %10683  ;;  %v5942_v44 = vpop.xlane.xlu0 %5941 }
 0xcc7   : > { %10697 = vpow2.f32 %v6129_v7  ;;  %v6135_v24 = vmul.f32 1.442695, %v6010_v10  ;;  %v6009_v12 = vsub.f32 %v15124_v46, %v5942_v44  ;;  %6247 = vadd.xlane.f32.xlu0 %v15334_v60  ;;  %v16435_v7 = vld [vmem:[#allocation32_spill] sm:$0xff]  ;;  %v16436_v10 = vld [vmem:[#allocation55_spill] sm:$0xff] }
 0xcc8   : > { %v15340_v34 = vpop.eup %10685  ;;  %v5948_v6 = vpop.xlane.xlu1 %5947 }
 0xcc9   : > { %10699 = vpow2.f32 %v6135_v24  ;;  %v6133_v36 = vmul.f32 1.442695, %v6009_v12  ;;  %6245 = vadd.xlane.f32.xlu1 %v15340_v34  ;;  %v6012_v16 = vsub.f32 %v15128_v53, %v5948_v6  ;;  %v16441_v24 = vld [vmem:[#allocation59_spill] sm:$0xff]  ;;  %v16442_v12 = vld [vmem:[#allocation70_spill] sm:$0xff] }
 0xcca   : > { %v15343_v61 = vpop.eup %10687  ;;  %v5946_v38 = vpop.xlane.xlu0 %5945 }
 0xccb   : > { %10701 = vpow2.f32 %v6133_v36  ;;  %v6011_v49 = vsub.f32 %v15132_v30, %v5946_v38  ;;  %6251 = vadd.xlane.f32.xlu0 %v15343_v61  ;;  %v6139_v0 = vmul.f32 1.442695, %v6012_v16  ;;  %v16443_v36 = vld [vmem:[#allocation65_spill] sm:$0xff]  ;;  %v16445_v16 = vld [vmem:[#allocation75_spill] sm:$0xff] }
 0xccc   : > { %v15348_v46 = vpop.eup %10689  ;;  %v6176_v20 = vpop.xlane.xlu1 %6175  ;;  %10703 = vpow2.f32 %v6107_v57  ;;  %v16444_v57 = vld [vmem:[#allocation62_spill] sm:$0xff] }
 0xccd   : > { %v6137_v13 = vmul.f32 1.442695, %v6011_v49  ;;  %6249 = vadd.xlane.f32.xlu1 %v15348_v46  ;;  %v16446_v49 = vld [vmem:[#allocation68_spill] sm:$0xff] }
 0xcce   : > { %v15351_v62 = vpop.eup %10691 }
 0xccf   : > { %10705 = vpow2.f32 %v6137_v13  ;;  %6255 = vadd.xlane.f32.xlu0 %v15351_v62  ;;  %v4938_v13 = vpop.permute.xlu0 %4937 }
 0xcd0   : > { %v15354_v23 = vpop.eup %10693  ;;  %10707 = vrcp.f32 %v6176_v20  ;;  %v6174_v53 = vpop.xlane.xlu1 %6173 }
 0xcd1   : > { %10709 = vrcp.f32 %v6174_v53  ;;  %6253 = vadd.xlane.f32.xlu1 %v15354_v23  ;;  %v16447_v53 = vld [vmem:[#allocation50_spill] sm:$0xff] }
 0xcd2   : > { %v15357_v30 = vpop.eup %10695  ;;  %10711 = vpow2.f32 %v6139_v0 }
 0xcd3   : > { %6259 = vadd.xlane.f32.xlu0 %v15357_v30 }
 0xcd4   : > { %v15360_v14 = vpop.eup %10697 }
 0xcd5   : > { %6257 = vadd.xlane.f32.xlu1 %v15360_v14 }
 0xcd6   : > { %v15363_v3 = vpop.eup %10699 }
 0xcd7   : > { %6263 = vadd.xlane.f32.xlu0 %v15363_v3 }
 0xcd8   : > { %v15366_v1 = vpop.eup %10701 }
 0xcd9   : > { %6261 = vadd.xlane.f32.xlu1 %v15366_v1  ;;  %v15369_v21 = vpop.eup %10703 }
 0xcdc   : > { %v15371_v27 = vpop.eup %10705 }
 0xcdd   : > { %v10708_v55 = vpop.eup %10707  ;;  %6235 = vadd.xlane.f32.xlu1 %v15369_v21  ;;  %6265 = vadd.xlane.f32.xlu0 %v15371_v27 }
 0xcde   : > { %v10710_v5 = vpop.eup %10709  ;;  %v6350_v15 = vmul.f32 %v10708_v55, %v15135_v19  ;;  %v16439_v19 = vld [vmem:[#allocation73_spill] sm:$0xff] }
 0xcdf   : > { %v6349_v26 = vmul.f32 %v10710_v5, %v15139_v58  ;;  %v15376_v2 = vpop.eup %10711  ;;  %v16438_v58 = vld [vmem:[#allocation46_spill] sm:$0xff]  ;;  %v16448_v5 = vld [vmem:[#allocation7_spill] sm:$0xff] }
 0xce1   : > { %10006 = vmatprep.mubr.f32.mxu1 %v6349_v26  ;;  %6267 = vadd.xlane.f32.xlu1 %v15376_v2 }
 0xce2   : > { %10007 = vmatmul.mubr.f32.vlgmr.msra.gmra.mxu1 %v6350_v15 }
 0xce3   : > { %10087 = vmatpush3.msra.mxu1 %v16434_v31 }
 0xce4   : > { %10088 = vmatprep.subr.mxu1 %v16435_v7 }
 0xce5   : > { %10089 = vmatpush3.msra.mxu1 %v16435_v7 }
 0xce6   : > { %10090 = vmatprep.subr.mxu1 %v16436_v10 }
 0xce7   : > { %10091 = vmatpush3.msra.mxu1 %v16436_v10 }
 0xce8   : > { %10092 = vmatprep.subr.mxu1 %v16437_v50 }
 0xce9   : > { %10093 = vmatpush3.msra.mxu1 %v16437_v50 }
 0xcea   : > { %10094 = vmatprep.subr.mxu1 %v16438_v58 }
 0xceb   : > { %10095 = vmatpush3.msra.mxu1 %v16438_v58 }
 0xcec   : > { %10096 = vmatprep.subr.mxu1 %v16439_v19 }
 0xced   : > { %10097 = vmatpush3.msra.mxu1 %v16439_v19  ;;  %v16449_v19 = vld [vmem:[#allocation61_spill] sm:$0xff] }
 0xcee   : > { %10098 = vmatprep.subr.mxu1 %v16440_v42  ;;  %v6206_v44 = vpop.xlane.xlu1 %6205 }
 0xcef   : > { %10099 = vmatpush3.msra.mxu1 %v16440_v42  ;;  %10713 = vrcp.f32 %v6206_v44 }
 0xcf0   : > { %10100 = vmatprep.subr.mxu1 %v16441_v24 }
 0xcf1   : > { %10101 = vmatpush3.msra.mxu1 %v16441_v24 }
 0xcf2   : > { %10102 = vmatprep.subr.mxu1 %v16442_v12  ;;  %v6180_v6 = vpop.xlane.xlu1 %6179 }
 0xcf3   : > { %10103 = vmatpush3.msra.mxu1 %v16442_v12  ;;  %10715 = vrcp.f32 %v6180_v6 }
 0xcf4   : > { %10104 = vmatprep.subr.mxu1 %v16443_v36 }
 0xcf5   : > { %10105 = vmatpush3.msra.mxu1 %v16443_v36 }
 0xcf6   : > { %10106 = vmatprep.subr.mxu1 %v16444_v57  ;;  %v6178_v38 = vpop.xlane.xlu1 %6177 }
 0xcf7   : > { %10107 = vmatpush3.msra.mxu1 %v16444_v57  ;;  %10717 = vrcp.f32 %v6178_v38 }
 0xcf8   : > { %10108 = vmatprep.subr.mxu1 %v16445_v16 }
 0xcf9   : > { %10109 = vmatpush3.msra.mxu1 %v16445_v16 }
 0xcfa   : > { %10110 = vmatprep.subr.mxu1 %v16446_v49  ;;  %v6210_v20 = vpop.xlane.xlu1 %6209 }
 0xcfb   : > { %10111 = vmatpush3.msra.mxu1 %v16446_v49  ;;  %10719 = vrcp.f32 %v6210_v20 }
 0xcfc   : > { %v10714_v0 = vpop.eup %10713  ;;  %10112 = vmatprep.subr.mxu1 %v16447_v53 }
 0xcfd   : > { %10113 = vmatpush3.msra.mxu1 %v16447_v53  ;;  %v6365_v55 = vmul.f32 %v10714_v0, %v15151_v22 }
 0xcfe   : > { %10114 = vmatprep.subr.mxu1 %v16448_v5  ;;  %v6184_v26 = vpop.xlane.xlu1 %6183 }
 0xcff   : > { %10115 = vmatpush3.msra.mxu1 %v16448_v5  ;;  %10062 = vmatprep.mubr.f32.mxu0 %v6365_v55  ;;  %v6208_v15 = vpop.xlane.xlu0 %6207 }
 0xd00   : > { %10116 = vmatprep.subr.mxu1 %v4938_v13  ;;  %10721 = vrcp.f32 %v6208_v15  ;;  %v10716_v7 = vpop.eup %10715 }
 0xd01   : > { %10117 = vmatpush3.msra.mxu1 %v4938_v13  ;;  %v6352_v42 = vmul.f32 %v10716_v7, %v16449_v19 }
 0xd02   : > { %v6214_v31 = vpop.xlane.xlu1 %6213 }
 0xd03   : > { %10723 = vrcp.f32 %v6214_v31  ;;  %v6212_v10 = vpop.xlane.xlu0 %6211 }
 0xd04   : > { %v10718_v50 = vpop.eup %10717  ;;  %10725 = vrcp.f32 %v6212_v10 }
 0xd05   : > { %v6351_v58 = vmul.f32 %v10718_v50, %v15161_v8 }
 0xd06   : > { %v6188_v22 = vpop.xlane.xlu1 %6187 }
 0xd07   : > { %10009 = vmatprep.mubr.f32.mxu1 %v6351_v58  ;;  %v6216_v44 = vpop.xlane.xlu0 %6215  ;;  %v16450_v58 = vld [vmem:[#allocation53_spill] sm:$0xff] }
 0xd08   : > { %10727 = vrcp.f32 %v6216_v44  ;;  %10010 = vmatmul.mubr.f32.gmra.mxu1 %v6352_v42  ;;  %v10720_v6 = vpop.eup %10719 }
 0xd09   : > { %10729 = vrcp.f32 %v6184_v26  ;;  %v6367_v8 = vmul.f32 %v10720_v6, %v15166_v18 }
 0xd0a   : > { %v6218_v24 = vpop.xlane.xlu1 %6217 }
 0xd0b   : > { %10731 = vrcp.f32 %v6218_v24  ;;  %v6182_v12 = vpop.xlane.xlu0 %6181 }
 0xd0c   : > { %10733 = vrcp.f32 %v6182_v12 }
 0xd0d   : > { %v10722_v36 = vpop.eup %10721 }
 0xd0e   : > { %v6366_v57 = vmul.f32 %v10722_v36, %v15174_v48  ;;  %v6192_v38 = vpop.xlane.xlu1 %6191 }
 0xd0f   : > { %v6220_v16 = vpop.xlane.xlu0 %6219 }
 0xd10   : > { %v10724_v49 = vpop.eup %10723  ;;  %10735 = vrcp.f32 %v6220_v16  ;;  %10063 = vmatmul.mubr.f32.vlgmr.msra.gmra.mxu0 %v6366_v57 }
 0xd11   : > { %v10726_v20 = vpop.eup %10725  ;;  %10065 = vmatprep.mubr.f32.mxu0 %v6367_v8  ;;  %10737 = vrcp.f32 %v6188_v22  ;;  %v6369_v55 = vmul.f32 %v10724_v49, %v15179_v4 }
 0xd12   : > { %v6222_v13 = vpop.xlane.xlu1 %6221  ;;  %v6368_v0 = vmul.f32 %v10726_v20, %v15182_v52 }
 0xd13   : > { %10739 = vrcp.f32 %v6222_v13  ;;  %v6186_v53 = vpop.xlane.xlu0 %6185 }
 0xd14   : > { %10741 = vrcp.f32 %v6186_v53  ;;  %10066 = vmatmul.mubr.f32.gmra.mxu0 %v6368_v0 }
 0xd15   : > { %v10728_v48 = vpop.eup %10727  ;;  %10068 = vmatprep.mubr.f32.mxu0 %v6369_v55 }
 0xd16   : > { %v6196_v5 = vpop.xlane.xlu1 %6195  ;;  %v6370_v18 = vmul.f32 %v10728_v48, %v15190_v35  ;;  %v10730_v26 = vpop.eup %10729 }
 0xd17   : > { %v6224_v15 = vpop.xlane.xlu0 %6223  ;;  %v6354_v22 = vmul.f32 %v10730_v26, %v16450_v58 }
 0xd18   : > { %v10732_v31 = vpop.eup %10731  ;;  %10743 = vrcp.f32 %v6224_v15  ;;  %10069 = vmatmul.mubr.f32.gmra.mxu0 %v6370_v18 }
 0xd19   : > { %v10734_v7 = vpop.eup %10733  ;;  %v6371_v10 = vmul.f32 %v10732_v31, %v15195_v25  ;;  %10745 = vrcp.f32 %v6192_v38  ;;  %v16451_v38 = vld [vmem:[#allocation47_spill] sm:$0xff] }
 0xd1a   : > { %v6226_v52 = vpop.xlane.xlu1 %6225  ;;  %v6353_v50 = vmul.f32 %v10734_v7, %v15198_v33 }
 0xd1b   : > { %10747 = vrcp.f32 %v6226_v52  ;;  %10071 = vmatprep.mubr.f32.mxu0 %v6371_v10  ;;  %v6190_v4 = vpop.xlane.xlu0 %6189 }
 0xd1c   : > { %10749 = vrcp.f32 %v6190_v4  ;;  %10012 = vmatprep.mubr.f32.mxu1 %v6353_v50 }
 0xd1d   : > { %v10736_v35 = vpop.eup %10735  ;;  %10013 = vmatmul.mubr.f32.gmra.mxu1 %v6354_v22 }
 0xd1e   : > { %v6200_v19 = vpop.xlane.xlu1 %6199  ;;  %v6372_v42 = vmul.f32 %v10736_v35, %v15206_v11  ;;  %v10738_v44 = vpop.eup %10737 }
 0xd1f   : > { %v6228_v24 = vpop.xlane.xlu0 %6227  ;;  %v6356_v16 = vmul.f32 %v10738_v44, %v16451_v38 }
 0xd20   : > { %v10740_v12 = vpop.eup %10739  ;;  %10751 = vrcp.f32 %v6228_v24  ;;  %10072 = vmatmul.mubr.f32.gmra.mxu0 %v6372_v42 }
 0xd21   : > { %v10742_v25 = vpop.eup %10741  ;;  %v6373_v33 = vmul.f32 %v10740_v12, %v15212_v43  ;;  %10753 = vrcp.f32 %v6196_v5 }
 0xd22   : > { %v6230_v6 = vpop.xlane.xlu1 %6229  ;;  %v6355_v36 = vmul.f32 %v10742_v25, %v15216_v56 }
 0xd23   : > { %10755 = vrcp.f32 %v6230_v6  ;;  %10074 = vmatprep.mubr.f32.mxu0 %v6373_v33  ;;  %v6194_v57 = vpop.xlane.xlu0 %6193 }
 0xd24   : > { %10757 = vrcp.f32 %v6194_v57  ;;  %10015 = vmatprep.mubr.f32.mxu1 %v6355_v36 }
 0xd25   : > { %v10744_v11 = vpop.eup %10743  ;;  %10016 = vmatmul.mubr.f32.gmra.mxu1 %v6356_v16 }
 0xd26   : > { %v6202_v8 = vpop.xlane.xlu1 %6201  ;;  %v6374_v49 = vmul.f32 %v10744_v11, %v15223_v63  ;;  %v10746_v20 = vpop.eup %10745 }
 0xd27   : > { %v6232_v13 = vpop.xlane.xlu0 %6231  ;;  %v6358_v48 = vmul.f32 %v10746_v20, %v15203_v29  ;;  %v16452_v29 = vld [vmem:[#allocation48_spill] sm:$0xff] }
 0xd28   : > { %v10748_v0 = vpop.eup %10747  ;;  %10759 = vrcp.f32 %v6232_v13  ;;  %10075 = vmatmul.mubr.f32.gmra.mxu0 %v6374_v49 }
 0xd29   : > { %v10750_v43 = vpop.eup %10749  ;;  %v6375_v56 = vmul.f32 %v10748_v0, %v15229_v32  ;;  %10761 = vrcp.f32 %v6200_v19  ;;  %v16453_v19 = vld [vmem:[#allocation31_spill] sm:$0xff] }
 0xd2a   : > { %v6234_v53 = vpop.xlane.xlu1 %6233  ;;  %v6357_v55 = vmul.f32 %v10750_v43, %v15231_v47 }
 0xd2b   : > { %10763 = vrcp.f32 %v6234_v53  ;;  %10077 = vmatprep.mubr.f32.mxu0 %v6375_v56 }
 0xd2c   : > { %10765 = vrcp.f32 %v6202_v8  ;;  %v6198_v5 = vpop.xlane.xlu0 %6197  ;;  %10018 = vmatprep.mubr.f32.mxu1 %v6357_v55 }
 0xd2d   : > { %v10752_v63 = vpop.eup %10751  ;;  %10767 = vrcp.f32 %v6198_v5  ;;  %10019 = vmatmul.mubr.f32.gmra.mxu1 %v6358_v48 }
 0xd2e   : > { %v6376_v18 = vmul.f32 %v10752_v63, %v15237_v54  ;;  %v10754_v26 = vpop.eup %10753 }
 0xd2f   : > { %v6360_v10 = vmul.f32 %v10754_v26, %v16452_v29 }
 0xd30   : > { %v10756_v15 = vpop.eup %10755  ;;  %v6204_v31 = vpop.xlane.xlu0 %6203  ;;  %10078 = vmatmul.mubr.f32.gmra.mxu0 %v6376_v18 }
 0xd31   : > { %v10758_v32 = vpop.eup %10757  ;;  %10769 = vrcp.f32 %v6204_v31  ;;  %v6377_v47 = vmul.f32 %v10756_v15, %v15241_v9 }
 0xd32   : > { %v6359_v7 = vmul.f32 %v10758_v32, %v15243_v40 }
 0xd33   : > { %10080 = vmatprep.mubr.f32.mxu0 %v6377_v47 }
 0xd34   : > { %10021 = vmatprep.mubr.f32.mxu1 %v6359_v7 }
 0xd35   : > { %v10760_v52 = vpop.eup %10759  ;;  %10022 = vmatmul.mubr.f32.gmra.mxu1 %v6360_v10 }
 0xd36   : > { %v6378_v50 = vmul.f32 %v10760_v52, %v15246_v28  ;;  %v10762_v4 = vpop.eup %10761  ;;  %v16454_v28 = vld [vmem:[#allocation37_spill] sm:$0xff] }
 0xd37   : > { %v6362_v40 = vmul.f32 %v10762_v4, %v16453_v19 }
 0xd38   : > { %v10764_v54 = vpop.eup %10763  ;;  %10081 = vmatmul.mubr.f32.gmra.mxu0 %v6378_v50 }
 0xd39   : > { %v10766_v58 = vpop.eup %10765  ;;  %v6379_v22 = vmul.f32 %v10764_v54, %v15255_v39 }
 0xd3a   : > { %v10768_v35 = vpop.eup %10767  ;;  %v6363_v42 = vmul.f32 %v10766_v58, %v15249_v17 }
 0xd3b   : > { %10083 = vmatprep.mubr.f32.mxu0 %v6379_v22  ;;  %v6361_v9 = vmul.f32 %v10768_v35, %v15261_v51  ;;  %v8300_v35 = vld [vmem:[%s15884_s8 + $0x30] sm:$0xff] }
 0xd3d   : > { %10024 = vmatprep.mubr.f32.mxu1 %v6361_v9 }
 0xd3e   : > { %v10770_v44 = vpop.eup %10769  ;;  %10025 = vmatmul.mubr.f32.gmra.mxu1 %v6362_v40  ;;  %v6238_v24 = vpop.xlane.xlu1 %6237 }
 0xd3f   : > { %10771 = vrcp.f32 %v6238_v24  ;;  %10027 = vmatprep.mubr.f32.mxu1 %v6363_v42  ;;  %v6364_v12 = vmul.f32 %v10770_v44, %v16454_v28 }
 0xd42   : > { %10028 = vmatmul.mubr.f32.gmra.mxu1 %v6364_v12 }
 0xd44   : > { %v6240_v25 = vpop.xlane.xlu0 %6239 }
 0xd45   : > { %10773 = vrcp.f32 %v6240_v25 }
 0xd4a   : > { %v6242_v39 = vpop.xlane.xlu1 %6241 }
 0xd4b   : > { %10775 = vrcp.f32 %v6242_v39 }
 0xd4c   : > { %v10772_v33 = vpop.eup %10771  ;;  %v6244_v6 = vpop.xlane.xlu0 %6243 }
 0xd4d   : > { %10777 = vrcp.f32 %v6244_v6  ;;  %v6381_v51 = vmul.f32 %v10772_v33, %v15297_v59 }
 0xd4f   : > { %10118 = vmatprep.mubr.f32.mxu1 %v6381_v51 }
 0xd50   : > { %v6248_v36 = vpop.xlane.xlu0 %6247 }
 0xd51   : > { %10779 = vrcp.f32 %v6248_v36 }
 0xd52   : > { %v10774_v17 = vpop.eup %10773  ;;  %v6246_v57 = vpop.xlane.xlu1 %6245 }
 0xd53   : > { %v6382_v38 = vmul.f32 %v10774_v17, %v15310_v45  ;;  %10781 = vrcp.f32 %v6246_v57 }
 0xd54   : > { %v6252_v16 = vpop.xlane.xlu0 %6251 }
 0xd55   : > { %10119 = vmatmul.mubr.f32.vlgmr.msra.gmra.mxu1 %v6382_v38  ;;  %10783 = vrcp.f32 %v6252_v16 }
 0xd56   : > { %v6250_v11 = vpop.xlane.xlu1 %6249 }
 0xd57   : > { %10785 = vrcp.f32 %v6250_v11 }
 0xd58   : > { %v10776_v8 = vpop.eup %10775  ;;  %v6256_v49 = vpop.xlane.xlu0 %6255 }
 0xd59   : > { %v6383_v20 = vmul.f32 %v10776_v8, %v15323_v37  ;;  %10787 = vrcp.f32 %v6256_v49 }
 0xd5a   : > { %v10778_v13 = vpop.eup %10777  ;;  %v6254_v59 = vpop.xlane.xlu1 %6253 }
 0xd5b   : > { %10789 = vrcp.f32 %v6254_v59  ;;  %10121 = vmatprep.mubr.f32.mxu1 %v6383_v20  ;;  %v6384_v0 = vmul.f32 %v10778_v13, %v15327_v41 }
 0xd5c   : > { %v6260_v43 = vpop.xlane.xlu0 %6259 }
 0xd5d   : > { %10122 = vmatmul.mubr.f32.gmra.mxu1 %v6384_v0  ;;  %10791 = vrcp.f32 %v6260_v43 }
 0xd5e   : > { %v6258_v45 = vpop.xlane.xlu1 %6257  ;;  %v10780_v56 = vpop.eup %10779 }
 0xd5f   : > { %10793 = vrcp.f32 %v6258_v45  ;;  %v6386_v37 = vmul.f32 %v10780_v56, %v15334_v60  ;;  %v9952_v9 = vpop.f32.mrf.mxu0 }
 0xd60   : > { %v10782_v53 = vpop.eup %10781  ;;  %v6264_v55 = vpop.xlane.xlu0 %6263 }
 0xd61   : > { %v6385_v48 = vmul.f32 %v10782_v53, %v15340_v34  ;;  %10795 = vrcp.f32 %v6264_v55  ;;  %v6463_v19 = vpop.f32.mrf.mxu0 }
 0xd62   : > { %v6262_v5 = vpop.xlane.xlu1 %6261  ;;  %v10784_v63 = vpop.eup %10783 }
 0xd63   : > { %10797 = vrcp.f32 %v6262_v5  ;;  %10124 = vmatprep.mubr.f32.mxu1 %v6385_v48  ;;  %v6388_v15 = vmul.f32 %v10784_v63, %v15343_v61 }
 0xd64   : > { %v10786_v18 = vpop.eup %10785  ;;  %10125 = vmatmul.mubr.f32.gmra.mxu1 %v6386_v37  ;;  %v9955_v40 = vpop.f32.mrf.mxu0 }
 0xd65   : > { %v6387_v41 = vmul.f32 %v10786_v18, %v15348_v46 }
 0xd66   : > { %v6236_v26 = vpop.xlane.xlu1 %6235  ;;  %v10788_v31 = vpop.eup %10787 }
 0xd67   : > { %10799 = vrcp.f32 %v6236_v26  ;;  %v6266_v32 = vpop.xlane.xlu0 %6265  ;;  %10127 = vmatprep.mubr.f32.mxu1 %v6387_v41  ;;  %v6390_v7 = vmul.f32 %v10788_v31, %v15351_v62  ;;  %v6473_v42 = vpop.f32.mrf.mxu0 }
 0xd68   : > { %v10790_v47 = vpop.eup %10789  ;;  %10801 = vrcp.f32 %v6266_v32  ;;  %10128 = vmatmul.mubr.f32.gmra.mxu1 %v6388_v15  ;;  %v6984_v15 = vsel %vm692_vm1, %v9952_v9, 0.0 }
 0xd69   : > { %v6389_v34 = vmul.f32 %v10790_v47, %v15354_v23  ;;  %v6977_v47 = vsel %vm692_vm1, %v6463_v19, 0.0 }
 0xd6a   : > { %v6268_v60 = vpop.xlane.xlu1 %6267  ;;  %v10792_v29 = vpop.eup %10791 }
 0xd6b   : > { %10803 = vrcp.f32 %v6268_v60  ;;  %10130 = vmatprep.mubr.f32.mxu1 %v6389_v34  ;;  %v6392_v61 = vmul.f32 %v10792_v29, %v15357_v30  ;;  %v15473_v44 = vpop.f32.mrf.mxu0 }
 0xd6c   : > { %v10794_v10 = vpop.eup %10793  ;;  %10131 = vmatmul.mubr.f32.gmra.mxu1 %v6390_v7 }
 0xd6d   : > { %v6391_v46 = vmul.f32 %v10794_v10, %v15360_v14  ;;  %v15475_v24 = vpop.f32.mrf.mxu0 }
 0xd6e   : > { %v10796_v52 = vpop.eup %10795 }
 0xd6f   : > { %10133 = vmatprep.mubr.f32.mxu1 %v6391_v46  ;;  %v6394_v23 = vmul.f32 %v10796_v52, %v15363_v3  ;;  %v8278_v3 = vld [vmem:[%s15882_s6 + $0x30] sm:$0xff]  ;;  %v15477_v12 = vpop.f32.mrf.mxu0 }
 0xd70   : > { %v10798_v50 = vpop.eup %10797  ;;  %10134 = vmatmul.mubr.f32.gmra.mxu1 %v6392_v61 }
 0xd71   : > { %v6393_v4 = vmul.f32 %v10798_v50, %v15366_v1  ;;  %v8279_v1 = vld [vmem:[%s15882_s6 + $0x38] sm:$0xff]  ;;  %v15479_v39 = vpop.f32.mrf.mxu0 }
 0xd72   : > { %10142 = vmatprep.subr.mxu0 %v8279_v1 }
 0xd73   : > { %10136 = vmatprep.mubr.f32.mxu1 %v6393_v4  ;;  %10143 = vmatpush3.msra.mxu0 %v8279_v1  ;;  %v15481_v6 = vpop.f32.mrf.mxu0 }
 0xd74   : > { %v10800_v54 = vpop.eup %10799  ;;  %10137 = vmatmul.mubr.f32.gmra.mxu1 %v6394_v23  ;;  %10144 = vmatprep.subr.mxu0 %v8278_v3 }
 0xd75   : > { %v10802_v62 = vpop.eup %10801  ;;  %v6380_v58 = vmul.f32 %v10800_v54, %v15369_v21  ;;  %10145 = vmatpush3.msra.mxu0 %v8278_v3  ;;  %v8277_v21 = vld [vmem:[%s15882_s6 + $0x28] sm:$0xff]  ;;  %v15483_v17 = vpop.f32.mrf.mxu0  ;;  %v6991_v3 = vsel %vm692_vm1, %v6473_v42, 0.0 }
 0xd76   : > { %v6395_v22 = vmul.f32 %v10802_v62, %v15371_v27  ;;  %v8276_v27 = vld [vmem:[%s15882_s6 + $0x20] sm:$0xff]  ;;  %10146 = vmatprep.subr.mxu0 %v8277_v21 }
 0xd77   : > { %10084 = vmatmul.mubr.f32.gmra.mxu0 %v6380_v58  ;;  %v15485_v38 = vpop.f32.mrf.mxu0 }
 0xd78   : > { %v10804_v14 = vpop.eup %10803  ;;  %10139 = vmatprep.mubr.f32.mxu1 %v6395_v22  ;;  %10147 = vmatpush3.msra.mxu0 %v8277_v21 }
 0xd79   : > { %v6396_v30 = vmul.f32 %v10804_v14, %v15376_v2  ;;  %10148 = vmatprep.subr.mxu0 %v8276_v27  ;;  %v8301_v2 = vld [vmem:[%s15884_s8 + $0x38] sm:$0xff]  ;;  %v15489_v11 = vpop.f32.mrf.mxu0  ;;  %v6998_v14 = vsel %vm692_vm1, %v9955_v40, 0.0 }
 0xd7a   : > { %10149 = vmatpush3.msra.mxu0 %v8276_v27  ;;  %10174 = vmatprep.subr.mxu1 %v8301_v2 }
 0xd7b   : > { %10140 = vmatmul.mubr.f32.gmra.mxu1 %v6396_v30 }
 0xd7c   : > { %10175 = vmatpush3.msra.mxu1 %v8301_v2 }
 0xd7d   : > { %10176 = vmatprep.subr.mxu1 %v8300_v35 }
 0xd7e   : > { %10177 = vmatpush3.msra.mxu1 %v8300_v35  ;;  %v15493_v49 = vpop.f32.mrf.mxu0 }
 0xd80   : > { %v15497_v13 = vpop.f32.mrf.mxu0 }
 0xd85   : > { %v15501_v0 = vpop.f32.mrf.mxu0 }
 0xd87   : > { %v15505_v45 = vpop.f32.mrf.mxu0 }
 0xda2   : > { %v10008_v28 = vpop.f32.mrf.mxu1 }
 0xda3   : > { %v6985_v18 = vsel %vm692_vm1, %v10008_v28, 0.0 }
 0xda4   : > { %v6608_v25 = vpop.f32.mrf.mxu1  ;;  %v6986_v34 = vadd.f32 %v6985_v18, %v6984_v15 }
 0xda5   : > { %v6978_v41 = vsel %vm692_vm1, %v6608_v25, 0.0 }
 0xda6   : > { %v6979_v7 = vadd.f32 %v6978_v41, %v6977_v47  ;;  %v7005_v41 = vsel %vm692_vm1, %v15475_v24, 0.0 }
 0xdc8   : > { %v10011_v33 = vpop.f32.mrf.mxu1 }
 0xdc9   : > { %v6999_v54 = vsel %vm692_vm1, %v10011_v33, 0.0 }
 0xdca   : > { %v6618_v51 = vpop.f32.mrf.mxu1  ;;  %v7000_v21 = vadd.f32 %v6999_v54, %v6998_v14 }
 0xdcb   : > { %v6992_v58 = vsel %vm692_vm1, %v6618_v51, 0.0 }
 0xdcc   : > { %v6993_v9 = vadd.f32 %v6992_v58, %v6991_v3  ;;  %v7033_v58 = vsel %vm692_vm1, %v15483_v17, 0.0 }
 0xdd0   : > { %v10064_v53 = vpop.f32.mrf.mxu0 }
 0xdd1   : > { %v6987_v31 = vsel %vm692_vm1, %v10064_v53, 0.0  ;;  %v7012_v53 = vsel %vm692_vm1, %v15473_v44, 0.0  ;;  %v7026_v44 = vsel %vm692_vm1, %v15477_v12, 0.0 }
 0xdd2   : > { %v6753_v48 = vpop.f32.mrf.mxu0  ;;  %v6988_v10 = vadd.f32 %v6987_v31, %v6986_v34 }
 0xdd3   : > { %v6980_v60 = vsel %vm692_vm1, %v6753_v48, 0.0 }
 0xdd4   : > { %v10067_v37 = vpop.f32.mrf.mxu0  ;;  %v6981_v52 = vadd.f32 %v6980_v60, %v6979_v7  ;;  %v7019_v60 = vsel %vm692_vm1, %v15479_v39, 0.0 }
 0xdd5   : > { %v7001_v30 = vsel %vm692_vm1, %v10067_v37, 0.0 }
 0xdd6   : > { %v6763_v26 = vpop.f32.mrf.mxu0  ;;  %v7002_v28 = vadd.f32 %v7001_v30, %v7000_v21 }
 0xdd7   : > { %v6994_v27 = vsel %vm692_vm1, %v6763_v26, 0.0 }
 0xdd8   : > { %v10070_v46 = vpop.f32.mrf.mxu0  ;;  %v6995_v40 = vadd.f32 %v6994_v27, %v6993_v9 }
 0xdd9   : > { %v7015_v7 = vsel %vm692_vm1, %v10070_v46, 0.0 }
 0xdda   : > { %v6773_v22 = vpop.f32.mrf.mxu0 }
 0xddd   : > { %v10014_v36 = vpop.f32.mrf.mxu1 }
 0xdde   : > { %v7013_v25 = vsel %vm692_vm1, %v10014_v36, 0.0 }
 0xddf   : > { %v6628_v57 = vpop.f32.mrf.mxu1  ;;  %v7014_v26 = vadd.f32 %v7013_v25, %v7012_v53 }
 0xde0   : > { %v10073_v2 = vpop.f32.mrf.mxu0  ;;  %v7006_v51 = vsel %vm692_vm1, %v6628_v57, 0.0 }
 0xde1   : > { %v7007_v15 = vadd.f32 %v7006_v51, %v7005_v41 }
 0xde2   : > { %v6783_v48 = vpop.f32.mrf.mxu0 }
 0xde5   : > { %v15487_v16 = vpop.f32.mrf.mxu1 }
 0xde6   : > { %v7027_v31 = vsel %vm692_vm1, %v15487_v16, 0.0 }
 0xde7   : > { %v15491_v8 = vpop.f32.mrf.mxu1 }
 0xde8   : > { %v10076_v47 = vpop.f32.mrf.mxu0  ;;  %v7020_v57 = vsel %vm692_vm1, %v15491_v8, 0.0 }
 0xde9   : > { %v7021_v8 = vadd.f32 %v7020_v57, %v7019_v60  ;;  %v7043_v51 = vsel %vm692_vm1, %v10076_v47, 0.0  ;;  %v7061_v60 = vsel %vm692_vm1, %v15497_v13, 0.0 }
 0xded   : > { %v15495_v20 = vpop.f32.mrf.mxu1 }
 0xdee   : > { %v7041_v12 = vsel %vm692_vm1, %v15495_v20, 0.0 }
 0xdef   : > { %v15499_v59 = vpop.f32.mrf.mxu1 }
 0xdf0   : > { %v7034_v39 = vsel %vm692_vm1, %v15499_v59, 0.0 }
 0xdf1   : > { %v7035_v27 = vadd.f32 %v7034_v39, %v7033_v58 }
 0xdf5   : > { %v15503_v43 = vpop.f32.mrf.mxu1 }
 0xdf7   : > { %v15507_v56 = vpop.f32.mrf.mxu1 }
 0xdf8   : > { %v7048_v17 = vsel %vm692_vm1, %v15507_v56, 0.0 }
 0xdfe   : > { %v15509_v55 = vpop.f32.mrf.mxu1 }
 0xe00   : > { %v15511_v5 = vpop.f32.mrf.mxu1 }
 0xe02   : > { %v15513_v63 = vpop.f32.mrf.mxu1 }
 0xe04   : > { %v15519_v32 = vpop.f32.mrf.mxu1 }
 0xe15   : > { %v10120_v29 = vpop.f32.mrf.mxu1 }
 0xe16   : > { %v6989_v61 = vsel %vm692_vm1, %v10120_v29, 0.0 }
 0xe17   : > { %v6898_v50 = vpop.f32.mrf.mxu1  ;;  %v6990_v4 = vadd.f32 %v6989_v61, %v6988_v10  ;;  %v7008_v10 = vsel %vm692_vm1, %v6773_v22, 0.0  ;;  %v7028_v61 = vadd.f32 %v7027_v31, %v7026_v44  ;;  %v7029_v22 = vsel %vm692_vm1, %v10073_v2, 0.0 }
 0xe18   : > { %v6982_v23 = vsel %vm692_vm1, %v6898_v50, 0.0  ;;  %v6793_v50 = vpop.f32.mrf.mxu0  ;;  %v7062_v31 = vsel %vm692_vm1, %v15511_v5, 0.0  ;;  %v7068_v44 = vsel %vm692_vm1, %v15493_v49, 0.0 }
 0xe19   : > { %v6983_v62 = vadd.f32 %v6982_v23, %v6981_v52  ;;  %v7090_v35 = vmul.f32 0.25, %v6990_v4  ;;  %v7016_v52 = vadd.f32 %v7015_v7, %v7014_v26  ;;  %v7009_v23 = vadd.f32 %v7008_v10, %v7007_v15 }
 0xe1a   : > { %v10079_v14 = vpop.f32.mrf.mxu0  ;;  %v7030_v21 = vadd.f32 %v7029_v22, %v7028_v61 }
 0xe1b   : > { %v7089_v1 = vmul.f32 0.25, %v6983_v62  ;;  %v7040_v62 = vsel %vm692_vm1, %v15481_v6, 0.0  ;;  %v7057_v7 = vsel %vm692_vm1, %v10079_v14, 0.0 }
 0xe1c   : > { %v7042_v3 = vadd.f32 %v7041_v12, %v7040_v62 }
 0xe1d   : > { %v10123_v19 = vpop.f32.mrf.mxu1  ;;  %10150 = vmatprep.mubr.msk.f32.mxu0 %vm692_vm1, %v7089_v1  ;;  %v7022_v1 = vsel %vm692_vm1, %v6783_v48, 0.0  ;;  %v7036_v48 = vsel %vm692_vm1, %v6793_v50, 0.0 }
 0xe1e   : > { %v7003_v33 = vsel %vm692_vm1, %v10123_v19, 0.0  ;;  %10151 = vmatmul.mubr.msk.f32.vlgmr.msra.gmra.mxu0 %vm692_vm1, %v7090_v35  ;;  %v7055_v35 = vsel %vm692_vm1, %v15503_v43, 0.0  ;;  %v7023_v19 = vadd.f32 %v7022_v1, %v7021_v8  ;;  %v7037_v15 = vadd.f32 %v7036_v48, %v7035_v27 }
 0xe1f   : > { %v6908_v42 = vpop.f32.mrf.mxu1  ;;  %v7004_v37 = vadd.f32 %v7003_v33, %v7002_v28  ;;  %v7054_v33 = vsel %vm692_vm1, %v15485_v38, 0.0  ;;  %v7076_v27 = vsel %vm692_vm1, %v15519_v32, 0.0 }
 0xe20   : > { %v6996_v18 = vsel %vm692_vm1, %v6908_v42, 0.0  ;;  %v6803_v42 = vpop.f32.mrf.mxu0  ;;  %v7056_v56 = vadd.f32 %v7055_v35, %v7054_v33 }
 0xe21   : > { %v6997_v36 = vadd.f32 %v6996_v18, %v6995_v40  ;;  %v7092_v24 = vmul.f32 0.25, %v7004_v37  ;;  %v7047_v40 = vsel %vm692_vm1, %v15489_v11, 0.0  ;;  %v7044_v37 = vadd.f32 %v7043_v51, %v7042_v3 }
 0xe22   : > { %v7049_v41 = vadd.f32 %v7048_v17, %v7047_v40  ;;  %v10082_v38 = vpop.f32.mrf.mxu0  ;;  %v7069_v11 = vsel %vm692_vm1, %v15509_v55, 0.0  ;;  %v7058_v5 = vadd.f32 %v7057_v7, %v7056_v56 }
 0xe23   : > { %v7091_v34 = vmul.f32 0.25, %v6997_v36  ;;  %v7070_v10 = vadd.f32 %v7069_v11, %v7068_v44  ;;  %v8325_v11 = vld [vmem:[%s15886_s10 + $0x68] sm:$0xff] }
 0xe24   : > { %v10126_v29 = vpop.f32.mrf.mxu1 }
 0xe25   : > { %v7017_v16 = vsel %vm692_vm1, %v10126_v29, 0.0  ;;  %10153 = vmatprep.mubr.msk.f32.mxu0 %vm692_vm1, %v7091_v34  ;;  %v7050_v29 = vsel %vm692_vm1, %v6803_v42, 0.0 }
 0xe26   : > { %v6918_v4 = vpop.f32.mrf.mxu1  ;;  %10154 = vmatmul.mubr.msk.f32.gmra.mxu0 %vm692_vm1, %v7092_v24  ;;  %v7018_v46 = vadd.f32 %v7017_v16, %v7016_v52  ;;  %v6813_v52 = vpop.f32.mrf.mxu0  ;;  %v7063_v16 = vadd.f32 %v7062_v31, %v7061_v60  ;;  %v7051_v50 = vadd.f32 %v7050_v29, %v7049_v41  ;;  %v8327_v41 = vld [vmem:[%s15886_s10 + $0x78] sm:$0xff]  ;;  %v16456_v60 = vld [vmem:[#allocation42_spill] sm:$0xff] }
 0xe27   : > { %v7010_v54 = vsel %vm692_vm1, %v6918_v4, 0.0  ;;  %10206 = vmatprep.subr.mxu0 %v8327_v41 }
 0xe28   : > { %v7011_v20 = vadd.f32 %v7010_v54, %v7009_v23  ;;  %v10129_v30 = vpop.f32.mrf.mxu1  ;;  %v7094_v2 = vmul.f32 0.25, %v7018_v46  ;;  %v7071_v23 = vsel %vm692_vm1, %v10082_v38, 0.0  ;;  %v7064_v54 = vsel %vm692_vm1, %v6813_v52, 0.0  ;;  %v8326_v38 = vld [vmem:[%s15886_s10 + $0x70] sm:$0xff]  ;;  %10207 = vmatpush3.msra.mxu0 %v8327_v41  ;;  %v16458_v52 = vld [vmem:[#allocation22_spill] sm:$0xff] }
 0xe29   : > { %v7031_v59 = vsel %vm692_vm1, %v10129_v30, 0.0  ;;  %v7072_v62 = vadd.f32 %v7071_v23, %v7070_v10  ;;  %v7083_v30 = vsel %vm692_vm1, %v15513_v63, 0.0  ;;  %v7075_v63 = vsel %vm692_vm1, %v15505_v45, 0.0  ;;  %10208 = vmatprep.subr.mxu0 %v8326_v38 }
 0xe2a   : > { %v7093_v9 = vmul.f32 0.25, %v7011_v20  ;;  %v6928_v6 = vpop.f32.mrf.mxu1  ;;  %v7032_v28 = vadd.f32 %v7031_v59, %v7030_v21  ;;  %v7065_v20 = vadd.f32 %v7064_v54, %v7063_v16  ;;  %10209 = vmatpush3.msra.mxu0 %v8326_v38  ;;  %v16469_v38 = vld [vmem:[#allocation40_spill] sm:$0xff] }
 0xe2b   : > { %v7024_v25 = vsel %vm692_vm1, %v6928_v6, 0.0  ;;  %10210 = vmatprep.subr.mxu0 %v8325_v11 }
 0xe2c   : > { %v7025_v43 = vadd.f32 %v7024_v25, %v7023_v19  ;;  %v10132_v53 = vpop.f32.mrf.mxu1  ;;  %10156 = vmatprep.mubr.msk.f32.mxu0 %vm692_vm1, %v7093_v9  ;;  %v7096_v47 = vmul.f32 0.25, %v7032_v28  ;;  %v7082_v9 = vsel %vm692_vm1, %v15501_v0, 0.0  ;;  %v7077_v25 = vadd.f32 %v7076_v27, %v7075_v63  ;;  %10211 = vmatpush3.msra.mxu0 %v8325_v11 }
 0xe2d   : > { %v7045_v18 = vsel %vm692_vm1, %v10132_v53, 0.0  ;;  %10157 = vmatmul.mubr.msk.f32.gmra.mxu0 %vm692_vm1, %v7094_v2  ;;  %v7084_v17 = vadd.f32 %v7083_v30, %v7082_v9  ;;  %v16462_v30 = vld [vmem:[#allocation30_spill] sm:$0xff] }
 0xe2e   : > { %v7095_v26 = vmul.f32 0.25, %v7025_v43  ;;  %v6938_v36 = vpop.f32.mrf.mxu1  ;;  %v7046_v57 = vadd.f32 %v7045_v18, %v7044_v37  ;;  %v8299_v37 = vld [vmem:[%s15884_s8 + $0x28] sm:$0xff]  ;;  %v8298_v18 = vld [vmem:[%s15884_s8 + $0x20] sm:$0xff] }
 0xe2f   : > { %v7038_v34 = vsel %vm692_vm1, %v6938_v36, 0.0  ;;  %10178 = vmatprep.subr.mxu1 %v8299_v37  ;;  %v8281_v36 = vld [vmem:[%s15883_s7 + $0x1] ss:$0 sm:$0xff] }
 0xe30   : > { %v7039_v24 = vadd.f32 %v7038_v34, %v7037_v15  ;;  %v10135_v55 = vpop.f32.mrf.mxu1  ;;  %10159 = vmatprep.mubr.msk.f32.mxu0 %vm692_vm1, %v7095_v26  ;;  %v7098_v13 = vmul.f32 0.25, %v7046_v57  ;;  %10179 = vmatpush3.msra.mxu1 %v8299_v37  ;;  %v8324_v26 = vld [vmem:[%s15886_s10 + $0x60] sm:$0xff] }
 0xe31   : > { %v7059_v61 = vsel %vm692_vm1, %v10135_v55, 0.0  ;;  %10160 = vmatmul.mubr.msk.f32.gmra.mxu0 %vm692_vm1, %v7096_v47  ;;  %10180 = vmatprep.subr.mxu1 %v8298_v18  ;;  %v16455_v34 = vld [vmem:[#allocation45_spill] sm:$0xff] }
 0xe32   : > { %v7097_v49 = vmul.f32 0.25, %v7039_v24  ;;  %v6948_v8 = vpop.f32.mrf.mxu1  ;;  %v7060_v12 = vadd.f32 %v7059_v61, %v7058_v5  ;;  %10181 = vmatpush3.msra.mxu1 %v8298_v18  ;;  %10212 = vmatprep.subr.mxu0 %v8324_v26  ;;  %v16457_v5 = vld [vmem:[#allocation24_spill] sm:$0xff] }
 0xe33   : > { %v7052_v4 = vsel %vm692_vm1, %v6948_v8, 0.0  ;;  %10213 = vmatpush3.msra.mxu0 %v8324_v26  ;;  %v16470_v26 = vld [vmem:[#allocation60_spill] sm:$0xff] }
 0xe34   : > { %v7053_v39 = vadd.f32 %v7052_v4, %v7051_v50  ;;  %v10138_v46 = vpop.f32.mrf.mxu1  ;;  %10162 = vmatprep.mubr.msk.f32.mxu0 %vm692_vm1, %v7097_v49  ;;  %v7100_v1 = vmul.f32 0.25, %v7060_v12  ;;  %v16459_v4 = vld [vmem:[#allocation26_spill] sm:$0xff] }
 0xe35   : > { %v7073_v58 = vsel %vm692_vm1, %v10138_v46, 0.0  ;;  %10163 = vmatmul.mubr.msk.f32.gmra.mxu0 %vm692_vm1, %v7098_v13 }
 0xe36   : > { %v7099_v22 = vmul.f32 0.25, %v7053_v39  ;;  %v6958_v14 = vpop.f32.mrf.mxu1  ;;  %v7074_v3 = vadd.f32 %v7073_v58, %v7072_v62  ;;  %v16460_v39 = vld [vmem:[#allocation44_spill] sm:$0xff] }
 0xe37   : > { %v7066_v21 = vsel %vm692_vm1, %v6958_v14, 0.0  ;;  %v10085_v59 = vpop.f32.mrf.mxu0  ;;  %v16461_v14 = vld [vmem:[#allocation23_spill] sm:$0xff] }
 0xe38   : > { %v7067_v35 = vadd.f32 %v7066_v21, %v7065_v20  ;;  %10165 = vmatprep.mubr.msk.f32.mxu0 %vm692_vm1, %v7099_v22  ;;  %v7085_v6 = vsel %vm692_vm1, %v10085_v59, 0.0  ;;  %v7102_v32 = vmul.f32 0.25, %v7074_v3 }
 0xe39   : > { %v6823_v19 = vpop.f32.mrf.mxu0  ;;  %10166 = vmatmul.mubr.msk.f32.gmra.mxu0 %vm692_vm1, %v7100_v1  ;;  %v7086_v40 = vadd.f32 %v7085_v6, %v7084_v17  ;;  %v16464_v6 = vld [vmem:[#allocation34_spill] sm:$0xff] }
 0xe3a   : > { %v7101_v2 = vmul.f32 0.25, %v7067_v35  ;;  %v7078_v28 = vsel %vm692_vm1, %v6823_v19, 0.0  ;;  %v16463_v35 = vld [vmem:[#allocation39_spill] sm:$0xff] }
 0xe3b   : > { %v10141_v33 = vpop.f32.mrf.mxu1  ;;  %v7079_v0 = vadd.f32 %v7078_v28, %v7077_v25  ;;  %v16465_v25 = vld [vmem:[#allocation41_spill] sm:$0xff] }
 0xe3c   : > { %v7087_v51 = vsel %vm692_vm1, %v10141_v33, 0.0  ;;  %10168 = vmatprep.mubr.msk.f32.mxu0 %vm692_vm1, %v7101_v2  ;;  %v16466_v33 = vld [vmem:[#allocation35_spill] sm:$0xff] }
 0xe3d   : > { %v6968_v42 = vpop.f32.mrf.mxu1  ;;  %10169 = vmatmul.mubr.msk.f32.gmra.mxu0 %vm692_vm1, %v7102_v32  ;;  %v7088_v43 = vadd.f32 %v7087_v51, %v7086_v40 }
 0xe3e   : > { %v7080_v53 = vsel %vm692_vm1, %v6968_v42, 0.0 }
 0xe3f   : > { %v7081_v45 = vadd.f32 %v7080_v53, %v7079_v0  ;;  %v7104_v56 = vmul.f32 0.25, %v7088_v43  ;;  %v16467_v43 = vld [vmem:[#allocation43_spill] sm:$0xff] }
 0xe41   : > { %v7103_v48 = vmul.f32 0.25, %v7081_v45  ;;  %v16468_v45 = vld [vmem:[#allocation36_spill] sm:$0xff] }
 0xe43   : > { %10171 = vmatprep.mubr.msk.f32.mxu0 %vm692_vm1, %v7103_v48 }
 0xe44   : > { %10172 = vmatmul.mubr.msk.f32.gmra.mxu0 %vm692_vm1, %v7104_v56 }
 0xede   : > { %v10152_v15 = vpop.f32.mrf.mxu0 }
 0xedf   : > { %v7238_v31 = vadd.f32 %v10152_v15, %v8281_v36 }
 0xee0   : > { %v7232_v47 = vpop.f32.mrf.mxu0 }
 0xee1   : > { %v7233_v57 = vadd.f32 %v8281_v36, %v7232_v47  ;;  %v15644_v7 = vadd.f32 %v7238_v31, %v16456_v60  ;;  %v8323_v31 = vld [vmem:[%s15886_s10 + $0x58] sm:$0xff]  ;;  %v8321_v47 = vld [vmem:[%s15886_s10 + $0x48] sm:$0xff] }
 0xee2   : > { %10214 = vmatprep.subr.mxu0 %v8323_v31 }
 0xee3   : > { %v15641_v44 = vadd.f32 %v7233_v57, %v16455_v34  ;;  %10215 = vmatpush3.msra.mxu0 %v8323_v31  ;;  %v8320_v57 = vld [vmem:[%s15886_s10 + $0x40] sm:$0xff] }
 0xee4   : > { %v8303_v34 = vld [vmem:[%s15885_s9 + $0x1] ss:$0 sm:$0xff] }
 0xee5   : > { %10182 = vmatprep.mubr.msk.f32.mxu1 %vm692_vm1, %v15641_v44 }
 0xee6   : > { %v10155_v24 = vpop.f32.mrf.mxu0  ;;  %10183 = vmatmul.mubr.msk.f32.vlgmr.msra.gmra.mxu1 %vm692_vm1, %v15644_v7 }
 0xee7   : > { %v7248_v55 = vadd.f32 %v10155_v24, %v8281_v36 }
 0xee8   : > { %v7242_v29 = vpop.f32.mrf.mxu0 }
 0xee9   : > { %v7243_v10 = vadd.f32 %v8281_v36, %v7242_v29  ;;  %v15654_v16 = vadd.f32 %v7248_v55, %v16458_v52 }
 0xeeb   : > { %v15651_v61 = vadd.f32 %v7243_v10, %v16457_v5 }
 0xeed   : > { %v10158_v49 = vpop.f32.mrf.mxu0  ;;  %10185 = vmatprep.mubr.msk.f32.mxu1 %vm692_vm1, %v15651_v61 }
 0xeee   : > { %10186 = vmatmul.mubr.msk.f32.gmra.mxu1 %vm692_vm1, %v15654_v16  ;;  %v7258_v8 = vadd.f32 %v10158_v49, %v8281_v36 }
 0xeef   : > { %v7252_v50 = vpop.f32.mrf.mxu0 }
 0xef0   : > { %v7253_v13 = vadd.f32 %v8281_v36, %v7252_v50  ;;  %v15664_v46 = vadd.f32 %v7258_v8, %v16460_v39 }
 0xef1   : > { %v10161_v12 = vpop.f32.mrf.mxu0 }
 0xef2   : > { %v15661_v23 = vadd.f32 %v7253_v13, %v16459_v4  ;;  %v7268_v54 = vadd.f32 %v10161_v12, %v8281_v36 }
 0xef3   : > { %v7262_v62 = vpop.f32.mrf.mxu0 }
 0xef4   : > { %v7263_v58 = vadd.f32 %v8281_v36, %v7262_v62  ;;  %10188 = vmatprep.mubr.msk.f32.mxu1 %vm692_vm1, %v15661_v23  ;;  %v15674_v1 = vadd.f32 %v7268_v54, %v16462_v30 }
 0xef5   : > { %v10164_v22 = vpop.f32.mrf.mxu0  ;;  %10189 = vmatmul.mubr.msk.f32.gmra.mxu1 %vm692_vm1, %v15664_v46 }
 0xef6   : > { %v15671_v20 = vadd.f32 %v7263_v58, %v16461_v14  ;;  %v7278_v3 = vadd.f32 %v10164_v22, %v8281_v36 }
 0xef7   : > { %v7272_v21 = vpop.f32.mrf.mxu0 }
 0xef8   : > { %v7273_v59 = vadd.f32 %v8281_v36, %v7272_v21  ;;  %10191 = vmatprep.mubr.msk.f32.mxu1 %vm692_vm1, %v15671_v20  ;;  %v15684_v19 = vadd.f32 %v7278_v3, %v16464_v6 }
 0xef9   : > { %v10167_v27 = vpop.f32.mrf.mxu0  ;;  %10192 = vmatmul.mubr.msk.f32.gmra.mxu1 %vm692_vm1, %v15674_v1 }
 0xefa   : > { %v15681_v9 = vadd.f32 %v7273_v59, %v16463_v35  ;;  %v7288_v63 = vadd.f32 %v10167_v27, %v8281_v36 }
 0xefb   : > { %v7282_v17 = vpop.f32.mrf.mxu0 }
 0xefc   : > { %v7283_v2 = vadd.f32 %v8281_v36, %v7282_v17  ;;  %10194 = vmatprep.mubr.msk.f32.mxu1 %vm692_vm1, %v15681_v9  ;;  %v15694_v40 = vadd.f32 %v7288_v63, %v16466_v33 }
 0xefd   : > { %v10170_v28 = vpop.f32.mrf.mxu0  ;;  %10195 = vmatmul.mubr.msk.f32.gmra.mxu1 %vm692_vm1, %v15684_v19 }
 0xefe   : > { %v15691_v32 = vadd.f32 %v7283_v2, %v16465_v25  ;;  %v7298_v51 = vadd.f32 %v10170_v28, %v8281_v36 }
 0xeff   : > { %v7292_v0 = vpop.f32.mrf.mxu0 }
 0xf00   : > { %v7293_v42 = vadd.f32 %v8281_v36, %v7292_v0  ;;  %10197 = vmatprep.mubr.msk.f32.mxu1 %vm692_vm1, %v15691_v32  ;;  %v15704_v48 = vadd.f32 %v7298_v51, %v16468_v45 }
 0xf01   : > { %10198 = vmatmul.mubr.msk.f32.gmra.mxu1 %vm692_vm1, %v15694_v40 }
 0xf02   : > { %v15701_v53 = vadd.f32 %v7293_v42, %v16467_v43 }
 0xf04   : > { %v10173_v56 = vpop.f32.mrf.mxu0  ;;  %10200 = vmatprep.mubr.msk.f32.mxu1 %vm692_vm1, %v15701_v53 }
 0xf05   : > { %10201 = vmatmul.mubr.msk.f32.gmra.mxu1 %vm692_vm1, %v15704_v48  ;;  %v7308_v37 = vadd.f32 %v10173_v56, %v8281_v36 }
 0xf06   : > { %v7302_v18 = vpop.f32.mrf.mxu0 }
 0xf07   : > { %v7303_v41 = vadd.f32 %v8281_v36, %v7302_v18  ;;  %v15714_v15 = vadd.f32 %v7308_v37, %v16470_v26  ;;  %v8322_v36 = vld [vmem:[%s15886_s10 + $0x50] sm:$0xff] }
 0xf08   : > { %10216 = vmatprep.subr.mxu0 %v8322_v36 }
 0xf09   : > { %v15711_v11 = vadd.f32 %v7303_v41, %v16469_v38  ;;  %10217 = vmatpush3.msra.mxu0 %v8322_v36 }
 0xf0a   : > { %10218 = vmatprep.subr.mxu0 %v8321_v47 }
 0xf0b   : > { %10203 = vmatprep.mubr.msk.f32.mxu1 %vm692_vm1, %v15711_v11  ;;  %10219 = vmatpush3.msra.mxu0 %v8321_v47 }
 0xf0c   : > { %10204 = vmatmul.mubr.msk.f32.gmra.mxu1 %vm692_vm1, %v15714_v15  ;;  %10220 = vmatprep.subr.mxu0 %v8320_v57 }
 0xf0d   : > { %10221 = vmatpush3.msra.mxu0 %v8320_v57 }
 0xfa6   : > { %v10184_v60 = vpop.f32.mrf.mxu1 }
 0xfa7   : > { %v7460_v24 = vadd.f32 %v10184_v60, %v8303_v34 }
 0xfa8   : > { %v7454_v55 = vpop.f32.mrf.mxu1 }
 0xfa9   : > { %v7455_v29 = vadd.f32 %v8303_v34, %v7454_v55  ;;  %v7534_v5 = vmax.f32 %v7460_v24, 0.0  ;;  %v15755_v24 = vld [vmem:[%s15887_s11 + $0x1] ss:$0 sm:$0xff] }
 0xfab   : > { %v7533_v10 = vmax.f32 %v7455_v29, 0.0 }
 0xfad   : > { %10222 = vmatprep.mubr.msk.f32.mxu0 %vm4006_vm2, %v7533_v10 }
 0xfae   : > { %v10187_v52 = vpop.f32.mrf.mxu1  ;;  %10223 = vmatmul.mubr.msk.f32.vlgmr.msra.gmra.mxu0 %vm4006_vm2, %v7534_v5 }
 0xfaf   : > { %v7470_v49 = vadd.f32 %v10187_v52, %v8303_v34 }
 0xfb0   : > { %v7464_v8 = vpop.f32.mrf.mxu1 }
 0xfb1   : > { %v7465_v50 = vadd.f32 %v8303_v34, %v7464_v8  ;;  %v7536_v12 = vmax.f32 %v7470_v49, 0.0 }
 0xfb3   : > { %v7535_v13 = vmax.f32 %v7465_v50, 0.0 }
 0xfb5   : > { %v10190_v4 = vpop.f32.mrf.mxu1  ;;  %10225 = vmatprep.mubr.msk.f32.mxu0 %vm4006_vm2, %v7535_v13 }
 0xfb6   : > { %10226 = vmatmul.mubr.msk.f32.gmra.mxu0 %vm4006_vm2, %v7536_v12  ;;  %v7480_v39 = vadd.f32 %v10190_v4, %v8303_v34 }
 0xfb7   : > { %v7474_v54 = vpop.f32.mrf.mxu1 }
 0xfb8   : > { %v7475_v62 = vadd.f32 %v8303_v34, %v7474_v54  ;;  %v7538_v14 = vmax.f32 %v7480_v39, 0.0 }
 0xfb9   : > { %v10193_v58 = vpop.f32.mrf.mxu1 }
 0xfba   : > { %v7537_v22 = vmax.f32 %v7475_v62, 0.0  ;;  %v7490_v30 = vadd.f32 %v10193_v58, %v8303_v34 }
 0xfbb   : > { %v7484_v3 = vpop.f32.mrf.mxu1 }
 0xfbc   : > { %v7485_v21 = vadd.f32 %v8303_v34, %v7484_v3  ;;  %10228 = vmatprep.mubr.msk.f32.mxu0 %vm4006_vm2, %v7537_v22  ;;  %v7540_v35 = vmax.f32 %v7490_v30, 0.0 }
 0xfbd   : > { %v10196_v59 = vpop.f32.mrf.mxu1  ;;  %10229 = vmatmul.mubr.msk.f32.gmra.mxu0 %vm4006_vm2, %v7538_v14 }
 0xfbe   : > { %v7539_v27 = vmax.f32 %v7485_v21, 0.0  ;;  %v7500_v6 = vadd.f32 %v10196_v59, %v8303_v34 }
 0xfbf   : > { %v7494_v63 = vpop.f32.mrf.mxu1 }
 0xfc0   : > { %v7495_v17 = vadd.f32 %v8303_v34, %v7494_v63  ;;  %10231 = vmatprep.mubr.msk.f32.mxu0 %vm4006_vm2, %v7539_v27  ;;  %v7542_v25 = vmax.f32 %v7500_v6, 0.0 }
 0xfc1   : > { %v10199_v2 = vpop.f32.mrf.mxu1  ;;  %10232 = vmatmul.mubr.msk.f32.gmra.mxu0 %vm4006_vm2, %v7540_v35 }
 0xfc2   : > { %v7541_v28 = vmax.f32 %v7495_v17, 0.0  ;;  %v7510_v33 = vadd.f32 %v10199_v2, %v8303_v34 }
 0xfc3   : > { %v7504_v51 = vpop.f32.mrf.mxu1 }
 0xfc4   : > { %v7505_v0 = vadd.f32 %v8303_v34, %v7504_v51  ;;  %10234 = vmatprep.mubr.msk.f32.mxu0 %vm4006_vm2, %v7541_v28  ;;  %v7544_v45 = vmax.f32 %v7510_v33, 0.0 }
 0xfc5   : > { %v10202_v42 = vpop.f32.mrf.mxu1  ;;  %10235 = vmatmul.mubr.msk.f32.gmra.mxu0 %vm4006_vm2, %v7542_v25 }
 0xfc6   : > { %v7543_v43 = vmax.f32 %v7505_v0, 0.0  ;;  %v7520_v56 = vadd.f32 %v10202_v42, %v8303_v34 }
 0xfc7   : > { %v7514_v37 = vpop.f32.mrf.mxu1 }
 0xfc8   : > { %v7515_v18 = vadd.f32 %v8303_v34, %v7514_v37  ;;  %10237 = vmatprep.mubr.msk.f32.mxu0 %vm4006_vm2, %v7543_v43  ;;  %v7546_v38 = vmax.f32 %v7520_v56, 0.0 }
 0xfc9   : > { %10238 = vmatmul.mubr.msk.f32.gmra.mxu0 %vm4006_vm2, %v7544_v45 }
 0xfca   : > { %v7545_v41 = vmax.f32 %v7515_v18, 0.0 }
 0xfcc   : > { %v10205_v26 = vpop.f32.mrf.mxu1  ;;  %10240 = vmatprep.mubr.msk.f32.mxu0 %vm4006_vm2, %v7545_v41 }
 0xfcd   : > { %10241 = vmatmul.mubr.msk.f32.gmra.mxu0 %vm4006_vm2, %v7546_v38  ;;  %v7530_v31 = vadd.f32 %v10205_v26, %v8303_v34 }
 0xfce   : > { %v7524_v36 = vpop.f32.mrf.mxu1 }
 0xfcf   : > { %v7525_v47 = vadd.f32 %v8303_v34, %v7524_v36  ;;  %v7548_v60 = vmax.f32 %v7530_v31, 0.0 }
 0xfd1   : > { %v7547_v57 = vmax.f32 %v7525_v47, 0.0 }
 0xfd3   : > { %10243 = vmatprep.mubr.msk.f32.mxu0 %vm4006_vm2, %v7547_v57 }
 0xfd4   : > { %10244 = vmatmul.mubr.msk.f32.gmra.mxu0 %vm4006_vm2, %v7548_v60 }
0x106e   : > { %v10224_v55 = vpop.f32.mrf.mxu0 }
0x106f   : > { %v7686_v29 = vadd.f32 %v10224_v55, %v15755_v24 }
0x1070   : > { %v7680_v10 = vpop.f32.mrf.mxu0 }
0x1071   : > { %v7760_v34 = vadd.f32 %v7686_v29, %v15644_v7  ;;  %v7681_v5 = vadd.f32 %v15755_v24, %v7680_v10 }
0x1073   : > { %7776 = vst.msk [vmem:[%s15762_s28 + $0x8] sm:$0xff] %vm692_vm1, %v7760_v34  ;;  %v7759_v52 = vadd.f32 %v7681_v5, %v15641_v44 }
0x1075   : > { %7775 = vst.msk [vmem:[%s15762_s28] sm:$0xff] %vm692_vm1, %v7759_v52 }
0x1076   : > { %v10227_v49 = vpop.f32.mrf.mxu0 }
0x1077   : > { %v7696_v8 = vadd.f32 %v10227_v49, %v15755_v24 }
0x1078   : > { %v7690_v50 = vpop.f32.mrf.mxu0 }
0x1079   : > { %v7762_v7 = vadd.f32 %v7696_v8, %v15654_v16  ;;  %v7691_v13 = vadd.f32 %v15755_v24, %v7690_v50 }
0x107b   : > { %7778 = vst.msk [vmem:[%s15762_s28 + $0x18] sm:$0xff] %vm692_vm1, %v7762_v7  ;;  %v7761_v12 = vadd.f32 %v7691_v13, %v15651_v61 }
0x107d   : > { %7777 = vst.msk [vmem:[%s15762_s28 + $0x10] sm:$0xff] %vm692_vm1, %v7761_v12  ;;  %v10230_v44 = vpop.f32.mrf.mxu0 }
0x107e   : > { %v7706_v4 = vadd.f32 %v10230_v44, %v15755_v24 }
0x107f   : > { %v7700_v39 = vpop.f32.mrf.mxu0 }
0x1080   : > { %v7764_v54 = vadd.f32 %v7706_v4, %v15664_v46  ;;  %v7701_v62 = vadd.f32 %v15755_v24, %v7700_v39 }
0x1081   : > { %v10233_v58 = vpop.f32.mrf.mxu0 }
0x1082   : > { %7780 = vst.msk [vmem:[%s15762_s28 + $0x28] sm:$0xff] %vm692_vm1, %v7764_v54  ;;  %v7763_v16 = vadd.f32 %v7701_v62, %v15661_v23  ;;  %v7716_v61 = vadd.f32 %v10233_v58, %v15755_v24 }
0x1083   : > { %v7710_v22 = vpop.f32.mrf.mxu0 }
0x1084   : > { %7779 = vst.msk [vmem:[%s15762_s28 + $0x20] sm:$0xff] %vm692_vm1, %v7763_v16  ;;  %v7766_v14 = vadd.f32 %v7716_v61, %v15674_v1  ;;  %v7711_v30 = vadd.f32 %v15755_v24, %v7710_v22 }
0x1085   : > { %v10236_v3 = vpop.f32.mrf.mxu0 }
0x1086   : > { %7782 = vst.msk [vmem:[%s15762_s28 + $0x38] sm:$0xff] %vm692_vm1, %v7766_v14  ;;  %v7765_v46 = vadd.f32 %v7711_v30, %v15671_v20  ;;  %v7726_v21 = vadd.f32 %v10236_v3, %v15755_v24 }
0x1087   : > { %v7720_v59 = vpop.f32.mrf.mxu0 }
0x1088   : > { %7781 = vst.msk [vmem:[%s15762_s28 + $0x30] sm:$0xff] %vm692_vm1, %v7765_v46  ;;  %v7768_v23 = vadd.f32 %v7726_v21, %v15684_v19  ;;  %v7721_v27 = vadd.f32 %v15755_v24, %v7720_v59 }
0x1089   : > { %v10239_v35 = vpop.f32.mrf.mxu0 }
0x108a   : > { %7784 = vst.msk [vmem:[%s15762_s28 + $0x48] sm:$0xff] %vm692_vm1, %v7768_v23  ;;  %v7767_v1 = vadd.f32 %v7721_v27, %v15681_v9  ;;  %v7736_v6 = vadd.f32 %v10239_v35, %v15755_v24 }
0x108b   : > { %v7730_v20 = vpop.f32.mrf.mxu0 }
0x108c   : > { %7783 = vst.msk [vmem:[%s15762_s28 + $0x40] sm:$0xff] %vm692_vm1, %v7767_v1  ;;  %v7770_v63 = vadd.f32 %v7736_v6, %v15694_v40  ;;  %v7731_v19 = vadd.f32 %v15755_v24, %v7730_v20 }
0x108d   : > { %v10242_v17 = vpop.f32.mrf.mxu0 }
0x108e   : > { %7786 = vst.msk [vmem:[%s15762_s28 + $0x58] sm:$0xff] %vm692_vm1, %v7770_v63  ;;  %v7769_v2 = vadd.f32 %v7731_v19, %v15691_v32  ;;  %v7746_v28 = vadd.f32 %v10242_v17, %v15755_v24 }
0x108f   : > { %v7740_v9 = vpop.f32.mrf.mxu0 }
0x1090   : > { %7785 = vst.msk [vmem:[%s15762_s28 + $0x50] sm:$0xff] %vm692_vm1, %v7769_v2  ;;  %v7772_v25 = vadd.f32 %v7746_v28, %v15704_v48  ;;  %v7741_v33 = vadd.f32 %v15755_v24, %v7740_v9 }
0x1092   : > { %7788 = vst.msk [vmem:[%s15762_s28 + $0x68] sm:$0xff] %vm692_vm1, %v7772_v25  ;;  %v7771_v40 = vadd.f32 %v7741_v33, %v15701_v53 }
0x1094   : > { %7787 = vst.msk [vmem:[%s15762_s28 + $0x60] sm:$0xff] %vm692_vm1, %v7771_v40  ;;  %v10245_v32 = vpop.f32.mrf.mxu0 }
0x1095   : > { %v7756_v51 = vadd.f32 %v10245_v32, %v15755_v24 }
0x1096   : > { %v7750_v0 = vpop.f32.mrf.mxu0 }
0x1097   : > { %v7774_v42 = vadd.f32 %v7756_v51, %v15714_v15  ;;  %v7751_v48 = vadd.f32 %v15755_v24, %v7750_v0 }
0x1099   : > { %7790 = vst.msk [vmem:[%s15762_s28 + $0x78] sm:$0xff] %vm692_vm1, %v7774_v42  ;;  %v7773_v53 = vadd.f32 %v7751_v48, %v15711_v11 }
0x109b   : > { %7789 = vst.msk [vmem:[%s15762_s28 + $0x70] sm:$0xff] %vm692_vm1, %v7773_v53 }
0x109c   : > { %10834 = shalt.err (!%p10831_p3)
}
0x109d   : > { %s10835_s26 = scalar_lea.hbm %s15825_s18, 2048  ;;  %s10839_s19 = scalar_lea.hbm %s15888_s12, 4096 }
0x109e   : > { %p10836_p4 = scmp.ne.s32.totalorder %s15825_s18, %s10835_s26  ;;  %p10840_p9 = scmp.lt.s32.totalorder %s15825_s18, %s15888_s12 }
0x109f   : > { %p10841_p10 = scmp.lt.s32.totalorder %s10839_s19, %s10835_s26 }
0x10a0   : > { %p10837_p7 = pnand %p10836_p4, %p10993_p5 }
0x10a1   : > { %p10842_p11 = por %p10841_p10, %p10840_p9 }
0x10a2   : > { %p10838_p8 = pneg %p10837_p7 }
0x10a4   : > { %p10843_p12 = pnand %p10842_p11, %p10838_p8 }
0x10a6   : > { %10846 = shalt.err (!%p10843_p12)
}
0x10a7   : > { %s10888_s16 = smov 128   ;;  %s10889_s29 = smov 8  }
0x10a8   : > { %10248 = dma.vmem_to_hbm [thread:$0]  (%p10993_p5), %s15827_s15, 2048, %s15825_s18, %s15836_s25, %s10888_s16, %s10888_s16, %s10889_s29  }
0x10a9 PF: > { %p10254_p13 = scmp.ge.s32.totalorder %s10881_s24, 2  ;;  %s7821_s17 = sand.u32 1, %s10869_s21  }
0x10aa   : > { %s7822_s0 = scalar_lea.sflag [#allocation3], %s7821_s17 }
0x10ab   : > { %p10251_p0 = pnand %p10254_p13, %p10997_p6 }
0x10ad   : > { %p10252_p1 = pneg %p10251_p0 }
0x10af   : > { %10864 = dma.done.wait (%p10252_p1), %s7822_s0, 2048  }
0x10b0   : > { %10866 = vsyncadd (%p10252_p1), %s7822_s0, 4294965248  ;;  %p22_p2 = scmp.ge.s32.totalorder %s10980_s27, 4   ;;  %s16471_s21 = smov %s10873_s22 }
0x10b1   : > { %s16472_s22 = smov %s10877_s23  ;;  %s16473_s23 = smov %s10991_s30 }
0x10b2   : > { %s16474_s24 = smov %s10980_s27  ;;  %24 = sbr.rel (!%p22_p2) target bundleno = 6 (0x6), region = 111 }
0x10b7   :  { %7827 = vsyncpa [#allocation3], 1 }
0x10b8   :  { %7829 = vsyncpa [#allocation3 + $0x1], 1 }

</bundles_post_ra>
